<compile_context>
chip_gen: v7x
topology: tpu7x:2x2x1
jax: 0.10.0
libtpu: 0.0.40
codegen_flags: <defaults>
</compile_context>

<pallas_src>
import functools

import jax
import jax.numpy as jnp
from jax.experimental import pallas as pl
from jax.experimental.pallas import tpu as pltpu

DISCR_FILTERS = 64
BN_EPS = 1e-5


# --------------------------------------------------------------------------
# Pallas kernels (single grid axis over M; full-K contraction per block)
# --------------------------------------------------------------------------

def _mm_bias_act_kernel(a_ref, b_ref, bias_ref, y_ref, *, act):
    """y = act(A_block @ B + bias); one MXU pass per M block (full K)."""
    y = jnp.dot(a_ref[...], b_ref[...], preferred_element_type=jnp.float32)
    y = y + bias_ref[...]
    if act == "relu":
        y = jnp.maximum(y, 0.0)
    elif act == "sigmoid":
        y = 1.0 / (1.0 + jnp.exp(-y))
    y_ref[...] = y.astype(y_ref.dtype)


def _mm_bias_stats_kernel(a_ref, b_ref, bias_ref, y_ref, sum_ref, sq_ref):
    """y = A_block @ B + bias, plus per-block channel sum / sum-of-squares
    partials.  Partials are written into row 0 of an (8, C) block (rows 1..7
    zero) so the M grid axis stays fully parallel (v7x dual-TC sharding); the
    host-side wrapper reduces the partials in XLA."""
    y = jnp.dot(a_ref[...], b_ref[...], preferred_element_type=jnp.float32)
    y = y + bias_ref[...]
    y_ref[...] = y.astype(y_ref.dtype)
    c = y.shape[1]
    s = jnp.sum(y, axis=0, keepdims=True)           # (1, C)
    q = jnp.sum(y * y, axis=0, keepdims=True)       # (1, C)
    rid = jax.lax.broadcasted_iota(jnp.int32, (8, c), 0)
    sum_ref[...] = jnp.where(rid == 0, s, 0.0)
    sq_ref[...] = jnp.where(rid == 0, q, 0.0)


def _final_head_kernel(x_ref, w_ref, b_ref, o_ref):
    """Conv(512 -> 1) head on the VPU: per-row dot with a single weight row,
    + bias, sigmoid.  Avoids the 1/128-lane-utilized MXU / masked-store path."""
    x = x_ref[...].astype(jnp.float32)
    w = w_ref[...].astype(jnp.float32)
    y = jnp.sum(x * w, axis=1, keepdims=True) + b_ref[...]
    o_ref[...] = (1.0 / (1.0 + jnp.exp(-y))).astype(o_ref.dtype)


# --------------------------------------------------------------------------
# Pallas wrappers
# --------------------------------------------------------------------------

def _pick_tile(m, pref):
    t = min(pref, m)
    while m % t != 0:
        t //= 2
    assert t == m or t % 8 == 0, (m, t)
    return t


def conv_matmul_act(a, b, bias, *, act="none", tm=256, out_dtype=jnp.bfloat16):
    """(M, K)bf16 @ (K, C)bf16 + bias, activation fused, single K block."""
    M, K = a.shape
    K2, C = b.shape
    assert K == K2
    tm_ = _pick_tile(M, tm)
    bias2 = bias.reshape(1, C).astype(jnp.float32)
    return pl.pallas_call(
        functools.partial(_mm_bias_act_kernel, act=act),
        out_shape=jax.ShapeDtypeStruct((M, C), out_dtype),
        grid=(M // tm_,),
        in_specs=[pl.BlockSpec((tm_, K), lambda i: (i, 0)),
                  pl.BlockSpec((K, C), lambda i: (0, 0)),
                  pl.BlockSpec((1, C), lambda i: (0, 0))],
        out_specs=pl.BlockSpec((tm_, C), lambda i: (i, 0)),
        compiler_params=pltpu.CompilerParams(
            dimension_semantics=("parallel",)),
    )(a, b, bias2)


def conv_matmul_stats(a, b, bias, *, tm=256, out_dtype=jnp.bfloat16):
    """Matmul + bias with fused per-block BatchNorm statistics partials.

    Returns (y_bf16 (M,C), sum_partials (8*nblk,C)f32, sq_partials (8*nblk,C)f32).
    """
    M, K = a.shape
    K2, C = b.shape
    assert K == K2
    tm_ = _pick_tile(M, tm)
    nblk = M // tm_
    bias2 = bias.reshape(1, C).astype(jnp.float32)
    return pl.pallas_call(
        _mm_bias_stats_kernel,
        out_shape=(jax.ShapeDtypeStruct((M, C), out_dtype),
                   jax.ShapeDtypeStruct((8 * nblk, C), jnp.float32),
                   jax.ShapeDtypeStruct((8 * nblk, C), jnp.float32)),
        grid=(nblk,),
        in_specs=[pl.BlockSpec((tm_, K), lambda i: (i, 0)),
                  pl.BlockSpec((K, C), lambda i: (0, 0)),
                  pl.BlockSpec((1, C), lambda i: (0, 0))],
        out_specs=(pl.BlockSpec((tm_, C), lambda i: (i, 0)),
                   pl.BlockSpec((8, C), lambda i: (i, 0)),
                   pl.BlockSpec((8, C), lambda i: (i, 0))),
        compiler_params=pltpu.CompilerParams(
            dimension_semantics=("parallel",)),
    )(a, b, bias2)


def final_head_sigmoid(a, w_col, bias):
    """sigmoid(a @ w_col + bias) for C_out == 1, single-step VPU kernel."""
    M, K = a.shape
    K2, C = w_col.shape
    assert K == K2 and C == 1
    w_row = jnp.transpose(w_col, (1, 0)).astype(jnp.float32)   # (1, K)
    b2 = bias.reshape(1, 1).astype(jnp.float32)
    return pl.pallas_call(
        _final_head_kernel,
        out_shape=jax.ShapeDtypeStruct((M, 1), jnp.float32),
        grid=(1,),
        in_specs=[pl.BlockSpec((M, K), lambda i: (0, 0)),
                  pl.BlockSpec((1, K), lambda i: (0, 0)),
                  pl.BlockSpec((1, 1), lambda i: (0, 0))],
        out_specs=pl.BlockSpec((M, 1), lambda i: (0, 0)),
    )(a, w_row, b2)


# --------------------------------------------------------------------------
# JAX glue: Conv2d -> im2col matrices (data rearrangement only, in bf16)
# --------------------------------------------------------------------------

def _pad_channels(x_nhwc, mult=8):
    """Zero-pad channels up to a multiple of `mult` (layer 1: 3 -> 8, K=128)."""
    c = x_nhwc.shape[-1]
    cp = -(-c // mult) * mult
    if cp != c:
        x_nhwc = jnp.pad(x_nhwc, ((0, 0), (0, 0), (0, 0), (0, cp - c)))
    return x_nhwc


def conv_im2col(x_nhwc, k, stride, padding):
    # TODO(synk): form the conv patches inside the kernel (stride-phase split
    # input in pl.ANY + manual DMA of the kxk shifted windows) to remove the
    # ~4x HBM duplication of activations; at batch=2 this rearrangement totals
    # <2 MiB so it stays in XLA for robustness.
    n, ih, iw, cin = x_nhwc.shape
    oh = (ih + 2 * padding - k) // stride + 1
    ow = (iw + 2 * padding - k) // stride + 1
    xp = x_nhwc
    if padding:
        xp = jnp.pad(xp, ((0, 0), (padding, padding), (padding, padding), (0, 0)))
    taps = []
    for i in range(k):
        for j in range(k):
            taps.append(xp[:, i:i + stride * (oh - 1) + 1:stride,
                           j:j + stride * (ow - 1) + 1:stride, :])
    patches = jnp.stack(taps, axis=3)                    # (N, OH, OW, K*K, Cin)
    patches = patches.reshape(n * oh * ow, k * k * cin)
    return patches, (n, oh, ow)


def conv_weight_matrix(w, cin_pad=None):
    """PyTorch Conv2d weight (Cout, Cin, KH, KW) -> (KH*KW*Cin_pad, Cout)."""
    cout, cin, kh, kw = w.shape
    if cin_pad is not None and cin_pad != cin:
        w = jnp.pad(w, ((0, 0), (0, cin_pad - cin), (0, 0), (0, 0)))
        cin = cin_pad
    wm = jnp.transpose(w, (2, 3, 1, 0))                  # (KH, KW, Cin, Cout)
    return wm.reshape(kh * kw * cin, cout)


# --------------------------------------------------------------------------
# Discriminator forward pass
# --------------------------------------------------------------------------

# (stride, padding, has_batchnorm, activation) per Conv2d layer.
_LAYER_CFGS = [
    (2, 1, False, "relu"),      # Conv(C_in, 64)   + ReLU
    (2, 1, True,  "relu"),      # Conv(64, 128)    + BN + ReLU
    (2, 1, True,  "relu"),      # Conv(128, 256)   + BN + ReLU
    (2, 1, True,  "relu"),      # Conv(256, 512)   + BN + ReLU
    (1, 0, False, "sigmoid"),   # Conv(512, 1)     + Sigmoid
]


def discriminator_forward(params, x_nchw, use_pallas=True):
    cdt = jnp.bfloat16 if use_pallas else jnp.float32
    x = jnp.transpose(x_nchw, (0, 2, 3, 1)).astype(cdt)   # NCHW -> NHWC
    last = len(_LAYER_CFGS) - 1
    for li, ((stride, padding, has_bn, act), p) in enumerate(
            zip(_LAYER_CFGS, params)):
        w, b = p["w"], p["b"]
        cout, _, kh, _ = w.shape
        x = _pad_channels(x)                 # no-op except layer 1 (3 -> 8)
        patches, (n, oh, ow) = conv_im2col(x, kh, stride, padding)
        wm = conv_weight_matrix(w, cin_pad=x.shape[-1]).astype(cdt)
        M = patches.shape[0]

        if use_pallas:
            if li == last:
                y = final_head_sigmoid(patches, wm, b)          # (N, 1) f32
            elif has_bn:
                y, ps, pq = conv_matmul_stats(patches, wm, b)
                s = jnp.sum(ps, axis=0)
                sq = jnp.sum(pq, axis=0)
                mean = s / M
                var = jnp.maximum(sq / M - mean * mean, 0.0)
                scale = p["gamma"] / jnp.sqrt(var + BN_EPS)
                shift = p["beta"] - mean * scale
                # scale/shift/ReLU left to XLA: it fuses with the next layer's
                # im2col slicing, saving a Pallas launch per BN layer.
                y = jnp.maximum(
                    y.astype(jnp.float32) * scale[None, :] + shift[None, :], 0.0)
            else:
                y = conv_matmul_act(patches, wm, b, act=act)
        else:  # pure-JAX f32 reference path (true module semantics)
            y = patches @ wm + b[None, :]
            if has_bn:
                mean = y.mean(axis=0)
                var = ((y - mean[None, :]) ** 2).mean(axis=0)
                scale = p["gamma"] / jnp.sqrt(var + BN_EPS)
                shift = p["beta"] - mean * scale
                y = jnp.maximum(y * scale[None, :] + shift[None, :], 0.0)
            elif act == "relu":
                y = jnp.maximum(y, 0.0)
            else:  # sigmoid
                y = 1.0 / (1.0 + jnp.exp(-y))

        out_dt = jnp.float32 if li == last else cdt
        x = y.reshape(n, oh, ow, cout).astype(out_dt)

    # final conv output is (N, 1, 1, 1) -> .view(-1, 1).squeeze(1) -> (N,)
    return x.reshape(-1).astype(jnp.float32)


# --------------------------------------------------------------------------
# Deterministic parameter init (shapes per the module's __init__)
# --------------------------------------------------------------------------

def init_params(key, in_channels):
    cfgs = [
        (in_channels, DISCR_FILTERS, False),
        (DISCR_FILTERS, DISCR_FILTERS * 2, True),
        (DISCR_FILTERS * 2, DISCR_FILTERS * 4, True),
        (DISCR_FILTERS * 4, DISCR_FILTERS * 8, True),
        (DISCR_FILTERS * 8, 1, False),
    ]
    params = []
    for cin, cout, has_bn in cfgs:
        key, kw_, kb_, kg_, kbe_ = jax.random.split(key, 5)
        p = {
            "w": 0.05 * jax.random.normal(kw_, (cout, cin, 4, 4), jnp.float32),
            "b": 0.05 * jax.random.normal(kb_, (cout,), jnp.float32),
        }
        if has_bn:
            p["gamma"] = 1.0 + 0.1 * jax.random.normal(kg_, (cout,), jnp.float32)
            p["beta"] = 0.1 * jax.random.normal(kbe_, (cout,), jnp.float32)
        params.append(p)
    return params


if __name__ == "__main__":
    input_shape = (3, 64, 64)   # Atari-like RGB frame; 64x64 required by arch
    batch = 2

    key = jax.random.PRNGKey(0)
    key, kx = jax.random.split(key)
    x = jax.random.normal(kx, (batch,) + input_shape, jnp.float32)
    params = init_params(key, input_shape[0])

    fwd = jax.jit(discriminator_forward, static_argnames=("use_pallas",))

    y = jax.block_until_ready(fwd(params, x, use_pallas=True))
    assert y.shape == (batch,), y.shape
    assert bool(jnp.all(jnp.isfinite(y)))
    assert bool(jnp.all((y >= 0.0) & (y <= 1.0)))        # sigmoid range

    # Pure-JAX f32 (XLA) reference of the identical math for a sanity check.
    y_ref = jax.block_until_ready(fwd(params, x, use_pallas=False))
    max_err = float(jnp.max(jnp.abs(y - y_ref)))
    assert max_err < 1e-1, f"mismatch vs reference: max abs diff = {max_err}"

    print("KERNEL_OK")
</pallas_src>

<mosaic_0001>
module attributes {stable_mosaic.version = 11 : i64} {
  func.func @_mm_bias_act_kernel(%arg0: i32, %arg1: memref<256x128xbf16, #tpu.memory_space<vmem>>, %arg2: memref<128x64xbf16, #tpu.memory_space<vmem>>, %arg3: memref<1x64xf32, #tpu.memory_space<vmem>>, %arg4: memref<256x64xbf16, #tpu.memory_space<vmem>>) attributes {dimension_semantics = [#tpu.dimension_semantics<parallel>], iteration_bounds = array<i64: 8>, scalar_prefetch = 0 : i64, scratch_operands = 0 : i64, tpu.core_type = #tpu.core_type<tc>, window_params = [{transform_indices = @transform_0, window_bounds = array<i64: 256, 128>}, {pipeline_mode = #tpu.pipeline_mode<synchronous>, transform_indices = @transform_1, window_bounds = array<i64: 128, 64>}, {pipeline_mode = #tpu.pipeline_mode<synchronous>, transform_indices = @transform_2, window_bounds = array<i64: 1, 64>}, {transform_indices = @transform_3, window_bounds = array<i64: 256, 64>}]} {
    %c0 = arith.constant 0 : index
    %c0_0 = arith.constant 0 : index
    %0 = vector.load %arg1[%c0, %c0_0] : memref<256x128xbf16, #tpu.memory_space<vmem>>, vector<256x128xbf16>
    %c0_1 = arith.constant 0 : index
    %c0_2 = arith.constant 0 : index
    %1 = vector.load %arg2[%c0_1, %c0_2] : memref<128x64xbf16, #tpu.memory_space<vmem>>, vector<128x64xbf16>
    %cst = arith.constant dense<0.000000e+00> : vector<256x64xf32>
    %2 = tpu.matmul %0, %1, %cst {dimension_numbers = #tpu.dot_dimension_numbers<[1], [0], [0], [1], [0, 0, 1, 1], [], []>} : vector<256x128xbf16>, vector<128x64xbf16>, vector<256x64xf32> -> vector<256x64xf32>
    %c0_3 = arith.constant 0 : index
    %c0_4 = arith.constant 0 : index
    %3 = vector.load %arg3[%c0_3, %c0_4] : memref<1x64xf32, #tpu.memory_space<vmem>>, vector<1x64xf32>
    %4 = vector.broadcast %3 : vector<1x64xf32> to vector<256x64xf32>
    %5 = arith.addf %2, %4 : vector<256x64xf32>
    %cst_5 = arith.constant 0.000000e+00 : f32
    %6 = vector.broadcast %cst_5 : f32 to vector<256x64xf32>
    %7 = arith.maximumf %5, %6 : vector<256x64xf32>
    %8 = arith.truncf %7 : vector<256x64xf32> to vector<256x64xbf16>
    %c0_6 = arith.constant 0 : index
    %c0_7 = arith.constant 0 : index
    %9 = vector.load %arg4[%c0_6, %c0_7] : memref<256x64xbf16, #tpu.memory_space<vmem>>, vector<256x64xbf16>
    tpu.vector_store %arg4[%c0_6, %c0_7], %8 {strides = array<i32>} : memref<256x64xbf16, #tpu.memory_space<vmem>>, vector<256x64xbf16>,
    return
  }
  func.func @transform_0(%arg0: i32) -> (i32, i32) {
    %c0_i32 = arith.constant 0 : i32
    %c0_i32_0 = arith.constant 0 : i32
    return %arg0, %c0_i32 : i32, i32
  }
  func.func @transform_1(%arg0: i32) -> (i32, i32) {
    %c0_i32 = arith.constant 0 : i32
    %c0_i32_0 = arith.constant 0 : i32
    %c0_i32_1 = arith.constant 0 : i32
    return %c0_i32, %c0_i32_0 : i32, i32
  }
  func.func @transform_2(%arg0: i32) -> (i32, i32) {
    %c0_i32 = arith.constant 0 : i32
    %c0_i32_0 = arith.constant 0 : i32
    %c0_i32_1 = arith.constant 0 : i32
    return %c0_i32, %c0_i32_0 : i32, i32
  }
  func.func @transform_3(%arg0: i32) -> (i32, i32) {
    %c0_i32 = arith.constant 0 : i32
    %c0_i32_0 = arith.constant 0 : i32
    return %arg0, %c0_i32 : i32, i32
  }
}

module attributes {stable_mosaic.version = 11 : i64} {
  func.func @_mm_bias_stats_kernel(%arg0: i32, %arg1: memref<256x1024xbf16, #tpu.memory_space<vmem>>, %arg2: memref<1024x128xbf16, #tpu.memory_space<vmem>>, %arg3: memref<1x128xf32, #tpu.memory_space<vmem>>, %arg4: memref<256x128xbf16, #tpu.memory_space<vmem>>, %arg5: memref<8x128xf32, #tpu.memory_space<vmem>>, %arg6: memref<8x128xf32, #tpu.memory_space<vmem>>) attributes {dimension_semantics = [#tpu.dimension_semantics<parallel>], iteration_bounds = array<i64: 2>, scalar_prefetch = 0 : i64, scratch_operands = 0 : i64, tpu.core_type = #tpu.core_type<tc>, window_params = [{transform_indices = @transform_0, window_bounds = array<i64: 256, 1024>}, {pipeline_mode = #tpu.pipeline_mode<synchronous>, transform_indices = @transform_1, window_bounds = array<i64: 1024, 128>}, {pipeline_mode = #tpu.pipeline_mode<synchronous>, transform_indices = @transform_2, window_bounds = array<i64: 1, 128>}, {transform_indices = @transform_3, window_bounds = array<i64: 256, 128>}, {transform_indices = @transform_4, window_bounds = array<i64: 8, 128>}, {transform_indices = @transform_5, window_bounds = array<i64: 8, 128>}]} {
    %c0 = arith.constant 0 : index
    %c0_0 = arith.constant 0 : index
    %0 = vector.load %arg1[%c0, %c0_0] : memref<256x1024xbf16, #tpu.memory_space<vmem>>, vector<256x1024xbf16>
    %c0_1 = arith.constant 0 : index
    %c0_2 = arith.constant 0 : index
    %1 = vector.load %arg2[%c0_1, %c0_2] : memref<1024x128xbf16, #tpu.memory_space<vmem>>, vector<1024x128xbf16>
    %cst = arith.constant dense<0.000000e+00> : vector<256x128xf32>
    %2 = tpu.matmul %0, %1, %cst {dimension_numbers = #tpu.dot_dimension_numbers<[1], [0], [0], [1], [0, 0, 1, 1], [], []>} : vector<256x1024xbf16>, vector<1024x128xbf16>, vector<256x128xf32> -> vector<256x128xf32>
    %c0_3 = arith.constant 0 : index
    %c0_4 = arith.constant 0 : index
    %3 = vector.load %arg3[%c0_3, %c0_4] : memref<1x128xf32, #tpu.memory_space<vmem>>, vector<1x128xf32>
    %4 = vector.broadcast %3 : vector<1x128xf32> to vector<256x128xf32>
    %5 = arith.addf %2, %4 : vector<256x128xf32>
    %6 = arith.truncf %5 : vector<256x128xf32> to vector<256x128xbf16>
    %c0_5 = arith.constant 0 : index
    %c0_6 = arith.constant 0 : index
    %7 = vector.load %arg4[%c0_5, %c0_6] : memref<256x128xbf16, #tpu.memory_space<vmem>>, vector<256x128xbf16>
    tpu.vector_store %arg4[%c0_5, %c0_6], %6 {strides = array<i32>} : memref<256x128xbf16, #tpu.memory_space<vmem>>, vector<256x128xbf16>,
    %cst_7 = arith.constant dense<0.000000e+00> : vector<128xf32>
    %8 = vector.multi_reduction <add>, %5, %cst_7 [0] : vector<256x128xf32> to vector<128xf32>
    %9 = vector.shape_cast %8 : vector<128xf32> to vector<1x128xf32>
    %10 = arith.mulf %5, %5 : vector<256x128xf32>
    %cst_8 = arith.constant dense<0.000000e+00> : vector<128xf32>
    %11 = vector.multi_reduction <add>, %10, %cst_8 [0] : vector<256x128xf32> to vector<128xf32>
    %12 = vector.shape_cast %11 : vector<128xf32> to vector<1x128xf32>
    %13 = tpu.iota {dimensions = array<i32: 0>} : vector<8x128xi32>
    %c0_i32 = arith.constant 0 : i32
    %14 = vector.broadcast %c0_i32 : i32 to vector<8x128xi32>
    %15 = arith.cmpi eq, %13, %14 : vector<8x128xi32>
    %cst_9 = arith.constant 0.000000e+00 : f32
    %16 = vector.shape_cast %9 : vector<1x128xf32> to vector<1x128xf32>
    %17 = vector.broadcast %16 : vector<1x128xf32> to vector<8x128xf32>
    %18 = vector.broadcast %cst_9 : f32 to vector<8x128xf32>
    %19 = arith.select %15, %17, %18 : vector<8x128xi1>, vector<8x128xf32>
    %c0_10 = arith.constant 0 : index
    %c0_11 = arith.constant 0 : index
    %20 = vector.load %arg5[%c0_10, %c0_11] : memref<8x128xf32, #tpu.memory_space<vmem>>, vector<8x128xf32>
    tpu.vector_store %arg5[%c0_10, %c0_11], %19 {strides = array<i32>} : memref<8x128xf32, #tpu.memory_space<vmem>>, vector<8x128xf32>,
    %c0_i32_12 = arith.constant 0 : i32
    %21 = vector.broadcast %c0_i32_12 : i32 to vector<8x128xi32>
    %22 = arith.cmpi eq, %13, %21 : vector<8x128xi32>
    %cst_13 = arith.constant 0.000000e+00 : f32
    %23 = vector.shape_cast %12 : vector<1x128xf32> to vector<1x128xf32>
    %24 = vector.broadcast %23 : vector<1x128xf32> to vector<8x128xf32>
    %25 = vector.broadcast %cst_13 : f32 to vector<8x128xf32>
    %26 = arith.select %22, %24, %25 : vector<8x128xi1>, vector<8x128xf32>
    %c0_14 = arith.constant 0 : index
    %c0_15 = arith.constant 0 : index
    %27 = vector.load %arg6[%c0_14, %c0_15] : memref<8x128xf32, #tpu.memory_space<vmem>>, vector<8x128xf32>
    tpu.vector_store %arg6[%c0_14, %c0_15], %26 {strides = array<i32>} : memref<8x128xf32, #tpu.memory_space<vmem>>, vector<8x128xf32>,
    return
  }
  func.func @transform_0(%arg0: i32) -> (i32, i32) {
    %c0_i32 = arith.constant 0 : i32
    %c0_i32_0 = arith.constant 0 : i32
    return %arg0, %c0_i32 : i32, i32
  }
  func.func @transform_1(%arg0: i32) -> (i32, i32) {
    %c0_i32 = arith.constant 0 : i32
    %c0_i32_0 = arith.constant 0 : i32
    %c0_i32_1 = arith.constant 0 : i32
    return %c0_i32, %c0_i32_0 : i32, i32
  }
  func.func @transform_2(%arg0: i32) -> (i32, i32) {
    %c0_i32 = arith.constant 0 : i32
    %c0_i32_0 = arith.constant 0 : i32
    %c0_i32_1 = arith.constant 0 : i32
    return %c0_i32, %c0_i32_0 : i32, i32
  }
  func.func @transform_3(%arg0: i32) -> (i32, i32) {
    %c0_i32 = arith.constant 0 : i32
    %c0_i32_0 = arith.constant 0 : i32
    return %arg0, %c0_i32 : i32, i32
  }
  func.func @transform_4(%arg0: i32) -> (i32, i32) {
    %c0_i32 = arith.constant 0 : i32
    %c0_i32_0 = arith.constant 0 : i32
    return %arg0, %c0_i32 : i32, i32
  }
  func.func @transform_5(%arg0: i32) -> (i32, i32) {
    %c0_i32 = arith.constant 0 : i32
    %c0_i32_0 = arith.constant 0 : i32
    return %arg0, %c0_i32 : i32, i32
  }
}

module attributes {stable_mosaic.version = 11 : i64} {
  func.func @_mm_bias_stats_kernel(%arg0: i32, %arg1: memref<128x2048xbf16, #tpu.memory_space<vmem>>, %arg2: memref<2048x256xbf16, #tpu.memory_space<vmem>>, %arg3: memref<1x256xf32, #tpu.memory_space<vmem>>, %arg4: memref<128x256xbf16, #tpu.memory_space<vmem>>, %arg5: memref<8x256xf32, #tpu.memory_space<vmem>>, %arg6: memref<8x256xf32, #tpu.memory_space<vmem>>) attributes {dimension_semantics = [#tpu.dimension_semantics<parallel>], iteration_bounds = array<i64: 1>, scalar_prefetch = 0 : i64, scratch_operands = 0 : i64, tpu.core_type = #tpu.core_type<tc>, window_params = [{transform_indices = @transform_0, window_bounds = array<i64: 128, 2048>}, {pipeline_mode = #tpu.pipeline_mode<synchronous>, transform_indices = @transform_1, window_bounds = array<i64: 2048, 256>}, {pipeline_mode = #tpu.pipeline_mode<synchronous>, transform_indices = @transform_2, window_bounds = array<i64: 1, 256>}, {transform_indices = @transform_3, window_bounds = array<i64: 128, 256>}, {transform_indices = @transform_4, window_bounds = array<i64: 8, 256>}, {transform_indices = @transform_5, window_bounds = array<i64: 8, 256>}]} {
    %c0 = arith.constant 0 : index
    %c0_0 = arith.constant 0 : index
    %0 = vector.load %arg1[%c0, %c0_0] : memref<128x2048xbf16, #tpu.memory_space<vmem>>, vector<128x2048xbf16>
    %c0_1 = arith.constant 0 : index
    %c0_2 = arith.constant 0 : index
    %1 = vector.load %arg2[%c0_1, %c0_2] : memref<2048x256xbf16, #tpu.memory_space<vmem>>, vector<2048x256xbf16>
    %cst = arith.constant dense<0.000000e+00> : vector<128x256xf32>
    %2 = tpu.matmul %0, %1, %cst {dimension_numbers = #tpu.dot_dimension_numbers<[1], [0], [0], [1], [0, 0, 1, 1], [], []>} : vector<128x2048xbf16>, vector<2048x256xbf16>, vector<128x256xf32> -> vector<128x256xf32>
    %c0_3 = arith.constant 0 : index
    %c0_4 = arith.constant 0 : index
    %3 = vector.load %arg3[%c0_3, %c0_4] : memref<1x256xf32, #tpu.memory_space<vmem>>, vector<1x256xf32>
    %4 = vector.broadcast %3 : vector<1x256xf32> to vector<128x256xf32>
    %5 = arith.addf %2, %4 : vector<128x256xf32>
    %6 = arith.truncf %5 : vector<128x256xf32> to vector<128x256xbf16>
    %c0_5 = arith.constant 0 : index
    %c0_6 = arith.constant 0 : index
    %7 = vector.load %arg4[%c0_5, %c0_6] : memref<128x256xbf16, #tpu.memory_space<vmem>>, vector<128x256xbf16>
    tpu.vector_store %arg4[%c0_5, %c0_6], %6 {strides = array<i32>} : memref<128x256xbf16, #tpu.memory_space<vmem>>, vector<128x256xbf16>,
    %cst_7 = arith.constant dense<0.000000e+00> : vector<256xf32>
    %8 = vector.multi_reduction <add>, %5, %cst_7 [0] : vector<128x256xf32> to vector<256xf32>
    %9 = vector.shape_cast %8 : vector<256xf32> to vector<1x256xf32>
    %10 = arith.mulf %5, %5 : vector<128x256xf32>
    %cst_8 = arith.constant dense<0.000000e+00> : vector<256xf32>
    %11 = vector.multi_reduction <add>, %10, %cst_8 [0] : vector<128x256xf32> to vector<256xf32>
    %12 = vector.shape_cast %11 : vector<256xf32> to vector<1x256xf32>
    %13 = tpu.iota {dimensions = array<i32: 0>} : vector<8x256xi32>
    %c0_i32 = arith.constant 0 : i32
    %14 = vector.broadcast %c0_i32 : i32 to vector<8x256xi32>
    %15 = arith.cmpi eq, %13, %14 : vector<8x256xi32>
    %cst_9 = arith.constant 0.000000e+00 : f32
    %16 = vector.shape_cast %9 : vector<1x256xf32> to vector<1x256xf32>
    %17 = vector.broadcast %16 : vector<1x256xf32> to vector<8x256xf32>
    %18 = vector.broadcast %cst_9 : f32 to vector<8x256xf32>
    %19 = arith.select %15, %17, %18 : vector<8x256xi1>, vector<8x256xf32>
    %c0_10 = arith.constant 0 : index
    %c0_11 = arith.constant 0 : index
    %20 = vector.load %arg5[%c0_10, %c0_11] : memref<8x256xf32, #tpu.memory_space<vmem>>, vector<8x256xf32>
    tpu.vector_store %arg5[%c0_10, %c0_11], %19 {strides = array<i32>} : memref<8x256xf32, #tpu.memory_space<vmem>>, vector<8x256xf32>,
    %c0_i32_12 = arith.constant 0 : i32
    %21 = vector.broadcast %c0_i32_12 : i32 to vector<8x256xi32>
    %22 = arith.cmpi eq, %13, %21 : vector<8x256xi32>
    %cst_13 = arith.constant 0.000000e+00 : f32
    %23 = vector.shape_cast %12 : vector<1x256xf32> to vector<1x256xf32>
    %24 = vector.broadcast %23 : vector<1x256xf32> to vector<8x256xf32>
    %25 = vector.broadcast %cst_13 : f32 to vector<8x256xf32>
    %26 = arith.select %22, %24, %25 : vector<8x256xi1>, vector<8x256xf32>
    %c0_14 = arith.constant 0 : index
    %c0_15 = arith.constant 0 : index
    %27 = vector.load %arg6[%c0_14, %c0_15] : memref<8x256xf32, #tpu.memory_space<vmem>>, vector<8x256xf32>
    tpu.vector_store %arg6[%c0_14, %c0_15], %26 {strides = array<i32>} : memref<8x256xf32, #tpu.memory_space<vmem>>, vector<8x256xf32>,
    return
  }
  func.func @transform_0(%arg0: i32) -> (i32, i32) {
    %c0_i32 = arith.constant 0 : i32
    %c0_i32_0 = arith.constant 0 : i32
    return %arg0, %c0_i32 : i32, i32
  }
  func.func @transform_1(%arg0: i32) -> (i32, i32) {
    %c0_i32 = arith.constant 0 : i32
    %c0_i32_0 = arith.constant 0 : i32
    %c0_i32_1 = arith.constant 0 : i32
    return %c0_i32, %c0_i32_0 : i32, i32
  }
  func.func @transform_2(%arg0: i32) -> (i32, i32) {
    %c0_i32 = arith.constant 0 : i32
    %c0_i32_0 = arith.constant 0 : i32
    %c0_i32_1 = arith.constant 0 : i32
    return %c0_i32, %c0_i32_0 : i32, i32
  }
  func.func @transform_3(%arg0: i32) -> (i32, i32) {
    %c0_i32 = arith.constant 0 : i32
    %c0_i32_0 = arith.constant 0 : i32
    return %arg0, %c0_i32 : i32, i32
  }
  func.func @transform_4(%arg0: i32) -> (i32, i32) {
    %c0_i32 = arith.constant 0 : i32
    %c0_i32_0 = arith.constant 0 : i32
    return %arg0, %c0_i32 : i32, i32
  }
  func.func @transform_5(%arg0: i32) -> (i32, i32) {
    %c0_i32 = arith.constant 0 : i32
    %c0_i32_0 = arith.constant 0 : i32
    return %arg0, %c0_i32 : i32, i32
  }
}

module attributes {stable_mosaic.version = 11 : i64} {
  func.func @_mm_bias_stats_kernel(%arg0: i32, %arg1: memref<32x4096xbf16, #tpu.memory_space<vmem>>, %arg2: memref<4096x512xbf16, #tpu.memory_space<vmem>>, %arg3: memref<1x512xf32, #tpu.memory_space<vmem>>, %arg4: memref<32x512xbf16, #tpu.memory_space<vmem>>, %arg5: memref<8x512xf32, #tpu.memory_space<vmem>>, %arg6: memref<8x512xf32, #tpu.memory_space<vmem>>) attributes {dimension_semantics = [#tpu.dimension_semantics<parallel>], iteration_bounds = array<i64: 1>, scalar_prefetch = 0 : i64, scratch_operands = 0 : i64, tpu.core_type = #tpu.core_type<tc>, window_params = [{transform_indices = @transform_0, window_bounds = array<i64: 32, 4096>}, {pipeline_mode = #tpu.pipeline_mode<synchronous>, transform_indices = @transform_1, window_bounds = array<i64: 4096, 512>}, {pipeline_mode = #tpu.pipeline_mode<synchronous>, transform_indices = @transform_2, window_bounds = array<i64: 1, 512>}, {transform_indices = @transform_3, window_bounds = array<i64: 32, 512>}, {transform_indices = @transform_4, window_bounds = array<i64: 8, 512>}, {transform_indices = @transform_5, window_bounds = array<i64: 8, 512>}]} {
    %c0 = arith.constant 0 : index
    %c0_0 = arith.constant 0 : index
    %0 = vector.load %arg1[%c0, %c0_0] : memref<32x4096xbf16, #tpu.memory_space<vmem>>, vector<32x4096xbf16>
    %c0_1 = arith.constant 0 : index
    %c0_2 = arith.constant 0 : index
    %1 = vector.load %arg2[%c0_1, %c0_2] : memref<4096x512xbf16, #tpu.memory_space<vmem>>, vector<4096x512xbf16>
    %cst = arith.constant dense<0.000000e+00> : vector<32x512xf32>
    %2 = tpu.matmul %0, %1, %cst {dimension_numbers = #tpu.dot_dimension_numbers<[1], [0], [0], [1], [0, 0, 1, 1], [], []>} : vector<32x4096xbf16>, vector<4096x512xbf16>, vector<32x512xf32> -> vector<32x512xf32>
    %c0_3 = arith.constant 0 : index
    %c0_4 = arith.constant 0 : index
    %3 = vector.load %arg3[%c0_3, %c0_4] : memref<1x512xf32, #tpu.memory_space<vmem>>, vector<1x512xf32>
    %4 = vector.broadcast %3 : vector<1x512xf32> to vector<32x512xf32>
    %5 = arith.addf %2, %4 : vector<32x512xf32>
    %6 = arith.truncf %5 : vector<32x512xf32> to vector<32x512xbf16>
    %c0_5 = arith.constant 0 : index
    %c0_6 = arith.constant 0 : index
    %7 = vector.load %arg4[%c0_5, %c0_6] : memref<32x512xbf16, #tpu.memory_space<vmem>>, vector<32x512xbf16>
    tpu.vector_store %arg4[%c0_5, %c0_6], %6 {strides = array<i32>} : memref<32x512xbf16, #tpu.memory_space<vmem>>, vector<32x512xbf16>,
    %cst_7 = arith.constant dense<0.000000e+00> : vector<512xf32>
    %8 = vector.multi_reduction <add>, %5, %cst_7 [0] : vector<32x512xf32> to vector<512xf32>
    %9 = vector.shape_cast %8 : vector<512xf32> to vector<1x512xf32>
    %10 = arith.mulf %5, %5 : vector<32x512xf32>
    %cst_8 = arith.constant dense<0.000000e+00> : vector<512xf32>
    %11 = vector.multi_reduction <add>, %10, %cst_8 [0] : vector<32x512xf32> to vector<512xf32>
    %12 = vector.shape_cast %11 : vector<512xf32> to vector<1x512xf32>
    %13 = tpu.iota {dimensions = array<i32: 0>} : vector<8x512xi32>
    %c0_i32 = arith.constant 0 : i32
    %14 = vector.broadcast %c0_i32 : i32 to vector<8x512xi32>
    %15 = arith.cmpi eq, %13, %14 : vector<8x512xi32>
    %cst_9 = arith.constant 0.000000e+00 : f32
    %16 = vector.shape_cast %9 : vector<1x512xf32> to vector<1x512xf32>
    %17 = vector.broadcast %16 : vector<1x512xf32> to vector<8x512xf32>
    %18 = vector.broadcast %cst_9 : f32 to vector<8x512xf32>
    %19 = arith.select %15, %17, %18 : vector<8x512xi1>, vector<8x512xf32>
    %c0_10 = arith.constant 0 : index
    %c0_11 = arith.constant 0 : index
    %20 = vector.load %arg5[%c0_10, %c0_11] : memref<8x512xf32, #tpu.memory_space<vmem>>, vector<8x512xf32>
    tpu.vector_store %arg5[%c0_10, %c0_11], %19 {strides = array<i32>} : memref<8x512xf32, #tpu.memory_space<vmem>>, vector<8x512xf32>,
    %c0_i32_12 = arith.constant 0 : i32
    %21 = vector.broadcast %c0_i32_12 : i32 to vector<8x512xi32>
    %22 = arith.cmpi eq, %13, %21 : vector<8x512xi32>
    %cst_13 = arith.constant 0.000000e+00 : f32
    %23 = vector.shape_cast %12 : vector<1x512xf32> to vector<1x512xf32>
    %24 = vector.broadcast %23 : vector<1x512xf32> to vector<8x512xf32>
    %25 = vector.broadcast %cst_13 : f32 to vector<8x512xf32>
    %26 = arith.select %22, %24, %25 : vector<8x512xi1>, vector<8x512xf32>
    %c0_14 = arith.constant 0 : index
    %c0_15 = arith.constant 0 : index
    %27 = vector.load %arg6[%c0_14, %c0_15] : memref<8x512xf32, #tpu.memory_space<vmem>>, vector<8x512xf32>
    tpu.vector_store %arg6[%c0_14, %c0_15], %26 {strides = array<i32>} : memref<8x512xf32, #tpu.memory_space<vmem>>, vector<8x512xf32>,
    return
  }
  func.func @transform_0(%arg0: i32) -> (i32, i32) {
    %c0_i32 = arith.constant 0 : i32
    %c0_i32_0 = arith.constant 0 : i32
    return %arg0, %c0_i32 : i32, i32
  }
  func.func @transform_1(%arg0: i32) -> (i32, i32) {
    %c0_i32 = arith.constant 0 : i32
    %c0_i32_0 = arith.constant 0 : i32
    %c0_i32_1 = arith.constant 0 : i32
    return %c0_i32, %c0_i32_0 : i32, i32
  }
  func.func @transform_2(%arg0: i32) -> (i32, i32) {
    %c0_i32 = arith.constant 0 : i32
    %c0_i32_0 = arith.constant 0 : i32
    %c0_i32_1 = arith.constant 0 : i32
    return %c0_i32, %c0_i32_0 : i32, i32
  }
  func.func @transform_3(%arg0: i32) -> (i32, i32) {
    %c0_i32 = arith.constant 0 : i32
    %c0_i32_0 = arith.constant 0 : i32
    return %arg0, %c0_i32 : i32, i32
  }
  func.func @transform_4(%arg0: i32) -> (i32, i32) {
    %c0_i32 = arith.constant 0 : i32
    %c0_i32_0 = arith.constant 0 : i32
    return %arg0, %c0_i32 : i32, i32
  }
  func.func @transform_5(%arg0: i32) -> (i32, i32) {
    %c0_i32 = arith.constant 0 : i32
    %c0_i32_0 = arith.constant 0 : i32
    return %arg0, %c0_i32 : i32, i32
  }
}

module attributes {stable_mosaic.version = 11 : i64} {
  func.func @_final_head_kernel(%arg0: i32, %arg1: memref<2x8192xbf16, #tpu.memory_space<vmem>>, %arg2: memref<1x8192xf32, #tpu.memory_space<vmem>>, %arg3: memref<1x1xf32, #tpu.memory_space<vmem>>, %arg4: memref<2x1xf32, #tpu.memory_space<vmem>>) attributes {dimension_semantics = [#tpu.dimension_semantics<arbitrary>], iteration_bounds = array<i64: 1>, scalar_prefetch = 0 : i64, scratch_operands = 0 : i64, tpu.core_type = #tpu.core_type<tc>, window_params = [{pipeline_mode = #tpu.pipeline_mode<synchronous>, transform_indices = @transform_0, window_bounds = array<i64: 2, 8192>}, {pipeline_mode = #tpu.pipeline_mode<synchronous>, transform_indices = @transform_1, window_bounds = array<i64: 1, 8192>}, {pipeline_mode = #tpu.pipeline_mode<synchronous>, transform_indices = @transform_2, window_bounds = array<i64: 1, 1>}, {pipeline_mode = #tpu.pipeline_mode<synchronous>, transform_indices = @transform_3, window_bounds = array<i64: 2, 1>}]} {
    %c0 = arith.constant 0 : index
    %c0_0 = arith.constant 0 : index
    %0 = vector.load %arg1[%c0, %c0_0] : memref<2x8192xbf16, #tpu.memory_space<vmem>>, vector<2x8192xbf16>
    %1 = arith.extf %0 : vector<2x8192xbf16> to vector<2x8192xf32>
    %c0_1 = arith.constant 0 : index
    %c0_2 = arith.constant 0 : index
    %2 = vector.load %arg2[%c0_1, %c0_2] : memref<1x8192xf32, #tpu.memory_space<vmem>>, vector<1x8192xf32>
    %3 = vector.broadcast %2 : vector<1x8192xf32> to vector<2x8192xf32>
    %4 = arith.mulf %1, %3 : vector<2x8192xf32>
    %cst = arith.constant dense<0.000000e+00> : vector<2xf32>
    %5 = vector.multi_reduction <add>, %4, %cst [1] : vector<2x8192xf32> to vector<2xf32>
    %6 = vector.shape_cast %5 : vector<2xf32> to vector<2x1xf32>
    %c0_3 = arith.constant 0 : index
    %c0_4 = arith.constant 0 : index
    %7 = vector.load %arg3[%c0_3, %c0_4] : memref<1x1xf32, #tpu.memory_space<vmem>>, vector<1x1xf32>
    %8 = vector.broadcast %7 : vector<1x1xf32> to vector<2x1xf32>
    %9 = arith.addf %6, %8 : vector<2x1xf32>
    %cst_5 = arith.constant 0.000000e+00 : f32
    %10 = vector.broadcast %cst_5 : f32 to vector<2x1xf32>
    %11 = arith.subf %10, %9 : vector<2x1xf32>
    %12 = math.exp %11 : vector<2x1xf32>
    %cst_6 = arith.constant 1.000000e+00 : f32
    %13 = vector.broadcast %cst_6 : f32 to vector<2x1xf32>
    %14 = arith.addf %13, %12 : vector<2x1xf32>
    %cst_7 = arith.constant 1.000000e+00 : f32
    %15 = vector.broadcast %cst_7 : f32 to vector<2x1xf32>
    %16 = arith.divf %15, %14 : vector<2x1xf32>
    %c0_8 = arith.constant 0 : index
    %c0_9 = arith.constant 0 : index
    %17 = vector.load %arg4[%c0_8, %c0_9] : memref<2x1xf32, #tpu.memory_space<vmem>>, vector<2x1xf32>
    tpu.vector_store %arg4[%c0_8, %c0_9], %16 {strides = array<i32>} : memref<2x1xf32, #tpu.memory_space<vmem>>, vector<2x1xf32>,
    return
  }
  func.func @transform_0(%arg0: i32) -> (i32, i32) {
    %c0_i32 = arith.constant 0 : i32
    %c0_i32_0 = arith.constant 0 : i32
    %c0_i32_1 = arith.constant 0 : i32
    return %c0_i32, %c0_i32_0 : i32, i32
  }
  func.func @transform_1(%arg0: i32) -> (i32, i32) {
    %c0_i32 = arith.constant 0 : i32
    %c0_i32_0 = arith.constant 0 : i32
    %c0_i32_1 = arith.constant 0 : i32
    return %c0_i32, %c0_i32_0 : i32, i32
  }
  func.func @transform_2(%arg0: i32) -> (i32, i32) {
    %c0_i32 = arith.constant 0 : i32
    %c0_i32_0 = arith.constant 0 : i32
    %c0_i32_1 = arith.constant 0 : i32
    return %c0_i32, %c0_i32_0 : i32, i32
  }
  func.func @transform_3(%arg0: i32) -> (i32, i32) {
    %c0_i32 = arith.constant 0 : i32
    %c0_i32_0 = arith.constant 0 : i32
    %c0_i32_1 = arith.constant 0 : i32
    return %c0_i32, %c0_i32_0 : i32, i32
  }
}

</mosaic_0001>

<bundles_post_ra>
// kernel: discriminator_forward.5
= control target key start
LH: loop header
LB: loop body
LE: loop exit
PB: predicated region body
PF: predicated region fallthrough
CT: control target
= control target key end

     0   :  { %s1032_s12 = smov 0   ;;  %s1201_s0 = inlined_call_operand.vmem [shape: bf16[2048,128], index: 0, kind: input, shape index: {}]   ;;  %s1202_s1 = inlined_call_operand.vmem [shape: bf16[128,64], index: 1, kind: input, shape index: {}]   ;;  %s1203_s2 = inlined_call_operand.vmem [shape: f32[1,64], index: 2, kind: input, shape index: {}]   ;;  %s1204_s3 = inlined_call_operand.vmem [shape: bf16[2048,64], index: 3, kind: output, shape index: {}]  }
   0x1 LB: > { %s784_s13 = sadd.s32 4294967295, %s1010_s12   ;;  %p788_p0 = scmp.ge.s32.totalorder %s1010_s12, 1  ;;  %s1010_s12 = sphi %s1032_s12, %s13_s12  }
   0x2   : > { %p138_p1 = scmp.lt.s32.totalorder %s1010_s12, 9 }
   0x4   : > { %p139_p2 = pnand %p788_p0, %p138_p1 }
   0x5   : > { %v980_v0 = vld [vmem:[%s1202_s1] sm:$0xff] (!%p139_p2)   ;;  %s789_s16 = sshll.u32 (!%p139_p2), %s784_s13, 5  ;;  %v981_v1 = vld [vmem:[%s1202_s1 + $0x8] sm:$0xff] (!%p139_p2)   ;;  %v982_v2 = vld [vmem:[%s1202_s1 + $0x10] sm:$0xff] (!%p139_p2)   ;;  %vm695_vm0 = vcmask (!%p139_p2), 519168  }
   0x6   : > { %142 = sbr.rel (%p139_p2) target bundleno = 284 (0x11c), region = 32  ;;  %p163_p3 = scmp.lt.s32.totalorder (!%p139_p2), %s789_s16, 255  ;;  %908 = vmatprep.subr.bf16.mxu0 (!%p139_p2), %v980_v0  ;;  %956 = vmatprep.subr.bf16.mxu1 (!%p139_p2), %v980_v0  ;;  %v983_v3 = vld [vmem:[%s1202_s1 + $0x18] sm:$0xff] (!%p139_p2)   ;;  %v984_v6 = vld [vmem:[%s1202_s1 + $0x20] sm:$0xff] (!%p139_p2)   ;;  %v985_v7 = vld [vmem:[%s1202_s1 + $0x28] sm:$0xff] (!%p139_p2)  }
   0x7   : > { %909 = vmatpush3.bf16.msra.mxu0 (!%p139_p2), %v980_v0  ;;  %964 = vmatpush3.bf16.msra.mxu1 (!%p139_p2), %v980_v0  ;;  %v986_v8 = vld [vmem:[%s1202_s1 + $0x30] sm:$0xff] (!%p139_p2)   ;;  %v987_v9 = vld [vmem:[%s1202_s1 + $0x38] sm:$0xff] (!%p139_p2)   ;;  %v1093_v24 = vld [vmem:[%s1203_s2] ss:$0 sm:$0xff] (!%p139_p2) }
   0x8   : > { %910 = vmatprep.subr.bf16.mxu0 (!%p139_p2), %v981_v1  ;;  %957 = vmatprep.subr.bf16.mxu1 (!%p139_p2), %v981_v1 }
   0xb   : > { %911 = vmatpush3.bf16.msra.mxu0 (!%p139_p2), %v981_v1  ;;  %965 = vmatpush3.bf16.msra.mxu1 (!%p139_p2), %v981_v1 }
   0xc   : > { %912 = vmatprep.subr.bf16.mxu0 (!%p139_p2), %v982_v2  ;;  %958 = vmatprep.subr.bf16.mxu1 (!%p139_p2), %v982_v2 }
   0xd   : > { %s1206_s16 = smov (!%p163_p3, %s789_s16), 255 }
   0xe   : > { %s790_s21 = sshll.u32 %s1206_s16, 2 }
   0xf   : > { %s1057_s24 = scalar_lea.vmem %s1201_s0, %s790_s21  ;;  %913 = vmatpush3.bf16.msra.mxu0 %v982_v2  ;;  %966 = vmatpush3.bf16.msra.mxu1 %v982_v2  ;;  %s1106_s13 = scalar_lea.vmem %s1204_s3, %s790_s21 }
  0x10   : > { %v988_v4 = vld [vmem:[%s1057_s24] sm:$0xff]   ;;  %914 = vmatprep.subr.bf16.mxu0 %v983_v3  ;;  %959 = vmatprep.subr.bf16.mxu1 %v983_v3  ;;  %v990_v10 = vld [vmem:[%s1057_s24 + $0x8] sm:$0xff]   ;;  %v992_v12 = vld [vmem:[%s1057_s24 + $0x10] sm:$0xff]  }
  0x11   : > { %v989_v5 = vld [vmem:[%s1057_s24 + $0x40] sm:$0xff]   ;;  %924 = vmatprep.mubr.bf16.mxu0 %v988_v4  ;;  %v991_v11 = vld [vmem:[%s1057_s24 + $0x48] sm:$0xff]   ;;  %v993_v13 = vld [vmem:[%s1057_s24 + $0x50] sm:$0xff]  }
  0x12   : > { %940 = vmatprep.mubr.bf16.mxu1 %v989_v5  ;;  %v994_v14 = vld [vmem:[%s1057_s24 + $0x18] sm:$0xff]   ;;  %v996_v16 = vld [vmem:[%s1057_s24 + $0x20] sm:$0xff]   ;;  %v998_v18 = vld [vmem:[%s1057_s24 + $0x28] sm:$0xff]  }
  0x13   : > { %915 = vmatpush3.bf16.msra.mxu0 %v983_v3  ;;  %967 = vmatpush3.bf16.msra.mxu1 %v983_v3  ;;  %v995_v15 = vld [vmem:[%s1057_s24 + $0x58] sm:$0xff]   ;;  %v997_v17 = vld [vmem:[%s1057_s24 + $0x60] sm:$0xff]   ;;  %v999_v19 = vld [vmem:[%s1057_s24 + $0x68] sm:$0xff]  }
  0x14   : > { %916 = vmatprep.subr.bf16.mxu0 %v984_v6  ;;  %960 = vmatprep.subr.bf16.mxu1 %v984_v6  ;;  %v1000_v20 = vld [vmem:[%s1057_s24 + $0x30] sm:$0xff]   ;;  %v1002_v22 = vld [vmem:[%s1057_s24 + $0x38] sm:$0xff]  }
  0x15   : > { %v1001_v21 = vld [vmem:[%s1057_s24 + $0x70] sm:$0xff]   ;;  %v1003_v23 = vld [vmem:[%s1057_s24 + $0x78] sm:$0xff]  }
  0x17   : > { %917 = vmatpush3.bf16.msra.mxu0 %v984_v6  ;;  %968 = vmatpush3.bf16.msra.mxu1 %v984_v6 }
  0x18   : > { %918 = vmatprep.subr.bf16.mxu0 %v985_v7  ;;  %961 = vmatprep.subr.bf16.mxu1 %v985_v7 }
  0x1b   : > { %919 = vmatpush3.bf16.msra.mxu0 %v985_v7  ;;  %969 = vmatpush3.bf16.msra.mxu1 %v985_v7 }
  0x1c   : > { %920 = vmatprep.subr.bf16.mxu0 %v986_v8  ;;  %962 = vmatprep.subr.bf16.mxu1 %v986_v8 }
  0x1f   : > { %921 = vmatpush3.bf16.msra.mxu0 %v986_v8  ;;  %970 = vmatpush3.bf16.msra.mxu1 %v986_v8 }
  0x20   : > { %922 = vmatprep.subr.bf16.mxu0 %v987_v9  ;;  %963 = vmatprep.subr.bf16.mxu1 %v987_v9 }
  0x23   : > { %923 = vmatpush3.bf16.msra.mxu0 %v987_v9  ;;  %971 = vmatpush3.bf16.msra.mxu1 %v987_v9 }
  0x26   : > { %925 = vmatmul.mubr.bf16.vlgmr.msra.gmra.mrb[0].mxu0 %v990_v10  ;;  %941 = vmatmul.mubr.bf16.vlgmr.msra.gmra.mrb[0].mxu1 %v991_v11 }
  0x27   : > { %928 = vmatprep.mubr.bf16.mxu0 %v992_v12  ;;  %944 = vmatprep.mubr.bf16.mxu1 %v993_v13 }
  0x2e   : > { %929 = vmatmul.mubr.bf16.gmra.mrb[4].mxu0 %v994_v14  ;;  %945 = vmatmul.mubr.bf16.gmra.mrb[4].mxu1 %v995_v15 }
  0x2f   : > { %932 = vmatprep.mubr.bf16.mxu0 %v996_v16  ;;  %948 = vmatprep.mubr.bf16.mxu1 %v997_v17 }
  0x36   : > { %933 = vmatmul.mubr.bf16.gmra.mrb[8].mxu0 %v998_v18  ;;  %949 = vmatmul.mubr.bf16.gmra.mrb[8].mxu1 %v999_v19 }
  0x37   : > { %936 = vmatprep.mubr.bf16.mxu0 %v1000_v20  ;;  %952 = vmatprep.mubr.bf16.mxu1 %v1001_v21 }
  0x3e   : > { %937 = vmatmul.mubr.bf16.gmra.mrb[12].mxu0 %v1002_v22  ;;  %953 = vmatmul.mubr.bf16.gmra.mrb[12].mxu1 %v1003_v23 }
  0xf9   : > { %v926_v25 = vpop.f32.mrb[0].mxu0  ;;  %v942_v26 = vpop.f32.mrb[0].mxu1 }
  0xfa   : > { %v417_v27 = vadd.f32 %v926_v25, %v1093_v24  ;;  %v481_v28 = vadd.f32 %v942_v26, %v1093_v24  ;;  %v408_v29 = vpop.f32.mrb[1].mxu0  ;;  %v472_v30 = vpop.f32.mrb[1].mxu1 }
  0xfb   : > { %v409_v31 = vadd.f32 %v1093_v24, %v408_v29  ;;  %v473_v32 = vadd.f32 %v1093_v24, %v472_v30  ;;  %v927_v33 = vpop.f32.mrb[2].mxu0  ;;  %v943_v34 = vpop.f32.mrb[2].mxu1 }
  0xfc   : > { %v537_v35 = vmax.f32 %v417_v27, 0.0  ;;  %v553_v36 = vmax.f32 %v481_v28, 0.0  ;;  %v420_v37 = vadd.f32 %v927_v33, %v1093_v24  ;;  %v484_v38 = vadd.f32 %v943_v34, %v1093_v24  ;;  %v411_v39 = vpop.f32.mrb[3].mxu0  ;;  %v475_v40 = vpop.f32.mrb[3].mxu1 }
  0xfd   : > { %v535_v41 = vmax.f32 %v409_v31, 0.0  ;;  %v551_v42 = vmax.f32 %v473_v32, 0.0  ;;  %v412_v43 = vadd.f32 %v1093_v24, %v411_v39  ;;  %v476_v44 = vadd.f32 %v1093_v24, %v475_v40 }
  0xfe   : > { %v854_v45 = vpack.c.bf16 %v537_v35, %v537_v35  ;;  %v870_v46 = vpack.c.bf16 %v553_v36, %v553_v36  ;;  %v538_v47 = vmax.f32 %v420_v37, 0.0  ;;  %v554_v48 = vmax.f32 %v484_v38, 0.0 }
  0xff   : > { %v852_v49 = vpack.c.bf16 %v535_v41, %v535_v41  ;;  %v868_v50 = vpack.c.bf16 %v551_v42, %v551_v42  ;;  %v536_v51 = vmax.f32 %v412_v43, 0.0  ;;  %v552_v52 = vmax.f32 %v476_v44, 0.0 }
 0x100   : > { %698 = vst.msk [vmem:[%s1106_s13 + $0x8] sm:$0xf] %vm695_vm0, %v854_v45  ;;  %714 = vst.msk [vmem:[%s1106_s13 + $0x48] sm:$0xf] %vm695_vm0, %v870_v46  ;;  %v855_v53 = vpack.c.bf16 %v538_v47, %v538_v47  ;;  %v871_v54 = vpack.c.bf16 %v554_v48, %v554_v48 }
 0x101   : > { %696 = vst.msk [vmem:[%s1106_s13] sm:$0xf] %vm695_vm0, %v852_v49  ;;  %712 = vst.msk [vmem:[%s1106_s13 + $0x40] sm:$0xf] %vm695_vm0, %v868_v50  ;;  %v853_v55 = vpack.c.bf16 %v536_v51, %v536_v51  ;;  %v869_v56 = vpack.c.bf16 %v552_v52, %v552_v52  ;;  %v930_v57 = vpop.f32.mrb[4].mxu0  ;;  %v946_v58 = vpop.f32.mrb[4].mxu1 }
 0x102   : > { %699 = vst.msk [vmem:[%s1106_s13 + $0xc] sm:$0xf] %vm695_vm0, %v855_v53  ;;  %715 = vst.msk [vmem:[%s1106_s13 + $0x4c] sm:$0xf] %vm695_vm0, %v871_v54  ;;  %v433_v59 = vadd.f32 %v930_v57, %v1093_v24  ;;  %v497_v60 = vadd.f32 %v946_v58, %v1093_v24  ;;  %v424_v61 = vpop.f32.mrb[5].mxu0  ;;  %v488_v62 = vpop.f32.mrb[5].mxu1 }
 0x103   : > { %697 = vst.msk [vmem:[%s1106_s13 + $0x4] sm:$0xf] %vm695_vm0, %v853_v55  ;;  %713 = vst.msk [vmem:[%s1106_s13 + $0x44] sm:$0xf] %vm695_vm0, %v869_v56  ;;  %v425_v63 = vadd.f32 %v1093_v24, %v424_v61  ;;  %v489_v0 = vadd.f32 %v1093_v24, %v488_v62  ;;  %v931_v1 = vpop.f32.mrb[6].mxu0  ;;  %v947_v2 = vpop.f32.mrb[6].mxu1 }
 0x104   : > { %v541_v3 = vmax.f32 %v433_v59, 0.0  ;;  %v557_v4 = vmax.f32 %v497_v60, 0.0  ;;  %v436_v5 = vadd.f32 %v931_v1, %v1093_v24  ;;  %v500_v6 = vadd.f32 %v947_v2, %v1093_v24  ;;  %v427_v7 = vpop.f32.mrb[7].mxu0  ;;  %v491_v8 = vpop.f32.mrb[7].mxu1 }
 0x105   : > { %v539_v9 = vmax.f32 %v425_v63, 0.0  ;;  %v555_v10 = vmax.f32 %v489_v0, 0.0  ;;  %v428_v11 = vadd.f32 %v1093_v24, %v427_v7  ;;  %v492_v12 = vadd.f32 %v1093_v24, %v491_v8 }
 0x106   : > { %v858_v13 = vpack.c.bf16 %v541_v3, %v541_v3  ;;  %v874_v14 = vpack.c.bf16 %v557_v4, %v557_v4  ;;  %v542_v15 = vmax.f32 %v436_v5, 0.0  ;;  %v558_v16 = vmax.f32 %v500_v6, 0.0 }
 0x107   : > { %v856_v17 = vpack.c.bf16 %v539_v9, %v539_v9  ;;  %v872_v18 = vpack.c.bf16 %v555_v10, %v555_v10  ;;  %v540_v19 = vmax.f32 %v428_v11, 0.0  ;;  %v556_v20 = vmax.f32 %v492_v12, 0.0 }
 0x108   : > { %702 = vst.msk [vmem:[%s1106_s13 + $0x18] sm:$0xf] %vm695_vm0, %v858_v13  ;;  %718 = vst.msk [vmem:[%s1106_s13 + $0x58] sm:$0xf] %vm695_vm0, %v874_v14  ;;  %v859_v21 = vpack.c.bf16 %v542_v15, %v542_v15  ;;  %v875_v22 = vpack.c.bf16 %v558_v16, %v558_v16 }
 0x109   : > { %700 = vst.msk [vmem:[%s1106_s13 + $0x10] sm:$0xf] %vm695_vm0, %v856_v17  ;;  %716 = vst.msk [vmem:[%s1106_s13 + $0x50] sm:$0xf] %vm695_vm0, %v872_v18  ;;  %v857_v23 = vpack.c.bf16 %v540_v19, %v540_v19  ;;  %v873_v25 = vpack.c.bf16 %v556_v20, %v556_v20  ;;  %v934_v26 = vpop.f32.mrb[8].mxu0  ;;  %v950_v27 = vpop.f32.mrb[8].mxu1 }
 0x10a   : > { %703 = vst.msk [vmem:[%s1106_s13 + $0x1c] sm:$0xf] %vm695_vm0, %v859_v21  ;;  %719 = vst.msk [vmem:[%s1106_s13 + $0x5c] sm:$0xf] %vm695_vm0, %v875_v22  ;;  %v449_v28 = vadd.f32 %v934_v26, %v1093_v24  ;;  %v513_v29 = vadd.f32 %v950_v27, %v1093_v24  ;;  %v440_v30 = vpop.f32.mrb[9].mxu0  ;;  %v504_v31 = vpop.f32.mrb[9].mxu1 }
 0x10b   : > { %701 = vst.msk [vmem:[%s1106_s13 + $0x14] sm:$0xf] %vm695_vm0, %v857_v23  ;;  %717 = vst.msk [vmem:[%s1106_s13 + $0x54] sm:$0xf] %vm695_vm0, %v873_v25  ;;  %v441_v32 = vadd.f32 %v1093_v24, %v440_v30  ;;  %v505_v33 = vadd.f32 %v1093_v24, %v504_v31  ;;  %v935_v34 = vpop.f32.mrb[10].mxu0  ;;  %v951_v35 = vpop.f32.mrb[10].mxu1 }
 0x10c   : > { %v545_v36 = vmax.f32 %v449_v28, 0.0  ;;  %v561_v37 = vmax.f32 %v513_v29, 0.0  ;;  %v452_v38 = vadd.f32 %v935_v34, %v1093_v24  ;;  %v516_v39 = vadd.f32 %v951_v35, %v1093_v24  ;;  %v443_v40 = vpop.f32.mrb[11].mxu0  ;;  %v507_v41 = vpop.f32.mrb[11].mxu1 }
 0x10d   : > { %v543_v42 = vmax.f32 %v441_v32, 0.0  ;;  %v559_v43 = vmax.f32 %v505_v33, 0.0  ;;  %v444_v44 = vadd.f32 %v1093_v24, %v443_v40  ;;  %v508_v45 = vadd.f32 %v1093_v24, %v507_v41 }
 0x10e   : > { %v862_v46 = vpack.c.bf16 %v545_v36, %v545_v36  ;;  %v878_v47 = vpack.c.bf16 %v561_v37, %v561_v37  ;;  %v546_v48 = vmax.f32 %v452_v38, 0.0  ;;  %v562_v49 = vmax.f32 %v516_v39, 0.0 }
 0x10f   : > { %v860_v50 = vpack.c.bf16 %v543_v42, %v543_v42  ;;  %v876_v51 = vpack.c.bf16 %v559_v43, %v559_v43  ;;  %v544_v52 = vmax.f32 %v444_v44, 0.0  ;;  %v560_v53 = vmax.f32 %v508_v45, 0.0 }
 0x110   : > { %706 = vst.msk [vmem:[%s1106_s13 + $0x28] sm:$0xf] %vm695_vm0, %v862_v46  ;;  %722 = vst.msk [vmem:[%s1106_s13 + $0x68] sm:$0xf] %vm695_vm0, %v878_v47  ;;  %v863_v54 = vpack.c.bf16 %v546_v48, %v546_v48  ;;  %v879_v55 = vpack.c.bf16 %v562_v49, %v562_v49 }
 0x111   : > { %704 = vst.msk [vmem:[%s1106_s13 + $0x20] sm:$0xf] %vm695_vm0, %v860_v50  ;;  %720 = vst.msk [vmem:[%s1106_s13 + $0x60] sm:$0xf] %vm695_vm0, %v876_v51  ;;  %v861_v56 = vpack.c.bf16 %v544_v52, %v544_v52  ;;  %v877_v57 = vpack.c.bf16 %v560_v53, %v560_v53  ;;  %v938_v58 = vpop.f32.mrb[12].mxu0  ;;  %v954_v59 = vpop.f32.mrb[12].mxu1 }
 0x112   : > { %707 = vst.msk [vmem:[%s1106_s13 + $0x2c] sm:$0xf] %vm695_vm0, %v863_v54  ;;  %723 = vst.msk [vmem:[%s1106_s13 + $0x6c] sm:$0xf] %vm695_vm0, %v879_v55  ;;  %v465_v60 = vadd.f32 %v938_v58, %v1093_v24  ;;  %v529_v61 = vadd.f32 %v954_v59, %v1093_v24  ;;  %v456_v62 = vpop.f32.mrb[13].mxu0  ;;  %v520_v63 = vpop.f32.mrb[13].mxu1 }
 0x113   : > { %705 = vst.msk [vmem:[%s1106_s13 + $0x24] sm:$0xf] %vm695_vm0, %v861_v56  ;;  %721 = vst.msk [vmem:[%s1106_s13 + $0x64] sm:$0xf] %vm695_vm0, %v877_v57  ;;  %v457_v0 = vadd.f32 %v1093_v24, %v456_v62  ;;  %v521_v1 = vadd.f32 %v1093_v24, %v520_v63  ;;  %v939_v2 = vpop.f32.mrb[14].mxu0  ;;  %v955_v3 = vpop.f32.mrb[14].mxu1 }
 0x114   : > { %v549_v4 = vmax.f32 %v465_v60, 0.0  ;;  %v565_v5 = vmax.f32 %v529_v61, 0.0  ;;  %v468_v6 = vadd.f32 %v939_v2, %v1093_v24  ;;  %v532_v7 = vadd.f32 %v955_v3, %v1093_v24  ;;  %v459_v8 = vpop.f32.mrb[15].mxu0  ;;  %v523_v9 = vpop.f32.mrb[15].mxu1 }
 0x115   : > { %v547_v10 = vmax.f32 %v457_v0, 0.0  ;;  %v563_v11 = vmax.f32 %v521_v1, 0.0  ;;  %v460_v12 = vadd.f32 %v1093_v24, %v459_v8  ;;  %v524_v13 = vadd.f32 %v1093_v24, %v523_v9 }
 0x116   : > { %v866_v14 = vpack.c.bf16 %v549_v4, %v549_v4  ;;  %v882_v15 = vpack.c.bf16 %v565_v5, %v565_v5  ;;  %v550_v16 = vmax.f32 %v468_v6, 0.0  ;;  %v566_v17 = vmax.f32 %v532_v7, 0.0 }
 0x117   : > { %v864_v18 = vpack.c.bf16 %v547_v10, %v547_v10  ;;  %v880_v19 = vpack.c.bf16 %v563_v11, %v563_v11  ;;  %v548_v20 = vmax.f32 %v460_v12, 0.0  ;;  %v564_v21 = vmax.f32 %v524_v13, 0.0 }
 0x118   : > { %710 = vst.msk [vmem:[%s1106_s13 + $0x38] sm:$0xf] %vm695_vm0, %v866_v14  ;;  %726 = vst.msk [vmem:[%s1106_s13 + $0x78] sm:$0xf] %vm695_vm0, %v882_v15  ;;  %v867_v22 = vpack.c.bf16 %v550_v16, %v550_v16  ;;  %v883_v23 = vpack.c.bf16 %v566_v17, %v566_v17 }
 0x119   : > { %708 = vst.msk [vmem:[%s1106_s13 + $0x30] sm:$0xf] %vm695_vm0, %v864_v18  ;;  %724 = vst.msk [vmem:[%s1106_s13 + $0x70] sm:$0xf] %vm695_vm0, %v880_v19  ;;  %v865_v24 = vpack.c.bf16 %v548_v20, %v548_v20  ;;  %v881_v25 = vpack.c.bf16 %v564_v21, %v564_v21 }
 0x11a   : > { %711 = vst.msk [vmem:[%s1106_s13 + $0x3c] sm:$0xf] %vm695_vm0, %v867_v22  ;;  %727 = vst.msk [vmem:[%s1106_s13 + $0x7c] sm:$0xf] %vm695_vm0, %v883_v23 }
 0x11b   : > { %709 = vst.msk [vmem:[%s1106_s13 + $0x34] sm:$0xf] %vm695_vm0, %v865_v24  ;;  %725 = vst.msk [vmem:[%s1106_s13 + $0x74] sm:$0xf] %vm695_vm0, %v881_v25 }
 0x11c PF: > { %s13_s12 = sadd.s32 1, %s1010_s12  }
 0x11d   : > { %p10_p4 = scmp.ge.s32.totalorder %s13_s12, 10  }
 0x11f   :  { %12 = sbr.rel (!%p10_p4) target bundleno = 1 (0x1), region = 62 }

// kernel: discriminator_forward.6
= control target key start
LH: loop header
LB: loop body
LE: loop exit
PB: predicated region body
PF: predicated region fallthrough
CT: control target
= control target key end

     0   :  { %s3500_s18 = smov 0   ;;  %s4005_s0 = inlined_call_operand.vmem [shape: bf16[512,1024], index: 0, kind: input, shape index: {}]   ;;  %s4006_s1 = inlined_call_operand.vmem [shape: bf16[1024,128], index: 1, kind: input, shape index: {}]   ;;  %s4007_s2 = inlined_call_operand.vmem [shape: f32[1,128], index: 2, kind: input, shape index: {}]   ;;  %s4008_s3 = inlined_call_operand.vmem [shape: bf16[512,128], index: 3, kind: output, shape index: {0}]   ;;  %s4009_s4 = inlined_call_operand.vmem [shape: f32[16,128], index: 4, kind: output, shape index: {1}]   ;;  %s4010_s5 = inlined_call_operand.vmem [shape: f32[16,128], index: 5, kind: output, shape index: {2}]  }
   0x1 LB: > { %s3506_s19 = sadd.s32 4294967295, %s3468_s18   ;;  %p2579_p0 = scmp.ge.s32.totalorder %s3468_s18, 1  ;;  %s3468_s18 = sphi %s3500_s18, %s16_s18  }
   0x2   : > { %p194_p1 = scmp.lt.s32.totalorder %s3468_s18, 3 }
   0x4   : > { %p195_p2 = pnand %p2579_p0, %p194_p1 }
   0x5   : > { %v3398_v0 = vld [vmem:[%s4006_s1 + $0x40] sm:$0xff] (!%p195_p2)   ;;  %v3402_v4 = vld [vmem:[%s4006_s1 + $0x48] sm:$0xff] (!%p195_p2)   ;;  %v3406_v8 = vld [vmem:[%s4006_s1 + $0x50] sm:$0xff] (!%p195_p2)   ;;  %s2580_s29 = sshll.u32 (!%p195_p2), %s3506_s19, 5  ;;  %p244_p4 = scmp.lt.s32.totalorder (!%p195_p2), %s3506_s19, 1 }
   0x6   : > { %198 = sbr.rel (%p195_p2) target bundleno = 526 (0x20e), region = 32  ;;  %v3399_v1 = vld [vmem:[%s4006_s1 + $0xc0] sm:$0xff] (!%p195_p2)   ;;  %2942 = vmatprep.subr.bf16.mxu0 (!%p195_p2), %v3398_v0  ;;  %v3403_v5 = vld [vmem:[%s4006_s1 + $0xc8] sm:$0xff] (!%p195_p2)   ;;  %v3407_v9 = vld [vmem:[%s4006_s1 + $0xd0] sm:$0xff] (!%p195_p2)   ;;  %p232_p3 = scmp.lt.s32.totalorder (!%p195_p2), %s2580_s29, 63 }
   0x7   : > { %v3400_v2 = vld [vmem:[%s4006_s1] sm:$0xff] (!%p195_p2)   ;;  %3054 = vmatprep.subr.bf16.mxu1 (!%p195_p2), %v3399_v1  ;;  %v3404_v6 = vld [vmem:[%s4006_s1 + $0x8] sm:$0xff] (!%p195_p2)   ;;  %v3408_v10 = vld [vmem:[%s4006_s1 + $0x10] sm:$0xff] (!%p195_p2)  }
   0x8   : > { %v3401_v3 = vld [vmem:[%s4006_s1 + $0x80] sm:$0xff] (!%p195_p2)   ;;  %2943 = vmatpush3.bf16.msra.mxu0 (!%p195_p2), %v3400_v2  ;;  %v3405_v7 = vld [vmem:[%s4006_s1 + $0x88] sm:$0xff] (!%p195_p2)   ;;  %v3409_v11 = vld [vmem:[%s4006_s1 + $0x90] sm:$0xff] (!%p195_p2)  }
   0x9   : > { %3055 = vmatpush3.bf16.msra.mxu1 (!%p195_p2), %v3401_v3  ;;  %2944 = vmatprep.subr.bf16.mxu0 (!%p195_p2), %v3402_v4  ;;  %v3410_v12 = vld [vmem:[%s4006_s1 + $0x58] sm:$0xff] (!%p195_p2)   ;;  %v3414_v16 = vld [vmem:[%s4006_s1 + $0x60] sm:$0xff] (!%p195_p2)   ;;  %v3418_v20 = vld [vmem:[%s4006_s1 + $0x68] sm:$0xff] (!%p195_p2)  }
   0xa   : > { %3056 = vmatprep.subr.bf16.mxu1 (!%p195_p2), %v3403_v5  ;;  %v3411_v13 = vld [vmem:[%s4006_s1 + $0xd8] sm:$0xff] (!%p195_p2)   ;;  %v3415_v17 = vld [vmem:[%s4006_s1 + $0xe0] sm:$0xff] (!%p195_p2)   ;;  %v3419_v21 = vld [vmem:[%s4006_s1 + $0xe8] sm:$0xff] (!%p195_p2)  }
   0xb   : > { %v3412_v14 = vld [vmem:[%s4006_s1 + $0x18] sm:$0xff] (!%p195_p2)   ;;  %v3416_v18 = vld [vmem:[%s4006_s1 + $0x20] sm:$0xff] (!%p195_p2)   ;;  %v3420_v22 = vld [vmem:[%s4006_s1 + $0x28] sm:$0xff] (!%p195_p2)  }
   0xc   : > { %2945 = vmatpush3.bf16.msra.mxu0 (!%p195_p2), %v3404_v6  ;;  %v3413_v15 = vld [vmem:[%s4006_s1 + $0x98] sm:$0xff] (!%p195_p2)   ;;  %v3417_v19 = vld [vmem:[%s4006_s1 + $0xa0] sm:$0xff] (!%p195_p2)   ;;  %v3421_v23 = vld [vmem:[%s4006_s1 + $0xa8] sm:$0xff] (!%p195_p2)  }
   0xd   : > { %3057 = vmatpush3.bf16.msra.mxu1 %v3405_v7  ;;  %2946 = vmatprep.subr.bf16.mxu0 %v3406_v8  ;;  %s4012_s29 = smov (!%p232_p3, %s2580_s29), 63  ;;  %v3422_v24 = vld [vmem:[%s4006_s1 + $0x70] sm:$0xff]   ;;  %v3426_v28 = vld [vmem:[%s4006_s1 + $0x78] sm:$0xff]   ;;  %v3430_v40 = vld [vmem:[%s4006_s1 + $0x140] sm:$0xff]   ;;  %s4014_s19 = smov (!%p244_p4, %s3506_s19), 1 }
   0xe   : > { %3058 = vmatprep.subr.bf16.mxu1 %v3407_v9  ;;  %v3423_v25 = vld [vmem:[%s4006_s1 + $0xf0] sm:$0xff]   ;;  %s2814_s30 = sshll.u32 %s4012_s29, 5  ;;  %v3427_v29 = vld [vmem:[%s4006_s1 + $0xf8] sm:$0xff]   ;;  %v3431_v41 = vld [vmem:[%s4006_s1 + $0x100] sm:$0xff]  }
   0xf   : > { %v3424_v26 = vld [vmem:[%s4006_s1 + $0x30] sm:$0xff]   ;;  %s3607_s14 = scalar_lea.vmem %s4005_s0, %s2814_s30  ;;  %v3428_v30 = vld [vmem:[%s4006_s1 + $0x38] sm:$0xff]   ;;  %v3432_v42 = vld [vmem:[%s4006_s1 + $0x1c0] sm:$0xff]  }
  0x10   : > { %2947 = vmatpush3.bf16.msra.mxu0 %v3408_v10  ;;  %v3425_v27 = vld [vmem:[%s4006_s1 + $0xb0] sm:$0xff]   ;;  %v3429_v31 = vld [vmem:[%s4006_s1 + $0xb8] sm:$0xff]   ;;  %v253_v32 = vld [vmem:[%s3607_s14] sm:$0xff] }
  0x11   : > { %3059 = vmatpush3.bf16.msra.mxu1 %v3409_v11  ;;  %2948 = vmatprep.subr.bf16.mxu0 %v3410_v12  ;;  %v257_v33 = vld [vmem:[%s3607_s14 + $0x20] sm:$0xff]  ;;  %v254_v34 = vld [vmem:[%s3607_s14 + $0x8] sm:$0xff]  ;;  %v3438_v2 = vld [vmem:[%s4006_s1 + $0x150] sm:$0xff]  }
  0x12   : > { %3060 = vmatprep.subr.bf16.mxu1 %v3411_v13  ;;  %v2588_v35 = vcombine.low %v253_v32, %v257_v33  ;;  %v2589_v36 = vcombine.high %v253_v32, %v257_v33  ;;  %v258_v37 = vld [vmem:[%s3607_s14 + $0x28] sm:$0xff]  ;;  %v3433_v43 = vld [vmem:[%s4006_s1 + $0x180] sm:$0xff]   ;;  %v3439_v4 = vld [vmem:[%s4006_s1 + $0x110] sm:$0xff]  }
  0x13   : > { %v2590_v38 = vcombine.low %v254_v34, %v258_v37  ;;  %v2591_v39 = vcombine.high %v254_v34, %v258_v37  ;;  %v261_v44 = vld [vmem:[%s3607_s14 + $0x40] sm:$0xff]  ;;  %v262_v47 = vld [vmem:[%s3607_s14 + $0x48] sm:$0xff]  ;;  %v3440_v7 = vld [vmem:[%s4006_s1 + $0x1d0] sm:$0xff]  }
  0x14   : > { %2949 = vmatpush3.bf16.msra.mxu0 %v3412_v14  ;;  %1572 = vmatprep.mubr.bf16.mxu0 %v2589_v36  ;;  %v265_v45 = vld [vmem:[%s3607_s14 + $0x60] sm:$0xff]  ;;  %v266_v48 = vld [vmem:[%s3607_s14 + $0x68] sm:$0xff]  ;;  %v3441_v9 = vld [vmem:[%s4006_s1 + $0x190] sm:$0xff]  }
  0x15   : > { %3061 = vmatpush3.bf16.msra.mxu1 %v3413_v15  ;;  %2950 = vmatprep.subr.bf16.mxu0 %v3414_v16  ;;  %v2597_v46 = vcombine.high %v261_v44, %v265_v45  ;;  %v269_v49 = vld [vmem:[%s3607_s14 + $0x80] sm:$0xff]  ;;  %v2599_v50 = vcombine.high %v262_v47, %v266_v48  ;;  %v270_v52 = vld [vmem:[%s3607_s14 + $0x88] sm:$0xff]  ;;  %v2596_v54 = vcombine.low %v261_v44, %v265_v45  ;;  %v3442_v14 = vld [vmem:[%s4006_s1 + $0x158] sm:$0xff]  }
  0x16   : > { %3062 = vmatprep.subr.bf16.mxu1 %v3415_v17  ;;  %1733 = vmatprep.mubr.bf16.mxu1 %v2591_v39  ;;  %v273_v51 = vld [vmem:[%s3607_s14 + $0xa0] sm:$0xff]  ;;  %v274_v53 = vld [vmem:[%s3607_s14 + $0xa8] sm:$0xff]  ;;  %v2598_v56 = vcombine.low %v262_v47, %v266_v48  ;;  %v3443_v15 = vld [vmem:[%s4006_s1 + $0x118] sm:$0xff]  }
  0x17   : > { %v3434_v55 = vld [vmem:[%s4006_s1 + $0x148] sm:$0xff]   ;;  %v2605_v57 = vcombine.high %v269_v49, %v273_v51  ;;  %v2607_v59 = vcombine.high %v270_v52, %v274_v53  ;;  %v277_v62 = vld [vmem:[%s3607_s14 + $0xc0] sm:$0xff]  ;;  %v2604_v3 = vcombine.low %v269_v49, %v273_v51  ;;  %v2606_v5 = vcombine.low %v270_v52, %v274_v53  ;;  %v3444_v17 = vld [vmem:[%s4006_s1 + $0x1d8] sm:$0xff]  }
  0x18   : > { %2951 = vmatpush3.bf16.msra.mxu0 %v3416_v18  ;;  %v3435_v58 = vld [vmem:[%s4006_s1 + $0x108] sm:$0xff]   ;;  %v281_v63 = vld [vmem:[%s3607_s14 + $0xe0] sm:$0xff]  ;;  %v3455_v47 = vld [vmem:[%s4006_s1 + $0x130] sm:$0xff]  }
  0x19   : > { %3063 = vmatpush3.bf16.msra.mxu1 %v3417_v19  ;;  %2952 = vmatprep.subr.bf16.mxu0 %v3418_v20  ;;  %v3436_v60 = vld [vmem:[%s4006_s1 + $0x1c8] sm:$0xff]   ;;  %v2613_v6 = vcombine.high %v277_v62, %v281_v63  ;;  %v285_v10 = vld [vmem:[%s3607_s14 + $0x100] sm:$0xff]  ;;  %v2612_v16 = vcombine.low %v277_v62, %v281_v63  ;;  %v3445_v20 = vld [vmem:[%s4006_s1 + $0x198] sm:$0xff]  }
  0x1a   : > { %3064 = vmatprep.subr.bf16.mxu1 %v3419_v21  ;;  %v3437_v61 = vld [vmem:[%s4006_s1 + $0x188] sm:$0xff]   ;;  %v289_v11 = vld [vmem:[%s3607_s14 + $0x120] sm:$0xff]  ;;  %v3456_v48 = vld [vmem:[%s4006_s1 + $0x1f0] sm:$0xff]  }
  0x1b   : > { %v278_v0 = vld [vmem:[%s3607_s14 + $0xc8] sm:$0xff]  ;;  %v2621_v19 = vcombine.high %v285_v10, %v289_v11  ;;  %v3457_v49 = vld [vmem:[%s4006_s1 + $0x1b0] sm:$0xff]   ;;  %v313_v51 = vld [vmem:[%s3607_s14 + $0x1e0] sm:$0xff] }
  0x1c   : > { %2953 = vmatpush3.bf16.msra.mxu0 %v3420_v22  ;;  %v282_v1 = vld [vmem:[%s3607_s14 + $0xe8] sm:$0xff]  ;;  %v293_v22 = vld [vmem:[%s3607_s14 + $0x140] sm:$0xff] }
  0x1d   : > { %3065 = vmatpush3.bf16.msra.mxu1 %v3421_v23  ;;  %2954 = vmatprep.subr.bf16.mxu0 %v3422_v24  ;;  %v2615_v8 = vcombine.high %v278_v0, %v282_v1  ;;  %v286_v12 = vld [vmem:[%s3607_s14 + $0x108] sm:$0xff]  ;;  %v2614_v18 = vcombine.low %v278_v0, %v282_v1  ;;  %v297_v23 = vld [vmem:[%s3607_s14 + $0x160] sm:$0xff] }
  0x1e   : > { %3066 = vmatprep.subr.bf16.mxu1 %v3423_v25  ;;  %v290_v13 = vld [vmem:[%s3607_s14 + $0x128] sm:$0xff]  ;;  %v3446_v24 = vld [vmem:[%s4006_s1 + $0x160] sm:$0xff]   ;;  %v2629_v32 = vcombine.high %v293_v22, %v297_v23 }
  0x1f   : > { %v2623_v21 = vcombine.high %v286_v12, %v290_v13  ;;  %v294_v25 = vld [vmem:[%s3607_s14 + $0x148] sm:$0xff]  ;;  %v317_v62 = vld [vmem:[%s3607_s14 + $0x200] sm:$0xff] }
  0x20   : > { %2955 = vmatpush3.bf16.msra.mxu0 %v3424_v26  ;;  %v298_v26 = vld [vmem:[%s3607_s14 + $0x168] sm:$0xff]  ;;  %v321_v63 = vld [vmem:[%s3607_s14 + $0x220] sm:$0xff] }
  0x21   : > { %3067 = vmatpush3.bf16.msra.mxu1 %v3425_v27  ;;  %2956 = vmatprep.subr.bf16.mxu0 %v3426_v28  ;;  %v3447_v27 = vld [vmem:[%s4006_s1 + $0x120] sm:$0xff]   ;;  %v2631_v33 = vcombine.high %v294_v25, %v298_v26  ;;  %v3450_v34 = vld [vmem:[%s4006_s1 + $0x168] sm:$0xff]  }
  0x22   : > { %3068 = vmatprep.subr.bf16.mxu1 %v3427_v29  ;;  %v3448_v28 = vld [vmem:[%s4006_s1 + $0x1e0] sm:$0xff]   ;;  %v3451_v36 = vld [vmem:[%s4006_s1 + $0x128] sm:$0xff]  }
  0x23   : > { %v3449_v29 = vld [vmem:[%s4006_s1 + $0x1a0] sm:$0xff]   ;;  %v3452_v37 = vld [vmem:[%s4006_s1 + $0x1e8] sm:$0xff]  }
  0x24   : > { %2957 = vmatpush3.bf16.msra.mxu0 %v3428_v30  ;;  %v2620_v30 = vcombine.low %v285_v10, %v289_v11  ;;  %v3453_v39 = vld [vmem:[%s4006_s1 + $0x1a8] sm:$0xff]   ;;  %v2652_v10 = vcombine.low %v317_v62, %v321_v63 }
  0x25   : > { %3069 = vmatpush3.bf16.msra.mxu1 %v3429_v31  ;;  %3166 = vmatprep.subr.bf16.mxu0 %v3430_v40  ;;  %v2622_v31 = vcombine.low %v286_v12, %v290_v13  ;;  %v302_v40 = vld [vmem:[%s3607_s14 + $0x188] sm:$0xff] }
  0x26   : > { %3278 = vmatprep.subr.bf16.mxu1 %v3432_v42  ;;  %v2628_v42 = vcombine.low %v293_v22, %v297_v23  ;;  %v310_v52 = vld [vmem:[%s3607_s14 + $0x1c8] sm:$0xff]  ;;  %v341_v22 = vld [vmem:[%s3607_s14 + $0x2c0] sm:$0xff] }
  0x27   : > { %1573 = vmatmul.mubr.bf16.vlgmr.msra.gmra.mrb[0].mxu0 %v2588_v35  ;;  %v301_v35 = vld [vmem:[%s3607_s14 + $0x180] sm:$0xff]  ;;  %v314_v53 = vld [vmem:[%s3607_s14 + $0x1e8] sm:$0xff] }
  0x28   : > { %1734 = vmatmul.mubr.bf16.vlgmr.msra.gmra.mrb[0].mxu1 %v2590_v38  ;;  %3167 = vmatpush3.bf16.msra.mxu0 %v3431_v41  ;;  %v305_v38 = vld [vmem:[%s3607_s14 + $0x1a0] sm:$0xff]  ;;  %v306_v41 = vld [vmem:[%s3607_s14 + $0x1a8] sm:$0xff] }
  0x29   : > { %3279 = vmatpush3.bf16.msra.mxu1 %v3433_v43  ;;  %1580 = vmatprep.mubr.bf16.mxu0 %v2597_v46  ;;  %v2630_v43 = vcombine.low %v294_v25, %v298_v26  ;;  %v2637_v44 = vcombine.high %v301_v35, %v305_v38  ;;  %v2639_v45 = vcombine.high %v302_v40, %v306_v41  ;;  %v3454_v46 = vld [vmem:[%s4006_s1 + $0x170] sm:$0xff]   ;;  %v318_v0 = vld [vmem:[%s3607_s14 + $0x208] sm:$0xff]  ;;  %v345_v23 = vld [vmem:[%s3607_s14 + $0x2e0] sm:$0xff] }
  0x2a   : > { %1741 = vmatprep.mubr.bf16.mxu1 %v2599_v50  ;;  %3168 = vmatprep.subr.bf16.mxu0 %v3434_v55  ;;  %v309_v50 = vld [vmem:[%s3607_s14 + $0x1c0] sm:$0xff]  ;;  %v3458_v55 = vld [vmem:[%s4006_s1 + $0x178] sm:$0xff]   ;;  %v322_v1 = vld [vmem:[%s3607_s14 + $0x228] sm:$0xff] }
  0x2b   : > { %3280 = vmatprep.subr.bf16.mxu1 %v3436_v60  ;;  %v3460_v60 = vld [vmem:[%s4006_s1 + $0x1f8] sm:$0xff]   ;;  %v2654_v11 = vcombine.low %v318_v0, %v322_v1  ;;  %v346_v25 = vld [vmem:[%s3607_s14 + $0x2e8] sm:$0xff] }
  0x2c   : > { %3169 = vmatpush3.bf16.msra.mxu0 %v3435_v58  ;;  %v3459_v58 = vld [vmem:[%s4006_s1 + $0x138] sm:$0xff]  }
  0x2d   : > { %3281 = vmatpush3.bf16.msra.mxu1 %v3437_v61  ;;  %3170 = vmatprep.subr.bf16.mxu0 %v3438_v2  ;;  %v3461_v61 = vld [vmem:[%s4006_s1 + $0x1b8] sm:$0xff]   ;;  %v2644_v2 = vcombine.low %v309_v50, %v313_v51 }
  0x2e   : > { %3282 = vmatprep.subr.bf16.mxu1 %v3440_v7  ;;  %v329_v7 = vld [vmem:[%s3607_s14 + $0x260] sm:$0xff] }
  0x2f   : > { %1581 = vmatmul.mubr.bf16.gmra.mrb[4].mxu0 %v2596_v54  ;;  %v2636_v54 = vcombine.low %v301_v35, %v305_v38  ;;  %v357_v38 = vld [vmem:[%s3607_s14 + $0x340] sm:$0xff] }
  0x30   : > { %1742 = vmatmul.mubr.bf16.gmra.mrb[4].mxu1 %v2598_v56  ;;  %1588 = vmatprep.mubr.bf16.mxu0 %v2605_v57  ;;  %v2638_v56 = vcombine.low %v302_v40, %v306_v41  ;;  %v2645_v57 = vcombine.high %v309_v50, %v313_v51  ;;  %v358_v40 = vld [vmem:[%s3607_s14 + $0x348] sm:$0xff] }
  0x31   : > { %1749 = vmatprep.mubr.bf16.mxu1 %v2607_v59  ;;  %3171 = vmatpush3.bf16.msra.mxu0 %v3439_v4  ;;  %v2647_v59 = vcombine.high %v310_v52, %v314_v53  ;;  %v2653_v4 = vcombine.high %v317_v62, %v321_v63  ;;  %v362_v41 = vld [vmem:[%s3607_s14 + $0x368] sm:$0xff]  ;;  %v255_v62 = vld [vmem:[%s3607_s14 + $0x10] sm:$0xff] }
  0x32   : > { %3283 = vmatpush3.bf16.msra.mxu1 %v3441_v9  ;;  %3172 = vmatprep.subr.bf16.mxu0 %v3442_v14  ;;  %v330_v9 = vld [vmem:[%s3607_s14 + $0x268] sm:$0xff]  ;;  %v333_v14 = vld [vmem:[%s3607_s14 + $0x280] sm:$0xff]  ;;  %v2694_v51 = vcombine.low %v358_v40, %v362_v41  ;;  %v259_v63 = vld [vmem:[%s3607_s14 + $0x30] sm:$0xff] }
  0x33   : > { %3284 = vmatprep.subr.bf16.mxu1 %v3444_v17  ;;  %v338_v17 = vld [vmem:[%s3607_s14 + $0x2a8] sm:$0xff] }
  0x35   : > { %3173 = vmatpush3.bf16.msra.mxu0 %v3443_v15  ;;  %v337_v15 = vld [vmem:[%s3607_s14 + $0x2a0] sm:$0xff] }
  0x36   : > { %3285 = vmatpush3.bf16.msra.mxu1 %v3445_v20  ;;  %3174 = vmatprep.subr.bf16.mxu0 %v3446_v24  ;;  %v2669_v20 = vcombine.high %v333_v14, %v337_v15  ;;  %v342_v24 = vld [vmem:[%s3607_s14 + $0x2c8] sm:$0xff]  ;;  %v2668_v26 = vcombine.low %v333_v14, %v337_v15  ;;  %v271_v14 = vld [vmem:[%s3607_s14 + $0x90] sm:$0xff] }
  0x37   : > { %1589 = vmatmul.mubr.bf16.gmra.mrb[8].mxu0 %v2604_v3  ;;  %3286 = vmatprep.subr.bf16.mxu1 %v3448_v28  ;;  %v2646_v3 = vcombine.low %v310_v52, %v314_v53  ;;  %v2677_v28 = vcombine.high %v341_v22, %v345_v23  ;;  %v2678_v35 = vcombine.low %v342_v24, %v346_v25  ;;  %v275_v15 = vld [vmem:[%s3607_s14 + $0xb0] sm:$0xff] }
  0x38   : > { %1750 = vmatmul.mubr.bf16.gmra.mrb[8].mxu1 %v2606_v5  ;;  %1596 = vmatprep.mubr.bf16.mxu0 %v2613_v6  ;;  %v2655_v5 = vcombine.high %v318_v0, %v322_v1  ;;  %v325_v6 = vld [vmem:[%s3607_s14 + $0x240] sm:$0xff]  ;;  %v256_v0 = vld [vmem:[%s3607_s14 + $0x18] sm:$0xff] }
  0x39   : > { %1757 = vmatprep.mubr.bf16.mxu1 %v2615_v8  ;;  %3175 = vmatpush3.bf16.msra.mxu0 %v3447_v27  ;;  %v326_v8 = vld [vmem:[%s3607_s14 + $0x248] sm:$0xff]  ;;  %v2661_v12 = vcombine.high %v325_v6, %v329_v7  ;;  %v260_v1 = vld [vmem:[%s3607_s14 + $0x38] sm:$0xff] }
  0x3a   : > { %3287 = vmatpush3.bf16.msra.mxu1 %v3449_v29  ;;  %3176 = vmatprep.subr.bf16.mxu0 %v3450_v34  ;;  %v2663_v13 = vcombine.high %v326_v8, %v330_v9  ;;  %v2679_v29 = vcombine.high %v342_v24, %v346_v25  ;;  %v2676_v34 = vcombine.low %v341_v22, %v345_v23  ;;  %v279_v22 = vld [vmem:[%s3607_s14 + $0xd0] sm:$0xff]  ;;  %v280_v24 = vld [vmem:[%s3607_s14 + $0xd8] sm:$0xff] }
  0x3b   : > { %3288 = vmatprep.subr.bf16.mxu1 %v3452_v37  ;;  %v283_v23 = vld [vmem:[%s3607_s14 + $0xf0] sm:$0xff]  ;;  %v284_v25 = vld [vmem:[%s3607_s14 + $0xf8] sm:$0xff] }
  0x3d   : > { %3177 = vmatpush3.bf16.msra.mxu0 %v3451_v36 }
  0x3e   : > { %3289 = vmatpush3.bf16.msra.mxu1 %v3453_v39  ;;  %3178 = vmatprep.subr.bf16.mxu0 %v3454_v46  ;;  %v361_v39 = vld [vmem:[%s3607_s14 + $0x360] sm:$0xff] }
  0x3f   : > { %1597 = vmatmul.mubr.bf16.gmra.mrb[12].mxu0 %v2612_v16  ;;  %3290 = vmatprep.subr.bf16.mxu1 %v3456_v48  ;;  %v334_v16 = vld [vmem:[%s3607_s14 + $0x288] sm:$0xff]  ;;  %v365_v46 = vld [vmem:[%s3607_s14 + $0x380] sm:$0xff]  ;;  %v2692_v50 = vcombine.low %v357_v38, %v361_v39 }
  0x40   : > { %1758 = vmatmul.mubr.bf16.gmra.mrb[12].mxu1 %v2614_v18  ;;  %1604 = vmatprep.mubr.bf16.mxu0 %v2621_v19  ;;  %v2660_v18 = vcombine.low %v325_v6, %v329_v7  ;;  %v2662_v19 = vcombine.low %v326_v8, %v330_v9  ;;  %v2670_v27 = vcombine.low %v334_v16, %v338_v17  ;;  %v366_v48 = vld [vmem:[%s3607_s14 + $0x388] sm:$0xff]  ;;  %v263_v6 = vld [vmem:[%s3607_s14 + $0x50] sm:$0xff]  ;;  %v264_v8 = vld [vmem:[%s3607_s14 + $0x58] sm:$0xff] }
  0x41   : > { %1765 = vmatprep.mubr.bf16.mxu1 %v2623_v21  ;;  %3179 = vmatpush3.bf16.msra.mxu0 %v3455_v47  ;;  %v2671_v21 = vcombine.high %v334_v16, %v338_v17  ;;  %v369_v47 = vld [vmem:[%s3607_s14 + $0x3a0] sm:$0xff]  ;;  %v267_v7 = vld [vmem:[%s3607_s14 + $0x70] sm:$0xff]  ;;  %v268_v9 = vld [vmem:[%s3607_s14 + $0x78] sm:$0xff] }
  0x42   : > { %3291 = vmatpush3.bf16.msra.mxu1 %v3457_v49  ;;  %3180 = vmatprep.subr.bf16.mxu0 %v3458_v55  ;;  %v370_v49 = vld [vmem:[%s3607_s14 + $0x3a8] sm:$0xff]  ;;  %v2701_v52 = vcombine.high %v365_v46, %v369_v47  ;;  %v377_v55 = vld [vmem:[%s3607_s14 + $0x3e0] sm:$0xff]  ;;  %v272_v16 = vld [vmem:[%s3607_s14 + $0x98] sm:$0xff] }
  0x43   : > { %3292 = vmatprep.subr.bf16.mxu1 %v3460_v60  ;;  %v2703_v53 = vcombine.high %v366_v48, %v370_v49  ;;  %v276_v17 = vld [vmem:[%s3607_s14 + $0xb8] sm:$0xff] }
  0x45   : > { %3181 = vmatpush3.bf16.msra.mxu0 %v3459_v58  ;;  %v2700_v58 = vcombine.low %v365_v46, %v369_v47  ;;  %v303_v46 = vld [vmem:[%s3607_s14 + $0x190] sm:$0xff] }
  0x46   : > { %3293 = vmatpush3.bf16.msra.mxu1 %v3461_v61  ;;  %v307_v47 = vld [vmem:[%s3607_s14 + $0x1b0] sm:$0xff] }
  0x47   : > { %1605 = vmatmul.mubr.bf16.gmra.mrb[16].mxu0 %v2620_v30  ;;  %v349_v30 = vld [vmem:[%s3607_s14 + $0x300] sm:$0xff] }
  0x48   : > { %1766 = vmatmul.mubr.bf16.gmra.mrb[16].mxu1 %v2622_v31  ;;  %1612 = vmatprep.mubr.bf16.mxu0 %v2629_v32  ;;  %v353_v31 = vld [vmem:[%s3607_s14 + $0x320] sm:$0xff]  ;;  %v350_v32 = vld [vmem:[%s3607_s14 + $0x308] sm:$0xff] }
  0x49   : > { %1773 = vmatprep.mubr.bf16.mxu1 %v2631_v33  ;;  %v354_v33 = vld [vmem:[%s3607_s14 + $0x328] sm:$0xff]  ;;  %v2685_v36 = vcombine.high %v349_v30, %v353_v31 }
  0x4a   : > { %v2687_v37 = vcombine.high %v350_v32, %v354_v33 }
  0x4f   : > { %1613 = vmatmul.mubr.bf16.gmra.mrb[20].mxu0 %v2628_v42  ;;  %v2684_v42 = vcombine.low %v349_v30, %v353_v31  ;;  %v287_v30 = vld [vmem:[%s3607_s14 + $0x110] sm:$0xff] }
  0x50   : > { %1774 = vmatmul.mubr.bf16.gmra.mrb[20].mxu1 %v2630_v43  ;;  %1620 = vmatprep.mubr.bf16.mxu0 %v2637_v44  ;;  %v2686_v43 = vcombine.low %v350_v32, %v354_v33  ;;  %v2693_v44 = vcombine.high %v357_v38, %v361_v39  ;;  %v291_v31 = vld [vmem:[%s3607_s14 + $0x130] sm:$0xff]  ;;  %v288_v32 = vld [vmem:[%s3607_s14 + $0x118] sm:$0xff] }
  0x51   : > { %1781 = vmatprep.mubr.bf16.mxu1 %v2639_v45  ;;  %v2695_v45 = vcombine.high %v358_v40, %v362_v41  ;;  %v292_v33 = vld [vmem:[%s3607_s14 + $0x138] sm:$0xff]  ;;  %v295_v38 = vld [vmem:[%s3607_s14 + $0x150] sm:$0xff] }
  0x52   : > { %v299_v39 = vld [vmem:[%s3607_s14 + $0x170] sm:$0xff]  ;;  %v296_v40 = vld [vmem:[%s3607_s14 + $0x158] sm:$0xff] }
  0x53   : > { %v300_v41 = vld [vmem:[%s3607_s14 + $0x178] sm:$0xff] }
  0x57   : > { %1621 = vmatmul.mubr.bf16.gmra.mrb[24].mxu0 %v2636_v54  ;;  %v373_v54 = vld [vmem:[%s3607_s14 + $0x3c0] sm:$0xff] }
  0x58   : > { %1782 = vmatmul.mubr.bf16.gmra.mrb[24].mxu1 %v2638_v56  ;;  %1628 = vmatprep.mubr.bf16.mxu0 %v2645_v57  ;;  %v374_v56 = vld [vmem:[%s3607_s14 + $0x3c8] sm:$0xff]  ;;  %v2709_v60 = vcombine.high %v373_v54, %v377_v55 }
  0x59   : > { %1789 = vmatprep.mubr.bf16.mxu1 %v2647_v59  ;;  %v378_v57 = vld [vmem:[%s3607_s14 + $0x3e8] sm:$0xff]  ;;  %v2702_v59 = vcombine.low %v366_v48, %v370_v49  ;;  %v304_v48 = vld [vmem:[%s3607_s14 + $0x198] sm:$0xff] }
  0x5a   : > { %v2711_v61 = vcombine.high %v374_v56, %v378_v57  ;;  %v308_v49 = vld [vmem:[%s3607_s14 + $0x1b8] sm:$0xff] }
  0x5f   : > { %1629 = vmatmul.mubr.bf16.gmra.mrb[28].mxu0 %v2644_v2  ;;  %v2708_v2 = vcombine.low %v373_v54, %v377_v55  ;;  %v311_v54 = vld [vmem:[%s3607_s14 + $0x1d0] sm:$0xff] }
  0x60   : > { %1790 = vmatmul.mubr.bf16.gmra.mrb[28].mxu1 %v2646_v3  ;;  %1636 = vmatprep.mubr.bf16.mxu0 %v2653_v4  ;;  %v2710_v3 = vcombine.low %v374_v56, %v378_v57  ;;  %v2593_v4 = vcombine.high %v255_v62, %v259_v63  ;;  %v315_v55 = vld [vmem:[%s3607_s14 + $0x1f0] sm:$0xff]  ;;  %v312_v56 = vld [vmem:[%s3607_s14 + $0x1d8] sm:$0xff] }
  0x61   : > { %1797 = vmatprep.mubr.bf16.mxu1 %v2655_v5  ;;  %v2595_v5 = vcombine.high %v256_v0, %v260_v1  ;;  %v316_v57 = vld [vmem:[%s3607_s14 + $0x1f8] sm:$0xff] }
  0x67   : > { %1637 = vmatmul.mubr.bf16.gmra.mrb[32].mxu0 %v2652_v10  ;;  %v2592_v10 = vcombine.low %v255_v62, %v259_v63  ;;  %v319_v62 = vld [vmem:[%s3607_s14 + $0x210] sm:$0xff] }
  0x68   : > { %1798 = vmatmul.mubr.bf16.gmra.mrb[32].mxu1 %v2654_v11  ;;  %1644 = vmatprep.mubr.bf16.mxu0 %v2661_v12  ;;  %v2594_v11 = vcombine.low %v256_v0, %v260_v1  ;;  %v2601_v12 = vcombine.high %v263_v6, %v267_v7  ;;  %v323_v63 = vld [vmem:[%s3607_s14 + $0x230] sm:$0xff]  ;;  %v320_v0 = vld [vmem:[%s3607_s14 + $0x218] sm:$0xff] }
  0x69   : > { %1805 = vmatprep.mubr.bf16.mxu1 %v2663_v13  ;;  %v2603_v13 = vcombine.high %v264_v8, %v268_v9  ;;  %v324_v1 = vld [vmem:[%s3607_s14 + $0x238] sm:$0xff] }
  0x6f   : > { %1645 = vmatmul.mubr.bf16.gmra.mrb[36].mxu0 %v2660_v18  ;;  %v2600_v18 = vcombine.low %v263_v6, %v267_v7  ;;  %v327_v6 = vld [vmem:[%s3607_s14 + $0x250] sm:$0xff] }
  0x70   : > { %1806 = vmatmul.mubr.bf16.gmra.mrb[36].mxu1 %v2662_v19  ;;  %1652 = vmatprep.mubr.bf16.mxu0 %v2669_v20  ;;  %v2602_v19 = vcombine.low %v264_v8, %v268_v9  ;;  %v2609_v20 = vcombine.high %v271_v14, %v275_v15  ;;  %v331_v7 = vld [vmem:[%s3607_s14 + $0x270] sm:$0xff]  ;;  %v328_v8 = vld [vmem:[%s3607_s14 + $0x258] sm:$0xff] }
  0x71   : > { %1813 = vmatprep.mubr.bf16.mxu1 %v2671_v21  ;;  %v2611_v21 = vcombine.high %v272_v16, %v276_v17  ;;  %v332_v9 = vld [vmem:[%s3607_s14 + $0x278] sm:$0xff] }
  0x77   : > { %1653 = vmatmul.mubr.bf16.gmra.mrb[40].mxu0 %v2668_v26  ;;  %v2608_v26 = vcombine.low %v271_v14, %v275_v15  ;;  %v335_v14 = vld [vmem:[%s3607_s14 + $0x290] sm:$0xff] }
  0x78   : > { %1814 = vmatmul.mubr.bf16.gmra.mrb[40].mxu1 %v2670_v27  ;;  %1660 = vmatprep.mubr.bf16.mxu0 %v2677_v28  ;;  %v2610_v27 = vcombine.low %v272_v16, %v276_v17  ;;  %v2617_v28 = vcombine.high %v279_v22, %v283_v23  ;;  %v339_v15 = vld [vmem:[%s3607_s14 + $0x2b0] sm:$0xff]  ;;  %v336_v16 = vld [vmem:[%s3607_s14 + $0x298] sm:$0xff] }
  0x79   : > { %1821 = vmatprep.mubr.bf16.mxu1 %v2679_v29  ;;  %v2619_v29 = vcombine.high %v280_v24, %v284_v25  ;;  %v340_v17 = vld [vmem:[%s3607_s14 + $0x2b8] sm:$0xff] }
  0x7f   : > { %1661 = vmatmul.mubr.bf16.gmra.mrb[44].mxu0 %v2676_v34  ;;  %v2616_v34 = vcombine.low %v279_v22, %v283_v23  ;;  %v343_v22 = vld [vmem:[%s3607_s14 + $0x2d0] sm:$0xff] }
  0x80   : > { %1822 = vmatmul.mubr.bf16.gmra.mrb[44].mxu1 %v2678_v35  ;;  %1668 = vmatprep.mubr.bf16.mxu0 %v2685_v36  ;;  %v2618_v35 = vcombine.low %v280_v24, %v284_v25  ;;  %v2625_v36 = vcombine.high %v287_v30, %v291_v31  ;;  %v347_v23 = vld [vmem:[%s3607_s14 + $0x2f0] sm:$0xff]  ;;  %v344_v24 = vld [vmem:[%s3607_s14 + $0x2d8] sm:$0xff] }
  0x81   : > { %1829 = vmatprep.mubr.bf16.mxu1 %v2687_v37  ;;  %v2627_v37 = vcombine.high %v288_v32, %v292_v33  ;;  %v348_v25 = vld [vmem:[%s3607_s14 + $0x2f8] sm:$0xff] }
  0x87   : > { %1669 = vmatmul.mubr.bf16.gmra.mrb[48].mxu0 %v2684_v42  ;;  %v2624_v42 = vcombine.low %v287_v30, %v291_v31  ;;  %v351_v30 = vld [vmem:[%s3607_s14 + $0x310] sm:$0xff] }
  0x88   : > { %1830 = vmatmul.mubr.bf16.gmra.mrb[48].mxu1 %v2686_v43  ;;  %1676 = vmatprep.mubr.bf16.mxu0 %v2693_v44  ;;  %v2626_v43 = vcombine.low %v288_v32, %v292_v33  ;;  %v2633_v44 = vcombine.high %v295_v38, %v299_v39  ;;  %v355_v31 = vld [vmem:[%s3607_s14 + $0x330] sm:$0xff]  ;;  %v352_v33 = vld [vmem:[%s3607_s14 + $0x318] sm:$0xff] }
  0x89   : > { %1837 = vmatprep.mubr.bf16.mxu1 %v2695_v45  ;;  %v2635_v45 = vcombine.high %v296_v40, %v300_v41 }
  0x8f   : > { %1677 = vmatmul.mubr.bf16.gmra.mrb[52].mxu0 %v2692_v50  ;;  %v2632_v50 = vcombine.low %v295_v38, %v299_v39  ;;  %v2680_v38 = vcombine.low %v343_v22, %v347_v23 }
  0x90   : > { %1838 = vmatmul.mubr.bf16.gmra.mrb[52].mxu1 %v2694_v51  ;;  %1684 = vmatprep.mubr.bf16.mxu0 %v2701_v52  ;;  %v2634_v51 = vcombine.low %v296_v40, %v300_v41  ;;  %v2641_v52 = vcombine.high %v303_v46, %v307_v47 }
  0x91   : > { %1845 = vmatprep.mubr.bf16.mxu1 %v2703_v53  ;;  %v2643_v53 = vcombine.high %v304_v48, %v308_v49 }
  0x97   : > { %1685 = vmatmul.mubr.bf16.gmra.mrb[56].mxu0 %v2700_v58  ;;  %v2640_v58 = vcombine.low %v303_v46, %v307_v47 }
  0x98   : > { %1846 = vmatmul.mubr.bf16.gmra.mrb[56].mxu1 %v2702_v59  ;;  %1692 = vmatprep.mubr.bf16.mxu0 %v2709_v60  ;;  %v2642_v59 = vcombine.low %v304_v48, %v308_v49  ;;  %v2649_v60 = vcombine.high %v311_v54, %v315_v55 }
  0x99   : > { %1853 = vmatprep.mubr.bf16.mxu1 %v2711_v61  ;;  %v2651_v61 = vcombine.high %v312_v56, %v316_v57 }
  0x9f   : > { %1693 = vmatmul.mubr.bf16.gmra.mrb[60].mxu0 %v2708_v2  ;;  %v2648_v2 = vcombine.low %v311_v54, %v315_v55  ;;  %v359_v54 = vld [vmem:[%s3607_s14 + $0x350] sm:$0xff] }
  0xa0   : > { %1854 = vmatmul.mubr.bf16.gmra.mrb[60].mxu1 %v2710_v3  ;;  %1894 = vmatprep.mubr.bf16.mxu0 %v2593_v4  ;;  %v2650_v3 = vcombine.low %v312_v56, %v316_v57  ;;  %v2657_v4 = vcombine.high %v319_v62, %v323_v63  ;;  %v363_v55 = vld [vmem:[%s3607_s14 + $0x370] sm:$0xff] }
  0xa1   : > { %2055 = vmatprep.mubr.bf16.mxu1 %v2595_v5  ;;  %v2659_v5 = vcombine.high %v320_v0, %v324_v1 }
  0xa7   : > { %1895 = vmatmul.mubr.bf16.vlgmr.msra.gmra.mrb[64].mxu0 %v2592_v10  ;;  %v2656_v10 = vcombine.low %v319_v62, %v323_v63  ;;  %v2688_v62 = vcombine.low %v351_v30, %v355_v31 }
  0xa8   : > { %2056 = vmatmul.mubr.bf16.vlgmr.msra.gmra.mrb[64].mxu1 %v2594_v11  ;;  %1902 = vmatprep.mubr.bf16.mxu0 %v2601_v12  ;;  %v2658_v11 = vcombine.low %v320_v0, %v324_v1  ;;  %v2665_v12 = vcombine.high %v327_v6, %v331_v7 }
  0xa9   : > { %2063 = vmatprep.mubr.bf16.mxu1 %v2603_v13  ;;  %v2667_v13 = vcombine.high %v328_v8, %v332_v9 }
  0xaf   : > { %1903 = vmatmul.mubr.bf16.gmra.mrb[68].mxu0 %v2600_v18  ;;  %v2664_v18 = vcombine.low %v327_v6, %v331_v7 }
  0xb0   : > { %2064 = vmatmul.mubr.bf16.gmra.mrb[68].mxu1 %v2602_v19  ;;  %1910 = vmatprep.mubr.bf16.mxu0 %v2609_v20  ;;  %v2666_v19 = vcombine.low %v328_v8, %v332_v9  ;;  %v2673_v20 = vcombine.high %v335_v14, %v339_v15 }
  0xb1   : > { %2071 = vmatprep.mubr.bf16.mxu1 %v2611_v21  ;;  %v2675_v21 = vcombine.high %v336_v16, %v340_v17 }
  0xb7   : > { %1911 = vmatmul.mubr.bf16.gmra.mrb[72].mxu0 %v2608_v26  ;;  %v2672_v26 = vcombine.low %v335_v14, %v339_v15  ;;  %v367_v14 = vld [vmem:[%s3607_s14 + $0x390] sm:$0xff] }
  0xb8   : > { %2072 = vmatmul.mubr.bf16.gmra.mrb[72].mxu1 %v2610_v27  ;;  %1918 = vmatprep.mubr.bf16.mxu0 %v2617_v28  ;;  %v2674_v27 = vcombine.low %v336_v16, %v340_v17  ;;  %v2681_v28 = vcombine.high %v343_v22, %v347_v23  ;;  %v371_v15 = vld [vmem:[%s3607_s14 + $0x3b0] sm:$0xff]  ;;  %v2696_v22 = vcombine.low %v359_v54, %v363_v55 }
  0xb9   : > { %2079 = vmatprep.mubr.bf16.mxu1 %v2619_v29  ;;  %v2683_v29 = vcombine.high %v344_v24, %v348_v25 }
  0xbf   : > { %1919 = vmatmul.mubr.bf16.gmra.mrb[76].mxu0 %v2616_v34  ;;  %v356_v34 = vld [vmem:[%s3607_s14 + $0x338] sm:$0xff] }
  0xc0   : > { %2080 = vmatmul.mubr.bf16.gmra.mrb[76].mxu1 %v2618_v35  ;;  %1926 = vmatprep.mubr.bf16.mxu0 %v2625_v36  ;;  %v3830_v36 = vld [vmem:[%s4007_s2] ss:$0 sm:$0xff]  ;;  %v2691_v47 = vcombine.high %v352_v33, %v356_v34 }
  0xc1   : > { %2087 = vmatprep.mubr.bf16.mxu1 %v2627_v37 }
  0xc7   : > { %1927 = vmatmul.mubr.bf16.gmra.mrb[80].mxu0 %v2624_v42  ;;  %v2682_v42 = vcombine.low %v344_v24, %v348_v25 }
  0xc8   : > { %2088 = vmatmul.mubr.bf16.gmra.mrb[80].mxu1 %v2626_v43  ;;  %1934 = vmatprep.mubr.bf16.mxu0 %v2633_v44  ;;  %v2689_v43 = vcombine.high %v351_v30, %v355_v31 }
  0xc9   : > { %2095 = vmatprep.mubr.bf16.mxu1 %v2635_v45 }
  0xcf   : > { %1935 = vmatmul.mubr.bf16.gmra.mrb[84].mxu0 %v2632_v50 }
  0xd0   : > { %2096 = vmatmul.mubr.bf16.gmra.mrb[84].mxu1 %v2634_v51  ;;  %1942 = vmatprep.mubr.bf16.mxu0 %v2641_v52 }
  0xd1   : > { %2103 = vmatprep.mubr.bf16.mxu1 %v2643_v53 }
  0xd7   : > { %1943 = vmatmul.mubr.bf16.gmra.mrb[88].mxu0 %v2640_v58  ;;  %v360_v58 = vld [vmem:[%s3607_s14 + $0x358] sm:$0xff] }
  0xd8   : > { %2104 = vmatmul.mubr.bf16.gmra.mrb[88].mxu1 %v2642_v59  ;;  %1950 = vmatprep.mubr.bf16.mxu0 %v2649_v60  ;;  %v364_v59 = vld [vmem:[%s3607_s14 + $0x378] sm:$0xff] }
  0xd9   : > { %2111 = vmatprep.mubr.bf16.mxu1 %v2651_v61  ;;  %v2699_v7 = vcombine.high %v360_v58, %v364_v59 }
  0xdf   : > { %1951 = vmatmul.mubr.bf16.gmra.mrb[92].mxu0 %v2648_v2  ;;  %v2690_v2 = vcombine.low %v352_v33, %v356_v34 }
  0xe0   : > { %2112 = vmatmul.mubr.bf16.gmra.mrb[92].mxu1 %v2650_v3  ;;  %1958 = vmatprep.mubr.bf16.mxu0 %v2657_v4  ;;  %v2697_v3 = vcombine.high %v359_v54, %v363_v55 }
  0xe1   : > { %2119 = vmatprep.mubr.bf16.mxu1 %v2659_v5 }
  0xe7   : > { %1959 = vmatmul.mubr.bf16.gmra.mrb[96].mxu0 %v2656_v10 }
  0xe8   : > { %2120 = vmatmul.mubr.bf16.gmra.mrb[96].mxu1 %v2658_v11  ;;  %1966 = vmatprep.mubr.bf16.mxu0 %v2665_v12 }
  0xe9   : > { %2127 = vmatprep.mubr.bf16.mxu1 %v2667_v13 }
  0xef   : > { %1967 = vmatmul.mubr.bf16.gmra.mrb[100].mxu0 %v2664_v18  ;;  %v368_v18 = vld [vmem:[%s3607_s14 + $0x398] sm:$0xff] }
  0xf0   : > { %2128 = vmatmul.mubr.bf16.gmra.mrb[100].mxu1 %v2666_v19  ;;  %1974 = vmatprep.mubr.bf16.mxu0 %v2673_v20  ;;  %v372_v19 = vld [vmem:[%s3607_s14 + $0x3b8] sm:$0xff] }
  0xf1   : > { %2135 = vmatprep.mubr.bf16.mxu1 %v2675_v21  ;;  %v2707_v31 = vcombine.high %v368_v18, %v372_v19 }
  0xf7   : > { %1975 = vmatmul.mubr.bf16.gmra.mrb[104].mxu0 %v2672_v26  ;;  %v2698_v26 = vcombine.low %v360_v58, %v364_v59 }
  0xf8   : > { %2136 = vmatmul.mubr.bf16.gmra.mrb[104].mxu1 %v2674_v27  ;;  %1982 = vmatprep.mubr.bf16.mxu0 %v2681_v28  ;;  %v2705_v27 = vcombine.high %v367_v14, %v371_v15 }
  0xf9   : > { %2143 = vmatprep.mubr.bf16.mxu1 %v2683_v29 }
  0xfa   : > { %v2958_v32 = vpop.f32.mrb[0].mxu0 }
  0xfb   : > { %v3070_v35 = vpop.f32.mrb[0].mxu1  ;;  %v2959_v37 = vpop.f32.mrb[1].mxu0 }
  0xfc   : > { %v2960_v39 = vadd.f32 %v2959_v37, %v2958_v32  ;;  %v3071_v40 = vpop.f32.mrb[1].mxu1  ;;  %v2961_v41 = vpop.f32.mrb[2].mxu0 }
  0xfd   : > { %v3072_v44 = vadd.f32 %v3071_v40, %v3070_v35  ;;  %v3073_v45 = vpop.f32.mrb[2].mxu1  ;;  %v2962_v46 = vpop.f32.mrb[3].mxu0  ;;  %v379_v40 = vld [vmem:[%s3607_s14 + $0x3f0] sm:$0xff] }
  0xfe   : > { %v1575_v48 = vadd.f32 %v2960_v39, %v3830_v36  ;;  %v2963_v49 = vadd.f32 %v2962_v46, %v2961_v41  ;;  %v3074_v50 = vpop.f32.mrb[3].mxu1  ;;  %v375_v39 = vld [vmem:[%s3607_s14 + $0x3d0] sm:$0xff] }
  0xff   : > { %v3075_v51 = vadd.f32 %v3074_v50, %v3073_v45  ;;  %1983 = vmatmul.mubr.bf16.gmra.mrb[108].mxu0 %v2680_v38 }
 0x100   : > { %v3833_v52 = vadd.f32 %v3072_v44, %v1575_v48  ;;  %v1578_v53 = vadd.f32 %v2963_v49, %v3830_v36  ;;  %2144 = vmatmul.mubr.bf16.gmra.mrb[108].mxu1 %v2682_v42  ;;  %1990 = vmatprep.mubr.bf16.mxu0 %v2689_v43  ;;  %v376_v43 = vld [vmem:[%s3607_s14 + $0x3d8] sm:$0xff] }
 0x101   : > { %2151 = vmatprep.mubr.bf16.mxu1 %v2691_v47  ;;  %v380_v44 = vld [vmem:[%s3607_s14 + $0x3f8] sm:$0xff]  ;;  %v2704_v47 = vcombine.low %v367_v14, %v371_v15  ;;  %s2584_s14 = sshll.u32 %s4012_s29, 2  ;;  %s2585_s29 = sshll.u32 %s4014_s19, 3 }
 0x102   : > { %v3838_v56 = vadd.f32 %v3075_v51, %v1578_v53  ;;  %v2964_v57 = vpop.f32.mrb[4].mxu0  ;;  %v2706_v51 = vcombine.low %v368_v18, %v372_v19  ;;  %v2713_v53 = vcombine.high %v375_v39, %v379_v40  ;;  %v2715_v58 = vcombine.high %v376_v43, %v380_v44  ;;  %s3946_s26 = scalar_lea.vmem %s4008_s3, %s2584_s14  ;;  %s247_s30 = scalar_lea.vmem %s4009_s4, %s2585_s29 }
 0x103   : > { %v3076_v60 = vpop.f32.mrb[4].mxu1  ;;  %v2965_v61 = vpop.f32.mrb[5].mxu0  ;;  %s251_s8 = scalar_lea.vmem %s4010_s5, %s2585_s29 }
 0x104   : > { %v2966_v63 = vadd.f32 %v2965_v61, %v2964_v57  ;;  %v3077_v0 = vpop.f32.mrb[5].mxu1  ;;  %v2967_v1 = vpop.f32.mrb[6].mxu0 }
 0x105   : > { %v3078_v4 = vadd.f32 %v3077_v0, %v3076_v60  ;;  %v3079_v5 = vpop.f32.mrb[6].mxu1  ;;  %v2968_v6 = vpop.f32.mrb[7].mxu0 }
 0x106   : > { %v1583_v8 = vadd.f32 %v2966_v63, %v3830_v36  ;;  %v2969_v9 = vadd.f32 %v2968_v6, %v2967_v1  ;;  %v3080_v10 = vpop.f32.mrb[7].mxu1 }
 0x107   : > { %v3081_v11 = vadd.f32 %v3080_v10, %v3079_v5  ;;  %1991 = vmatmul.mubr.bf16.gmra.mrb[112].mxu0 %v2688_v62  ;;  %v2712_v5 = vcombine.low %v375_v39, %v379_v40 }
 0x108   : > { %v3843_v12 = vadd.f32 %v3078_v4, %v1583_v8  ;;  %v1586_v13 = vadd.f32 %v2969_v9, %v3830_v36  ;;  %2152 = vmatmul.mubr.bf16.gmra.mrb[112].mxu1 %v2690_v2  ;;  %1998 = vmatprep.mubr.bf16.mxu0 %v2697_v3  ;;  %v2714_v9 = vcombine.low %v376_v43, %v380_v44 }
 0x109   : > { %2159 = vmatprep.mubr.bf16.mxu1 %v2699_v7 }
 0x10a   : > { %v3848_v16 = vadd.f32 %v3081_v11, %v1586_v13  ;;  %v2970_v17 = vpop.f32.mrb[8].mxu0 }
 0x10b   : > { %v3082_v20 = vpop.f32.mrb[8].mxu1  ;;  %v2971_v21 = vpop.f32.mrb[9].mxu0 }
 0x10c   : > { %v2972_v23 = vadd.f32 %v2971_v21, %v2970_v17  ;;  %v3083_v24 = vpop.f32.mrb[9].mxu1  ;;  %v2973_v25 = vpop.f32.mrb[10].mxu0 }
 0x10d   : > { %v3084_v28 = vadd.f32 %v3083_v24, %v3082_v20  ;;  %v3085_v29 = vpop.f32.mrb[10].mxu1  ;;  %v2974_v30 = vpop.f32.mrb[11].mxu0 }
 0x10e   : > { %v1591_v32 = vadd.f32 %v2972_v23, %v3830_v36  ;;  %v2975_v33 = vadd.f32 %v2974_v30, %v2973_v25  ;;  %v3086_v34 = vpop.f32.mrb[11].mxu1 }
 0x10f   : > { %v3087_v35 = vadd.f32 %v3086_v34, %v3085_v29  ;;  %1999 = vmatmul.mubr.bf16.gmra.mrb[116].mxu0 %v2696_v22 }
 0x110   : > { %v3853_v37 = vadd.f32 %v3084_v28, %v1591_v32  ;;  %v1594_v38 = vadd.f32 %v2975_v33, %v3830_v36  ;;  %2160 = vmatmul.mubr.bf16.gmra.mrb[116].mxu1 %v2698_v26  ;;  %2006 = vmatprep.mubr.bf16.mxu0 %v2705_v27 }
 0x111   : > { %2167 = vmatprep.mubr.bf16.mxu1 %v2707_v31 }
 0x112   : > { %v3858_v41 = vadd.f32 %v3087_v35, %v1594_v38  ;;  %v2976_v42 = vpop.f32.mrb[12].mxu0 }
 0x113   : > { %v3088_v45 = vpop.f32.mrb[12].mxu1  ;;  %v2977_v46 = vpop.f32.mrb[13].mxu0 }
 0x114   : > { %v2978_v48 = vadd.f32 %v2977_v46, %v2976_v42  ;;  %v3089_v49 = vpop.f32.mrb[13].mxu1  ;;  %v2979_v50 = vpop.f32.mrb[14].mxu0 }
 0x115   : > { %v3090_v54 = vadd.f32 %v3089_v49, %v3088_v45  ;;  %v3091_v55 = vpop.f32.mrb[14].mxu1  ;;  %v2980_v57 = vpop.f32.mrb[15].mxu0 }
 0x116   : > { %v1599_v59 = vadd.f32 %v2978_v48, %v3830_v36  ;;  %v2981_v60 = vadd.f32 %v2980_v57, %v2979_v50  ;;  %v3092_v61 = vpop.f32.mrb[15].mxu1 }
 0x117   : > { %v3093_v62 = vadd.f32 %v3092_v61, %v3091_v55  ;;  %2007 = vmatmul.mubr.bf16.gmra.mrb[120].mxu0 %v2704_v47 }
 0x118   : > { %v3863_v63 = vadd.f32 %v3090_v54, %v1599_v59  ;;  %v1602_v0 = vadd.f32 %v2981_v60, %v3830_v36  ;;  %2168 = vmatmul.mubr.bf16.gmra.mrb[120].mxu1 %v2706_v51  ;;  %2014 = vmatprep.mubr.bf16.mxu0 %v2713_v53 }
 0x119   : > { %2175 = vmatprep.mubr.bf16.mxu1 %v2715_v58 }
 0x11a   : > { %v3866_v1 = vadd.f32 %v3093_v62, %v1602_v0  ;;  %v2982_v2 = vpop.f32.mrb[16].mxu0 }
 0x11b   : > { %v3094_v3 = vpop.f32.mrb[16].mxu1  ;;  %v2983_v4 = vpop.f32.mrb[17].mxu0 }
 0x11c   : > { %v2984_v6 = vadd.f32 %v2983_v4, %v2982_v2  ;;  %v3095_v7 = vpop.f32.mrb[17].mxu1  ;;  %v2985_v8 = vpop.f32.mrb[18].mxu0 }
 0x11d   : > { %v3096_v10 = vadd.f32 %v3095_v7, %v3094_v3  ;;  %v3097_v11 = vpop.f32.mrb[18].mxu1  ;;  %v2986_v13 = vpop.f32.mrb[19].mxu0 }
 0x11e   : > { %v1607_v14 = vadd.f32 %v2984_v6, %v3830_v36  ;;  %v2987_v15 = vadd.f32 %v2986_v13, %v2985_v8  ;;  %v3098_v17 = vpop.f32.mrb[19].mxu1 }
 0x11f   : > { %v3099_v18 = vadd.f32 %v3098_v17, %v3097_v11  ;;  %2015 = vmatmul.mubr.bf16.gmra.mrb[124].mxu0 %v2712_v5 }
 0x120   : > { %v3869_v19 = vadd.f32 %v3096_v10, %v1607_v14  ;;  %v1610_v20 = vadd.f32 %v2987_v15, %v3830_v36  ;;  %2176 = vmatmul.mubr.bf16.gmra.mrb[124].mxu1 %v2714_v9 }
 0x122   : > { %v3872_v21 = vadd.f32 %v3099_v18, %v1610_v20  ;;  %v2988_v22 = vpop.f32.mrb[20].mxu0 }
 0x123   : > { %v3100_v23 = vpop.f32.mrb[20].mxu1  ;;  %v2989_v24 = vpop.f32.mrb[21].mxu0 }
 0x124   : > { %v2990_v25 = vadd.f32 %v2989_v24, %v2988_v22  ;;  %v3101_v26 = vpop.f32.mrb[21].mxu1  ;;  %v2991_v27 = vpop.f32.mrb[22].mxu0 }
 0x125   : > { %v3102_v28 = vadd.f32 %v3101_v26, %v3100_v23  ;;  %v3103_v29 = vpop.f32.mrb[22].mxu1  ;;  %v2992_v30 = vpop.f32.mrb[23].mxu0 }
 0x126   : > { %v1615_v31 = vadd.f32 %v2990_v25, %v3830_v36  ;;  %v2993_v32 = vadd.f32 %v2992_v30, %v2991_v27  ;;  %v3104_v33 = vpop.f32.mrb[23].mxu1 }
 0x127   : > { %v3105_v34 = vadd.f32 %v3104_v33, %v3103_v29 }
 0x128   : > { %v3875_v35 = vadd.f32 %v3102_v28, %v1615_v31  ;;  %v1618_v38 = vadd.f32 %v2993_v32, %v3830_v36 }
 0x12a   : > { %v3878_v39 = vadd.f32 %v3105_v34, %v1618_v38  ;;  %v2994_v40 = vpop.f32.mrb[24].mxu0 }
 0x12b   : > { %v3106_v42 = vpop.f32.mrb[24].mxu1  ;;  %v2995_v43 = vpop.f32.mrb[25].mxu0 }
 0x12c   : > { %v2996_v44 = vadd.f32 %v2995_v43, %v2994_v40  ;;  %v3107_v45 = vpop.f32.mrb[25].mxu1  ;;  %v2997_v46 = vpop.f32.mrb[26].mxu0 }
 0x12d   : > { %v3108_v47 = vadd.f32 %v3107_v45, %v3106_v42  ;;  %v3109_v48 = vpop.f32.mrb[26].mxu1  ;;  %v2998_v49 = vpop.f32.mrb[27].mxu0 }
 0x12e   : > { %v1623_v50 = vadd.f32 %v2996_v44, %v3830_v36  ;;  %v2999_v51 = vadd.f32 %v2998_v49, %v2997_v46  ;;  %v3110_v53 = vpop.f32.mrb[27].mxu1 }
 0x12f   : > { %v3111_v54 = vadd.f32 %v3110_v53, %v3109_v48 }
 0x130   : > { %v3881_v55 = vadd.f32 %v3108_v47, %v1623_v50  ;;  %v1626_v57 = vadd.f32 %v2999_v51, %v3830_v36 }
 0x132   : > { %v3884_v58 = vadd.f32 %v3111_v54, %v1626_v57  ;;  %v3000_v59 = vpop.f32.mrb[28].mxu0 }
 0x133   : > { %v3112_v60 = vpop.f32.mrb[28].mxu1  ;;  %v3001_v61 = vpop.f32.mrb[29].mxu0 }
 0x134   : > { %v3002_v62 = vadd.f32 %v3001_v61, %v3000_v59  ;;  %v3113_v0 = vpop.f32.mrb[29].mxu1  ;;  %v3003_v2 = vpop.f32.mrb[30].mxu0 }
 0x135   : > { %v3114_v3 = vadd.f32 %v3113_v0, %v3112_v60  ;;  %v3115_v4 = vpop.f32.mrb[30].mxu1  ;;  %v3004_v5 = vpop.f32.mrb[31].mxu0 }
 0x136   : > { %v1631_v6 = vadd.f32 %v3002_v62, %v3830_v36  ;;  %v3005_v7 = vadd.f32 %v3004_v5, %v3003_v2  ;;  %v3116_v8 = vpop.f32.mrb[31].mxu1 }
 0x137   : > { %v3117_v9 = vadd.f32 %v3116_v8, %v3115_v4 }
 0x138   : > { %v3887_v10 = vadd.f32 %v3114_v3, %v1631_v6  ;;  %v1634_v11 = vadd.f32 %v3005_v7, %v3830_v36 }
 0x13a   : > { %v3890_v13 = vadd.f32 %v3117_v9, %v1634_v11  ;;  %v3006_v14 = vpop.f32.mrb[32].mxu0 }
 0x13b   : > { %v3118_v15 = vpop.f32.mrb[32].mxu1  ;;  %v3007_v17 = vpop.f32.mrb[33].mxu0 }
 0x13c   : > { %v3008_v18 = vadd.f32 %v3007_v17, %v3006_v14  ;;  %v3119_v20 = vpop.f32.mrb[33].mxu1  ;;  %v3009_v22 = vpop.f32.mrb[34].mxu0 }
 0x13d   : > { %v3120_v23 = vadd.f32 %v3119_v20, %v3118_v15  ;;  %v3121_v24 = vpop.f32.mrb[34].mxu1  ;;  %v3010_v25 = vpop.f32.mrb[35].mxu0 }
 0x13e   : > { %v1639_v26 = vadd.f32 %v3008_v18, %v3830_v36  ;;  %v3011_v27 = vadd.f32 %v3010_v25, %v3009_v22  ;;  %v3122_v28 = vpop.f32.mrb[35].mxu1 }
 0x13f   : > { %v3123_v29 = vadd.f32 %v3122_v28, %v3121_v24 }
 0x140   : > { %v3893_v30 = vadd.f32 %v3120_v23, %v1639_v26  ;;  %v1642_v31 = vadd.f32 %v3011_v27, %v3830_v36 }
 0x142   : > { %v3896_v32 = vadd.f32 %v3123_v29, %v1642_v31  ;;  %v3012_v33 = vpop.f32.mrb[36].mxu0 }
 0x143   : > { %v3124_v34 = vpop.f32.mrb[36].mxu1  ;;  %v3013_v38 = vpop.f32.mrb[37].mxu0 }
 0x144   : > { %v3014_v40 = vadd.f32 %v3013_v38, %v3012_v33  ;;  %v3125_v42 = vpop.f32.mrb[37].mxu1  ;;  %v3015_v43 = vpop.f32.mrb[38].mxu0 }
 0x145   : > { %v3126_v44 = vadd.f32 %v3125_v42, %v3124_v34  ;;  %v3127_v45 = vpop.f32.mrb[38].mxu1  ;;  %v3016_v46 = vpop.f32.mrb[39].mxu0 }
 0x146   : > { %v1647_v47 = vadd.f32 %v3014_v40, %v3830_v36  ;;  %v3017_v48 = vadd.f32 %v3016_v46, %v3015_v43  ;;  %v3128_v49 = vpop.f32.mrb[39].mxu1 }
 0x147   : > { %v3129_v50 = vadd.f32 %v3128_v49, %v3127_v45 }
 0x148   : > { %v3899_v51 = vadd.f32 %v3126_v44, %v1647_v47  ;;  %v1650_v53 = vadd.f32 %v3017_v48, %v3830_v36 }
 0x14a   : > { %v3902_v54 = vadd.f32 %v3129_v50, %v1650_v53  ;;  %v3018_v57 = vpop.f32.mrb[40].mxu0 }
 0x14b   : > { %v3130_v59 = vpop.f32.mrb[40].mxu1  ;;  %v3019_v60 = vpop.f32.mrb[41].mxu0 }
 0x14c   : > { %v3020_v61 = vadd.f32 %v3019_v60, %v3018_v57  ;;  %v3131_v62 = vpop.f32.mrb[41].mxu1  ;;  %v3021_v0 = vpop.f32.mrb[42].mxu0 }
 0x14d   : > { %v3132_v2 = vadd.f32 %v3131_v62, %v3130_v59  ;;  %v3133_v3 = vpop.f32.mrb[42].mxu1  ;;  %v3022_v4 = vpop.f32.mrb[43].mxu0 }
 0x14e   : > { %v1655_v5 = vadd.f32 %v3020_v61, %v3830_v36  ;;  %v3023_v6 = vadd.f32 %v3022_v4, %v3021_v0  ;;  %v3134_v7 = vpop.f32.mrb[43].mxu1 }
 0x14f   : > { %v3135_v8 = vadd.f32 %v3134_v7, %v3133_v3 }
 0x150   : > { %v3905_v9 = vadd.f32 %v3132_v2, %v1655_v5  ;;  %v1658_v11 = vadd.f32 %v3023_v6, %v3830_v36 }
 0x152   : > { %v3908_v14 = vadd.f32 %v3135_v8, %v1658_v11  ;;  %v3024_v15 = vpop.f32.mrb[44].mxu0 }
 0x153   : > { %v3136_v17 = vpop.f32.mrb[44].mxu1  ;;  %v3025_v18 = vpop.f32.mrb[45].mxu0 }
 0x154   : > { %v3026_v20 = vadd.f32 %v3025_v18, %v3024_v15  ;;  %v3137_v22 = vpop.f32.mrb[45].mxu1  ;;  %v3027_v23 = vpop.f32.mrb[46].mxu0 }
 0x155   : > { %v3138_v24 = vadd.f32 %v3137_v22, %v3136_v17  ;;  %v3139_v25 = vpop.f32.mrb[46].mxu1  ;;  %v3028_v26 = vpop.f32.mrb[47].mxu0 }
 0x156   : > { %v1663_v27 = vadd.f32 %v3026_v20, %v3830_v36  ;;  %v3029_v28 = vadd.f32 %v3028_v26, %v3027_v23  ;;  %v3140_v29 = vpop.f32.mrb[47].mxu1 }
 0x157   : > { %v3141_v31 = vadd.f32 %v3140_v29, %v3139_v25 }
 0x158   : > { %v3911_v33 = vadd.f32 %v3138_v24, %v1663_v27  ;;  %v1666_v34 = vadd.f32 %v3029_v28, %v3830_v36 }
 0x15a   : > { %v3914_v38 = vadd.f32 %v3141_v31, %v1666_v34  ;;  %v3030_v40 = vpop.f32.mrb[48].mxu0 }
 0x15b   : > { %v3142_v42 = vpop.f32.mrb[48].mxu1  ;;  %v3031_v43 = vpop.f32.mrb[49].mxu0 }
 0x15c   : > { %v3032_v44 = vadd.f32 %v3031_v43, %v3030_v40  ;;  %v3143_v45 = vpop.f32.mrb[49].mxu1  ;;  %v3033_v46 = vpop.f32.mrb[50].mxu0 }
 0x15d   : > { %v3144_v47 = vadd.f32 %v3143_v45, %v3142_v42  ;;  %v3145_v48 = vpop.f32.mrb[50].mxu1  ;;  %v3034_v49 = vpop.f32.mrb[51].mxu0 }
 0x15e   : > { %v1671_v50 = vadd.f32 %v3032_v44, %v3830_v36  ;;  %v3035_v53 = vadd.f32 %v3034_v49, %v3033_v46  ;;  %v3146_v57 = vpop.f32.mrb[51].mxu1 }
 0x15f   : > { %v3147_v59 = vadd.f32 %v3146_v57, %v3145_v48 }
 0x160   : > { %v3917_v60 = vadd.f32 %v3144_v47, %v1671_v50  ;;  %v1674_v61 = vadd.f32 %v3035_v53, %v3830_v36 }
 0x162   : > { %v3920_v62 = vadd.f32 %v3147_v59, %v1674_v61  ;;  %v3036_v0 = vpop.f32.mrb[52].mxu0 }
 0x163   : > { %v3148_v2 = vpop.f32.mrb[52].mxu1  ;;  %v3037_v3 = vpop.f32.mrb[53].mxu0 }
 0x164   : > { %v3038_v4 = vadd.f32 %v3037_v3, %v3036_v0  ;;  %v3149_v5 = vpop.f32.mrb[53].mxu1  ;;  %v3039_v6 = vpop.f32.mrb[54].mxu0 }
 0x165   : > { %v3150_v7 = vadd.f32 %v3149_v5, %v3148_v2  ;;  %v3151_v8 = vpop.f32.mrb[54].mxu1  ;;  %v3040_v11 = vpop.f32.mrb[55].mxu0 }
 0x166   : > { %v1679_v15 = vadd.f32 %v3038_v4, %v3830_v36  ;;  %v3041_v17 = vadd.f32 %v3040_v11, %v3039_v6  ;;  %v3152_v18 = vpop.f32.mrb[55].mxu1 }
 0x167   : > { %v3153_v20 = vadd.f32 %v3152_v18, %v3151_v8 }
 0x168   : > { %v3923_v22 = vadd.f32 %v3150_v7, %v1679_v15  ;;  %v1682_v23 = vadd.f32 %v3041_v17, %v3830_v36 }
 0x16a   : > { %v3926_v24 = vadd.f32 %v3153_v20, %v1682_v23  ;;  %v3042_v25 = vpop.f32.mrb[56].mxu0 }
 0x16b   : > { %v3154_v26 = vpop.f32.mrb[56].mxu1  ;;  %v3043_v27 = vpop.f32.mrb[57].mxu0 }
 0x16c   : > { %v3044_v28 = vadd.f32 %v3043_v27, %v3042_v25  ;;  %v3155_v29 = vpop.f32.mrb[57].mxu1  ;;  %v3045_v31 = vpop.f32.mrb[58].mxu0 }
 0x16d   : > { %v3156_v34 = vadd.f32 %v3155_v29, %v3154_v26  ;;  %v3157_v40 = vpop.f32.mrb[58].mxu1  ;;  %v3046_v42 = vpop.f32.mrb[59].mxu0 }
 0x16e   : > { %v1687_v43 = vadd.f32 %v3044_v28, %v3830_v36  ;;  %v3047_v44 = vadd.f32 %v3046_v42, %v3045_v31  ;;  %v3158_v45 = vpop.f32.mrb[59].mxu1 }
 0x16f   : > { %v3159_v46 = vadd.f32 %v3158_v45, %v3157_v40 }
 0x170   : > { %v3929_v47 = vadd.f32 %v3156_v34, %v1687_v43  ;;  %v1690_v48 = vadd.f32 %v3047_v44, %v3830_v36 }
 0x172   : > { %v3932_v49 = vadd.f32 %v3159_v46, %v1690_v48  ;;  %v3048_v50 = vpop.f32.mrb[60].mxu0 }
 0x173   : > { %v3160_v53 = vpop.f32.mrb[60].mxu1  ;;  %v3049_v57 = vpop.f32.mrb[61].mxu0 }
 0x174   : > { %v3050_v59 = vadd.f32 %v3049_v57, %v3048_v50  ;;  %v3161_v61 = vpop.f32.mrb[61].mxu1  ;;  %v3051_v0 = vpop.f32.mrb[62].mxu0 }
 0x175   : > { %v3162_v2 = vadd.f32 %v3161_v61, %v3160_v53  ;;  %v3163_v3 = vpop.f32.mrb[62].mxu1  ;;  %v3052_v4 = vpop.f32.mrb[63].mxu0 }
 0x176   : > { %v1695_v5 = vadd.f32 %v3050_v59, %v3830_v36  ;;  %v3053_v6 = vadd.f32 %v3052_v4, %v3051_v0  ;;  %v3164_v7 = vpop.f32.mrb[63].mxu1 }
 0x177   : > { %v3165_v8 = vadd.f32 %v3164_v7, %v3163_v3 }
 0x178   : > { %v3935_v11 = vadd.f32 %v3162_v2, %v1695_v5  ;;  %v1698_v15 = vadd.f32 %v3053_v6, %v3830_v36 }
 0x17a   : > { %v3938_v17 = vadd.f32 %v3165_v8, %v1698_v15  ;;  %v3182_v18 = vpop.f32.mrb[64].mxu0 }
 0x17b   : > { %v3294_v20 = vpop.f32.mrb[64].mxu1  ;;  %v3183_v23 = vpop.f32.mrb[65].mxu0 }
 0x17c   : > { %v3184_v25 = vadd.f32 %v3183_v23, %v3182_v18  ;;  %v3295_v26 = vpop.f32.mrb[65].mxu1  ;;  %v3185_v27 = vpop.f32.mrb[66].mxu0 }
 0x17d   : > { %v3296_v28 = vadd.f32 %v3295_v26, %v3294_v20  ;;  %v3297_v29 = vpop.f32.mrb[66].mxu1  ;;  %v3186_v31 = vpop.f32.mrb[67].mxu0 }
 0x17e   : > { %v1897_v34 = vadd.f32 %v3184_v25, %v3833_v52  ;;  %v3187_v40 = vadd.f32 %v3186_v31, %v3185_v27  ;;  %v3298_v42 = vpop.f32.mrb[67].mxu1 }
 0x17f   : > { %v3299_v43 = vadd.f32 %v3298_v42, %v3297_v29 }
 0x180   : > { %v2058_v44 = vadd.f32 %v3296_v28, %v1897_v34  ;;  %v1900_v36 = vadd.f32 %v3187_v40, %v3838_v56 }
 0x182   : > { %v2061_v45 = vadd.f32 %v3299_v43, %v1900_v36  ;;  %v3188_v46 = vpop.f32.mrb[68].mxu0  ;;  %v2381_v48 = vmul.f32 %v2058_v44, %v2058_v44 }
 0x183   : > { %v3300_v50 = vpop.f32.mrb[68].mxu1  ;;  %v3189_v53 = vpop.f32.mrb[69].mxu0 }
 0x184   : > { %v2850_v57 = vpack.c.bf16 %v2061_v45, %v2058_v44  ;;  %v2344_v52 = vadd.f32 %v2061_v45, %v2058_v44  ;;  %v2382_v59 = vmul.f32 %v2061_v45, %v2061_v45  ;;  %v3190_v61 = vadd.f32 %v3189_v53, %v3188_v46  ;;  %v3301_v0 = vpop.f32.mrb[69].mxu1  ;;  %v3191_v2 = vpop.f32.mrb[70].mxu0 }
 0x185   : > { %v3302_v3 = vadd.f32 %v3301_v0, %v3300_v50  ;;  %v3303_v56 = vpop.f32.mrb[70].mxu1  ;;  %v3192_v4 = vpop.f32.mrb[71].mxu0 }
 0x186   : > { %2851 = vst [vmem:[%s3946_s26] sm:$0xff] %v2850_v57   ;;  %v2413_v5 = vadd.f32 %v2382_v59, %v2381_v48  ;;  %v1905_v6 = vadd.f32 %v3190_v61, %v3843_v12  ;;  %v3193_v7 = vadd.f32 %v3192_v4, %v3191_v2  ;;  %v3304_v8 = vpop.f32.mrb[71].mxu1 }
 0x187   : > { %v3305_v15 = vadd.f32 %v3304_v8, %v3303_v56 }
 0x188   : > { %v2066_v18 = vadd.f32 %v3302_v3, %v1905_v6  ;;  %v1908_v20 = vadd.f32 %v3193_v7, %v3848_v16 }
 0x18a   : > { %v2345_v23 = vadd.f32 %v2344_v52, %v2066_v18  ;;  %v2383_v25 = vmul.f32 %v2066_v18, %v2066_v18  ;;  %v2069_v26 = vadd.f32 %v3305_v15, %v1908_v20  ;;  %v3194_v27 = vpop.f32.mrb[72].mxu0 }
 0x18b   : > { %v3306_v28 = vpop.f32.mrb[72].mxu1  ;;  %v3195_v29 = vpop.f32.mrb[73].mxu0 }
 0x18c   : > { %v2414_v31 = vadd.f32 %v2413_v5, %v2383_v25  ;;  %v2855_v34 = vpack.c.bf16 %v2069_v26, %v2066_v18  ;;  %v2346_v40 = vadd.f32 %v2345_v23, %v2069_v26  ;;  %v2384_v42 = vmul.f32 %v2069_v26, %v2069_v26  ;;  %v3307_v43 = vpop.f32.mrb[73].mxu1  ;;  %v3197_v44 = vpop.f32.mrb[74].mxu0 }
 0x18d   : > { %v3196_v12 = vadd.f32 %v3195_v29, %v3194_v27  ;;  %v3308_v36 = vadd.f32 %v3307_v43, %v3306_v28  ;;  %v3309_v45 = vpop.f32.mrb[74].mxu1  ;;  %v3198_v46 = vpop.f32.mrb[75].mxu0 }
 0x18e   : > { %2927 = vst [vmem:[%s3946_s26 + $0x8] sm:$0xff] %v2855_v34   ;;  %v2415_v48 = vadd.f32 %v2414_v31, %v2384_v42  ;;  %v3199_v16 = vadd.f32 %v3198_v46, %v3197_v44  ;;  %v3310_v50 = vpop.f32.mrb[75].mxu1 }
 0x18f   : > { %v1913_v53 = vadd.f32 %v3196_v12, %v3853_v37  ;;  %v3311_v57 = vadd.f32 %v3310_v50, %v3309_v45 }
 0x190   : > { %v1916_v52 = vadd.f32 %v3199_v16, %v3858_v41 }
 0x191   : > { %v2074_v59 = vadd.f32 %v3308_v36, %v1913_v53 }
 0x192   : > { %v2077_v61 = vadd.f32 %v3311_v57, %v1916_v52  ;;  %v3200_v0 = vpop.f32.mrb[76].mxu0 }
 0x193   : > { %v2347_v2 = vadd.f32 %v2346_v40, %v2074_v59  ;;  %v2385_v3 = vmul.f32 %v2074_v59, %v2074_v59  ;;  %v3312_v56 = vpop.f32.mrb[76].mxu1  ;;  %v3201_v4 = vpop.f32.mrb[77].mxu0 }
 0x194   : > { %v2860_v5 = vpack.c.bf16 %v2077_v61, %v2074_v59  ;;  %v2386_v6 = vmul.f32 %v2077_v61, %v2077_v61  ;;  %v3202_v7 = vadd.f32 %v3201_v4, %v3200_v0  ;;  %v3313_v8 = vpop.f32.mrb[77].mxu1  ;;  %v3203_v15 = vpop.f32.mrb[78].mxu0 }
 0x195   : > { %v2416_v18 = vadd.f32 %v2415_v48, %v2385_v3  ;;  %v2348_v20 = vadd.f32 %v2347_v2, %v2077_v61  ;;  %v3314_v23 = vadd.f32 %v3313_v8, %v3312_v56  ;;  %v3315_v37 = vpop.f32.mrb[78].mxu1  ;;  %v3204_v25 = vpop.f32.mrb[79].mxu0 }
 0x196   : > { %2928 = vst [vmem:[%s3946_s26 + $0x10] sm:$0xff] %v2860_v5   ;;  %v1921_v41 = vadd.f32 %v3202_v7, %v3863_v63  ;;  %v3205_v26 = vadd.f32 %v3204_v25, %v3203_v15  ;;  %v3316_v27 = vpop.f32.mrb[79].mxu1 }
 0x197   : > { %v2417_v28 = vadd.f32 %v2416_v18, %v2386_v6  ;;  %v3317_v29 = vadd.f32 %v3316_v27, %v3315_v37 }
 0x198   : > { %v2082_v31 = vadd.f32 %v3314_v23, %v1921_v41  ;;  %v1924_v34 = vadd.f32 %v3205_v26, %v3866_v1 }
 0x19a   : > { %v2349_v40 = vadd.f32 %v2348_v20, %v2082_v31  ;;  %v2387_v42 = vmul.f32 %v2082_v31, %v2082_v31  ;;  %v2085_v43 = vadd.f32 %v3317_v29, %v1924_v34  ;;  %v3206_v44 = vpop.f32.mrb[80].mxu0 }
 0x19b   : > { %v3318_v12 = vpop.f32.mrb[80].mxu1  ;;  %v3207_v36 = vpop.f32.mrb[81].mxu0 }
 0x19c   : > { %v2418_v45 = vadd.f32 %v2417_v28, %v2387_v42  ;;  %v2865_v46 = vpack.c.bf16 %v2085_v43, %v2082_v31  ;;  %v2350_v48 = vadd.f32 %v2349_v40, %v2085_v43  ;;  %v2388_v16 = vmul.f32 %v2085_v43, %v2085_v43  ;;  %v3319_v50 = vpop.f32.mrb[81].mxu1  ;;  %v3209_v63 = vpop.f32.mrb[82].mxu0 }
 0x19d   : > { %v3208_v53 = vadd.f32 %v3207_v36, %v3206_v44  ;;  %v3320_v57 = vadd.f32 %v3319_v50, %v3318_v12  ;;  %v3321_v52 = vpop.f32.mrb[82].mxu1  ;;  %v3210_v59 = vpop.f32.mrb[83].mxu0 }
 0x19e   : > { %2929 = vst [vmem:[%s3946_s26 + $0x18] sm:$0xff] %v2865_v46   ;;  %v2419_v61 = vadd.f32 %v2418_v45, %v2388_v16  ;;  %v3211_v1 = vadd.f32 %v3210_v59, %v3209_v63  ;;  %v3322_v0 = vpop.f32.mrb[83].mxu1 }
 0x19f   : > { %v1929_v2 = vadd.f32 %v3208_v53, %v3869_v19  ;;  %v3323_v3 = vadd.f32 %v3322_v0, %v3321_v52 }
 0x1a0   : > { %v1932_v56 = vadd.f32 %v3211_v1, %v3872_v21 }
 0x1a1   : > { %v2090_v4 = vadd.f32 %v3320_v57, %v1929_v2 }
 0x1a2   : > { %v2093_v5 = vadd.f32 %v3323_v3, %v1932_v56  ;;  %v3212_v6 = vpop.f32.mrb[84].mxu0 }
 0x1a3   : > { %v2351_v7 = vadd.f32 %v2350_v48, %v2090_v4  ;;  %v2389_v8 = vmul.f32 %v2090_v4, %v2090_v4  ;;  %v3324_v15 = vpop.f32.mrb[84].mxu1  ;;  %v3213_v18 = vpop.f32.mrb[85].mxu0 }
 0x1a4   : > { %v2870_v20 = vpack.c.bf16 %v2093_v5, %v2090_v4  ;;  %v2390_v23 = vmul.f32 %v2093_v5, %v2093_v5  ;;  %v3214_v37 = vadd.f32 %v3213_v18, %v3212_v6  ;;  %v3325_v25 = vpop.f32.mrb[85].mxu1  ;;  %v3215_v41 = vpop.f32.mrb[86].mxu0 }
 0x1a5   : > { %v2420_v26 = vadd.f32 %v2419_v61, %v2389_v8  ;;  %v2352_v27 = vadd.f32 %v2351_v7, %v2093_v5  ;;  %v3326_v28 = vadd.f32 %v3325_v25, %v3324_v15  ;;  %v3327_v19 = vpop.f32.mrb[86].mxu1  ;;  %v3216_v29 = vpop.f32.mrb[87].mxu0 }
 0x1a6   : > { %2930 = vst [vmem:[%s3946_s26 + $0x20] sm:$0xff] %v2870_v20   ;;  %v1937_v21 = vadd.f32 %v3214_v37, %v3875_v35  ;;  %v3217_v31 = vadd.f32 %v3216_v29, %v3215_v41  ;;  %v3328_v34 = vpop.f32.mrb[87].mxu1 }
 0x1a7   : > { %v2421_v40 = vadd.f32 %v2420_v26, %v2390_v23  ;;  %v3329_v42 = vadd.f32 %v3328_v34, %v3327_v19 }
 0x1a8   : > { %v2098_v43 = vadd.f32 %v3326_v28, %v1937_v21  ;;  %v1940_v44 = vadd.f32 %v3217_v31, %v3878_v39 }
 0x1aa   : > { %v2353_v12 = vadd.f32 %v2352_v27, %v2098_v43  ;;  %v2391_v36 = vmul.f32 %v2098_v43, %v2098_v43  ;;  %v2101_v45 = vadd.f32 %v3329_v42, %v1940_v44  ;;  %v3218_v46 = vpop.f32.mrb[88].mxu0 }
 0x1ab   : > { %v3330_v48 = vpop.f32.mrb[88].mxu1  ;;  %v3219_v16 = vpop.f32.mrb[89].mxu0 }
 0x1ac   : > { %v2422_v50 = vadd.f32 %v2421_v40, %v2391_v36  ;;  %v2875_v63 = vpack.c.bf16 %v2101_v45, %v2098_v43  ;;  %v2354_v53 = vadd.f32 %v2353_v12, %v2101_v45  ;;  %v2392_v57 = vmul.f32 %v2101_v45, %v2101_v45  ;;  %v3331_v52 = vpop.f32.mrb[89].mxu1  ;;  %v3221_v35 = vpop.f32.mrb[90].mxu0 }
 0x1ad   : > { %v3220_v59 = vadd.f32 %v3219_v16, %v3218_v46  ;;  %v3332_v61 = vadd.f32 %v3331_v52, %v3330_v48  ;;  %v3333_v1 = vpop.f32.mrb[90].mxu1  ;;  %v3222_v0 = vpop.f32.mrb[91].mxu0 }
 0x1ae   : > { %2931 = vst [vmem:[%s3946_s26 + $0x28] sm:$0xff] %v2875_v63   ;;  %v2423_v2 = vadd.f32 %v2422_v50, %v2392_v57  ;;  %v3223_v39 = vadd.f32 %v3222_v0, %v3221_v35  ;;  %v3334_v3 = vpop.f32.mrb[91].mxu1 }
 0x1af   : > { %v1945_v56 = vadd.f32 %v3220_v59, %v3881_v55  ;;  %v3335_v4 = vadd.f32 %v3334_v3, %v3333_v1 }
 0x1b0   : > { %v1948_v5 = vadd.f32 %v3223_v39, %v3884_v58 }
 0x1b1   : > { %v2106_v6 = vadd.f32 %v3332_v61, %v1945_v56 }
 0x1b2   : > { %v2109_v7 = vadd.f32 %v3335_v4, %v1948_v5  ;;  %v3224_v8 = vpop.f32.mrb[92].mxu0 }
 0x1b3   : > { %v2355_v15 = vadd.f32 %v2354_v53, %v2106_v6  ;;  %v2393_v18 = vmul.f32 %v2106_v6, %v2106_v6  ;;  %v3336_v20 = vpop.f32.mrb[92].mxu1  ;;  %v3225_v23 = vpop.f32.mrb[93].mxu0 }
 0x1b4   : > { %v2880_v37 = vpack.c.bf16 %v2109_v7, %v2106_v6  ;;  %v2394_v25 = vmul.f32 %v2109_v7, %v2109_v7  ;;  %v3226_v41 = vadd.f32 %v3225_v23, %v3224_v8  ;;  %v3337_v26 = vpop.f32.mrb[93].mxu1  ;;  %v3227_v27 = vpop.f32.mrb[94].mxu0 }
 0x1b5   : > { %v2424_v28 = vadd.f32 %v2423_v2, %v2393_v18  ;;  %v2356_v19 = vadd.f32 %v2355_v15, %v2109_v7  ;;  %v3338_v29 = vadd.f32 %v3337_v26, %v3336_v20  ;;  %v3339_v55 = vpop.f32.mrb[94].mxu1  ;;  %v3228_v21 = vpop.f32.mrb[95].mxu0 }
 0x1b6   : > { %2932 = vst [vmem:[%s3946_s26 + $0x30] sm:$0xff] %v2880_v37   ;;  %v1953_v58 = vadd.f32 %v3226_v41, %v3887_v10  ;;  %v3229_v31 = vadd.f32 %v3228_v21, %v3227_v27  ;;  %v3340_v34 = vpop.f32.mrb[95].mxu1 }
 0x1b7   : > { %v2425_v40 = vadd.f32 %v2424_v28, %v2394_v25  ;;  %v3341_v42 = vadd.f32 %v3340_v34, %v3339_v55 }
 0x1b8   : > { %v2114_v43 = vadd.f32 %v3338_v29, %v1953_v58  ;;  %v1956_v44 = vadd.f32 %v3229_v31, %v3890_v13 }
 0x1ba   : > { %v2357_v12 = vadd.f32 %v2356_v19, %v2114_v43  ;;  %v2395_v36 = vmul.f32 %v2114_v43, %v2114_v43  ;;  %v2117_v45 = vadd.f32 %v3341_v42, %v1956_v44  ;;  %v3230_v46 = vpop.f32.mrb[96].mxu0 }
 0x1bb   : > { %v3342_v48 = vpop.f32.mrb[96].mxu1  ;;  %v3231_v16 = vpop.f32.mrb[97].mxu0 }
 0x1bc   : > { %v2426_v50 = vadd.f32 %v2425_v40, %v2395_v36  ;;  %v2885_v63 = vpack.c.bf16 %v2117_v45, %v2114_v43  ;;  %v2358_v53 = vadd.f32 %v2357_v12, %v2117_v45  ;;  %v2396_v57 = vmul.f32 %v2117_v45, %v2117_v45  ;;  %v3343_v52 = vpop.f32.mrb[97].mxu1  ;;  %v3233_v10 = vpop.f32.mrb[98].mxu0 }
 0x1bd   : > { %v3232_v35 = vadd.f32 %v3231_v16, %v3230_v46  ;;  %v3344_v59 = vadd.f32 %v3343_v52, %v3342_v48  ;;  %v3345_v61 = vpop.f32.mrb[98].mxu1  ;;  %v3234_v1 = vpop.f32.mrb[99].mxu0 }
 0x1be   : > { %2933 = vst [vmem:[%s3946_s26 + $0x38] sm:$0xff] %v2885_v63   ;;  %v2427_v0 = vadd.f32 %v2426_v50, %v2396_v57  ;;  %v3235_v13 = vadd.f32 %v3234_v1, %v3233_v10  ;;  %v3346_v2 = vpop.f32.mrb[99].mxu1 }
 0x1bf   : > { %v1961_v39 = vadd.f32 %v3232_v35, %v3893_v30  ;;  %v3347_v3 = vadd.f32 %v3346_v2, %v3345_v61 }
 0x1c0   : > { %v1964_v56 = vadd.f32 %v3235_v13, %v3896_v32 }
 0x1c1   : > { %v2122_v4 = vadd.f32 %v3344_v59, %v1961_v39 }
 0x1c2   : > { %v2125_v5 = vadd.f32 %v3347_v3, %v1964_v56  ;;  %v3236_v6 = vpop.f32.mrb[100].mxu0 }
 0x1c3   : > { %v2359_v7 = vadd.f32 %v2358_v53, %v2122_v4  ;;  %v2397_v8 = vmul.f32 %v2122_v4, %v2122_v4  ;;  %v3348_v15 = vpop.f32.mrb[100].mxu1  ;;  %v3237_v18 = vpop.f32.mrb[101].mxu0 }
 0x1c4   : > { %v2890_v20 = vpack.c.bf16 %v2125_v5, %v2122_v4  ;;  %v2398_v23 = vmul.f32 %v2125_v5, %v2125_v5  ;;  %v3238_v37 = vadd.f32 %v3237_v18, %v3236_v6  ;;  %v3349_v25 = vpop.f32.mrb[101].mxu1  ;;  %v3239_v41 = vpop.f32.mrb[102].mxu0 }
 0x1c5   : > { %v2428_v26 = vadd.f32 %v2427_v0, %v2397_v8  ;;  %v2360_v27 = vadd.f32 %v2359_v7, %v2125_v5  ;;  %v3350_v28 = vadd.f32 %v3349_v25, %v3348_v15  ;;  %v3351_v30 = vpop.f32.mrb[102].mxu1  ;;  %v3240_v19 = vpop.f32.mrb[103].mxu0 }
 0x1c6   : > { %2934 = vst [vmem:[%s3946_s26 + $0x40] sm:$0xff] %v2890_v20   ;;  %v1969_v32 = vadd.f32 %v3238_v37, %v3899_v51  ;;  %v3241_v29 = vadd.f32 %v3240_v19, %v3239_v41  ;;  %v3352_v55 = vpop.f32.mrb[103].mxu1 }
 0x1c7   : > { %v2429_v21 = vadd.f32 %v2428_v26, %v2398_v23  ;;  %v3353_v58 = vadd.f32 %v3352_v55, %v3351_v30 }
 0x1c8   : > { %v2130_v31 = vadd.f32 %v3350_v28, %v1969_v32  ;;  %v1972_v34 = vadd.f32 %v3241_v29, %v3902_v54 }
 0x1ca   : > { %v2361_v40 = vadd.f32 %v2360_v27, %v2130_v31  ;;  %v2399_v42 = vmul.f32 %v2130_v31, %v2130_v31  ;;  %v2133_v43 = vadd.f32 %v3353_v58, %v1972_v34  ;;  %v3242_v44 = vpop.f32.mrb[104].mxu0 }
 0x1cb   : > { %v3354_v12 = vpop.f32.mrb[104].mxu1  ;;  %v3243_v36 = vpop.f32.mrb[105].mxu0 }
 0x1cc   : > { %v2430_v45 = vadd.f32 %v2429_v21, %v2399_v42  ;;  %v2895_v46 = vpack.c.bf16 %v2133_v43, %v2130_v31  ;;  %v2362_v48 = vadd.f32 %v2361_v40, %v2133_v43  ;;  %v2400_v16 = vmul.f32 %v2133_v43, %v2133_v43  ;;  %v3355_v50 = vpop.f32.mrb[105].mxu1  ;;  %v3245_v51 = vpop.f32.mrb[106].mxu0 }
 0x1cd   : > { %v3244_v63 = vadd.f32 %v3243_v36, %v3242_v44  ;;  %v3356_v53 = vadd.f32 %v3355_v50, %v3354_v12  ;;  %v3357_v57 = vpop.f32.mrb[106].mxu1  ;;  %v3246_v52 = vpop.f32.mrb[107].mxu0 }
 0x1ce   : > { %2935 = vst [vmem:[%s3946_s26 + $0x48] sm:$0xff] %v2895_v46   ;;  %v2431_v10 = vadd.f32 %v2430_v45, %v2400_v16  ;;  %v3247_v54 = vadd.f32 %v3246_v52, %v3245_v51  ;;  %v3358_v35 = vpop.f32.mrb[107].mxu1 }
 0x1cf   : > { %v1977_v59 = vadd.f32 %v3244_v63, %v3905_v9  ;;  %v3359_v61 = vadd.f32 %v3358_v35, %v3357_v57 }
 0x1d0   : > { %v1980_v1 = vadd.f32 %v3247_v54, %v3908_v14 }
 0x1d1   : > { %v2138_v0 = vadd.f32 %v3356_v53, %v1977_v59 }
 0x1d2   : > { %v2141_v13 = vadd.f32 %v3359_v61, %v1980_v1  ;;  %v3248_v2 = vpop.f32.mrb[108].mxu0 }
 0x1d3   : > { %v2363_v39 = vadd.f32 %v2362_v48, %v2138_v0  ;;  %v2401_v3 = vmul.f32 %v2138_v0, %v2138_v0  ;;  %v3360_v56 = vpop.f32.mrb[108].mxu1  ;;  %v3249_v4 = vpop.f32.mrb[109].mxu0 }
 0x1d4   : > { %v2900_v5 = vpack.c.bf16 %v2141_v13, %v2138_v0  ;;  %v2402_v6 = vmul.f32 %v2141_v13, %v2141_v13  ;;  %v3250_v7 = vadd.f32 %v3249_v4, %v3248_v2  ;;  %v3361_v8 = vpop.f32.mrb[109].mxu1  ;;  %v3251_v15 = vpop.f32.mrb[110].mxu0 }
 0x1d5   : > { %v2432_v18 = vadd.f32 %v2431_v10, %v2401_v3  ;;  %v2364_v20 = vadd.f32 %v2363_v39, %v2141_v13  ;;  %v3362_v23 = vadd.f32 %v3361_v8, %v3360_v56  ;;  %v3363_v9 = vpop.f32.mrb[110].mxu1  ;;  %v3252_v37 = vpop.f32.mrb[111].mxu0 }
 0x1d6   : > { %2936 = vst [vmem:[%s3946_s26 + $0x50] sm:$0xff] %v2900_v5   ;;  %v1985_v14 = vadd.f32 %v3250_v7, %v3911_v33  ;;  %v3253_v25 = vadd.f32 %v3252_v37, %v3251_v15  ;;  %v3364_v41 = vpop.f32.mrb[111].mxu1 }
 0x1d7   : > { %v2433_v26 = vadd.f32 %v2432_v18, %v2402_v6  ;;  %v3365_v27 = vadd.f32 %v3364_v41, %v3363_v9 }
 0x1d8   : > { %v2146_v28 = vadd.f32 %v3362_v23, %v1985_v14  ;;  %v1988_v30 = vadd.f32 %v3253_v25, %v3914_v38 }
 0x1da   : > { %v2365_v19 = vadd.f32 %v2364_v20, %v2146_v28  ;;  %v2403_v32 = vmul.f32 %v2146_v28, %v2146_v28  ;;  %v2149_v29 = vadd.f32 %v3365_v27, %v1988_v30  ;;  %v3254_v55 = vpop.f32.mrb[112].mxu0 }
 0x1db   : > { %v3366_v21 = vpop.f32.mrb[112].mxu1  ;;  %v3255_v58 = vpop.f32.mrb[113].mxu0 }
 0x1dc   : > { %v2434_v31 = vadd.f32 %v2433_v26, %v2403_v32  ;;  %v2905_v34 = vpack.c.bf16 %v2149_v29, %v2146_v28  ;;  %v2366_v40 = vadd.f32 %v2365_v19, %v2149_v29  ;;  %v2404_v42 = vmul.f32 %v2149_v29, %v2149_v29  ;;  %v3367_v43 = vpop.f32.mrb[113].mxu1  ;;  %v3257_v33 = vpop.f32.mrb[114].mxu0 }
 0x1dd   : > { %v3256_v44 = vadd.f32 %v3255_v58, %v3254_v55  ;;  %v3368_v12 = vadd.f32 %v3367_v43, %v3366_v21  ;;  %v3369_v36 = vpop.f32.mrb[114].mxu1  ;;  %v3258_v45 = vpop.f32.mrb[115].mxu0 }
 0x1de   : > { %2937 = vst [vmem:[%s3946_s26 + $0x58] sm:$0xff] %v2905_v34   ;;  %v2435_v46 = vadd.f32 %v2434_v31, %v2404_v42  ;;  %v3259_v38 = vadd.f32 %v3258_v45, %v3257_v33  ;;  %v3370_v48 = vpop.f32.mrb[115].mxu1 }
 0x1df   : > { %v1993_v16 = vadd.f32 %v3256_v44, %v3917_v60  ;;  %v3371_v50 = vadd.f32 %v3370_v48, %v3369_v36 }
 0x1e0   : > { %v1996_v51 = vadd.f32 %v3259_v38, %v3920_v62 }
 0x1e1   : > { %v2154_v63 = vadd.f32 %v3368_v12, %v1993_v16 }
 0x1e2   : > { %v2157_v53 = vadd.f32 %v3371_v50, %v1996_v51  ;;  %v3260_v57 = vpop.f32.mrb[116].mxu0 }
 0x1e3   : > { %v2367_v52 = vadd.f32 %v2366_v40, %v2154_v63  ;;  %v2405_v10 = vmul.f32 %v2154_v63, %v2154_v63  ;;  %v3372_v54 = vpop.f32.mrb[116].mxu1  ;;  %v3261_v35 = vpop.f32.mrb[117].mxu0 }
 0x1e4   : > { %v2910_v59 = vpack.c.bf16 %v2157_v53, %v2154_v63  ;;  %v2406_v61 = vmul.f32 %v2157_v53, %v2157_v53  ;;  %v3262_v1 = vadd.f32 %v3261_v35, %v3260_v57  ;;  %v3373_v0 = vpop.f32.mrb[117].mxu1  ;;  %v3263_v13 = vpop.f32.mrb[118].mxu0 }
 0x1e5   : > { %v2436_v2 = vadd.f32 %v2435_v46, %v2405_v10  ;;  %v2368_v39 = vadd.f32 %v2367_v52, %v2157_v53  ;;  %v3374_v3 = vadd.f32 %v3373_v0, %v3372_v54  ;;  %v3375_v60 = vpop.f32.mrb[118].mxu1  ;;  %v3264_v56 = vpop.f32.mrb[119].mxu0 }
 0x1e6   : > { %2938 = vst [vmem:[%s3946_s26 + $0x60] sm:$0xff] %v2910_v59   ;;  %v2001_v62 = vadd.f32 %v3262_v1, %v3923_v22  ;;  %v3265_v4 = vadd.f32 %v3264_v56, %v3263_v13  ;;  %v3376_v5 = vpop.f32.mrb[119].mxu1 }
 0x1e7   : > { %v2437_v6 = vadd.f32 %v2436_v2, %v2406_v61  ;;  %v3377_v7 = vadd.f32 %v3376_v5, %v3375_v60 }
 0x1e8   : > { %v2162_v8 = vadd.f32 %v3374_v3, %v2001_v62  ;;  %v2004_v15 = vadd.f32 %v3265_v4, %v3926_v24 }
 0x1ea   : > { %v2369_v18 = vadd.f32 %v2368_v39, %v2162_v8  ;;  %v2407_v20 = vmul.f32 %v2162_v8, %v2162_v8  ;;  %v2165_v23 = vadd.f32 %v3377_v7, %v2004_v15  ;;  %v3266_v9 = vpop.f32.mrb[120].mxu0 }
 0x1eb   : > { %v3378_v37 = vpop.f32.mrb[120].mxu1  ;;  %v3267_v14 = vpop.f32.mrb[121].mxu0 }
 0x1ec   : > { %v2438_v25 = vadd.f32 %v2437_v6, %v2407_v20  ;;  %v2915_v41 = vpack.c.bf16 %v2165_v23, %v2162_v8  ;;  %v2370_v26 = vadd.f32 %v2369_v18, %v2165_v23  ;;  %v2408_v27 = vmul.f32 %v2165_v23, %v2165_v23  ;;  %v3379_v28 = vpop.f32.mrb[121].mxu1  ;;  %v3269_v22 = vpop.f32.mrb[122].mxu0 }
 0x1ed   : > { %v3268_v30 = vadd.f32 %v3267_v14, %v3266_v9  ;;  %v3380_v19 = vadd.f32 %v3379_v28, %v3378_v37  ;;  %v3381_v32 = vpop.f32.mrb[122].mxu1  ;;  %v3270_v29 = vpop.f32.mrb[123].mxu0 }
 0x1ee   : > { %2939 = vst [vmem:[%s3946_s26 + $0x68] sm:$0xff] %v2915_v41   ;;  %v2439_v55 = vadd.f32 %v2438_v25, %v2408_v27  ;;  %v3271_v24 = vadd.f32 %v3270_v29, %v3269_v22  ;;  %v3382_v21 = vpop.f32.mrb[123].mxu1 }
 0x1ef   : > { %v2009_v58 = vadd.f32 %v3268_v30, %v3929_v47  ;;  %v3383_v31 = vadd.f32 %v3382_v21, %v3381_v32 }
 0x1f0   : > { %v2012_v34 = vadd.f32 %v3271_v24, %v3932_v49 }
 0x1f1   : > { %v2170_v40 = vadd.f32 %v3380_v19, %v2009_v58 }
 0x1f2   : > { %v2173_v42 = vadd.f32 %v3383_v31, %v2012_v34  ;;  %v3272_v43 = vpop.f32.mrb[124].mxu0 }
 0x1f3   : > { %v2371_v33 = vadd.f32 %v2370_v26, %v2170_v40  ;;  %v2409_v44 = vmul.f32 %v2170_v40, %v2170_v40  ;;  %v3384_v12 = vpop.f32.mrb[124].mxu1  ;;  %v3273_v36 = vpop.f32.mrb[125].mxu0 }
 0x1f4   : > { %v2920_v45 = vpack.c.bf16 %v2173_v42, %v2170_v40  ;;  %v2410_v46 = vmul.f32 %v2173_v42, %v2173_v42  ;;  %v3274_v38 = vadd.f32 %v3273_v36, %v3272_v43  ;;  %v3385_v48 = vpop.f32.mrb[125].mxu1  ;;  %v3275_v16 = vpop.f32.mrb[126].mxu0 }
 0x1f5   : > { %v2440_v50 = vadd.f32 %v2439_v55, %v2409_v44  ;;  %v2372_v51 = vadd.f32 %v2371_v33, %v2173_v42  ;;  %v3386_v63 = vadd.f32 %v3385_v48, %v3384_v12  ;;  %v3387_v47 = vpop.f32.mrb[126].mxu1  ;;  %v3276_v53 = vpop.f32.mrb[127].mxu0 }
 0x1f6   : > { %2940 = vst [vmem:[%s3946_s26 + $0x70] sm:$0xff] %v2920_v45   ;;  %v2017_v49 = vadd.f32 %v3274_v38, %v3935_v11  ;;  %v3277_v57 = vadd.f32 %v3276_v53, %v3275_v16  ;;  %v3388_v52 = vpop.f32.mrb[127].mxu1  ;;  %v2450_v11 = vlaneseq }
 0x1f7   : > { %v2441_v10 = vadd.f32 %v2440_v50, %v2410_v46  ;;  %v3389_v54 = vadd.f32 %v3388_v52, %v3387_v47 }
 0x1f8   : > { %v2178_v35 = vadd.f32 %v3386_v63, %v2017_v49  ;;  %v2020_v59 = vadd.f32 %v3277_v57, %v3938_v17  ;;  %v2451_v7 = vshrl.u32 %v2450_v11, 7 }
 0x1fa   : > { %v2373_v61 = vadd.f32 %v2372_v51, %v2178_v35  ;;  %v2411_v1 = vmul.f32 %v2178_v35, %v2178_v35  ;;  %v2181_v0 = vadd.f32 %v3389_v54, %v2020_v59  ;;  %vm2452_vm0 = vcmp.eq.s32.totalorder %v2451_v7, 0 }
 0x1fc   : > { %v2442_v13 = vadd.f32 %v2441_v10, %v2411_v1  ;;  %v2925_v2 = vpack.c.bf16 %v2181_v0, %v2178_v35  ;;  %v2374_v39 = vadd.f32 %v2373_v61, %v2181_v0  ;;  %v2412_v3 = vmul.f32 %v2181_v0, %v2181_v0 }
 0x1fe   : > { %2941 = vst [vmem:[%s3946_s26 + $0x78] sm:$0xff] %v2925_v2   ;;  %v2375_v60 = vrot.slane %v2374_v39, 4  ;;  %v2443_v56 = vadd.f32 %v2442_v13, %v2412_v3 }
 0x200   : > { %v2376_v62 = vadd.f32 %v2375_v60, %v2374_v39  ;;  %v2444_v4 = vrot.slane %v2443_v56, 4 }
 0x202   : > { %v2377_v5 = vrot.slane %v2376_v62, 2  ;;  %v2445_v6 = vadd.f32 %v2444_v4, %v2443_v56 }
 0x204   : > { %v2378_v8 = vadd.f32 %v2377_v5, %v2376_v62  ;;  %v2446_v17 = vrot.slane %v2445_v6, 2 }
 0x206   : > { %v2379_v15 = vrot.slane %v2378_v8, 1  ;;  %v2447_v18 = vadd.f32 %v2446_v17, %v2445_v6 }
 0x208   : > { %v2380_v20 = vadd.f32 %v2379_v15, %v2378_v8  ;;  %v2448_v23 = vrot.slane %v2447_v18, 1 }
 0x20a   : > { %v2449_v9 = vadd.f32 %v2448_v23, %v2447_v18  ;;  %v2453_v37 = vsel %vm2452_vm0, %v2380_v20, 0.0 }
 0x20b   : > { %2454 = vst [vmem:[%s247_s30] sm:$0xff] %v2453_v37 }
 0x20c   : > { %v2455_v14 = vsel %vm2452_vm0, %v2449_v9, 0.0 }
 0x20d   : > { %2456 = vst [vmem:[%s251_s8] sm:$0xff] %v2455_v14 }
 0x20e PF: > { %s16_s18 = sadd.s32 1, %s3468_s18  }
 0x20f   : > { %p13_p5 = scmp.ge.s32.totalorder %s16_s18, 4  }
 0x211   :  { %15 = sbr.rel (!%p13_p5) target bundleno = 1 (0x1), region = 86 }

// kernel: discriminator_forward.7
= control target key start
LH: loop header
LB: loop body
LE: loop exit
PB: predicated region body
PF: predicated region fallthrough
CT: control target
= control target key end

     0   :  { %s5838_s1 = inlined_call_operand.vmem [shape: bf16[2048,256], index: 1, kind: input, shape index: {}]   ;;  %s5839_s0 = inlined_call_operand.vmem [shape: bf16[128,2048], index: 0, kind: input, shape index: {}]   ;;  %s5840_s2 = inlined_call_operand.vmem [shape: f32[1,256], index: 2, kind: input, shape index: {}]   ;;  %s5841_s3 = inlined_call_operand.vmem [shape: bf16[128,256], index: 3, kind: output, shape index: {0}]   ;;  %s5842_s4 = inlined_call_operand.vmem [shape: f32[8,256], index: 4, kind: output, shape index: {1}]   ;;  %s5843_s5 = inlined_call_operand.vmem [shape: f32[8,256], index: 5, kind: output, shape index: {2}]  }
   0x1   :  { %v4160_v0 = vld [vmem:[%s5838_s1 + $0x4] ss:$8 sps:$4 sm:$0xff]   ;;  %v4164_v2 = vld [vmem:[%s5838_s1] ss:$8 sps:$4 sm:$0xff]   ;;  %v4166_v4 = vld [vmem:[%s5838_s1 + $0x14] ss:$8 sps:$4 sm:$0xff]  }
   0x2   :  { %v4162_v1 = vld [vmem:[%s5838_s1 + $0x404] ss:$8 sps:$4 sm:$0xff]   ;;  %2333 = vmatprep.subr.bf16.mxu1 %v4160_v0  ;;  %v4165_v3 = vld [vmem:[%s5838_s1 + $0x400] ss:$8 sps:$4 sm:$0xff]   ;;  %v4168_v5 = vld [vmem:[%s5838_s1 + $0x414] ss:$8 sps:$4 sm:$0xff]  }
   0x3   :  { %2785 = vmatprep.subr.bf16.mxu0 %v4162_v1  ;;  %2334 = vmatpush1.bf16.msra.mxu1 %v4164_v2  ;;  %v4170_v6 = vld [vmem:[%s5838_s1 + $0x10] ss:$8 sps:$4 sm:$0xff]   ;;  %v4172_v8 = vld [vmem:[%s5838_s1 + $0x24] ss:$8 sps:$4 sm:$0xff]   ;;  %v4176_v10 = vld [vmem:[%s5838_s1 + $0x20] ss:$8 sps:$4 sm:$0xff]  }
   0x4   :  { %2786 = vmatpush1.bf16.msra.mxu0 %v4165_v3  ;;  %2335 = vmatprep.subr.bf16.mxu1 %v4166_v4  ;;  %v4171_v7 = vld [vmem:[%s5838_s1 + $0x410] ss:$8 sps:$4 sm:$0xff]   ;;  %v4174_v9 = vld [vmem:[%s5838_s1 + $0x424] ss:$8 sps:$4 sm:$0xff]   ;;  %v4177_v11 = vld [vmem:[%s5838_s1 + $0x420] ss:$8 sps:$4 sm:$0xff]  }
   0x5   :  { %2787 = vmatprep.subr.bf16.mxu0 %v4168_v5  ;;  %v4178_v12 = vld [vmem:[%s5838_s1 + $0x34] ss:$8 sps:$4 sm:$0xff]   ;;  %v4182_v14 = vld [vmem:[%s5838_s1 + $0x30] ss:$8 sps:$4 sm:$0xff]   ;;  %v4184_v16 = vld [vmem:[%s5838_s1 + $0x44] ss:$8 sps:$4 sm:$0xff]  }
   0x6   :  { %v4180_v13 = vld [vmem:[%s5838_s1 + $0x434] ss:$8 sps:$4 sm:$0xff]   ;;  %v4183_v15 = vld [vmem:[%s5838_s1 + $0x430] ss:$8 sps:$4 sm:$0xff]   ;;  %v4186_v17 = vld [vmem:[%s5838_s1 + $0x444] ss:$8 sps:$4 sm:$0xff]  }
   0x7   :  { %2336 = vmatpush1.bf16.msra.mxu1 %v4170_v6  ;;  %v4188_v18 = vld [vmem:[%s5838_s1 + $0x40] ss:$8 sps:$4 sm:$0xff]   ;;  %v4190_v20 = vld [vmem:[%s5838_s1 + $0x54] ss:$8 sps:$4 sm:$0xff]   ;;  %v4194_v22 = vld [vmem:[%s5838_s1 + $0x50] ss:$8 sps:$4 sm:$0xff]  }
   0x8   :  { %2788 = vmatpush1.bf16.msra.mxu0 %v4171_v7  ;;  %2337 = vmatprep.subr.bf16.mxu1 %v4172_v8  ;;  %v4189_v19 = vld [vmem:[%s5838_s1 + $0x440] ss:$8 sps:$4 sm:$0xff]   ;;  %v4192_v21 = vld [vmem:[%s5838_s1 + $0x454] ss:$8 sps:$4 sm:$0xff]   ;;  %v4195_v23 = vld [vmem:[%s5838_s1 + $0x450] ss:$8 sps:$4 sm:$0xff]  }
   0x9   :  { %2789 = vmatprep.subr.bf16.mxu0 %v4174_v9  ;;  %v4196_v24 = vld [vmem:[%s5838_s1 + $0x64] ss:$8 sps:$4 sm:$0xff]   ;;  %v4200_v26 = vld [vmem:[%s5838_s1 + $0x60] ss:$8 sps:$4 sm:$0xff]   ;;  %v4202_v28 = vld [vmem:[%s5838_s1 + $0x74] ss:$8 sps:$4 sm:$0xff]  }
   0xa   :  { %v4198_v25 = vld [vmem:[%s5838_s1 + $0x464] ss:$8 sps:$4 sm:$0xff]   ;;  %v4201_v27 = vld [vmem:[%s5838_s1 + $0x460] ss:$8 sps:$4 sm:$0xff]   ;;  %v4204_v29 = vld [vmem:[%s5838_s1 + $0x474] ss:$8 sps:$4 sm:$0xff]  }
   0xb   :  { %2338 = vmatpush1.bf16.msra.mxu1 %v4176_v10  ;;  %v4206_v30 = vld [vmem:[%s5838_s1 + $0x70] ss:$8 sps:$4 sm:$0xff]   ;;  %v4208_v32 = vld [vmem:[%s5838_s1 + $0x84] ss:$8 sps:$4 sm:$0xff]   ;;  %v4212_v34 = vld [vmem:[%s5838_s1 + $0x80] ss:$8 sps:$4 sm:$0xff]  }
   0xc   :  { %2790 = vmatpush1.bf16.msra.mxu0 %v4177_v11  ;;  %2339 = vmatprep.subr.bf16.mxu1 %v4178_v12  ;;  %v4207_v31 = vld [vmem:[%s5838_s1 + $0x470] ss:$8 sps:$4 sm:$0xff]   ;;  %v4210_v33 = vld [vmem:[%s5838_s1 + $0x484] ss:$8 sps:$4 sm:$0xff]   ;;  %v4213_v35 = vld [vmem:[%s5838_s1 + $0x480] ss:$8 sps:$4 sm:$0xff]  }
   0xd   :  { %2791 = vmatprep.subr.bf16.mxu0 %v4180_v13  ;;  %v4214_v36 = vld [vmem:[%s5838_s1 + $0x94] ss:$8 sps:$4 sm:$0xff]   ;;  %v4218_v38 = vld [vmem:[%s5838_s1 + $0x90] ss:$8 sps:$4 sm:$0xff]   ;;  %v4220_v40 = vld [vmem:[%s5838_s1 + $0xa4] ss:$8 sps:$4 sm:$0xff]  }
   0xe   :  { %v4216_v37 = vld [vmem:[%s5838_s1 + $0x494] ss:$8 sps:$4 sm:$0xff]   ;;  %v4219_v39 = vld [vmem:[%s5838_s1 + $0x490] ss:$8 sps:$4 sm:$0xff]   ;;  %v4222_v41 = vld [vmem:[%s5838_s1 + $0x4a4] ss:$8 sps:$4 sm:$0xff]  }
   0xf   :  { %2340 = vmatpush1.bf16.msra.mxu1 %v4182_v14  ;;  %v4224_v42 = vld [vmem:[%s5838_s1 + $0xa0] ss:$8 sps:$4 sm:$0xff]   ;;  %v4226_v44 = vld [vmem:[%s5838_s1 + $0xb4] ss:$8 sps:$4 sm:$0xff]   ;;  %v4230_v46 = vld [vmem:[%s5838_s1 + $0xb0] ss:$8 sps:$4 sm:$0xff]  }
  0x10   :  { %2792 = vmatpush1.bf16.msra.mxu0 %v4183_v15  ;;  %2341 = vmatprep.subr.bf16.mxu1 %v4184_v16  ;;  %v4225_v43 = vld [vmem:[%s5838_s1 + $0x4a0] ss:$8 sps:$4 sm:$0xff]   ;;  %v4228_v45 = vld [vmem:[%s5838_s1 + $0x4b4] ss:$8 sps:$4 sm:$0xff]   ;;  %v4231_v47 = vld [vmem:[%s5838_s1 + $0x4b0] ss:$8 sps:$4 sm:$0xff]  }
  0x11   :  { %2793 = vmatprep.subr.bf16.mxu0 %v4186_v17  ;;  %v17_v48 = vld [vmem:[%s5839_s0] sm:$0xff]  ;;  %v4238_v58 = vld [vmem:[%s5838_s1 + $0xd4] ss:$8 sps:$4 sm:$0xff]   ;;  %v4242_v60 = vld [vmem:[%s5838_s1 + $0xd0] ss:$8 sps:$4 sm:$0xff]  }
  0x12   :  { %v25_v49 = vld [vmem:[%s5839_s0 + $0x40] sm:$0xff]  ;;  %v4240_v59 = vld [vmem:[%s5838_s1 + $0x4d4] ss:$8 sps:$4 sm:$0xff]   ;;  %v4243_v61 = vld [vmem:[%s5838_s1 + $0x4d0] ss:$8 sps:$4 sm:$0xff]  }
  0x13   :  { %2342 = vmatpush1.bf16.msra.mxu1 %v4188_v18  ;;  %v21_v50 = vld [vmem:[%s5839_s0 + $0x20] sm:$0xff]  ;;  %v3489_v53 = vcombine.high %v17_v48, %v25_v49  ;;  %v4250_v2 = vld [vmem:[%s5838_s1 + $0xf4] ss:$8 sps:$4 sm:$0xff]   ;;  %v4254_v4 = vld [vmem:[%s5838_s1 + $0xf0] ss:$8 sps:$4 sm:$0xff]   ;;  %v3488_v11 = vcombine.low %v17_v48, %v25_v49 }
  0x14   :  { %2794 = vmatpush1.bf16.msra.mxu0 %v4189_v19  ;;  %2343 = vmatprep.subr.bf16.mxu1 %v4190_v20  ;;  %v29_v51 = vld [vmem:[%s5839_s0 + $0x60] sm:$0xff]  ;;  %v4252_v3 = vld [vmem:[%s5838_s1 + $0x4f4] ss:$8 sps:$4 sm:$0xff]   ;;  %v4255_v5 = vld [vmem:[%s5838_s1 + $0x4f0] ss:$8 sps:$4 sm:$0xff]  }
  0x15   :  { %2795 = vmatprep.subr.bf16.mxu0 %v4192_v21  ;;  %v4232_v52 = vld [vmem:[%s5838_s1 + $0xc4] ss:$8 sps:$4 sm:$0xff]   ;;  %v3497_v55 = vcombine.high %v21_v50, %v29_v51  ;;  %2365 = vmatprep.mubr.bf16.mxu1 %v3489_v53  ;;  %v4236_v56 = vld [vmem:[%s5838_s1 + $0xc0] ss:$8 sps:$4 sm:$0xff]   ;;  %v3496_v12 = vcombine.low %v21_v50, %v29_v51  ;;  %v4264_v16 = vld [vmem:[%s5838_s1 + $0x114] ss:$8 sps:$4 sm:$0xff]  }
  0x16   :  { %v4234_v54 = vld [vmem:[%s5838_s1 + $0x4c4] ss:$8 sps:$4 sm:$0xff]   ;;  %v4237_v57 = vld [vmem:[%s5838_s1 + $0x4c0] ss:$8 sps:$4 sm:$0xff]   ;;  %v4267_v17 = vld [vmem:[%s5838_s1 + $0x514] ss:$8 sps:$4 sm:$0xff]  }
  0x17   :  { %2344 = vmatpush1.bf16.msra.mxu1 %v4194_v22  ;;  %2817 = vmatprep.mubr.bf16.mxu0 %v3497_v55  ;;  %v4244_v62 = vld [vmem:[%s5838_s1 + $0xe4] ss:$8 sps:$4 sm:$0xff]   ;;  %v4248_v0 = vld [vmem:[%s5838_s1 + $0xe0] ss:$8 sps:$4 sm:$0xff]   ;;  %v4262_v20 = vld [vmem:[%s5838_s1 + $0x110] ss:$8 sps:$4 sm:$0xff]  }
  0x18   :  { %2796 = vmatpush1.bf16.msra.mxu0 %v4195_v23  ;;  %2345 = vmatprep.subr.bf16.mxu1 %v4196_v24  ;;  %v4246_v63 = vld [vmem:[%s5838_s1 + $0x4e4] ss:$8 sps:$4 sm:$0xff]   ;;  %v4249_v1 = vld [vmem:[%s5838_s1 + $0x4e0] ss:$8 sps:$4 sm:$0xff]   ;;  %v4265_v21 = vld [vmem:[%s5838_s1 + $0x510] ss:$8 sps:$4 sm:$0xff]  }
  0x19   :  { %2797 = vmatprep.subr.bf16.mxu0 %v4198_v25  ;;  %v4258_v6 = vld [vmem:[%s5838_s1 + $0x104] ss:$8 sps:$4 sm:$0xff]   ;;  %v4256_v8 = vld [vmem:[%s5838_s1 + $0x100] ss:$8 sps:$4 sm:$0xff]   ;;  %v4288_v48 = vld [vmem:[%s5838_s1 + $0x154] ss:$8 sps:$4 sm:$0xff]  }
  0x1a   :  { %v4261_v7 = vld [vmem:[%s5838_s1 + $0x504] ss:$8 sps:$4 sm:$0xff]   ;;  %v4259_v9 = vld [vmem:[%s5838_s1 + $0x500] ss:$8 sps:$4 sm:$0xff]   ;;  %v4291_v49 = vld [vmem:[%s5838_s1 + $0x554] ss:$8 sps:$4 sm:$0xff]  }
  0x1b   :  { %2346 = vmatpush1.bf16.msra.mxu1 %v4200_v26  ;;  %v33_v10 = vld [vmem:[%s5839_s0 + $0x80] sm:$0xff]  ;;  %v4289_v53 = vld [vmem:[%s5838_s1 + $0x550] ss:$8 sps:$4 sm:$0xff]  }
  0x1c   :  { %2798 = vmatpush1.bf16.msra.mxu0 %v4201_v27  ;;  %2347 = vmatprep.subr.bf16.mxu1 %v4202_v28  ;;  %v41_v13 = vld [vmem:[%s5839_s0 + $0xc0] sm:$0xff] }
  0x1d   :  { %2799 = vmatprep.subr.bf16.mxu0 %v4204_v29  ;;  %v37_v14 = vld [vmem:[%s5839_s0 + $0xa0] sm:$0xff]  ;;  %v3505_v18 = vcombine.high %v33_v10, %v41_v13  ;;  %v3504_v28 = vcombine.low %v33_v10, %v41_v13 }
  0x1e   :  { %v45_v15 = vld [vmem:[%s5839_s0 + $0xe0] sm:$0xff] }
  0x1f   :  { %2348 = vmatpush1.bf16.msra.mxu1 %v4206_v30  ;;  %v3513_v19 = vcombine.high %v37_v14, %v45_v15  ;;  %v4270_v22 = vld [vmem:[%s5838_s1 + $0x124] ss:$8 sps:$4 sm:$0xff]   ;;  %v4268_v24 = vld [vmem:[%s5838_s1 + $0x120] ss:$8 sps:$4 sm:$0xff]   ;;  %v3512_v29 = vcombine.low %v37_v14, %v45_v15 }
  0x20   :  { %2800 = vmatpush1.bf16.msra.mxu0 %v4207_v31  ;;  %2349 = vmatprep.subr.bf16.mxu1 %v4208_v32  ;;  %v4273_v23 = vld [vmem:[%s5838_s1 + $0x524] ss:$8 sps:$4 sm:$0xff]   ;;  %v4271_v25 = vld [vmem:[%s5838_s1 + $0x520] ss:$8 sps:$4 sm:$0xff]   ;;  %v4276_v32 = vld [vmem:[%s5838_s1 + $0x134] ss:$8 sps:$4 sm:$0xff]  }
  0x21   :  { %2801 = vmatprep.subr.bf16.mxu0 %v4210_v33  ;;  %v49_v26 = vld [vmem:[%s5839_s0 + $0x100] sm:$0xff]  ;;  %v4279_v33 = vld [vmem:[%s5838_s1 + $0x534] ss:$8 sps:$4 sm:$0xff]  }
  0x22   :  { %v57_v27 = vld [vmem:[%s5839_s0 + $0x140] sm:$0xff] }
  0x23   :  { %2350 = vmatpush1.bf16.msra.mxu1 %v4212_v34  ;;  %v53_v30 = vld [vmem:[%s5839_s0 + $0x120] sm:$0xff]  ;;  %v3521_v34 = vcombine.high %v49_v26, %v57_v27 }
  0x24   :  { %2802 = vmatpush1.bf16.msra.mxu0 %v4213_v35  ;;  %2351 = vmatprep.subr.bf16.mxu1 %v4214_v36  ;;  %v61_v31 = vld [vmem:[%s5839_s0 + $0x160] sm:$0xff]  ;;  %v4274_v36 = vld [vmem:[%s5838_s1 + $0x130] ss:$8 sps:$4 sm:$0xff]  }
  0x25   :  { %2803 = vmatprep.subr.bf16.mxu0 %v4216_v37  ;;  %v3529_v35 = vcombine.high %v53_v30, %v61_v31  ;;  %v4277_v37 = vld [vmem:[%s5838_s1 + $0x530] ss:$8 sps:$4 sm:$0xff]   ;;  %v4297_v55 = vld [vmem:[%s5838_s1 + $0x564] ss:$8 sps:$4 sm:$0xff]   ;;  %v4304_v14 = vld [vmem:[%s5838_s1 + $0x180] ss:$8 sps:$4 sm:$0xff]  }
  0x26   :  { %v109_v13 = vld [vmem:[%s5839_s0 + $0x2e0] sm:$0xff] }
  0x27   :  { %2352 = vmatpush1.bf16.msra.mxu1 %v4218_v38  ;;  %v4282_v38 = vld [vmem:[%s5838_s1 + $0x144] ss:$8 sps:$4 sm:$0xff]   ;;  %v4307_v15 = vld [vmem:[%s5838_s1 + $0x580] ss:$8 sps:$4 sm:$0xff]  }
  0x28   :  { %2804 = vmatpush1.bf16.msra.mxu0 %v4219_v39  ;;  %2353 = vmatprep.subr.bf16.mxu1 %v4220_v40  ;;  %v4285_v39 = vld [vmem:[%s5838_s1 + $0x544] ss:$8 sps:$4 sm:$0xff]   ;;  %v4280_v40 = vld [vmem:[%s5838_s1 + $0x140] ss:$8 sps:$4 sm:$0xff]  }
  0x29   :  { %2805 = vmatprep.subr.bf16.mxu0 %v4222_v41  ;;  %v4283_v41 = vld [vmem:[%s5838_s1 + $0x540] ss:$8 sps:$4 sm:$0xff]  }
  0x2b   :  { %2354 = vmatpush1.bf16.msra.mxu1 %v4224_v42  ;;  %v65_v42 = vld [vmem:[%s5839_s0 + $0x180] sm:$0xff] }
  0x2c   :  { %2806 = vmatpush1.bf16.msra.mxu0 %v4225_v43  ;;  %2355 = vmatprep.subr.bf16.mxu1 %v4226_v44  ;;  %v73_v43 = vld [vmem:[%s5839_s0 + $0x1c0] sm:$0xff]  ;;  %v3520_v44 = vcombine.low %v49_v26, %v57_v27 }
  0x2d   :  { %2807 = vmatprep.subr.bf16.mxu0 %v4228_v45  ;;  %v3528_v45 = vcombine.low %v53_v30, %v61_v31  ;;  %v3537_v50 = vcombine.high %v65_v42, %v73_v43  ;;  %v113_v26 = vld [vmem:[%s5839_s0 + $0x300] sm:$0xff] }
  0x2e   :  { %v117_v30 = vld [vmem:[%s5839_s0 + $0x320] sm:$0xff] }
  0x2f   :  { %2356 = vmatpush1.bf16.msra.mxu1 %v4230_v46  ;;  %v69_v46 = vld [vmem:[%s5839_s0 + $0x1a0] sm:$0xff] }
  0x30   :  { %2808 = vmatpush1.bf16.msra.mxu0 %v4231_v47  ;;  %2357 = vmatprep.subr.bf16.mxu1 %v4232_v52  ;;  %v77_v47 = vld [vmem:[%s5839_s0 + $0x1e0] sm:$0xff]  ;;  %v4286_v52 = vld [vmem:[%s5838_s1 + $0x150] ss:$8 sps:$4 sm:$0xff]  }
  0x31   :  { %2809 = vmatprep.subr.bf16.mxu0 %v4234_v54  ;;  %v3545_v51 = vcombine.high %v69_v46, %v77_v47  ;;  %v4294_v54 = vld [vmem:[%s5838_s1 + $0x164] ss:$8 sps:$4 sm:$0xff]  }
  0x32   :  { %v125_v31 = vld [vmem:[%s5839_s0 + $0x360] sm:$0xff] }
  0x33   :  { %2358 = vmatpush1.bf16.msra.mxu1 %v4236_v56  ;;  %v4292_v56 = vld [vmem:[%s5838_s1 + $0x160] ss:$8 sps:$4 sm:$0xff]  }
  0x34   :  { %2810 = vmatpush1.bf16.msra.mxu0 %v4237_v57  ;;  %2359 = vmatprep.subr.bf16.mxu1 %v4238_v58  ;;  %v81_v57 = vld [vmem:[%s5839_s0 + $0x200] sm:$0xff] }
  0x35   :  { %2811 = vmatprep.subr.bf16.mxu0 %v4240_v59  ;;  %v89_v58 = vld [vmem:[%s5839_s0 + $0x240] sm:$0xff]  ;;  %v3536_v59 = vcombine.low %v65_v42, %v73_v43 }
  0x36   :  { %v3552_v10 = vcombine.low %v81_v57, %v89_v58  ;;  %v129_v42 = vld [vmem:[%s5839_s0 + $0x380] sm:$0xff] }
  0x37   :  { %2360 = vmatpush1.bf16.msra.mxu1 %v4242_v60  ;;  %v3544_v60 = vcombine.low %v69_v46, %v77_v47  ;;  %v137_v43 = vld [vmem:[%s5839_s0 + $0x3c0] sm:$0xff] }
  0x38   :  { %2812 = vmatpush1.bf16.msra.mxu0 %v4243_v61  ;;  %2361 = vmatprep.subr.bf16.mxu1 %v4244_v62  ;;  %v85_v61 = vld [vmem:[%s5839_s0 + $0x220] sm:$0xff] }
  0x39   :  { %2813 = vmatprep.subr.bf16.mxu0 %v4246_v63  ;;  %v93_v62 = vld [vmem:[%s5839_s0 + $0x260] sm:$0xff] }
  0x3a   :  { %v4295_v63 = vld [vmem:[%s5838_s1 + $0x560] ss:$8 sps:$4 sm:$0xff]  }
  0x3b   :  { %2362 = vmatpush1.bf16.msra.mxu1 %v4248_v0  ;;  %v4300_v0 = vld [vmem:[%s5838_s1 + $0x174] ss:$8 sps:$4 sm:$0xff]   ;;  %v133_v46 = vld [vmem:[%s5839_s0 + $0x3a0] sm:$0xff] }
  0x3c   :  { %2814 = vmatpush1.bf16.msra.mxu0 %v4249_v1  ;;  %2363 = vmatprep.subr.bf16.mxu1 %v4250_v2  ;;  %v4303_v1 = vld [vmem:[%s5838_s1 + $0x574] ss:$8 sps:$4 sm:$0xff]   ;;  %v3553_v2 = vcombine.high %v81_v57, %v89_v58  ;;  %v141_v47 = vld [vmem:[%s5839_s0 + $0x3e0] sm:$0xff]  ;;  %v18_v58 = vld [vmem:[%s5839_s0 + $0x8] sm:$0xff] }
  0x3d   :  { %2815 = vmatprep.subr.bf16.mxu0 %v4252_v3  ;;  %v3561_v3 = vcombine.high %v85_v61, %v93_v62  ;;  %v4343_v57 = vld [vmem:[%s5838_s1 + $0x5e0] ss:$8 sps:$4 sm:$0xff]  }
  0x3f   :  { %2364 = vmatpush1.bf16.msra.mxu1 %v4254_v4  ;;  %v4298_v4 = vld [vmem:[%s5838_s1 + $0x170] ss:$8 sps:$4 sm:$0xff]  }
  0x40   :  { %2816 = vmatpush1.bf16.msra.mxu0 %v4255_v5  ;;  %2446 = vmatprep.subr.bf16.mxu1 %v4258_v6  ;;  %v4301_v5 = vld [vmem:[%s5838_s1 + $0x570] ss:$8 sps:$4 sm:$0xff]   ;;  %v4306_v6 = vld [vmem:[%s5838_s1 + $0x184] ss:$8 sps:$4 sm:$0xff]  }
  0x41   :  { %2898 = vmatprep.subr.bf16.mxu0 %v4261_v7  ;;  %v4309_v7 = vld [vmem:[%s5838_s1 + $0x584] ss:$8 sps:$4 sm:$0xff]  }
  0x42   :  { %2366 = vmatmul.mubr.bf16.vlgmr.msra.gmra.mrb[0].mxu1 %v3488_v11  ;;  %v3560_v11 = vcombine.low %v85_v61, %v93_v62  ;;  %v3608_v61 = vcombine.low %v133_v46, %v141_v47  ;;  %v22_v62 = vld [vmem:[%s5839_s0 + $0x28] sm:$0xff] }
  0x43   :  { %2818 = vmatmul.mubr.bf16.vlgmr.msra.gmra.mrb[0].mxu0 %v3496_v12  ;;  %2447 = vmatpush1.bf16.msra.mxu1 %v4256_v8  ;;  %v97_v8 = vld [vmem:[%s5839_s0 + $0x280] sm:$0xff] }
  0x44   :  { %2899 = vmatpush1.bf16.msra.mxu0 %v4259_v9  ;;  %2448 = vmatprep.subr.bf16.mxu1 %v4264_v16  ;;  %v105_v9 = vld [vmem:[%s5839_s0 + $0x2c0] sm:$0xff]  ;;  %v4312_v16 = vld [vmem:[%s5838_s1 + $0x194] ss:$8 sps:$4 sm:$0xff]  }
  0x45   :  { %2900 = vmatprep.subr.bf16.mxu0 %v4267_v17  ;;  %2375 = vmatprep.mubr.bf16.mxu1 %v3505_v18  ;;  %v101_v12 = vld [vmem:[%s5839_s0 + $0x2a0] sm:$0xff]  ;;  %v4315_v17 = vld [vmem:[%s5838_s1 + $0x594] ss:$8 sps:$4 sm:$0xff]   ;;  %v3569_v18 = vcombine.high %v97_v8, %v105_v9  ;;  %v3568_v27 = vcombine.low %v97_v8, %v105_v9  ;;  %v34_v9 = vld [vmem:[%s5839_s0 + $0x88] sm:$0xff] }
  0x46   :  { %2827 = vmatprep.mubr.bf16.mxu0 %v3513_v19  ;;  %v3577_v19 = vcombine.high %v101_v12, %v109_v13  ;;  %v4352_v8 = vld [vmem:[%s5838_s1 + $0x200] ss:$8 sps:$4 sm:$0xff]  }
  0x47   :  { %2449 = vmatpush1.bf16.msra.mxu1 %v4262_v20  ;;  %v4310_v20 = vld [vmem:[%s5838_s1 + $0x190] ss:$8 sps:$4 sm:$0xff]  }
  0x48   :  { %2901 = vmatpush1.bf16.msra.mxu0 %v4265_v21  ;;  %2450 = vmatprep.subr.bf16.mxu1 %v4270_v22  ;;  %v4313_v21 = vld [vmem:[%s5838_s1 + $0x590] ss:$8 sps:$4 sm:$0xff]   ;;  %v4318_v22 = vld [vmem:[%s5838_s1 + $0x1a4] ss:$8 sps:$4 sm:$0xff]  }
  0x49   :  { %2902 = vmatprep.subr.bf16.mxu0 %v4273_v23  ;;  %v4321_v23 = vld [vmem:[%s5838_s1 + $0x5a4] ss:$8 sps:$4 sm:$0xff]  }
  0x4a   :  { %2376 = vmatmul.mubr.bf16.gmra.mrb[4].mxu1 %v3504_v28  ;;  %v3576_v28 = vcombine.low %v101_v12, %v109_v13  ;;  %v38_v13 = vld [vmem:[%s5839_s0 + $0xa8] sm:$0xff] }
  0x4b   :  { %2828 = vmatmul.mubr.bf16.gmra.mrb[4].mxu0 %v3512_v29  ;;  %2451 = vmatpush1.bf16.msra.mxu1 %v4268_v24  ;;  %v4316_v24 = vld [vmem:[%s5838_s1 + $0x1a0] ss:$8 sps:$4 sm:$0xff]  }
  0x4c   :  { %2903 = vmatpush1.bf16.msra.mxu0 %v4271_v25  ;;  %2452 = vmatprep.subr.bf16.mxu1 %v4276_v32  ;;  %v4319_v25 = vld [vmem:[%s5838_s1 + $0x5a0] ss:$8 sps:$4 sm:$0xff]   ;;  %v4324_v32 = vld [vmem:[%s5838_s1 + $0x1b4] ss:$8 sps:$4 sm:$0xff]  }
  0x4d   :  { %2904 = vmatprep.subr.bf16.mxu0 %v4279_v33  ;;  %2385 = vmatprep.mubr.bf16.mxu1 %v3521_v34  ;;  %v121_v29 = vld [vmem:[%s5839_s0 + $0x340] sm:$0xff]  ;;  %v4327_v33 = vld [vmem:[%s5838_s1 + $0x5b4] ss:$8 sps:$4 sm:$0xff]  }
  0x4e   :  { %2837 = vmatprep.mubr.bf16.mxu0 %v3529_v35  ;;  %v3585_v34 = vcombine.high %v113_v26, %v121_v29  ;;  %v3593_v35 = vcombine.high %v117_v30, %v125_v31 }
  0x4f   :  { %2453 = vmatpush1.bf16.msra.mxu1 %v4274_v36  ;;  %v4322_v36 = vld [vmem:[%s5838_s1 + $0x1b0] ss:$8 sps:$4 sm:$0xff]  }
  0x50   :  { %2905 = vmatpush1.bf16.msra.mxu0 %v4277_v37  ;;  %2454 = vmatprep.subr.bf16.mxu1 %v4282_v38  ;;  %v4325_v37 = vld [vmem:[%s5838_s1 + $0x5b0] ss:$8 sps:$4 sm:$0xff]   ;;  %v4330_v38 = vld [vmem:[%s5838_s1 + $0x1c4] ss:$8 sps:$4 sm:$0xff]  }
  0x51   :  { %2906 = vmatprep.subr.bf16.mxu0 %v4285_v39  ;;  %v4333_v39 = vld [vmem:[%s5838_s1 + $0x5c4] ss:$8 sps:$4 sm:$0xff]  }
  0x52   :  { %2386 = vmatmul.mubr.bf16.gmra.mrb[8].mxu1 %v3520_v44  ;;  %v3584_v44 = vcombine.low %v113_v26, %v121_v29  ;;  %v62_v29 = vld [vmem:[%s5839_s0 + $0x168] sm:$0xff] }
  0x53   :  { %2838 = vmatmul.mubr.bf16.gmra.mrb[8].mxu0 %v3528_v45  ;;  %2455 = vmatpush1.bf16.msra.mxu1 %v4280_v40  ;;  %v4328_v40 = vld [vmem:[%s5838_s1 + $0x1c0] ss:$8 sps:$4 sm:$0xff]   ;;  %v3592_v45 = vcombine.low %v117_v30, %v125_v31 }
  0x54   :  { %2907 = vmatpush1.bf16.msra.mxu0 %v4283_v41  ;;  %2456 = vmatprep.subr.bf16.mxu1 %v4288_v48  ;;  %v4331_v41 = vld [vmem:[%s5838_s1 + $0x5c0] ss:$8 sps:$4 sm:$0xff]   ;;  %v4336_v48 = vld [vmem:[%s5838_s1 + $0x1d4] ss:$8 sps:$4 sm:$0xff]  }
  0x55   :  { %2908 = vmatprep.subr.bf16.mxu0 %v4291_v49  ;;  %2395 = vmatprep.mubr.bf16.mxu1 %v3537_v50  ;;  %v4339_v49 = vld [vmem:[%s5838_s1 + $0x5d4] ss:$8 sps:$4 sm:$0xff]   ;;  %v3601_v50 = vcombine.high %v129_v42, %v137_v43  ;;  %v4364_v30 = vld [vmem:[%s5838_s1 + $0x220] ss:$8 sps:$4 sm:$0xff]  }
  0x56   :  { %2847 = vmatprep.mubr.bf16.mxu0 %v3545_v51  ;;  %v3609_v51 = vcombine.high %v133_v46, %v141_v47  ;;  %v4367_v31 = vld [vmem:[%s5838_s1 + $0x620] ss:$8 sps:$4 sm:$0xff]  }
  0x57   :  { %2457 = vmatpush1.bf16.msra.mxu1 %v4286_v52  ;;  %v4334_v52 = vld [vmem:[%s5838_s1 + $0x1d0] ss:$8 sps:$4 sm:$0xff]   ;;  %v70_v46 = vld [vmem:[%s5839_s0 + $0x1a8] sm:$0xff] }
  0x58   :  { %2909 = vmatpush1.bf16.msra.mxu0 %v4289_v53  ;;  %2458 = vmatprep.subr.bf16.mxu1 %v4294_v54  ;;  %v4337_v53 = vld [vmem:[%s5838_s1 + $0x5d0] ss:$8 sps:$4 sm:$0xff]   ;;  %v4342_v54 = vld [vmem:[%s5838_s1 + $0x1e4] ss:$8 sps:$4 sm:$0xff]  }
  0x59   :  { %2910 = vmatprep.subr.bf16.mxu0 %v4297_v55  ;;  %v4345_v55 = vld [vmem:[%s5838_s1 + $0x5e4] ss:$8 sps:$4 sm:$0xff]  }
  0x5a   :  { %2396 = vmatmul.mubr.bf16.gmra.mrb[12].mxu1 %v3536_v59  ;;  %v26_v59 = vld [vmem:[%s5839_s0 + $0x48] sm:$0xff] }
  0x5b   :  { %2848 = vmatmul.mubr.bf16.gmra.mrb[12].mxu0 %v3544_v60  ;;  %2459 = vmatpush1.bf16.msra.mxu1 %v4292_v56  ;;  %v4340_v56 = vld [vmem:[%s5838_s1 + $0x1e0] ss:$8 sps:$4 sm:$0xff]   ;;  %v3600_v60 = vcombine.low %v129_v42, %v137_v43 }
  0x5c   :  { %2911 = vmatpush1.bf16.msra.mxu0 %v4295_v63  ;;  %2460 = vmatprep.subr.bf16.mxu1 %v4300_v0  ;;  %v30_v63 = vld [vmem:[%s5839_s0 + $0x68] sm:$0xff]  ;;  %v4348_v0 = vld [vmem:[%s5838_s1 + $0x1f4] ss:$8 sps:$4 sm:$0xff]  }
  0x5d   :  { %2912 = vmatprep.subr.bf16.mxu0 %v4303_v1  ;;  %2405 = vmatprep.mubr.bf16.mxu1 %v3553_v2  ;;  %v4351_v1 = vld [vmem:[%s5838_s1 + $0x5f4] ss:$8 sps:$4 sm:$0xff]   ;;  %v3491_v2 = vcombine.high %v18_v58, %v26_v59  ;;  %v3498_v12 = vcombine.low %v22_v62, %v30_v63  ;;  %v66_v42 = vld [vmem:[%s5839_s0 + $0x188] sm:$0xff] }
  0x5e   :  { %2857 = vmatprep.mubr.bf16.mxu0 %v3561_v3  ;;  %v3499_v3 = vcombine.high %v22_v62, %v30_v63  ;;  %v78_v47 = vld [vmem:[%s5839_s0 + $0x1e8] sm:$0xff] }
  0x5f   :  { %2461 = vmatpush1.bf16.msra.mxu1 %v4298_v4  ;;  %v4346_v4 = vld [vmem:[%s5838_s1 + $0x1f0] ss:$8 sps:$4 sm:$0xff]   ;;  %v86_v62 = vld [vmem:[%s5839_s0 + $0x228] sm:$0xff] }
  0x60   :  { %2913 = vmatpush1.bf16.msra.mxu0 %v4301_v5  ;;  %2462 = vmatprep.subr.bf16.mxu1 %v4306_v6  ;;  %v4349_v5 = vld [vmem:[%s5838_s1 + $0x5f0] ss:$8 sps:$4 sm:$0xff]   ;;  %v4354_v6 = vld [vmem:[%s5838_s1 + $0x204] ss:$8 sps:$4 sm:$0xff]  }
  0x61   :  { %2914 = vmatprep.subr.bf16.mxu0 %v4309_v7  ;;  %v4357_v7 = vld [vmem:[%s5838_s1 + $0x604] ss:$8 sps:$4 sm:$0xff]  }
  0x62   :  { %2406 = vmatmul.mubr.bf16.gmra.mrb[16].mxu1 %v3552_v10  ;;  %v42_v10 = vld [vmem:[%s5839_s0 + $0xc8] sm:$0xff] }
  0x63   :  { %2858 = vmatmul.mubr.bf16.gmra.mrb[16].mxu0 %v3560_v11  ;;  %2463 = vmatpush1.bf16.msra.mxu1 %v4304_v14  ;;  %v3490_v11 = vcombine.low %v18_v58, %v26_v59  ;;  %v46_v14 = vld [vmem:[%s5839_s0 + $0xe8] sm:$0xff]  ;;  %v3506_v26 = vcombine.low %v34_v9, %v42_v10 }
  0x64   :  { %2915 = vmatpush1.bf16.msra.mxu0 %v4307_v15  ;;  %2464 = vmatprep.subr.bf16.mxu1 %v4312_v16  ;;  %v4355_v15 = vld [vmem:[%s5838_s1 + $0x600] ss:$8 sps:$4 sm:$0xff]   ;;  %v4360_v16 = vld [vmem:[%s5838_s1 + $0x214] ss:$8 sps:$4 sm:$0xff]  }
  0x65   :  { %2916 = vmatprep.subr.bf16.mxu0 %v4315_v17  ;;  %2415 = vmatprep.mubr.bf16.mxu1 %v3569_v18  ;;  %v4363_v17 = vld [vmem:[%s5838_s1 + $0x614] ss:$8 sps:$4 sm:$0xff]   ;;  %v3507_v18 = vcombine.high %v34_v9, %v42_v10  ;;  %v82_v58 = vld [vmem:[%s5839_s0 + $0x208] sm:$0xff] }
  0x66   :  { %2867 = vmatprep.mubr.bf16.mxu0 %v3577_v19  ;;  %v3515_v19 = vcombine.high %v38_v13, %v46_v14  ;;  %v90_v59 = vld [vmem:[%s5839_s0 + $0x248] sm:$0xff] }
  0x67   :  { %2465 = vmatpush1.bf16.msra.mxu1 %v4310_v20  ;;  %v4358_v20 = vld [vmem:[%s5838_s1 + $0x210] ss:$8 sps:$4 sm:$0xff]   ;;  %v94_v63 = vld [vmem:[%s5839_s0 + $0x268] sm:$0xff] }
  0x68   :  { %2917 = vmatpush1.bf16.msra.mxu0 %v4313_v21  ;;  %2466 = vmatprep.subr.bf16.mxu1 %v4318_v22  ;;  %v4361_v21 = vld [vmem:[%s5838_s1 + $0x610] ss:$8 sps:$4 sm:$0xff]   ;;  %v4366_v22 = vld [vmem:[%s5838_s1 + $0x224] ss:$8 sps:$4 sm:$0xff]   ;;  %v4403_v9 = vld [vmem:[%s5838_s1 + $0x680] ss:$8 sps:$4 sm:$0xff]  }
  0x69   :  { %2918 = vmatprep.subr.bf16.mxu0 %v4321_v23  ;;  %v4369_v23 = vld [vmem:[%s5838_s1 + $0x624] ss:$8 sps:$4 sm:$0xff]  }
  0x6a   :  { %2416 = vmatmul.mubr.bf16.gmra.mrb[20].mxu1 %v3568_v27  ;;  %v3514_v27 = vcombine.low %v38_v13, %v46_v14  ;;  %v98_v10 = vld [vmem:[%s5839_s0 + $0x288] sm:$0xff]  ;;  %v3562_v13 = vcombine.low %v86_v62, %v94_v63 }
  0x6b   :  { %2868 = vmatmul.mubr.bf16.gmra.mrb[20].mxu0 %v3576_v28  ;;  %2467 = vmatpush1.bf16.msra.mxu1 %v4316_v24  ;;  %v50_v24 = vld [vmem:[%s5839_s0 + $0x108] sm:$0xff] }
  0x6c   :  { %2919 = vmatpush1.bf16.msra.mxu0 %v4319_v25  ;;  %2468 = vmatprep.subr.bf16.mxu1 %v4324_v32  ;;  %v58_v25 = vld [vmem:[%s5839_s0 + $0x148] sm:$0xff]  ;;  %v4372_v32 = vld [vmem:[%s5838_s1 + $0x234] ss:$8 sps:$4 sm:$0xff]  }
  0x6d   :  { %2920 = vmatprep.subr.bf16.mxu0 %v4327_v33  ;;  %2425 = vmatprep.mubr.bf16.mxu1 %v3585_v34  ;;  %v54_v28 = vld [vmem:[%s5839_s0 + $0x128] sm:$0xff]  ;;  %v4375_v33 = vld [vmem:[%s5838_s1 + $0x634] ss:$8 sps:$4 sm:$0xff]   ;;  %v3523_v34 = vcombine.high %v50_v24, %v58_v25  ;;  %v3522_v43 = vcombine.low %v50_v24, %v58_v25 }
  0x6e   :  { %2877 = vmatprep.mubr.bf16.mxu0 %v3593_v35  ;;  %v3531_v35 = vcombine.high %v54_v28, %v62_v29  ;;  %v102_v14 = vld [vmem:[%s5839_s0 + $0x2a8] sm:$0xff] }
  0x6f   :  { %2469 = vmatpush1.bf16.msra.mxu1 %v4322_v36  ;;  %v4370_v36 = vld [vmem:[%s5838_s1 + $0x230] ss:$8 sps:$4 sm:$0xff]   ;;  %v4412_v24 = vld [vmem:[%s5838_s1 + $0x2a0] ss:$8 sps:$4 sm:$0xff]  }
  0x70   :  { %2921 = vmatpush1.bf16.msra.mxu0 %v4325_v37  ;;  %2470 = vmatprep.subr.bf16.mxu1 %v4330_v38  ;;  %v4373_v37 = vld [vmem:[%s5838_s1 + $0x630] ss:$8 sps:$4 sm:$0xff]   ;;  %v4378_v38 = vld [vmem:[%s5838_s1 + $0x244] ss:$8 sps:$4 sm:$0xff]  }
  0x71   :  { %2922 = vmatprep.subr.bf16.mxu0 %v4333_v39  ;;  %v4381_v39 = vld [vmem:[%s5838_s1 + $0x644] ss:$8 sps:$4 sm:$0xff]  }
  0x72   :  { %2426 = vmatmul.mubr.bf16.gmra.mrb[24].mxu1 %v3584_v44  ;;  %v3530_v44 = vcombine.low %v54_v28, %v62_v29  ;;  %v114_v25 = vld [vmem:[%s5839_s0 + $0x308] sm:$0xff] }
  0x73   :  { %2878 = vmatmul.mubr.bf16.gmra.mrb[24].mxu0 %v3592_v45  ;;  %2471 = vmatpush1.bf16.msra.mxu1 %v4328_v40  ;;  %v4376_v40 = vld [vmem:[%s5838_s1 + $0x240] ss:$8 sps:$4 sm:$0xff]  }
  0x74   :  { %2923 = vmatpush1.bf16.msra.mxu0 %v4331_v41  ;;  %2472 = vmatprep.subr.bf16.mxu1 %v4336_v48  ;;  %v4379_v41 = vld [vmem:[%s5838_s1 + $0x640] ss:$8 sps:$4 sm:$0xff]   ;;  %v4384_v48 = vld [vmem:[%s5838_s1 + $0x254] ss:$8 sps:$4 sm:$0xff]  }
  0x75   :  { %2924 = vmatprep.subr.bf16.mxu0 %v4339_v49  ;;  %2435 = vmatprep.mubr.bf16.mxu1 %v3601_v50  ;;  %v74_v45 = vld [vmem:[%s5839_s0 + $0x1c8] sm:$0xff]  ;;  %v4387_v49 = vld [vmem:[%s5838_s1 + $0x654] ss:$8 sps:$4 sm:$0xff]  }
  0x76   :  { %2887 = vmatprep.mubr.bf16.mxu0 %v3609_v51  ;;  %v3539_v50 = vcombine.high %v66_v42, %v74_v45  ;;  %v3547_v51 = vcombine.high %v70_v46, %v78_v47  ;;  %v118_v29 = vld [vmem:[%s5839_s0 + $0x328] sm:$0xff] }
  0x77   :  { %2473 = vmatpush1.bf16.msra.mxu1 %v4334_v52  ;;  %v4382_v52 = vld [vmem:[%s5838_s1 + $0x250] ss:$8 sps:$4 sm:$0xff]  }
  0x78   :  { %2925 = vmatpush1.bf16.msra.mxu0 %v4337_v53  ;;  %2474 = vmatprep.subr.bf16.mxu1 %v4342_v54  ;;  %v4385_v53 = vld [vmem:[%s5838_s1 + $0x650] ss:$8 sps:$4 sm:$0xff]   ;;  %v4390_v54 = vld [vmem:[%s5838_s1 + $0x264] ss:$8 sps:$4 sm:$0xff]  }
  0x79   :  { %2926 = vmatprep.subr.bf16.mxu0 %v4345_v55  ;;  %v4393_v55 = vld [vmem:[%s5838_s1 + $0x664] ss:$8 sps:$4 sm:$0xff]  }
  0x7a   :  { %2436 = vmatmul.mubr.bf16.gmra.mrb[28].mxu1 %v3600_v60  ;;  %v3538_v60 = vcombine.low %v66_v42, %v74_v45  ;;  %v142_v45 = vld [vmem:[%s5839_s0 + $0x3e8] sm:$0xff] }
  0x7b   :  { %2888 = vmatmul.mubr.bf16.gmra.mrb[28].mxu0 %v3608_v61  ;;  %2475 = vmatpush1.bf16.msra.mxu1 %v4340_v56  ;;  %v4388_v56 = vld [vmem:[%s5838_s1 + $0x260] ss:$8 sps:$4 sm:$0xff]   ;;  %v3546_v61 = vcombine.low %v70_v46, %v78_v47 }
  0x7c   :  { %2927 = vmatpush1.bf16.msra.mxu0 %v4343_v57  ;;  %2476 = vmatprep.subr.bf16.mxu1 %v4348_v0  ;;  %v4391_v57 = vld [vmem:[%s5838_s1 + $0x660] ss:$8 sps:$4 sm:$0xff]   ;;  %v4396_v0 = vld [vmem:[%s5838_s1 + $0x274] ss:$8 sps:$4 sm:$0xff]  }
  0x7d   :  { %2928 = vmatprep.subr.bf16.mxu0 %v4351_v1  ;;  %2478 = vmatprep.mubr.bf16.mxu1 %v3491_v2  ;;  %v4399_v1 = vld [vmem:[%s5838_s1 + $0x674] ss:$8 sps:$4 sm:$0xff]   ;;  %v3555_v2 = vcombine.high %v82_v58, %v90_v59  ;;  %v4424_v46 = vld [vmem:[%s5838_s1 + $0x2c0] ss:$8 sps:$4 sm:$0xff]  }
  0x7e   :  { %2930 = vmatprep.mubr.bf16.mxu0 %v3499_v3  ;;  %v3563_v3 = vcombine.high %v86_v62, %v94_v63  ;;  %v4427_v47 = vld [vmem:[%s5838_s1 + $0x6c0] ss:$8 sps:$4 sm:$0xff]   ;;  %v23_v62 = vld [vmem:[%s5839_s0 + $0x30] sm:$0xff] }
  0x7f   :  { %2477 = vmatpush1.bf16.msra.mxu1 %v4346_v4  ;;  %v4394_v4 = vld [vmem:[%s5838_s1 + $0x270] ss:$8 sps:$4 sm:$0xff]  }
  0x80   :  { %2929 = vmatpush1.bf16.msra.mxu0 %v4349_v5  ;;  %2559 = vmatprep.subr.bf16.mxu1 %v4354_v6  ;;  %v4397_v5 = vld [vmem:[%s5838_s1 + $0x670] ss:$8 sps:$4 sm:$0xff]   ;;  %v4402_v6 = vld [vmem:[%s5838_s1 + $0x284] ss:$8 sps:$4 sm:$0xff]  }
  0x81   :  { %3011 = vmatprep.subr.bf16.mxu0 %v4357_v7  ;;  %v4405_v7 = vld [vmem:[%s5838_s1 + $0x684] ss:$8 sps:$4 sm:$0xff]   ;;  %v31_v63 = vld [vmem:[%s5839_s0 + $0x70] sm:$0xff] }
  0x82   :  { %2479 = vmatmul.mubr.bf16.vlgmr.msra.gmra.mrb[0].mxu1 %v3490_v11  ;;  %v106_v11 = vld [vmem:[%s5839_s0 + $0x2c8] sm:$0xff] }
  0x83   :  { %2931 = vmatmul.mubr.bf16.vlgmr.msra.gmra.mrb[0].mxu0 %v3498_v12  ;;  %2560 = vmatpush1.bf16.msra.mxu1 %v4352_v8  ;;  %v4400_v8 = vld [vmem:[%s5838_s1 + $0x280] ss:$8 sps:$4 sm:$0xff]   ;;  %v3554_v12 = vcombine.low %v82_v58, %v90_v59  ;;  %v19_v58 = vld [vmem:[%s5839_s0 + $0x10] sm:$0xff] }
  0x84   :  { %3012 = vmatpush1.bf16.msra.mxu0 %v4355_v15  ;;  %2561 = vmatprep.subr.bf16.mxu1 %v4360_v16  ;;  %v110_v15 = vld [vmem:[%s5839_s0 + $0x2e8] sm:$0xff]  ;;  %v4408_v16 = vld [vmem:[%s5838_s1 + $0x294] ss:$8 sps:$4 sm:$0xff]  }
  0x85   :  { %3013 = vmatprep.subr.bf16.mxu0 %v4363_v17  ;;  %2488 = vmatprep.mubr.bf16.mxu1 %v3507_v18  ;;  %v4411_v17 = vld [vmem:[%s5838_s1 + $0x694] ss:$8 sps:$4 sm:$0xff]   ;;  %v3571_v18 = vcombine.high %v98_v10, %v106_v11  ;;  %v3578_v28 = vcombine.low %v102_v14, %v110_v15 }
  0x86   :  { %2940 = vmatprep.mubr.bf16.mxu0 %v3515_v19  ;;  %v3579_v19 = vcombine.high %v102_v14, %v110_v15  ;;  %v39_v14 = vld [vmem:[%s5839_s0 + $0xb0] sm:$0xff] }
  0x87   :  { %2562 = vmatpush1.bf16.msra.mxu1 %v4358_v20  ;;  %v4406_v20 = vld [vmem:[%s5838_s1 + $0x290] ss:$8 sps:$4 sm:$0xff]  }
  0x88   :  { %3014 = vmatpush1.bf16.msra.mxu0 %v4361_v21  ;;  %2563 = vmatprep.subr.bf16.mxu1 %v4366_v22  ;;  %v4409_v21 = vld [vmem:[%s5838_s1 + $0x690] ss:$8 sps:$4 sm:$0xff]   ;;  %v4414_v22 = vld [vmem:[%s5838_s1 + $0x2a4] ss:$8 sps:$4 sm:$0xff]  }
  0x89   :  { %3015 = vmatprep.subr.bf16.mxu0 %v4369_v23  ;;  %v4417_v23 = vld [vmem:[%s5838_s1 + $0x6a4] ss:$8 sps:$4 sm:$0xff]   ;;  %v47_v15 = vld [vmem:[%s5839_s0 + $0xf0] sm:$0xff] }
  0x8a   :  { %2489 = vmatmul.mubr.bf16.gmra.mrb[4].mxu1 %v3506_v26  ;;  %v122_v26 = vld [vmem:[%s5839_s0 + $0x348] sm:$0xff] }
  0x8b   :  { %2941 = vmatmul.mubr.bf16.gmra.mrb[4].mxu0 %v3514_v27  ;;  %2564 = vmatpush1.bf16.msra.mxu1 %v4364_v30  ;;  %v3570_v27 = vcombine.low %v98_v10, %v106_v11  ;;  %v126_v30 = vld [vmem:[%s5839_s0 + $0x368] sm:$0xff]  ;;  %v3586_v42 = vcombine.low %v114_v25, %v122_v26  ;;  %v35_v10 = vld [vmem:[%s5839_s0 + $0x90] sm:$0xff] }
  0x8c   :  { %3016 = vmatpush1.bf16.msra.mxu0 %v4367_v31  ;;  %2565 = vmatprep.subr.bf16.mxu1 %v4372_v32  ;;  %v4415_v31 = vld [vmem:[%s5838_s1 + $0x6a0] ss:$8 sps:$4 sm:$0xff]   ;;  %v4420_v32 = vld [vmem:[%s5838_s1 + $0x2b4] ss:$8 sps:$4 sm:$0xff]  }
  0x8d   :  { %3017 = vmatprep.subr.bf16.mxu0 %v4375_v33  ;;  %2498 = vmatprep.mubr.bf16.mxu1 %v3523_v34  ;;  %v4423_v33 = vld [vmem:[%s5838_s1 + $0x6b4] ss:$8 sps:$4 sm:$0xff]   ;;  %v3587_v34 = vcombine.high %v114_v25, %v122_v26  ;;  %v4463_v25 = vld [vmem:[%s5838_s1 + $0x720] ss:$8 sps:$4 sm:$0xff]  }
  0x8e   :  { %2950 = vmatprep.mubr.bf16.mxu0 %v3531_v35  ;;  %v3595_v35 = vcombine.high %v118_v29, %v126_v30  ;;  %v43_v11 = vld [vmem:[%s5839_s0 + $0xd0] sm:$0xff] }
  0x8f   :  { %2566 = vmatpush1.bf16.msra.mxu1 %v4370_v36  ;;  %v4418_v36 = vld [vmem:[%s5838_s1 + $0x2b0] ss:$8 sps:$4 sm:$0xff]  }
  0x90   :  { %3018 = vmatpush1.bf16.msra.mxu0 %v4373_v37  ;;  %2567 = vmatprep.subr.bf16.mxu1 %v4378_v38  ;;  %v4421_v37 = vld [vmem:[%s5838_s1 + $0x6b0] ss:$8 sps:$4 sm:$0xff]   ;;  %v4426_v38 = vld [vmem:[%s5838_s1 + $0x2c4] ss:$8 sps:$4 sm:$0xff]  }
  0x91   :  { %3019 = vmatprep.subr.bf16.mxu0 %v4381_v39  ;;  %v4429_v39 = vld [vmem:[%s5838_s1 + $0x6c4] ss:$8 sps:$4 sm:$0xff]   ;;  %v51_v26 = vld [vmem:[%s5839_s0 + $0x110] sm:$0xff] }
  0x92   :  { %2499 = vmatmul.mubr.bf16.gmra.mrb[8].mxu1 %v3522_v43  ;;  %v3594_v43 = vcombine.low %v118_v29, %v126_v30  ;;  %v3516_v29 = vcombine.low %v39_v14, %v47_v15  ;;  %v55_v30 = vld [vmem:[%s5839_s0 + $0x130] sm:$0xff] }
  0x93   :  { %2951 = vmatmul.mubr.bf16.gmra.mrb[8].mxu0 %v3530_v44  ;;  %2568 = vmatpush1.bf16.msra.mxu1 %v4376_v40  ;;  %v130_v40 = vld [vmem:[%s5839_s0 + $0x388] sm:$0xff] }
  0x94   :  { %3020 = vmatpush1.bf16.msra.mxu0 %v4379_v41  ;;  %2569 = vmatprep.subr.bf16.mxu1 %v4384_v48  ;;  %v138_v41 = vld [vmem:[%s5839_s0 + $0x3c8] sm:$0xff]  ;;  %v4432_v48 = vld [vmem:[%s5838_s1 + $0x2d4] ss:$8 sps:$4 sm:$0xff]  }
  0x95   :  { %3021 = vmatprep.subr.bf16.mxu0 %v4387_v49  ;;  %2508 = vmatprep.mubr.bf16.mxu1 %v3539_v50  ;;  %v134_v44 = vld [vmem:[%s5839_s0 + $0x3a8] sm:$0xff]  ;;  %v4435_v49 = vld [vmem:[%s5838_s1 + $0x6d4] ss:$8 sps:$4 sm:$0xff]   ;;  %v3603_v50 = vcombine.high %v130_v40, %v138_v41  ;;  %v3602_v59 = vcombine.low %v130_v40, %v138_v41 }
  0x96   :  { %2960 = vmatprep.mubr.bf16.mxu0 %v3547_v51  ;;  %v3611_v51 = vcombine.high %v134_v44, %v142_v45  ;;  %v67_v40 = vld [vmem:[%s5839_s0 + $0x190] sm:$0xff] }
  0x97   :  { %2570 = vmatpush1.bf16.msra.mxu1 %v4382_v52  ;;  %v4430_v52 = vld [vmem:[%s5838_s1 + $0x2d0] ss:$8 sps:$4 sm:$0xff]  }
  0x98   :  { %3022 = vmatpush1.bf16.msra.mxu0 %v4385_v53  ;;  %2571 = vmatprep.subr.bf16.mxu1 %v4390_v54  ;;  %v4433_v53 = vld [vmem:[%s5838_s1 + $0x6d0] ss:$8 sps:$4 sm:$0xff]   ;;  %v4438_v54 = vld [vmem:[%s5838_s1 + $0x2e4] ss:$8 sps:$4 sm:$0xff]  }
  0x99   :  { %3023 = vmatprep.subr.bf16.mxu0 %v4393_v55  ;;  %v4441_v55 = vld [vmem:[%s5838_s1 + $0x6e4] ss:$8 sps:$4 sm:$0xff]  }
  0x9a   :  { %2509 = vmatmul.mubr.bf16.gmra.mrb[12].mxu1 %v3538_v60  ;;  %v3610_v60 = vcombine.low %v134_v44, %v142_v45  ;;  %v71_v44 = vld [vmem:[%s5839_s0 + $0x1b0] sm:$0xff] }
  0x9b   :  { %2961 = vmatmul.mubr.bf16.gmra.mrb[12].mxu0 %v3546_v61  ;;  %2572 = vmatpush1.bf16.msra.mxu1 %v4388_v56  ;;  %v4436_v56 = vld [vmem:[%s5838_s1 + $0x2e0] ss:$8 sps:$4 sm:$0xff]   ;;  %v27_v61 = vld [vmem:[%s5839_s0 + $0x50] sm:$0xff] }
  0x9c   :  { %3024 = vmatpush1.bf16.msra.mxu0 %v4391_v57  ;;  %2573 = vmatprep.subr.bf16.mxu1 %v4396_v0  ;;  %v4439_v57 = vld [vmem:[%s5838_s1 + $0x6e0] ss:$8 sps:$4 sm:$0xff]   ;;  %v4444_v0 = vld [vmem:[%s5838_s1 + $0x2f4] ss:$8 sps:$4 sm:$0xff]  }
  0x9d   :  { %3025 = vmatprep.subr.bf16.mxu0 %v4399_v1  ;;  %2518 = vmatprep.mubr.bf16.mxu1 %v3555_v2  ;;  %v4447_v1 = vld [vmem:[%s5838_s1 + $0x6f4] ss:$8 sps:$4 sm:$0xff]   ;;  %v3493_v2 = vcombine.high %v19_v58, %v27_v61 }
  0x9e   :  { %2970 = vmatprep.mubr.bf16.mxu0 %v3563_v3  ;;  %v3501_v3 = vcombine.high %v23_v62, %v31_v63  ;;  %v79_v45 = vld [vmem:[%s5839_s0 + $0x1f0] sm:$0xff] }
  0x9f   :  { %2574 = vmatpush1.bf16.msra.mxu1 %v4394_v4  ;;  %v4442_v4 = vld [vmem:[%s5838_s1 + $0x2f0] ss:$8 sps:$4 sm:$0xff]  }
  0xa0   :  { %3026 = vmatpush1.bf16.msra.mxu0 %v4397_v5  ;;  %2575 = vmatprep.subr.bf16.mxu1 %v4402_v6  ;;  %v4445_v5 = vld [vmem:[%s5838_s1 + $0x6f0] ss:$8 sps:$4 sm:$0xff]   ;;  %v4450_v6 = vld [vmem:[%s5838_s1 + $0x304] ss:$8 sps:$4 sm:$0xff]  }
  0xa1   :  { %3027 = vmatprep.subr.bf16.mxu0 %v4405_v7  ;;  %v4453_v7 = vld [vmem:[%s5838_s1 + $0x704] ss:$8 sps:$4 sm:$0xff]  }
  0xa2   :  { %2519 = vmatmul.mubr.bf16.gmra.mrb[16].mxu1 %v3554_v12  ;;  %v3492_v12 = vcombine.low %v19_v58, %v27_v61  ;;  %v3548_v58 = vcombine.low %v71_v44, %v79_v45  ;;  %v95_v61 = vld [vmem:[%s5839_s0 + $0x270] sm:$0xff] }
  0xa3   :  { %2971 = vmatmul.mubr.bf16.gmra.mrb[16].mxu0 %v3562_v13  ;;  %2576 = vmatpush1.bf16.msra.mxu1 %v4400_v8  ;;  %v4448_v8 = vld [vmem:[%s5838_s1 + $0x300] ss:$8 sps:$4 sm:$0xff]   ;;  %v3500_v13 = vcombine.low %v23_v62, %v31_v63 }
  0xa4   :  { %3028 = vmatpush1.bf16.msra.mxu0 %v4403_v9  ;;  %2577 = vmatprep.subr.bf16.mxu1 %v4408_v16  ;;  %v4451_v9 = vld [vmem:[%s5838_s1 + $0x700] ss:$8 sps:$4 sm:$0xff]   ;;  %v4456_v16 = vld [vmem:[%s5838_s1 + $0x314] ss:$8 sps:$4 sm:$0xff]  }
  0xa5   :  { %3029 = vmatprep.subr.bf16.mxu0 %v4411_v17  ;;  %2528 = vmatprep.mubr.bf16.mxu1 %v3571_v18  ;;  %v4459_v17 = vld [vmem:[%s5838_s1 + $0x714] ss:$8 sps:$4 sm:$0xff]   ;;  %v3509_v18 = vcombine.high %v35_v10, %v43_v11  ;;  %v4484_v62 = vld [vmem:[%s5838_s1 + $0x360] ss:$8 sps:$4 sm:$0xff]  }
  0xa6   :  { %2980 = vmatprep.mubr.bf16.mxu0 %v3579_v19  ;;  %v3517_v19 = vcombine.high %v39_v14, %v47_v15  ;;  %v4487_v63 = vld [vmem:[%s5838_s1 + $0x760] ss:$8 sps:$4 sm:$0xff]  }
  0xa7   :  { %2578 = vmatpush1.bf16.msra.mxu1 %v4406_v20  ;;  %v4454_v20 = vld [vmem:[%s5838_s1 + $0x310] ss:$8 sps:$4 sm:$0xff]   ;;  %v4496_v14 = vld [vmem:[%s5838_s1 + $0x380] ss:$8 sps:$4 sm:$0xff]  }
  0xa8   :  { %3030 = vmatpush1.bf16.msra.mxu0 %v4409_v21  ;;  %2579 = vmatprep.subr.bf16.mxu1 %v4414_v22  ;;  %v4457_v21 = vld [vmem:[%s5838_s1 + $0x710] ss:$8 sps:$4 sm:$0xff]   ;;  %v4462_v22 = vld [vmem:[%s5838_s1 + $0x324] ss:$8 sps:$4 sm:$0xff]   ;;  %v4499_v15 = vld [vmem:[%s5838_s1 + $0x780] ss:$8 sps:$4 sm:$0xff]  }
  0xa9   :  { %3031 = vmatprep.subr.bf16.mxu0 %v4417_v23  ;;  %v4465_v23 = vld [vmem:[%s5838_s1 + $0x724] ss:$8 sps:$4 sm:$0xff]  }
  0xaa   :  { %2529 = vmatmul.mubr.bf16.gmra.mrb[20].mxu1 %v3570_v27  ;;  %v59_v27 = vld [vmem:[%s5839_s0 + $0x150] sm:$0xff] }
  0xab   :  { %2981 = vmatmul.mubr.bf16.gmra.mrb[20].mxu0 %v3578_v28  ;;  %2580 = vmatpush1.bf16.msra.mxu1 %v4412_v24  ;;  %v4460_v24 = vld [vmem:[%s5838_s1 + $0x320] ss:$8 sps:$4 sm:$0xff]   ;;  %v3508_v28 = vcombine.low %v35_v10, %v43_v11  ;;  %v3524_v41 = vcombine.low %v51_v26, %v59_v27  ;;  %v107_v11 = vld [vmem:[%s5839_s0 + $0x2d0] sm:$0xff] }
  0xac   :  { %3032 = vmatpush1.bf16.msra.mxu0 %v4415_v31  ;;  %2581 = vmatprep.subr.bf16.mxu1 %v4420_v32  ;;  %v63_v31 = vld [vmem:[%s5839_s0 + $0x170] sm:$0xff] }
  0xad   :  { %3033 = vmatprep.subr.bf16.mxu0 %v4423_v33  ;;  %2538 = vmatprep.mubr.bf16.mxu1 %v3587_v34  ;;  %v4468_v32 = vld [vmem:[%s5838_s1 + $0x334] ss:$8 sps:$4 sm:$0xff]   ;;  %v3525_v34 = vcombine.high %v51_v26, %v59_v27 }
  0xae   :  { %2990 = vmatprep.mubr.bf16.mxu0 %v3595_v35  ;;  %v4471_v33 = vld [vmem:[%s5838_s1 + $0x734] ss:$8 sps:$4 sm:$0xff]   ;;  %v3533_v35 = vcombine.high %v55_v30, %v63_v31 }
  0xaf   :  { %2582 = vmatpush1.bf16.msra.mxu1 %v4418_v36  ;;  %v4466_v36 = vld [vmem:[%s5838_s1 + $0x330] ss:$8 sps:$4 sm:$0xff]  }
  0xb0   :  { %3034 = vmatpush1.bf16.msra.mxu0 %v4421_v37  ;;  %2583 = vmatprep.subr.bf16.mxu1 %v4426_v38  ;;  %v4469_v37 = vld [vmem:[%s5838_s1 + $0x730] ss:$8 sps:$4 sm:$0xff]   ;;  %v4474_v38 = vld [vmem:[%s5838_s1 + $0x344] ss:$8 sps:$4 sm:$0xff]  }
  0xb1   :  { %3035 = vmatprep.subr.bf16.mxu0 %v4429_v39  ;;  %v4477_v39 = vld [vmem:[%s5838_s1 + $0x744] ss:$8 sps:$4 sm:$0xff]   ;;  %v123_v27 = vld [vmem:[%s5839_s0 + $0x350] sm:$0xff] }
  0xb2   :  { %2539 = vmatmul.mubr.bf16.gmra.mrb[24].mxu1 %v3586_v42  ;;  %v3532_v42 = vcombine.low %v55_v30, %v63_v31  ;;  %v4508_v30 = vld [vmem:[%s5838_s1 + $0x3a0] ss:$8 sps:$4 sm:$0xff]  }
  0xb3   :  { %2991 = vmatmul.mubr.bf16.gmra.mrb[24].mxu0 %v3594_v43  ;;  %2584 = vmatpush1.bf16.msra.mxu1 %v4424_v46  ;;  %v75_v43 = vld [vmem:[%s5839_s0 + $0x1d0] sm:$0xff]  ;;  %v4472_v46 = vld [vmem:[%s5838_s1 + $0x340] ss:$8 sps:$4 sm:$0xff]  }
  0xb4   :  { %3036 = vmatpush1.bf16.msra.mxu0 %v4427_v47  ;;  %2585 = vmatprep.subr.bf16.mxu1 %v4432_v48  ;;  %v4475_v47 = vld [vmem:[%s5838_s1 + $0x740] ss:$8 sps:$4 sm:$0xff]   ;;  %v4480_v48 = vld [vmem:[%s5838_s1 + $0x354] ss:$8 sps:$4 sm:$0xff]  }
  0xb5   :  { %3037 = vmatprep.subr.bf16.mxu0 %v4435_v49  ;;  %2548 = vmatprep.mubr.bf16.mxu1 %v3603_v50  ;;  %v4483_v49 = vld [vmem:[%s5838_s1 + $0x754] ss:$8 sps:$4 sm:$0xff]   ;;  %v3541_v50 = vcombine.high %v67_v40, %v75_v43  ;;  %v4511_v31 = vld [vmem:[%s5838_s1 + $0x7a0] ss:$8 sps:$4 sm:$0xff]  }
  0xb6   :  { %3000 = vmatprep.mubr.bf16.mxu0 %v3611_v51  ;;  %v3549_v51 = vcombine.high %v71_v44, %v79_v45  ;;  %v135_v44 = vld [vmem:[%s5839_s0 + $0x3b0] sm:$0xff] }
  0xb7   :  { %2586 = vmatpush1.bf16.msra.mxu1 %v4430_v52  ;;  %v4478_v52 = vld [vmem:[%s5838_s1 + $0x350] ss:$8 sps:$4 sm:$0xff]  }
  0xb8   :  { %3038 = vmatpush1.bf16.msra.mxu0 %v4433_v53  ;;  %2587 = vmatprep.subr.bf16.mxu1 %v4438_v54  ;;  %v4481_v53 = vld [vmem:[%s5838_s1 + $0x750] ss:$8 sps:$4 sm:$0xff]   ;;  %v4486_v54 = vld [vmem:[%s5838_s1 + $0x364] ss:$8 sps:$4 sm:$0xff]  }
  0xb9   :  { %3039 = vmatprep.subr.bf16.mxu0 %v4441_v55  ;;  %v4489_v55 = vld [vmem:[%s5838_s1 + $0x764] ss:$8 sps:$4 sm:$0xff]   ;;  %v143_v45 = vld [vmem:[%s5839_s0 + $0x3f0] sm:$0xff] }
  0xba   :  { %2549 = vmatmul.mubr.bf16.gmra.mrb[28].mxu1 %v3602_v59  ;;  %v91_v59 = vld [vmem:[%s5839_s0 + $0x250] sm:$0xff] }
  0xbb   :  { %3001 = vmatmul.mubr.bf16.gmra.mrb[28].mxu0 %v3610_v60  ;;  %2588 = vmatpush1.bf16.msra.mxu1 %v4436_v56  ;;  %v83_v56 = vld [vmem:[%s5839_s0 + $0x210] sm:$0xff] }
  0xbc   :  { %3040 = vmatpush1.bf16.msra.mxu0 %v4439_v57  ;;  %2589 = vmatprep.subr.bf16.mxu1 %v4444_v0  ;;  %v3540_v57 = vcombine.low %v67_v40, %v75_v43  ;;  %v87_v60 = vld [vmem:[%s5839_s0 + $0x230] sm:$0xff] }
  0xbd   :  { %3041 = vmatprep.subr.bf16.mxu0 %v4447_v1  ;;  %2591 = vmatprep.mubr.bf16.mxu1 %v3493_v2  ;;  %v4492_v0 = vld [vmem:[%s5838_s1 + $0x374] ss:$8 sps:$4 sm:$0xff]   ;;  %v3557_v2 = vcombine.high %v83_v56, %v91_v59  ;;  %v3564_v10 = vcombine.low %v87_v60, %v95_v61 }
  0xbe   :  { %3043 = vmatprep.mubr.bf16.mxu0 %v3501_v3  ;;  %v4495_v1 = vld [vmem:[%s5838_s1 + $0x774] ss:$8 sps:$4 sm:$0xff]   ;;  %v3565_v3 = vcombine.high %v87_v60, %v95_v61 }
  0xbf   :  { %2590 = vmatpush1.bf16.msra.mxu1 %v4442_v4  ;;  %v4490_v4 = vld [vmem:[%s5838_s1 + $0x370] ss:$8 sps:$4 sm:$0xff]  }
  0xc0   :  { %3042 = vmatpush1.bf16.msra.mxu0 %v4445_v5  ;;  %2672 = vmatprep.subr.bf16.mxu1 %v4450_v6  ;;  %v4493_v5 = vld [vmem:[%s5838_s1 + $0x770] ss:$8 sps:$4 sm:$0xff]   ;;  %v4498_v6 = vld [vmem:[%s5838_s1 + $0x384] ss:$8 sps:$4 sm:$0xff]  }
  0xc1   :  { %3124 = vmatprep.subr.bf16.mxu0 %v4453_v7  ;;  %v4501_v7 = vld [vmem:[%s5838_s1 + $0x784] ss:$8 sps:$4 sm:$0xff]   ;;  %v131_v40 = vld [vmem:[%s5839_s0 + $0x390] sm:$0xff]  ;;  %v24_v60 = vld [vmem:[%s5839_s0 + $0x38] sm:$0xff] }
  0xc2   :  { %2592 = vmatmul.mubr.bf16.vlgmr.msra.gmra.mrb[0].mxu1 %v3492_v12  ;;  %v103_v12 = vld [vmem:[%s5839_s0 + $0x2b0] sm:$0xff]  ;;  %v32_v61 = vld [vmem:[%s5839_s0 + $0x78] sm:$0xff] }
  0xc3   :  { %3044 = vmatmul.mubr.bf16.vlgmr.msra.gmra.mrb[0].mxu0 %v3500_v13  ;;  %2673 = vmatpush1.bf16.msra.mxu1 %v4448_v8  ;;  %v99_v8 = vld [vmem:[%s5839_s0 + $0x290] sm:$0xff] }
  0xc4   :  { %3125 = vmatpush1.bf16.msra.mxu0 %v4451_v9  ;;  %2674 = vmatprep.subr.bf16.mxu1 %v4456_v16  ;;  %v3556_v9 = vcombine.low %v83_v56, %v91_v59  ;;  %v111_v13 = vld [vmem:[%s5839_s0 + $0x2f0] sm:$0xff]  ;;  %v20_v56 = vld [vmem:[%s5839_s0 + $0x18] sm:$0xff] }
  0xc5   :  { %3126 = vmatprep.subr.bf16.mxu0 %v4459_v17  ;;  %2601 = vmatprep.mubr.bf16.mxu1 %v3509_v18  ;;  %v4504_v16 = vld [vmem:[%s5838_s1 + $0x394] ss:$8 sps:$4 sm:$0xff]   ;;  %v3573_v18 = vcombine.high %v99_v8, %v107_v11  ;;  %v3580_v26 = vcombine.low %v103_v12, %v111_v13 }
  0xc6   :  { %3053 = vmatprep.mubr.bf16.mxu0 %v3517_v19  ;;  %v4507_v17 = vld [vmem:[%s5838_s1 + $0x794] ss:$8 sps:$4 sm:$0xff]   ;;  %v3581_v19 = vcombine.high %v103_v12, %v111_v13 }
  0xc7   :  { %2675 = vmatpush1.bf16.msra.mxu1 %v4454_v20  ;;  %v4502_v20 = vld [vmem:[%s5838_s1 + $0x390] ss:$8 sps:$4 sm:$0xff]  }
  0xc8   :  { %3127 = vmatpush1.bf16.msra.mxu0 %v4457_v21  ;;  %2676 = vmatprep.subr.bf16.mxu1 %v4462_v22  ;;  %v4505_v21 = vld [vmem:[%s5838_s1 + $0x790] ss:$8 sps:$4 sm:$0xff]   ;;  %v4510_v22 = vld [vmem:[%s5838_s1 + $0x3a4] ss:$8 sps:$4 sm:$0xff]  }
  0xc9   :  { %3128 = vmatprep.subr.bf16.mxu0 %v4465_v23  ;;  %v4513_v23 = vld [vmem:[%s5838_s1 + $0x7a4] ss:$8 sps:$4 sm:$0xff]   ;;  %v139_v43 = vld [vmem:[%s5839_s0 + $0x3d0] sm:$0xff]  ;;  %v28_v59 = vld [vmem:[%s5839_s0 + $0x58] sm:$0xff] }
  0xca   :  { %2602 = vmatmul.mubr.bf16.gmra.mrb[4].mxu1 %v3508_v28  ;;  %v119_v28 = vld [vmem:[%s5839_s0 + $0x330] sm:$0xff] }
  0xcb   :  { %3054 = vmatmul.mubr.bf16.gmra.mrb[4].mxu0 %v3516_v29  ;;  %2677 = vmatpush1.bf16.msra.mxu1 %v4460_v24  ;;  %v115_v24 = vld [vmem:[%s5839_s0 + $0x310] sm:$0xff] }
  0xcc   :  { %3129 = vmatpush1.bf16.msra.mxu0 %v4463_v25  ;;  %2678 = vmatprep.subr.bf16.mxu1 %v4468_v32  ;;  %v3572_v25 = vcombine.low %v99_v8, %v107_v11  ;;  %v127_v29 = vld [vmem:[%s5839_s0 + $0x370] sm:$0xff]  ;;  %v40_v8 = vld [vmem:[%s5839_s0 + $0xb8] sm:$0xff]  ;;  %v3502_v11 = vcombine.low %v24_v60, %v32_v61 }
  0xcd   :  { %3130 = vmatprep.subr.bf16.mxu0 %v4471_v33  ;;  %2611 = vmatprep.mubr.bf16.mxu1 %v3525_v34  ;;  %v4516_v32 = vld [vmem:[%s5838_s1 + $0x3b4] ss:$8 sps:$4 sm:$0xff]   ;;  %v3589_v34 = vcombine.high %v115_v24, %v123_v27 }
  0xce   :  { %3063 = vmatprep.mubr.bf16.mxu0 %v3533_v35  ;;  %v4519_v33 = vld [vmem:[%s5838_s1 + $0x7b4] ss:$8 sps:$4 sm:$0xff]   ;;  %v3597_v35 = vcombine.high %v119_v28, %v127_v29 }
  0xcf   :  { %2679 = vmatpush1.bf16.msra.mxu1 %v4466_v36  ;;  %v4514_v36 = vld [vmem:[%s5838_s1 + $0x3b0] ss:$8 sps:$4 sm:$0xff]  }
  0xd0   :  { %3131 = vmatpush1.bf16.msra.mxu0 %v4469_v37  ;;  %2680 = vmatprep.subr.bf16.mxu1 %v4474_v38  ;;  %v4517_v37 = vld [vmem:[%s5838_s1 + $0x7b0] ss:$8 sps:$4 sm:$0xff]   ;;  %v4522_v38 = vld [vmem:[%s5838_s1 + $0x3c4] ss:$8 sps:$4 sm:$0xff]  }
  0xd1   :  { %3132 = vmatprep.subr.bf16.mxu0 %v4477_v39  ;;  %v4525_v39 = vld [vmem:[%s5838_s1 + $0x7c4] ss:$8 sps:$4 sm:$0xff]  }
  0xd2   :  { %2612 = vmatmul.mubr.bf16.gmra.mrb[8].mxu1 %v3524_v41  ;;  %v3588_v41 = vcombine.low %v115_v24, %v123_v27  ;;  %v72_v24 = vld [vmem:[%s5839_s0 + $0x1b8] sm:$0xff] }
  0xd3   :  { %3064 = vmatmul.mubr.bf16.gmra.mrb[8].mxu0 %v3532_v42  ;;  %2681 = vmatpush1.bf16.msra.mxu1 %v4472_v46  ;;  %v3596_v42 = vcombine.low %v119_v28, %v127_v29  ;;  %v4520_v46 = vld [vmem:[%s5838_s1 + $0x3c0] ss:$8 sps:$4 sm:$0xff]  }
  0xd4   :  { %3133 = vmatpush1.bf16.msra.mxu0 %v4475_v47  ;;  %2682 = vmatprep.subr.bf16.mxu1 %v4480_v48  ;;  %v4523_v47 = vld [vmem:[%s5838_s1 + $0x7c0] ss:$8 sps:$4 sm:$0xff]   ;;  %v4528_v48 = vld [vmem:[%s5838_s1 + $0x3d4] ss:$8 sps:$4 sm:$0xff]  }
  0xd5   :  { %3134 = vmatprep.subr.bf16.mxu0 %v4483_v49  ;;  %2621 = vmatprep.mubr.bf16.mxu1 %v3541_v50  ;;  %v4531_v49 = vld [vmem:[%s5838_s1 + $0x7d4] ss:$8 sps:$4 sm:$0xff]   ;;  %v3605_v50 = vcombine.high %v131_v40, %v139_v43 }
  0xd6   :  { %3073 = vmatprep.mubr.bf16.mxu0 %v3549_v51  ;;  %v3613_v51 = vcombine.high %v135_v44, %v143_v45 }
  0xd7   :  { %2683 = vmatpush1.bf16.msra.mxu1 %v4478_v52  ;;  %v4526_v52 = vld [vmem:[%s5838_s1 + $0x3d0] ss:$8 sps:$4 sm:$0xff]  }
  0xd8   :  { %3135 = vmatpush1.bf16.msra.mxu0 %v4481_v53  ;;  %2684 = vmatprep.subr.bf16.mxu1 %v4486_v54  ;;  %v4529_v53 = vld [vmem:[%s5838_s1 + $0x7d0] ss:$8 sps:$4 sm:$0xff]   ;;  %v4534_v54 = vld [vmem:[%s5838_s1 + $0x3e4] ss:$8 sps:$4 sm:$0xff]  }
  0xd9   :  { %3136 = vmatprep.subr.bf16.mxu0 %v4489_v55  ;;  %v4537_v55 = vld [vmem:[%s5838_s1 + $0x7e4] ss:$8 sps:$4 sm:$0xff]  }
  0xda   :  { %2622 = vmatmul.mubr.bf16.gmra.mrb[12].mxu1 %v3540_v57  ;;  %v3604_v57 = vcombine.low %v131_v40, %v139_v43  ;;  %v104_v40 = vld [vmem:[%s5839_s0 + $0x2b8] sm:$0xff] }
  0xdb   :  { %3074 = vmatmul.mubr.bf16.gmra.mrb[12].mxu0 %v3548_v58  ;;  %2685 = vmatpush1.bf16.msra.mxu1 %v4484_v62  ;;  %v3612_v58 = vcombine.low %v135_v44, %v143_v45  ;;  %v4532_v62 = vld [vmem:[%s5838_s1 + $0x3e0] ss:$8 sps:$4 sm:$0xff]  }
  0xdc   :  { %3137 = vmatpush1.bf16.msra.mxu0 %v4487_v63  ;;  %2686 = vmatprep.subr.bf16.mxu1 %v4492_v0  ;;  %v4535_v63 = vld [vmem:[%s5838_s1 + $0x7e0] ss:$8 sps:$4 sm:$0xff]   ;;  %v4540_v0 = vld [vmem:[%s5838_s1 + $0x3f4] ss:$8 sps:$4 sm:$0xff]  }
  0xdd   :  { %3138 = vmatprep.subr.bf16.mxu0 %v4495_v1  ;;  %2631 = vmatprep.mubr.bf16.mxu1 %v3557_v2  ;;  %v4543_v1 = vld [vmem:[%s5838_s1 + $0x7f4] ss:$8 sps:$4 sm:$0xff]   ;;  %v3495_v2 = vcombine.high %v20_v56, %v28_v59 }
  0xde   :  { %3083 = vmatprep.mubr.bf16.mxu0 %v3565_v3  ;;  %v3503_v3 = vcombine.high %v24_v60, %v32_v61 }
  0xdf   :  { %2687 = vmatpush1.bf16.msra.mxu1 %v4490_v4  ;;  %v4538_v4 = vld [vmem:[%s5838_s1 + $0x3f0] ss:$8 sps:$4 sm:$0xff]  }
  0xe0   :  { %3139 = vmatpush1.bf16.msra.mxu0 %v4493_v5  ;;  %2688 = vmatprep.subr.bf16.mxu1 %v4498_v6  ;;  %v4541_v5 = vld [vmem:[%s5838_s1 + $0x7f0] ss:$8 sps:$4 sm:$0xff]  }
  0xe1   :  { %3140 = vmatprep.subr.bf16.mxu0 %v4501_v7  ;;  %v36_v6 = vld [vmem:[%s5839_s0 + $0x98] sm:$0xff] }
  0xe2   :  { %2632 = vmatmul.mubr.bf16.gmra.mrb[16].mxu1 %v3556_v9  ;;  %v44_v7 = vld [vmem:[%s5839_s0 + $0xd8] sm:$0xff] }
  0xe3   :  { %3084 = vmatmul.mubr.bf16.gmra.mrb[16].mxu0 %v3564_v10  ;;  %2689 = vmatpush1.bf16.msra.mxu1 %v4496_v14  ;;  %v48_v9 = vld [vmem:[%s5839_s0 + $0xf8] sm:$0xff]  ;;  %v3494_v10 = vcombine.low %v20_v56, %v28_v59  ;;  %v3511_v12 = vcombine.high %v36_v6, %v44_v7 }
  0xe4   :  { %3141 = vmatpush1.bf16.msra.mxu0 %v4499_v15  ;;  %2690 = vmatprep.subr.bf16.mxu1 %v4504_v16  ;;  %v3519_v13 = vcombine.high %v40_v8, %v48_v9  ;;  %v52_v14 = vld [vmem:[%s5839_s0 + $0x118] sm:$0xff] }
  0xe5   :  { %3142 = vmatprep.subr.bf16.mxu0 %v4507_v17  ;;  %2641 = vmatprep.mubr.bf16.mxu1 %v3573_v18  ;;  %v60_v15 = vld [vmem:[%s5839_s0 + $0x158] sm:$0xff]  ;;  %v3510_v18 = vcombine.low %v36_v6, %v44_v7 }
  0xe6   :  { %3093 = vmatprep.mubr.bf16.mxu0 %v3581_v19  ;;  %v56_v16 = vld [vmem:[%s5839_s0 + $0x138] sm:$0xff]  ;;  %v3518_v19 = vcombine.low %v40_v8, %v48_v9 }
  0xe7   :  { %2691 = vmatpush1.bf16.msra.mxu1 %v4502_v20  ;;  %v64_v17 = vld [vmem:[%s5839_s0 + $0x178] sm:$0xff]  ;;  %v3527_v20 = vcombine.high %v52_v14, %v60_v15 }
  0xe8   :  { %3143 = vmatpush1.bf16.msra.mxu0 %v4505_v21  ;;  %2692 = vmatprep.subr.bf16.mxu1 %v4510_v22  ;;  %v3535_v21 = vcombine.high %v56_v16, %v64_v17  ;;  %v68_v22 = vld [vmem:[%s5839_s0 + $0x198] sm:$0xff]  ;;  %v3534_v27 = vcombine.low %v56_v16, %v64_v17 }
  0xe9   :  { %3144 = vmatprep.subr.bf16.mxu0 %v4513_v23  ;;  %v76_v23 = vld [vmem:[%s5839_s0 + $0x1d8] sm:$0xff] }
  0xea   :  { %2642 = vmatmul.mubr.bf16.gmra.mrb[20].mxu1 %v3572_v25  ;;  %v80_v25 = vld [vmem:[%s5839_s0 + $0x1f8] sm:$0xff]  ;;  %v3543_v28 = vcombine.high %v68_v22, %v76_v23 }
  0xeb   :  { %3094 = vmatmul.mubr.bf16.gmra.mrb[20].mxu0 %v3580_v26  ;;  %2693 = vmatpush1.bf16.msra.mxu1 %v4508_v30  ;;  %v3526_v26 = vcombine.low %v52_v14, %v60_v15  ;;  %v3551_v29 = vcombine.high %v72_v24, %v80_v25  ;;  %v84_v30 = vld [vmem:[%s5839_s0 + $0x218] sm:$0xff] }
  0xec   :  { %3145 = vmatpush1.bf16.msra.mxu0 %v4511_v31  ;;  %2694 = vmatprep.subr.bf16.mxu1 %v4516_v32  ;;  %v92_v31 = vld [vmem:[%s5839_s0 + $0x258] sm:$0xff] }
  0xed   :  { %3146 = vmatprep.subr.bf16.mxu0 %v4519_v33  ;;  %2651 = vmatprep.mubr.bf16.mxu1 %v3589_v34  ;;  %v88_v32 = vld [vmem:[%s5839_s0 + $0x238] sm:$0xff]  ;;  %v3542_v34 = vcombine.low %v68_v22, %v76_v23 }
  0xee   :  { %3103 = vmatprep.mubr.bf16.mxu0 %v3597_v35  ;;  %v96_v33 = vld [vmem:[%s5839_s0 + $0x278] sm:$0xff]  ;;  %v3550_v35 = vcombine.low %v72_v24, %v80_v25 }
  0xef   :  { %2695 = vmatpush1.bf16.msra.mxu1 %v4514_v36  ;;  %v3559_v36 = vcombine.high %v84_v30, %v92_v31  ;;  %v3566_v43 = vcombine.low %v88_v32, %v96_v33  ;;  %v136_v56 = vld [vmem:[%s5839_s0 + $0x3b8] sm:$0xff] }
  0xf0   :  { %3147 = vmatpush1.bf16.msra.mxu0 %v4517_v37  ;;  %2696 = vmatprep.subr.bf16.mxu1 %v4522_v38  ;;  %v3567_v37 = vcombine.high %v88_v32, %v96_v33  ;;  %v100_v38 = vld [vmem:[%s5839_s0 + $0x298] sm:$0xff] }
  0xf1   :  { %3148 = vmatprep.subr.bf16.mxu0 %v4525_v39  ;;  %v108_v39 = vld [vmem:[%s5839_s0 + $0x2d8] sm:$0xff] }
  0xf2   :  { %2652 = vmatmul.mubr.bf16.gmra.mrb[24].mxu1 %v3588_v41  ;;  %v112_v41 = vld [vmem:[%s5839_s0 + $0x2f8] sm:$0xff]  ;;  %v3575_v44 = vcombine.high %v100_v38, %v108_v39 }
  0xf3   :  { %3104 = vmatmul.mubr.bf16.gmra.mrb[24].mxu0 %v3596_v42  ;;  %2697 = vmatpush1.bf16.msra.mxu1 %v4520_v46  ;;  %v3558_v42 = vcombine.low %v84_v30, %v92_v31  ;;  %v3583_v45 = vcombine.high %v104_v40, %v112_v41  ;;  %v116_v46 = vld [vmem:[%s5839_s0 + $0x318] sm:$0xff] }
  0xf4   :  { %3149 = vmatpush1.bf16.msra.mxu0 %v4523_v47  ;;  %2698 = vmatprep.subr.bf16.mxu1 %v4528_v48  ;;  %v124_v47 = vld [vmem:[%s5839_s0 + $0x358] sm:$0xff] }
  0xf5   :  { %3150 = vmatprep.subr.bf16.mxu0 %v4531_v49  ;;  %2661 = vmatprep.mubr.bf16.mxu1 %v3605_v50  ;;  %v120_v48 = vld [vmem:[%s5839_s0 + $0x338] sm:$0xff]  ;;  %v3574_v50 = vcombine.low %v100_v38, %v108_v39 }
  0xf6   :  { %3113 = vmatprep.mubr.bf16.mxu0 %v3613_v51  ;;  %v128_v49 = vld [vmem:[%s5839_s0 + $0x378] sm:$0xff]  ;;  %v3582_v51 = vcombine.low %v104_v40, %v112_v41 }
  0xf7   :  { %2699 = vmatpush1.bf16.msra.mxu1 %v4526_v52  ;;  %v3591_v52 = vcombine.high %v116_v46, %v124_v47  ;;  %v3598_v59 = vcombine.low %v120_v48, %v128_v49 }
  0xf8   :  { %3151 = vmatpush1.bf16.msra.mxu0 %v4529_v53  ;;  %2700 = vmatprep.subr.bf16.mxu1 %v4534_v54  ;;  %v3599_v53 = vcombine.high %v120_v48, %v128_v49  ;;  %v132_v54 = vld [vmem:[%s5839_s0 + $0x398] sm:$0xff] }
  0xf9   :  { %3152 = vmatprep.subr.bf16.mxu0 %v4537_v55  ;;  %v140_v55 = vld [vmem:[%s5839_s0 + $0x3d8] sm:$0xff] }
  0xfa   :  { %2662 = vmatmul.mubr.bf16.gmra.mrb[28].mxu1 %v3604_v57  ;;  %v144_v57 = vld [vmem:[%s5839_s0 + $0x3f8] sm:$0xff]  ;;  %v3607_v60 = vcombine.high %v132_v54, %v140_v55 }
  0xfb   :  { %3114 = vmatmul.mubr.bf16.gmra.mrb[28].mxu0 %v3612_v58  ;;  %2701 = vmatpush1.bf16.msra.mxu1 %v4532_v62  ;;  %v3590_v58 = vcombine.low %v116_v46, %v124_v47  ;;  %v3615_v61 = vcombine.high %v136_v56, %v144_v57  ;;  %v3606_v62 = vcombine.low %v132_v54, %v140_v55 }
  0xfc   :  { %3153 = vmatpush1.bf16.msra.mxu0 %v4535_v63  ;;  %2702 = vmatprep.subr.bf16.mxu1 %v4540_v0  ;;  %v3614_v63 = vcombine.low %v136_v56, %v144_v57  ;;  %v403_v0 = vlaneseq }
  0xfd   :  { %3154 = vmatprep.subr.bf16.mxu0 %v4543_v1  ;;  %2704 = vmatprep.mubr.bf16.mxu1 %v3495_v2 }
  0xfe   :  { %3156 = vmatprep.mubr.bf16.mxu0 %v3503_v3  ;;  %v5726_v1 = vshrl.u32 %v403_v0, 7  ;;  %v401_v3 = vld [vmem:[%s5840_s2] sm:$0x3] }
  0xff   :  { %2703 = vmatpush1.bf16.msra.mxu1 %v4538_v4 }
 0x100   :  { %3155 = vmatpush1.bf16.msra.mxu0 %v4541_v5  ;;  %v405_v2 = vsub.s32 0, %v5726_v1  ;;  %v409_v4 = vsub.s32 1, %v5726_v1  ;;  %vm3467_vm0 = vcmp.eq.s32.totalorder %v5726_v1, 0 }
 0x102   :  { %2705 = vmatmul.mubr.bf16.vlgmr.msra.gmra.mrb[0].mxu1 %v3494_v10  ;;  %v5733_v5 = vrot.slane %v401_v3, %v405_v2  ;;  %v5735_v6 = vrot.slane %v401_v3, %v409_v4 }
 0x103   :  { %3157 = vmatmul.mubr.bf16.vlgmr.msra.gmra.mrb[0].mxu0 %v3502_v11  ;;  %2714 = vmatprep.mubr.bf16.mxu1 %v3511_v12 }
 0x104   :  { %3166 = vmatprep.mubr.bf16.mxu0 %v3519_v13 }
 0x10a   :  { %2715 = vmatmul.mubr.bf16.gmra.mrb[4].mxu1 %v3510_v18 }
 0x10b   :  { %3167 = vmatmul.mubr.bf16.gmra.mrb[4].mxu0 %v3518_v19  ;;  %2724 = vmatprep.mubr.bf16.mxu1 %v3527_v20 }
 0x10c   :  { %3176 = vmatprep.mubr.bf16.mxu0 %v3535_v21 }
 0x112   :  { %2725 = vmatmul.mubr.bf16.gmra.mrb[8].mxu1 %v3526_v26 }
 0x113   :  { %3177 = vmatmul.mubr.bf16.gmra.mrb[8].mxu0 %v3534_v27  ;;  %2734 = vmatprep.mubr.bf16.mxu1 %v3543_v28 }
 0x114   :  { %3186 = vmatprep.mubr.bf16.mxu0 %v3551_v29 }
 0x11a   :  { %2735 = vmatmul.mubr.bf16.gmra.mrb[12].mxu1 %v3542_v34 }
 0x11b   :  { %3187 = vmatmul.mubr.bf16.gmra.mrb[12].mxu0 %v3550_v35  ;;  %2744 = vmatprep.mubr.bf16.mxu1 %v3559_v36 }
 0x11c   :  { %3196 = vmatprep.mubr.bf16.mxu0 %v3567_v37 }
 0x122   :  { %2745 = vmatmul.mubr.bf16.gmra.mrb[16].mxu1 %v3558_v42 }
 0x123   :  { %3197 = vmatmul.mubr.bf16.gmra.mrb[16].mxu0 %v3566_v43  ;;  %2754 = vmatprep.mubr.bf16.mxu1 %v3575_v44 }
 0x124   :  { %3206 = vmatprep.mubr.bf16.mxu0 %v3583_v45 }
 0x12a   :  { %2755 = vmatmul.mubr.bf16.gmra.mrb[20].mxu1 %v3574_v50 }
 0x12b   :  { %3207 = vmatmul.mubr.bf16.gmra.mrb[20].mxu0 %v3582_v51  ;;  %2764 = vmatprep.mubr.bf16.mxu1 %v3591_v52 }
 0x12c   :  { %3216 = vmatprep.mubr.bf16.mxu0 %v3599_v53 }
 0x132   :  { %2765 = vmatmul.mubr.bf16.gmra.mrb[24].mxu1 %v3590_v58 }
 0x133   :  { %3217 = vmatmul.mubr.bf16.gmra.mrb[24].mxu0 %v3598_v59  ;;  %2774 = vmatprep.mubr.bf16.mxu1 %v3607_v60 }
 0x134   :  { %3226 = vmatprep.mubr.bf16.mxu0 %v3615_v61 }
 0x13a   :  { %2775 = vmatmul.mubr.bf16.gmra.mrb[28].mxu1 %v3606_v62 }
 0x13b   :  { %3227 = vmatmul.mubr.bf16.gmra.mrb[28].mxu0 %v3614_v63 }
 0x1d5   :  { %v2706_v7 = vpop.f32.mrb[0].mxu1 }
 0x1d6   :  { %v3158_v8 = vpop.f32.mrb[0].mxu0  ;;  %v3904_v9 = vadd.f32 %v2706_v7, %v5733_v5  ;;  %v2708_v10 = vpop.f32.mrb[1].mxu1 }
 0x1d7   :  { %v3160_v11 = vpop.f32.mrb[1].mxu0  ;;  %v3906_v12 = vadd.f32 %v2708_v10, %v5735_v6  ;;  %v2710_v13 = vpop.f32.mrb[2].mxu1 }
 0x1d8   :  { %v3162_v14 = vpop.f32.mrb[2].mxu0  ;;  %v3905_v15 = vadd.f32 %v3904_v9, %v3158_v8  ;;  %v3908_v16 = vadd.f32 %v2710_v13, %v5733_v5  ;;  %v2712_v17 = vpop.f32.mrb[3].mxu1 }
 0x1d9   :  { %v3164_v18 = vpop.f32.mrb[3].mxu0  ;;  %v3907_v19 = vadd.f32 %v3906_v12, %v3160_v11  ;;  %v3910_v20 = vadd.f32 %v2712_v17, %v5735_v6 }
 0x1da   :  { %v3909_v21 = vadd.f32 %v3908_v16, %v3162_v14  ;;  %v3391_v24 = vmul.f32 %v3905_v15, %v3905_v15 }
 0x1db   :  { %v3888_v22 = vpack.c.bf16 %v3907_v19, %v3905_v15  ;;  %v3911_v23 = vadd.f32 %v3910_v20, %v3164_v18  ;;  %v3392_v27 = vmul.f32 %v3907_v19, %v3907_v19 }
 0x1dc   :  { %v3349_v25 = vadd.f32 %v3909_v21, %v3905_v15  ;;  %v3393_v26 = vmul.f32 %v3909_v21, %v3909_v21 }
 0x1dd   :  { %3333 = vst [vmem:[%s5841_s3] sm:$0xff] %v3888_v22  ;;  %v3889_v28 = vpack.c.bf16 %v3911_v23, %v3909_v21  ;;  %v3370_v29 = vadd.f32 %v3911_v23, %v3907_v19  ;;  %v3394_v30 = vmul.f32 %v3911_v23, %v3911_v23  ;;  %v2716_v31 = vpop.f32.mrb[4].mxu1 }
 0x1de   :  { %v3168_v32 = vpop.f32.mrb[4].mxu0  ;;  %v3423_v33 = vadd.f32 %v3393_v26, %v3391_v24  ;;  %v3912_v34 = vadd.f32 %v2716_v31, %v5733_v5  ;;  %v2718_v35 = vpop.f32.mrb[5].mxu1 }
 0x1df   :  { %v3170_v36 = vpop.f32.mrb[5].mxu0  ;;  %3334 = vst [vmem:[%s5841_s3 + $0x8] sm:$0xff] %v3889_v28  ;;  %v3444_v37 = vadd.f32 %v3394_v30, %v3392_v27  ;;  %v3914_v38 = vadd.f32 %v2718_v35, %v5735_v6  ;;  %v2720_v39 = vpop.f32.mrb[6].mxu1 }
 0x1e0   :  { %v3172_v40 = vpop.f32.mrb[6].mxu0  ;;  %v3913_v41 = vadd.f32 %v3912_v34, %v3168_v32  ;;  %v3916_v42 = vadd.f32 %v2720_v39, %v5733_v5  ;;  %v2722_v43 = vpop.f32.mrb[7].mxu1 }
 0x1e1   :  { %v3174_v44 = vpop.f32.mrb[7].mxu0  ;;  %v3915_v45 = vadd.f32 %v3914_v38, %v3170_v36  ;;  %v3918_v46 = vadd.f32 %v2722_v43, %v5735_v6 }
 0x1e2   :  { %v3350_v47 = vadd.f32 %v3913_v41, %v3349_v25  ;;  %v3395_v48 = vmul.f32 %v3913_v41, %v3913_v41  ;;  %v3917_v49 = vadd.f32 %v3916_v42, %v3172_v40 }
 0x1e3   :  { %v3890_v50 = vpack.c.bf16 %v3915_v45, %v3913_v41  ;;  %v3371_v51 = vadd.f32 %v3915_v45, %v3370_v29  ;;  %v3396_v52 = vmul.f32 %v3915_v45, %v3915_v45  ;;  %v3919_v53 = vadd.f32 %v3918_v46, %v3174_v44 }
 0x1e4   :  { %v3424_v54 = vadd.f32 %v3423_v33, %v3395_v48  ;;  %v3351_v55 = vadd.f32 %v3917_v49, %v3350_v47  ;;  %v3397_v56 = vmul.f32 %v3917_v49, %v3917_v49 }
 0x1e5   :  { %3335 = vst [vmem:[%s5841_s3 + $0x10] sm:$0xff] %v3890_v50  ;;  %v3445_v57 = vadd.f32 %v3444_v37, %v3396_v52  ;;  %v3891_v58 = vpack.c.bf16 %v3919_v53, %v3917_v49  ;;  %v3372_v59 = vadd.f32 %v3919_v53, %v3371_v51  ;;  %v3398_v60 = vmul.f32 %v3919_v53, %v3919_v53  ;;  %v2726_v61 = vpop.f32.mrb[8].mxu1 }
 0x1e6   :  { %v3178_v62 = vpop.f32.mrb[8].mxu0  ;;  %v3425_v63 = vadd.f32 %v3424_v54, %v3397_v56  ;;  %v3920_v0 = vadd.f32 %v2726_v61, %v5733_v5  ;;  %v2728_v2 = vpop.f32.mrb[9].mxu1 }
 0x1e7   :  { %v3180_v3 = vpop.f32.mrb[9].mxu0  ;;  %3336 = vst [vmem:[%s5841_s3 + $0x18] sm:$0xff] %v3891_v58  ;;  %v3446_v4 = vadd.f32 %v3445_v57, %v3398_v60  ;;  %v3922_v7 = vadd.f32 %v2728_v2, %v5735_v6  ;;  %v2730_v8 = vpop.f32.mrb[10].mxu1 }
 0x1e8   :  { %v3182_v9 = vpop.f32.mrb[10].mxu0  ;;  %v3921_v10 = vadd.f32 %v3920_v0, %v3178_v62  ;;  %v3924_v11 = vadd.f32 %v2730_v8, %v5733_v5  ;;  %v2732_v12 = vpop.f32.mrb[11].mxu1 }
 0x1e9   :  { %v3184_v13 = vpop.f32.mrb[11].mxu0  ;;  %v3923_v14 = vadd.f32 %v3922_v7, %v3180_v3  ;;  %v3926_v15 = vadd.f32 %v2732_v12, %v5735_v6 }
 0x1ea   :  { %v3352_v16 = vadd.f32 %v3921_v10, %v3351_v55  ;;  %v3399_v17 = vmul.f32 %v3921_v10, %v3921_v10  ;;  %v3925_v18 = vadd.f32 %v3924_v11, %v3182_v9 }
 0x1eb   :  { %v3892_v19 = vpack.c.bf16 %v3923_v14, %v3921_v10  ;;  %v3373_v20 = vadd.f32 %v3923_v14, %v3372_v59  ;;  %v3400_v21 = vmul.f32 %v3923_v14, %v3923_v14  ;;  %v3927_v22 = vadd.f32 %v3926_v15, %v3184_v13 }
 0x1ec   :  { %v3426_v23 = vadd.f32 %v3425_v63, %v3399_v17  ;;  %v3353_v24 = vadd.f32 %v3925_v18, %v3352_v16  ;;  %v3401_v25 = vmul.f32 %v3925_v18, %v3925_v18 }
 0x1ed   :  { %3337 = vst [vmem:[%s5841_s3 + $0x20] sm:$0xff] %v3892_v19  ;;  %v3447_v26 = vadd.f32 %v3446_v4, %v3400_v21  ;;  %v3893_v27 = vpack.c.bf16 %v3927_v22, %v3925_v18  ;;  %v3374_v28 = vadd.f32 %v3927_v22, %v3373_v20  ;;  %v3402_v29 = vmul.f32 %v3927_v22, %v3927_v22  ;;  %v2736_v30 = vpop.f32.mrb[12].mxu1 }
 0x1ee   :  { %v3188_v31 = vpop.f32.mrb[12].mxu0  ;;  %v3427_v32 = vadd.f32 %v3426_v23, %v3401_v25  ;;  %v3928_v33 = vadd.f32 %v2736_v30, %v5733_v5  ;;  %v2738_v34 = vpop.f32.mrb[13].mxu1 }
 0x1ef   :  { %v3190_v35 = vpop.f32.mrb[13].mxu0  ;;  %3338 = vst [vmem:[%s5841_s3 + $0x28] sm:$0xff] %v3893_v27  ;;  %v3448_v36 = vadd.f32 %v3447_v26, %v3402_v29  ;;  %v3930_v37 = vadd.f32 %v2738_v34, %v5735_v6  ;;  %v2740_v38 = vpop.f32.mrb[14].mxu1 }
 0x1f0   :  { %v3192_v39 = vpop.f32.mrb[14].mxu0  ;;  %v3929_v40 = vadd.f32 %v3928_v33, %v3188_v31  ;;  %v3932_v41 = vadd.f32 %v2740_v38, %v5733_v5  ;;  %v2742_v42 = vpop.f32.mrb[15].mxu1 }
 0x1f1   :  { %v3194_v43 = vpop.f32.mrb[15].mxu0  ;;  %v3931_v44 = vadd.f32 %v3930_v37, %v3190_v35  ;;  %v3934_v45 = vadd.f32 %v2742_v42, %v5735_v6 }
 0x1f2   :  { %v3354_v46 = vadd.f32 %v3929_v40, %v3353_v24  ;;  %v3403_v47 = vmul.f32 %v3929_v40, %v3929_v40  ;;  %v3933_v48 = vadd.f32 %v3932_v41, %v3192_v39 }
 0x1f3   :  { %v3894_v49 = vpack.c.bf16 %v3931_v44, %v3929_v40  ;;  %v3375_v50 = vadd.f32 %v3931_v44, %v3374_v28  ;;  %v3404_v51 = vmul.f32 %v3931_v44, %v3931_v44  ;;  %v3935_v52 = vadd.f32 %v3934_v45, %v3194_v43 }
 0x1f4   :  { %v3428_v53 = vadd.f32 %v3427_v32, %v3403_v47  ;;  %v3355_v54 = vadd.f32 %v3933_v48, %v3354_v46  ;;  %v3405_v55 = vmul.f32 %v3933_v48, %v3933_v48 }
 0x1f5   :  { %3339 = vst [vmem:[%s5841_s3 + $0x30] sm:$0xff] %v3894_v49  ;;  %v3449_v56 = vadd.f32 %v3448_v36, %v3404_v51  ;;  %v3895_v57 = vpack.c.bf16 %v3935_v52, %v3933_v48  ;;  %v3376_v58 = vadd.f32 %v3935_v52, %v3375_v50  ;;  %v3406_v59 = vmul.f32 %v3935_v52, %v3935_v52  ;;  %v2746_v60 = vpop.f32.mrb[16].mxu1 }
 0x1f6   :  { %v3198_v61 = vpop.f32.mrb[16].mxu0  ;;  %v3429_v62 = vadd.f32 %v3428_v53, %v3405_v55  ;;  %v3936_v63 = vadd.f32 %v2746_v60, %v5733_v5  ;;  %v2748_v0 = vpop.f32.mrb[17].mxu1 }
 0x1f7   :  { %v3200_v2 = vpop.f32.mrb[17].mxu0  ;;  %3340 = vst [vmem:[%s5841_s3 + $0x38] sm:$0xff] %v3895_v57  ;;  %v3450_v3 = vadd.f32 %v3449_v56, %v3406_v59  ;;  %v3938_v4 = vadd.f32 %v2748_v0, %v5735_v6  ;;  %v2750_v7 = vpop.f32.mrb[18].mxu1 }
 0x1f8   :  { %v3202_v8 = vpop.f32.mrb[18].mxu0  ;;  %v3937_v9 = vadd.f32 %v3936_v63, %v3198_v61  ;;  %v3940_v10 = vadd.f32 %v2750_v7, %v5733_v5  ;;  %v2752_v11 = vpop.f32.mrb[19].mxu1 }
 0x1f9   :  { %v3204_v12 = vpop.f32.mrb[19].mxu0  ;;  %v3939_v13 = vadd.f32 %v3938_v4, %v3200_v2  ;;  %v3942_v14 = vadd.f32 %v2752_v11, %v5735_v6 }
 0x1fa   :  { %v3356_v15 = vadd.f32 %v3937_v9, %v3355_v54  ;;  %v3407_v16 = vmul.f32 %v3937_v9, %v3937_v9  ;;  %v3941_v17 = vadd.f32 %v3940_v10, %v3202_v8 }
 0x1fb   :  { %v3896_v18 = vpack.c.bf16 %v3939_v13, %v3937_v9  ;;  %v3377_v19 = vadd.f32 %v3939_v13, %v3376_v58  ;;  %v3408_v20 = vmul.f32 %v3939_v13, %v3939_v13  ;;  %v3943_v21 = vadd.f32 %v3942_v14, %v3204_v12 }
 0x1fc   :  { %v3430_v22 = vadd.f32 %v3429_v62, %v3407_v16  ;;  %v3357_v23 = vadd.f32 %v3941_v17, %v3356_v15  ;;  %v3409_v24 = vmul.f32 %v3941_v17, %v3941_v17 }
 0x1fd   :  { %3341 = vst [vmem:[%s5841_s3 + $0x40] sm:$0xff] %v3896_v18  ;;  %v3451_v25 = vadd.f32 %v3450_v3, %v3408_v20  ;;  %v3897_v26 = vpack.c.bf16 %v3943_v21, %v3941_v17  ;;  %v3378_v27 = vadd.f32 %v3943_v21, %v3377_v19  ;;  %v3410_v28 = vmul.f32 %v3943_v21, %v3943_v21  ;;  %v2756_v29 = vpop.f32.mrb[20].mxu1 }
 0x1fe   :  { %v3208_v30 = vpop.f32.mrb[20].mxu0  ;;  %v3431_v31 = vadd.f32 %v3430_v22, %v3409_v24  ;;  %v3944_v32 = vadd.f32 %v2756_v29, %v5733_v5  ;;  %v2758_v33 = vpop.f32.mrb[21].mxu1 }
 0x1ff   :  { %v3210_v34 = vpop.f32.mrb[21].mxu0  ;;  %3342 = vst [vmem:[%s5841_s3 + $0x48] sm:$0xff] %v3897_v26  ;;  %v3452_v35 = vadd.f32 %v3451_v25, %v3410_v28  ;;  %v3946_v36 = vadd.f32 %v2758_v33, %v5735_v6  ;;  %v2760_v37 = vpop.f32.mrb[22].mxu1 }
 0x200   :  { %v3212_v38 = vpop.f32.mrb[22].mxu0  ;;  %v3945_v39 = vadd.f32 %v3944_v32, %v3208_v30  ;;  %v3948_v40 = vadd.f32 %v2760_v37, %v5733_v5  ;;  %v2762_v41 = vpop.f32.mrb[23].mxu1 }
 0x201   :  { %v3214_v42 = vpop.f32.mrb[23].mxu0  ;;  %v3947_v43 = vadd.f32 %v3946_v36, %v3210_v34  ;;  %v3950_v44 = vadd.f32 %v2762_v41, %v5735_v6 }
 0x202   :  { %v3358_v45 = vadd.f32 %v3945_v39, %v3357_v23  ;;  %v3411_v46 = vmul.f32 %v3945_v39, %v3945_v39  ;;  %v3949_v47 = vadd.f32 %v3948_v40, %v3212_v38 }
 0x203   :  { %v3898_v48 = vpack.c.bf16 %v3947_v43, %v3945_v39  ;;  %v3379_v49 = vadd.f32 %v3947_v43, %v3378_v27  ;;  %v3412_v50 = vmul.f32 %v3947_v43, %v3947_v43  ;;  %v3951_v51 = vadd.f32 %v3950_v44, %v3214_v42 }
 0x204   :  { %v3432_v52 = vadd.f32 %v3431_v31, %v3411_v46  ;;  %v3359_v53 = vadd.f32 %v3949_v47, %v3358_v45  ;;  %v3413_v54 = vmul.f32 %v3949_v47, %v3949_v47 }
 0x205   :  { %3343 = vst [vmem:[%s5841_s3 + $0x50] sm:$0xff] %v3898_v48  ;;  %v3453_v55 = vadd.f32 %v3452_v35, %v3412_v50  ;;  %v3899_v56 = vpack.c.bf16 %v3951_v51, %v3949_v47  ;;  %v3380_v57 = vadd.f32 %v3951_v51, %v3379_v49  ;;  %v3414_v58 = vmul.f32 %v3951_v51, %v3951_v51  ;;  %v2766_v59 = vpop.f32.mrb[24].mxu1 }
 0x206   :  { %v3218_v60 = vpop.f32.mrb[24].mxu0  ;;  %v3433_v61 = vadd.f32 %v3432_v52, %v3413_v54  ;;  %v3952_v62 = vadd.f32 %v2766_v59, %v5733_v5  ;;  %v2768_v63 = vpop.f32.mrb[25].mxu1 }
 0x207   :  { %v3220_v0 = vpop.f32.mrb[25].mxu0  ;;  %3344 = vst [vmem:[%s5841_s3 + $0x58] sm:$0xff] %v3899_v56  ;;  %v3454_v2 = vadd.f32 %v3453_v55, %v3414_v58  ;;  %v3954_v3 = vadd.f32 %v2768_v63, %v5735_v6  ;;  %v2770_v4 = vpop.f32.mrb[26].mxu1 }
 0x208   :  { %v3222_v7 = vpop.f32.mrb[26].mxu0  ;;  %v3953_v8 = vadd.f32 %v3952_v62, %v3218_v60  ;;  %v3956_v9 = vadd.f32 %v2770_v4, %v5733_v5  ;;  %v2772_v10 = vpop.f32.mrb[27].mxu1 }
 0x209   :  { %v3224_v11 = vpop.f32.mrb[27].mxu0  ;;  %v3955_v12 = vadd.f32 %v3954_v3, %v3220_v0  ;;  %v3958_v13 = vadd.f32 %v2772_v10, %v5735_v6 }
 0x20a   :  { %v3360_v14 = vadd.f32 %v3953_v8, %v3359_v53  ;;  %v3415_v15 = vmul.f32 %v3953_v8, %v3953_v8  ;;  %v3957_v16 = vadd.f32 %v3956_v9, %v3222_v7 }
 0x20b   :  { %v3900_v17 = vpack.c.bf16 %v3955_v12, %v3953_v8  ;;  %v3381_v18 = vadd.f32 %v3955_v12, %v3380_v57  ;;  %v3416_v19 = vmul.f32 %v3955_v12, %v3955_v12  ;;  %v3959_v20 = vadd.f32 %v3958_v13, %v3224_v11 }
 0x20c   :  { %v3434_v21 = vadd.f32 %v3433_v61, %v3415_v15  ;;  %v3361_v22 = vadd.f32 %v3957_v16, %v3360_v14  ;;  %v3417_v23 = vmul.f32 %v3957_v16, %v3957_v16 }
 0x20d   :  { %3345 = vst [vmem:[%s5841_s3 + $0x60] sm:$0xff] %v3900_v17  ;;  %v3455_v24 = vadd.f32 %v3454_v2, %v3416_v19  ;;  %v3901_v25 = vpack.c.bf16 %v3959_v20, %v3957_v16  ;;  %v3382_v26 = vadd.f32 %v3959_v20, %v3381_v18  ;;  %v3418_v27 = vmul.f32 %v3959_v20, %v3959_v20  ;;  %v2776_v28 = vpop.f32.mrb[28].mxu1 }
 0x20e   :  { %v3228_v29 = vpop.f32.mrb[28].mxu0  ;;  %v3435_v30 = vadd.f32 %v3434_v21, %v3417_v23  ;;  %v3960_v31 = vadd.f32 %v2776_v28, %v5733_v5  ;;  %v2778_v32 = vpop.f32.mrb[29].mxu1 }
 0x20f   :  { %v3230_v33 = vpop.f32.mrb[29].mxu0  ;;  %3346 = vst [vmem:[%s5841_s3 + $0x68] sm:$0xff] %v3901_v25  ;;  %v3456_v34 = vadd.f32 %v3455_v24, %v3418_v27  ;;  %v3962_v35 = vadd.f32 %v2778_v32, %v5735_v6  ;;  %v2780_v36 = vpop.f32.mrb[30].mxu1 }
 0x210   :  { %v3232_v37 = vpop.f32.mrb[30].mxu0  ;;  %v3961_v38 = vadd.f32 %v3960_v31, %v3228_v29  ;;  %v3964_v39 = vadd.f32 %v2780_v36, %v5733_v5  ;;  %v2782_v40 = vpop.f32.mrb[31].mxu1 }
 0x211   :  { %v3234_v41 = vpop.f32.mrb[31].mxu0  ;;  %v3963_v42 = vadd.f32 %v3962_v35, %v3230_v33  ;;  %v3966_v43 = vadd.f32 %v2782_v40, %v5735_v6 }
 0x212   :  { %v3362_v44 = vadd.f32 %v3961_v38, %v3361_v22  ;;  %v3419_v45 = vmul.f32 %v3961_v38, %v3961_v38  ;;  %v3965_v46 = vadd.f32 %v3964_v39, %v3232_v37 }
 0x213   :  { %v3902_v47 = vpack.c.bf16 %v3963_v42, %v3961_v38  ;;  %v3383_v48 = vadd.f32 %v3963_v42, %v3382_v26  ;;  %v3420_v49 = vmul.f32 %v3963_v42, %v3963_v42  ;;  %v3967_v50 = vadd.f32 %v3966_v43, %v3234_v41 }
 0x214   :  { %v3436_v51 = vadd.f32 %v3435_v30, %v3419_v45  ;;  %v3363_v52 = vadd.f32 %v3965_v46, %v3362_v44  ;;  %v3421_v53 = vmul.f32 %v3965_v46, %v3965_v46 }
 0x215   :  { %3347 = vst [vmem:[%s5841_s3 + $0x70] sm:$0xff] %v3902_v47  ;;  %v3457_v5 = vadd.f32 %v3456_v34, %v3420_v49  ;;  %v3903_v54 = vpack.c.bf16 %v3967_v50, %v3965_v46  ;;  %v3384_v55 = vadd.f32 %v3967_v50, %v3383_v48  ;;  %v3422_v56 = vmul.f32 %v3967_v50, %v3967_v50 }
 0x216   :  { %v3364_v57 = vrot.slane %v3363_v52, 4  ;;  %v3437_v6 = vadd.f32 %v3436_v51, %v3421_v53 }
 0x217   :  { %3348 = vst [vmem:[%s5841_s3 + $0x78] sm:$0xff] %v3903_v54  ;;  %v3385_v58 = vrot.slane %v3384_v55, 4  ;;  %v3458_v59 = vadd.f32 %v3457_v5, %v3422_v56 }
 0x218   :  { %v3365_v60 = vadd.f32 %v3364_v57, %v3363_v52  ;;  %v3438_v61 = vrot.slane %v3437_v6, 4 }
 0x219   :  { %v3386_v62 = vadd.f32 %v3385_v58, %v3384_v55  ;;  %v3459_v63 = vrot.slane %v3458_v59, 4 }
 0x21a   :  { %v3366_v0 = vrot.slane %v3365_v60, 2  ;;  %v3439_v2 = vadd.f32 %v3438_v61, %v3437_v6 }
 0x21b   :  { %v3387_v3 = vrot.slane %v3386_v62, 2  ;;  %v3460_v4 = vadd.f32 %v3459_v63, %v3458_v59 }
 0x21c   :  { %v3367_v7 = vadd.f32 %v3366_v0, %v3365_v60  ;;  %v3440_v8 = vrot.slane %v3439_v2, 2 }
 0x21d   :  { %v3388_v9 = vadd.f32 %v3387_v3, %v3386_v62  ;;  %v3461_v10 = vrot.slane %v3460_v4, 2 }
 0x21e   :  { %v3368_v11 = vrot.slane %v3367_v7, 1  ;;  %v3441_v12 = vadd.f32 %v3440_v8, %v3439_v2 }
 0x21f   :  { %v3389_v13 = vrot.slane %v3388_v9, 1  ;;  %v3462_v14 = vadd.f32 %v3461_v10, %v3460_v4 }
 0x220   :  { %v3369_v15 = vadd.f32 %v3368_v11, %v3367_v7  ;;  %v3442_v16 = vrot.slane %v3441_v12, 1 }
 0x221   :  { %v3390_v17 = vadd.f32 %v3389_v13, %v3388_v9  ;;  %v3463_v18 = vrot.slane %v3462_v14, 1 }
 0x222   :  { %v3443_v19 = vadd.f32 %v3442_v16, %v3441_v12  ;;  %v3468_v20 = vsel %vm3467_vm0, %v3369_v15, 0.0 }
 0x223   :  { %3470 = vst [vmem:[%s5842_s4] sm:$0xff] %v3468_v20  ;;  %v3464_v21 = vadd.f32 %v3463_v18, %v3462_v14  ;;  %v3469_v22 = vsel %vm3467_vm0, %v3390_v17, 0.0 }
 0x224   :  { %v3472_v23 = vsel %vm3467_vm0, %v3443_v19, 0.0  ;;  %3471 = vst [vmem:[%s5842_s4 + $0x8] sm:$0xff] %v3469_v22 }
 0x225   :  { %3474 = vst [vmem:[%s5843_s5] sm:$0xff] %v3472_v23  ;;  %v3473_v24 = vsel %vm3467_vm0, %v3464_v21, 0.0 }
 0x226   :  { %3475 = vst [vmem:[%s5843_s5 + $0x8] sm:$0xff] %v3473_v24 }

// kernel: discriminator_forward.9
= control target key start
LH: loop header
LB: loop body
LE: loop exit
PB: predicated region body
PF: predicated region fallthrough
CT: control target
= control target key end

     0   :  { %v56_v1 = vlaneseq  ;;  %v1124_v51 = vmov 1983009808   ;;  %vm968_vm0 = vcmask 1041408   ;;  %vm1112_vm1 = vcmask 1024   ;;  %s1885_s2 = inlined_call_operand.<no memory space> [shape: f32[1,1], index: 2, kind: input, shape index: {}]   ;;  %s1886_s1 = inlined_call_operand.vmem [shape: f32[1,8192], index: 1, kind: input, shape index: {}]   ;;  %s1887_s0 = inlined_call_operand.vmem [shape: bf16[2,8192], index: 0, kind: input, shape index: {}]   ;;  %s1888_s3 = inlined_call_operand.vmem [shape: f32[2,1], index: 3, kind: output, shape index: {}]  }
   0x1   :  { %v8_v0 = vstv %s1885_s2  ;;  %v1153_v3 = vld [vmem:[%s1886_s1 + $0x20] sm:$0xff]  ;;  %v1170_v8 = vld [vmem:[%s1886_s1 + $0x28] sm:$0xff]  ;;  %v1195_v17 = vld [vmem:[%s1886_s1 + $0x30] sm:$0xff]  ;;  %v315_v52 = vunpack.c.l.s4 %v1124_v51 }
   0x2   :  { %9 = vst [vmem:[#allocation2] sm:$0x1] %v8_v0  ;;  %v1148_v2 = vshrl.u32 %v56_v1, 7  ;;  %v1216_v26 = vld [vmem:[%s1886_s1 + $0x38] sm:$0xff]  ;;  %v1253_v43 = vld [vmem:[%s1887_s0 + $0x20] sm:$0xff]  ;;  %v1258_v44 = vld [vmem:[%s1887_s0 + $0x28] sm:$0xff] }
   0x3   :  { %v1271_v49 = vld [vmem:[%s1887_s0 + $0x30] sm:$0xff]  ;;  %v1276_v50 = vld [vmem:[%s1887_s0 + $0x38] sm:$0xff]  ;;  %v1281_v53 = vld [vmem:[%s1886_s1] sm:$0xff]  ;;  %v316_v1 = vunpack.c.0.s8 %v315_v52 }
   0x4   :  { %v1156_v4 = vsub.s32 0, %v1148_v2  ;;  %v1159_v5 = vsub.s32 1, %v1148_v2  ;;  %v1162_v6 = vsub.s32 2, %v1148_v2  ;;  %v1165_v7 = vsub.s32 3, %v1148_v2  ;;  %v1293_v61 = vld [vmem:[%s1886_s1 + $0x8] sm:$0xff]  ;;  %v1311_v62 = vld [vmem:[%s1886_s1 + $0x10] sm:$0xff] }
   0x5   :  { %v1173_v9 = vsub.s32 4, %v1148_v2  ;;  %v1176_v10 = vsub.s32 5, %v1148_v2  ;;  %v1179_v11 = vsub.s32 6, %v1148_v2  ;;  %v1182_v12 = vsub.s32 7, %v1148_v2 }
   0x6   :  { %v187_v13 = vrot.slane %v1153_v3, %v1156_v4  ;;  %v191_v14 = vrot.slane %v1153_v3, %v1159_v5  ;;  %v195_v15 = vrot.slane %v1153_v3, %v1162_v6  ;;  %v199_v16 = vrot.slane %v1153_v3, %v1165_v7 }
   0x7   :  { %v203_v18 = vrot.slane %v1153_v3, %v1173_v9  ;;  %v207_v19 = vrot.slane %v1153_v3, %v1176_v10  ;;  %v211_v20 = vrot.slane %v1153_v3, %v1179_v11  ;;  %v215_v21 = vrot.slane %v1153_v3, %v1182_v12 }
   0x8   :  { %v219_v22 = vrot.slane %v1170_v8, %v1156_v4  ;;  %v223_v23 = vrot.slane %v1170_v8, %v1159_v5  ;;  %v227_v24 = vrot.slane %v1170_v8, %v1162_v6  ;;  %v231_v25 = vrot.slane %v1170_v8, %v1165_v7 }
   0x9   :  { %v235_v27 = vrot.slane %v1170_v8, %v1173_v9  ;;  %v239_v28 = vrot.slane %v1170_v8, %v1176_v10  ;;  %v243_v29 = vrot.slane %v1170_v8, %v1179_v11  ;;  %v247_v30 = vrot.slane %v1170_v8, %v1182_v12 }
   0xa   :  { %v251_v31 = vrot.slane %v1195_v17, %v1156_v4  ;;  %v255_v32 = vrot.slane %v1195_v17, %v1159_v5  ;;  %v259_v33 = vrot.slane %v1195_v17, %v1162_v6  ;;  %v263_v34 = vrot.slane %v1195_v17, %v1165_v7 }
   0xb   :  { %v267_v35 = vrot.slane %v1195_v17, %v1173_v9  ;;  %v271_v36 = vrot.slane %v1195_v17, %v1176_v10  ;;  %v279_v38 = vrot.slane %v1195_v17, %v1182_v12  ;;  %v59_v63 = vrot.slane %v1281_v53, %v1156_v4 }
   0xc   :  { %v63_v0 = vrot.slane %v1281_v53, %v1159_v5  ;;  %v67_v51 = vrot.slane %v1281_v53, %v1162_v6  ;;  %v71_v60 = vrot.slane %v1281_v53, %v1165_v7  ;;  %v75_v59 = vrot.slane %v1281_v53, %v1173_v9 }
   0xd   :  { %v79_v58 = vrot.slane %v1281_v53, %v1176_v10  ;;  %v83_v52 = vrot.slane %v1281_v53, %v1179_v11  ;;  %v87_v57 = vrot.slane %v1281_v53, %v1182_v12  ;;  %v91_v56 = vrot.slane %v1293_v61, %v1156_v4 }
   0xe   :  { %v95_v55 = vrot.slane %v1293_v61, %v1159_v5  ;;  %v99_v54 = vrot.slane %v1293_v61, %v1162_v6  ;;  %v103_v47 = vrot.slane %v1293_v61, %v1165_v7  ;;  %v107_v48 = vrot.slane %v1293_v61, %v1173_v9 }
   0xf   :  { %v111_v45 = vrot.slane %v1293_v61, %v1176_v10  ;;  %v115_v53 = vrot.slane %v1293_v61, %v1179_v11  ;;  %v119_v46 = vrot.slane %v1293_v61, %v1182_v12  ;;  %v1334_v41 = vsub.s32 %v316_v1, %v1148_v2 }
  0x10   :  { %v448_v42 = vcombine.low %v187_v13, %v191_v14  ;;  %v123_v39 = vrot.slane %v1311_v62, %v1156_v4  ;;  %v127_v40 = vrot.slane %v1311_v62, %v1159_v5  ;;  %v131_v37 = vrot.slane %v1311_v62, %v1162_v6 }
  0x11   :  { %v449_v2 = vcombine.low %v195_v15, %v199_v16  ;;  %v135_v61 = vrot.slane %v1311_v62, %v1165_v7  ;;  %v465_v14 = vcombine.low %v203_v18, %v207_v19  ;;  %v466_v1 = vcombine.low %v211_v20, %v215_v21 }
  0x12   :  { %v456_v13 = vrot.slane %v448_v42, %v1334_v41  ;;  %v1369_v15 = vcombine.low %v59_v63, %v63_v0  ;;  %v482_v42 = vcombine.low %v219_v22, %v223_v23  ;;  %v483_v18 = vcombine.low %v227_v24, %v231_v25 }
  0x13   :  { %v463_v16 = vrot.slane %v449_v2, %v1334_v41  ;;  %v1384_v3 = vcombine.low %v67_v51, %v71_v60  ;;  %v473_v19 = vrot.slane %v465_v14, %v1334_v41  ;;  %v480_v20 = vrot.slane %v466_v1, %v1334_v41 }
  0x14   :  { %v499_v21 = vcombine.low %v235_v27, %v239_v28  ;;  %v490_v23 = vrot.slane %v482_v42, %v1334_v41  ;;  %v497_v63 = vrot.slane %v483_v18, %v1334_v41  ;;  %v500_v24 = vcombine.low %v243_v29, %v247_v30 }
  0x15   :  { %v464_v22 = vcombine.low %v456_v13, %v463_v16  ;;  %v481_v25 = vcombine.low %v473_v19, %v480_v20  ;;  %v516_v27 = vcombine.low %v251_v31, %v255_v32  ;;  %v517_v28 = vcombine.low %v259_v33, %v263_v34 }
  0x16   :  { %v507_v60 = vrot.slane %v499_v21, %v1334_v41  ;;  %v498_v0 = vcombine.low %v490_v23, %v497_v63  ;;  %v514_v8 = vrot.slane %v500_v24, %v1334_v41  ;;  %v533_v29 = vcombine.low %v267_v35, %v271_v36 }
  0x17   :  { %v1890_v30 = vrot.slane %v1195_v17, %v1179_v11  ;;  %v524_v32 = vrot.slane %v516_v27, %v1334_v41  ;;  %v531_v33 = vrot.slane %v517_v28, %v1334_v41  ;;  %v1891_v34 = vrot.slane %v1216_v26, %v1159_v5 }
  0x18   :  { %v1892_v51 = vrot.slane %v1216_v26, %v1156_v4  ;;  %v1893_v35 = vrot.slane %v1216_v26, %v1165_v7  ;;  %v1894_v36 = vrot.slane %v1216_v26, %v1162_v6  ;;  %v515_v17 = vcombine.low %v507_v60, %v514_v8 }
  0x19   :  { %v534_v31 = vcombine.low %v1890_v30, %v279_v38  ;;  %v541_v38 = vrot.slane %v533_v29, %v1334_v41  ;;  %v1895_v1 = vrot.slane %v1216_v26, %v1176_v10  ;;  %v1896_v16 = vrot.slane %v1216_v26, %v1173_v9 }
  0x1a   :  { %v550_v2 = vcombine.low %v1892_v51, %v1891_v34  ;;  %v551_v13 = vcombine.low %v1894_v36, %v1893_v35  ;;  %v532_v18 = vcombine.low %v524_v32, %v531_v33  ;;  %v1897_v21 = vrot.slane %v1216_v26, %v1182_v12  ;;  %v17_v36 = vld [vmem:[%s1887_s0 + $0x8] sm:$0xff] }
  0x1b   :  { %v548_v14 = vrot.slane %v534_v31, %v1334_v41  ;;  %v567_v42 = vcombine.low %v1896_v16, %v1895_v1  ;;  %v1898_v23 = vrot.slane %v1216_v26, %v1179_v11  ;;  %v329_v24 = vcombine.low %v75_v59, %v79_v58  ;;  %v1517_v1 = vld [vmem:[%s1887_s0 + $0x10] sm:$0xff] }
  0x1c   :  { %v558_v19 = vrot.slane %v550_v2, %v1334_v41  ;;  %v565_v20 = vrot.slane %v551_v13, %v1334_v41  ;;  %v330_v60 = vcombine.low %v83_v52, %v87_v57  ;;  %v346_v8 = vcombine.low %v91_v56, %v95_v55 }
  0x1d   :  { %v568_v63 = vcombine.low %v1898_v23, %v1897_v21  ;;  %v549_v27 = vcombine.low %v541_v38, %v548_v14  ;;  %v575_v28 = vrot.slane %v567_v42, %v1334_v41  ;;  %v347_v29 = vcombine.low %v99_v54, %v103_v47 }
  0x1e   :  { %v566_v30 = vcombine.low %v558_v19, %v565_v20  ;;  %v320_v32 = vrot.slane %v1369_v15, %v1334_v41  ;;  %v327_v33 = vrot.slane %v1384_v3, %v1334_v41  ;;  %v363_v34 = vcombine.low %v107_v48, %v111_v45 }
  0x1f   :  { %v582_v31 = vrot.slane %v568_v63, %v1334_v41  ;;  %v364_v51 = vcombine.low %v115_v53, %v119_v46  ;;  %v1899_v58 = vunpack.c.l.bf16 %v1253_v43  ;;  %v1900_v59 = vunpack.c.h.bf16 %v1253_v43  ;;  %v16_v43 = vld [vmem:[%s1887_s0] sm:$0xff] }
  0x20   :  { %v1901_v47 = vunpack.c.l.bf16 %v1258_v44  ;;  %v1902_v55 = vunpack.c.h.bf16 %v1258_v44  ;;  %v1903_v15 = vunpack.c.l.bf16 %v1271_v49  ;;  %v1904_v45 = vunpack.c.h.bf16 %v1271_v49 }
  0x21   :  { %v583_v26 = vcombine.low %v575_v28, %v582_v31  ;;  %v608_v57 = vmul.f32 %v464_v22, %v1899_v58  ;;  %v609_v52 = vmul.f32 %v481_v25, %v1900_v59  ;;  %v1905_v48 = vunpack.c.l.bf16 %v1276_v50 }
  0x22   :  { %v610_v54 = vmul.f32 %v498_v0, %v1901_v47  ;;  %v611_v56 = vmul.f32 %v515_v17, %v1902_v55  ;;  %v1474_v2 = vmul.f32 %v532_v18, %v1903_v15  ;;  %v1478_v46 = vmul.f32 %v549_v27, %v1904_v45 }
  0x23   :  { %v1482_v53 = vmul.f32 %v566_v30, %v1905_v48  ;;  %v337_v3 = vrot.slane %v329_v24, %v1334_v41  ;;  %v344_v44 = vrot.slane %v330_v60, %v1334_v41  ;;  %v1906_v22 = vunpack.c.h.bf16 %v1276_v50 }
  0x24   :  { %v354_v49 = vrot.slane %v346_v8, %v1334_v41  ;;  %v361_v0 = vrot.slane %v347_v29, %v1334_v41  ;;  %v380_v35 = vcombine.low %v123_v39, %v127_v40  ;;  %v381_v50 = vcombine.low %v131_v37, %v135_v61  ;;  %v1522_v37 = vld [vmem:[%s1886_s1 + $0x18] sm:$0xff] }
  0x25   :  { %v1491_v25 = vmul.f32 %v583_v26, %v1906_v22  ;;  %v371_v13 = vrot.slane %v363_v34, %v1334_v41  ;;  %v378_v17 = vrot.slane %v364_v51, %v1334_v41  ;;  %v24_v38 = vunpack.c.l.bf16 %v16_v43 }
  0x26   :  { %v25_v14 = vunpack.c.h.bf16 %v16_v43  ;;  %v139_v39 = vrot.slane %v1311_v62, %v1173_v9  ;;  %v328_v40 = vcombine.low %v320_v32, %v327_v33  ;;  %v143_v61 = vrot.slane %v1311_v62, %v1176_v10 }
  0x27   :  { %v147_v16 = vrot.slane %v1311_v62, %v1179_v11  ;;  %v151_v42 = vrot.slane %v1311_v62, %v1182_v12  ;;  %v345_v18 = vcombine.low %v337_v3, %v344_v44  ;;  %v26_v19 = vunpack.c.l.bf16 %v17_v36 }
  0x28   :  { %v362_v20 = vcombine.low %v354_v49, %v361_v0  ;;  %v388_v21 = vrot.slane %v380_v35, %v1334_v41  ;;  %v395_v23 = vrot.slane %v381_v50, %v1334_v41  ;;  %v27_v63 = vunpack.c.h.bf16 %v17_v36 }
  0x29   :  { %v379_v24 = vcombine.low %v371_v13, %v378_v17  ;;  %v28_v60 = vunpack.c.l.bf16 %v1517_v1  ;;  %v600_v8 = vmul.f32 %v328_v40, %v24_v38  ;;  %v1539_v29 = vcombine.low %v139_v39, %v143_v61 }
  0x2a   :  { %v1541_v30 = vcombine.low %v147_v16, %v151_v42  ;;  %v601_v31 = vmul.f32 %v345_v18, %v25_v14  ;;  %v396_v32 = vcombine.low %v388_v21, %v395_v23  ;;  %v602_v33 = vmul.f32 %v362_v20, %v26_v19 }
  0x2b   :  { %v632_v34 = vcombine.high %v600_v8, %v600_v8  ;;  %v768_v51 = vcombine.high %v608_v57, %v608_v57  ;;  %v603_v26 = vmul.f32 %v379_v24, %v27_v63  ;;  %v1544_v58 = vrot.slane %v608_v57, %v1334_v41 }
  0x2c   :  { %v785_v59 = vcombine.high %v609_v52, %v609_v52  ;;  %v1547_v47 = vrot.slane %v609_v52, %v1334_v41  ;;  %v639_v55 = vrot.slane %v600_v8, %v1334_v41  ;;  %v802_v45 = vcombine.high %v610_v54, %v610_v54 }
  0x2d   :  { %1907 = vst [vmem:[#allocation3_spill] sm:$0xff] %v1544_v58  ;;  %v1551_v15 = vrot.slane %v768_v51, %v1334_v41  ;;  %v1554_v48 = vrot.slane %v610_v54, %v1334_v41  ;;  %v649_v43 = vcombine.high %v601_v31, %v601_v31  ;;  %v656_v3 = vrot.slane %v601_v31, %v1334_v41 }
  0x2e   :  { %v1558_v44 = vrot.slane %v785_v59, %v1334_v41  ;;  %v819_v57 = vcombine.high %v611_v56, %v611_v56  ;;  %v646_v22 = vrot.slane %v632_v34, %v1334_v41  ;;  %v666_v52 = vcombine.high %v602_v33, %v602_v33 }
  0x2f   :  { %v1562_v49 = vrot.slane %v802_v45, %v1334_v41  ;;  %v1565_v0 = vrot.slane %v611_v56, %v1334_v41  ;;  %v673_v35 = vrot.slane %v602_v33, %v1334_v41  ;;  %v836_v50 = vcombine.high %v1474_v2, %v1474_v2 }
  0x30   :  { %v1569_v54 = vrot.slane %v819_v57, %v1334_v41  ;;  %v1575_v36 = vrot.slane %v1474_v2, %v1334_v41  ;;  %v647_v13 = vcombine.high %v639_v55, %v639_v55  ;;  %v683_v17 = vcombine.high %v603_v26, %v603_v26 }
  0x31   :  { %v853_v38 = vcombine.high %v1478_v46, %v1478_v46  ;;  %v1581_v56 = vrot.slane %v1478_v46, %v1334_v41  ;;  %v663_v14 = vrot.slane %v649_v43, %v1334_v41  ;;  %v1585_v39 = vrot.slane %v603_v26, %v1334_v41 }
  0x32   :  { %v1588_v40 = vrot.slane %v836_v50, %v1334_v41  ;;  %v870_v2 = vcombine.high %v1482_v53, %v1482_v53  ;;  %v648_v61 = vcombine.high %v646_v22, %v646_v22  ;;  %v1597_v42 = vrot.slane %v1482_v53, %v1334_v41 }
  0x33   :  { %v1593_v16 = vrot.slane %v853_v38, %v1334_v41  ;;  %v887_v46 = vcombine.high %v1491_v25, %v1491_v25  ;;  %v680_v18 = vrot.slane %v666_v52, %v1334_v41  ;;  %v1607_v20 = vrot.slane %v1491_v25, %v1334_v41 }
  0x34   :  { %v1603_v19 = vrot.slane %v870_v2, %v1334_v41  ;;  %v969_v21 = vsel %vm968_vm0, %v639_v55, 0.0  ;;  %v970_v24 = vsel %vm968_vm0, %v647_v13, 0.0  ;;  %v1620_v31 = vmul.f32 %v396_v32, %v28_v60 }
  0x35   :  { %v1615_v63 = vrot.slane %v887_v46, %v1334_v41  ;;  %v971_v25 = vadd.f32 %v970_v24, %v969_v21  ;;  %v972_v33 = vsel %vm968_vm0, %v646_v22, 0.0  ;;  %v664_v34 = vcombine.high %v656_v3, %v656_v3 }
  0x36   :  { %v681_v51 = vcombine.high %v673_v35, %v673_v35  ;;  %v1624_v26 = vrot.slane %v683_v17, %v1334_v41  ;;  %v974_v59 = vsel %vm968_vm0, %v648_v61, 0.0  ;;  %v665_v55 = vcombine.high %v663_v14, %v663_v14 }
  0x37   :  { %v682_v45 = vcombine.high %v680_v18, %v680_v18  ;;  %v973_v57 = vadd.f32 %v972_v33, %v971_v25  ;;  %v783_v60 = vcombine.high %v1544_v58, %v1544_v58  ;;  %v784_v32 = vcombine.high %v1551_v15, %v1551_v15 }
  0x38   :  { %v800_v22 = vcombine.high %v1547_v47, %v1547_v47  ;;  %v976_v52 = vsel %vm968_vm0, %v656_v3, 0.0  ;;  %v801_v50 = vcombine.high %v1558_v44, %v1558_v44  ;;  %v817_v13 = vcombine.high %v1554_v48, %v1554_v48 }
  0x39   :  { %v818_v17 = vcombine.high %v1562_v49, %v1562_v49  ;;  %v975_v38 = vadd.f32 %v974_v59, %v973_v57  ;;  %v834_v2 = vcombine.high %v1565_v0, %v1565_v0  ;;  %v835_v61 = vcombine.high %v1569_v54, %v1569_v54 }
  0x3a   :  { %v851_v46 = vcombine.high %v1575_v36, %v1575_v36  ;;  %v978_v3 = vsel %vm968_vm0, %v664_v34, 0.0  ;;  %v852_v21 = vcombine.high %v1588_v40, %v1588_v40  ;;  %v868_v24 = vcombine.high %v1581_v56, %v1581_v56 }
  0x3b   :  { %v869_v25 = vcombine.high %v1593_v16, %v1593_v16  ;;  %v977_v33 = vadd.f32 %v976_v52, %v975_v38  ;;  %v885_v59 = vcombine.high %v1597_v42, %v1597_v42  ;;  %v886_v57 = vcombine.high %v1603_v19, %v1603_v19 }
  0x3c   :  { %v902_v43 = vcombine.high %v1607_v20, %v1607_v20  ;;  %v980_v34 = vsel %vm968_vm0, %v663_v14, 0.0  ;;  %v903_v62 = vcombine.high %v1615_v63, %v1615_v63  ;;  %v982_v27 = vsel %vm968_vm0, %v665_v55, 0.0 }
  0x3d   :  { %v979_v23 = vadd.f32 %v978_v3, %v977_v33  ;;  %v984_v28 = vsel %vm968_vm0, %v673_v35, 0.0  ;;  %v986_v52 = vsel %vm968_vm0, %v681_v51, 0.0  ;;  %v988_v38 = vsel %vm968_vm0, %v680_v18, 0.0 }
  0x3e   :  { %v990_v53 = vsel %vm968_vm0, %v682_v45, 0.0  ;;  %v1670_v8 = vsel %vm968_vm0, %v783_v60, 0.0  ;;  %v1674_v14 = vsel %vm968_vm0, %v1551_v15, 0.0  ;;  %v1677_v3 = vsel %vm968_vm0, %v784_v32, 0.0 }
  0x3f   :  { %v981_v58 = vadd.f32 %v980_v34, %v979_v23  ;;  %v1681_v35 = vsel %vm968_vm0, %v1547_v47, 0.0  ;;  %v1684_v51 = vsel %vm968_vm0, %v800_v22, 0.0  ;;  %v1688_v18 = vsel %vm968_vm0, %v1558_v44, 0.0 }
  0x40   :  { %v1691_v23 = vsel %vm968_vm0, %v801_v50, 0.0  ;;  %v1695_v15 = vsel %vm968_vm0, %v1554_v48, 0.0  ;;  %v1698_v45 = vsel %vm968_vm0, %v817_v13, 0.0  ;;  %v1702_v47 = vsel %vm968_vm0, %v1562_v49, 0.0 }
  0x41   :  { %v983_v55 = vadd.f32 %v982_v27, %v981_v58  ;;  %v1705_v60 = vsel %vm968_vm0, %v818_v17, 0.0  ;;  %v1709_v44 = vsel %vm968_vm0, %v1565_v0, 0.0  ;;  %v1712_v32 = vsel %vm968_vm0, %v834_v2, 0.0 }
  0x42   :  { %v1716_v27 = vsel %vm968_vm0, %v1569_v54, 0.0  ;;  %v1719_v58 = vsel %vm968_vm0, %v835_v61, 0.0  ;;  %v1723_v49 = vsel %vm968_vm0, %v1575_v36, 0.0  ;;  %v1726_v22 = vsel %vm968_vm0, %v851_v46, 0.0 }
  0x43   :  { %v985_v48 = vadd.f32 %v984_v28, %v983_v55  ;;  %v1730_v0 = vsel %vm968_vm0, %v1588_v40, 0.0  ;;  %v1733_v50 = vsel %vm968_vm0, %v852_v21, 0.0  ;;  %v1737_v54 = vsel %vm968_vm0, %v1581_v56, 0.0 }
  0x44   :  { %v1740_v28 = vsel %vm968_vm0, %v868_v24, 0.0  ;;  %v1744_v36 = vsel %vm968_vm0, %v1593_v16, 0.0  ;;  %v1747_v17 = vsel %vm968_vm0, %v869_v25, 0.0  ;;  %v1751_v40 = vsel %vm968_vm0, %v1597_v42, 0.0 }
  0x45   :  { %v987_v13 = vadd.f32 %v986_v52, %v985_v48  ;;  %v1754_v2 = vsel %vm968_vm0, %v885_v59, 0.0  ;;  %v1758_v56 = vsel %vm968_vm0, %v1603_v19, 0.0  ;;  %v1761_v61 = vsel %vm968_vm0, %v886_v57, 0.0 }
  0x46   :  { %v1765_v16 = vsel %vm968_vm0, %v1607_v20, 0.0  ;;  %v1768_v46 = vsel %vm968_vm0, %v902_v43, 0.0  ;;  %v1772_v42 = vsel %vm968_vm0, %v1615_v63, 0.0  ;;  %v1775_v24 = vsel %vm968_vm0, %v903_v62, 0.0 }
  0x47   :  { %v989_v21 = vadd.f32 %v988_v38, %v987_v13  ;;  %v29_v19 = vunpack.c.h.bf16 %v1517_v1  ;;  %v992_v25 = vsel %vm968_vm0, %v1585_v39, 0.0  ;;  %v1908_v20 = vrot.slane %v1541_v30, %v1334_v41 }
  0x48   :  { %v1909_v43 = vrot.slane %v1539_v29, %v1334_v41  ;;  %v1910_v59 = vrot.slane %v1522_v37, %v1159_v5  ;;  %v1911_v63 = vrot.slane %v1522_v37, %v1156_v4  ;;  %v1912_v1 = vrot.slane %v1522_v37, %v1165_v7 }
  0x49   :  { %v1913_v57 = vrot.slane %v1522_v37, %v1162_v6  ;;  %v991_v52 = vadd.f32 %v990_v53, %v989_v21  ;;  %v699_v30 = vcombine.high %v1624_v26, %v1624_v26  ;;  %v700_v29 = vcombine.high %v1620_v31, %v1620_v31 }
  0x4a   :  { %v413_v33 = vcombine.low %v1909_v43, %v1908_v20  ;;  %v414_v62 = vcombine.low %v1911_v63, %v1910_v59  ;;  %v707_v5 = vrot.slane %v1620_v31, %v1334_v41  ;;  %v1914_v4 = vcombine.high %v1585_v39, %v1585_v39  ;;  %v19_v31 = vld [vmem:[%s1887_s0 + $0x18] sm:$0xff] }
  0x4b   :  { %v415_v34 = vcombine.low %v1913_v57, %v1912_v1  ;;  %v993_v7 = vadd.f32 %v992_v25, %v991_v52  ;;  %v171_v6 = vrot.slane %v1522_v37, %v1173_v9  ;;  %v175_v53 = vrot.slane %v1522_v37, %v1176_v10 }
  0x4c   :  { %v994_v38 = vsel %vm968_vm0, %v1914_v4, 0.0  ;;  %v179_v55 = vrot.slane %v1522_v37, %v1179_v11  ;;  %v996_v48 = vsel %vm968_vm0, %v1624_v26, 0.0  ;;  %v183_v39 = vrot.slane %v1522_v37, %v1182_v12 }
  0x4d   :  { %v422_v13 = vrot.slane %v414_v62, %v1334_v41  ;;  %v429_v9 = vrot.slane %v415_v34, %v1334_v41  ;;  %v995_v21 = vadd.f32 %v994_v38, %v993_v7  ;;  %v605_v25 = vmul.f32 %v413_v33, %v29_v19 }
  0x4e   :  { %v714_v10 = vrot.slane %v700_v29, %v1334_v41  ;;  %v715_v20 = vcombine.high %v707_v5, %v707_v5  ;;  %v998_v11 = vsel %vm968_vm0, %v699_v30, 0.0  ;;  %v30_v26 = vunpack.c.l.bf16 %v19_v31 }
  0x4f   :  { %v997_v43 = vadd.f32 %v996_v48, %v995_v21  ;;  %v1000_v59 = vsel %vm968_vm0, %v707_v5, 0.0  ;;  %v430_v63 = vcombine.low %v422_v13, %v429_v9  ;;  %v431_v1 = vcombine.low %v171_v6, %v175_v53 }
  0x50   :  { %v432_v57 = vcombine.low %v179_v55, %v183_v39  ;;  %v716_v12 = vcombine.high %v714_v10, %v714_v10  ;;  %v717_v37 = vcombine.high %v605_v25, %v605_v25  ;;  %v724_v62 = vrot.slane %v605_v25, %v1334_v41 }
  0x51   :  { %v999_v52 = vadd.f32 %v998_v11, %v997_v43  ;;  %v1002_v34 = vsel %vm968_vm0, %v715_v20, 0.0  ;;  %v1004_v33 = vsel %vm968_vm0, %v714_v10, 0.0  ;;  %v439_v29 = vrot.slane %v431_v1, %v1334_v41 }
  0x52   :  { %v446_v30 = vrot.slane %v432_v57, %v1334_v41  ;;  %v606_v38 = vmul.f32 %v430_v63, %v30_v26  ;;  %v731_v5 = vrot.slane %v717_v37, %v1334_v41  ;;  %v732_v7 = vcombine.high %v724_v62, %v724_v62 }
  0x53   :  { %v1001_v19 = vadd.f32 %v1000_v59, %v999_v52  ;;  %v1006_v6 = vsel %vm968_vm0, %v716_v12, 0.0  ;;  %v1008_v55 = vsel %vm968_vm0, %v724_v62, 0.0  ;;  %v31_v48 = vunpack.c.h.bf16 %v19_v31 }
  0x54   :  { %v447_v39 = vcombine.low %v439_v29, %v446_v30  ;;  %v733_v9 = vcombine.high %v731_v5, %v731_v5  ;;  %v734_v21 = vcombine.high %v606_v38, %v606_v38  ;;  %v741_v25 = vrot.slane %v606_v38, %v1334_v41 }
  0x55   :  { %v1003_v4 = vadd.f32 %v1002_v34, %v1001_v19  ;;  %v1010_v10 = vsel %vm968_vm0, %v732_v7, 0.0  ;;  %v1012_v11 = vsel %vm968_vm0, %v731_v5, 0.0 }
  0x56   :  { %v607_v26 = vmul.f32 %v447_v39, %v31_v48  ;;  %v748_v59 = vrot.slane %v734_v21, %v1334_v41  ;;  %v749_v63 = vcombine.high %v741_v25, %v741_v25  ;;  %v1014_v1 = vsel %vm968_vm0, %v733_v9, 0.0 }
  0x57   :  { %v1005_v53 = vadd.f32 %v1004_v33, %v1003_v4  ;;  %v1016_v31 = vsel %vm968_vm0, %v741_v25, 0.0  ;;  %v1915_v25 = vld [vmem:[#allocation3_spill] sm:$0xff] }
  0x58   :  { %v750_v12 = vcombine.high %v748_v59, %v748_v59  ;;  %v751_v37 = vcombine.high %v607_v26, %v607_v26  ;;  %v758_v62 = vrot.slane %v607_v26, %v1334_v41  ;;  %v1018_v34 = vsel %vm968_vm0, %v749_v63, 0.0 }
  0x59   :  { %v1007_v13 = vadd.f32 %v1006_v6, %v1005_v53  ;;  %v1020_v33 = vsel %vm968_vm0, %v748_v59, 0.0 }
  0x5a   :  { %v765_v30 = vrot.slane %v751_v37, %v1334_v41  ;;  %v766_v4 = vcombine.high %v758_v62, %v758_v62  ;;  %v1022_v38 = vsel %vm968_vm0, %v750_v12, 0.0  ;;  %v1024_v7 = vsel %vm968_vm0, %v758_v62, 0.0 }
  0x5b   :  { %v1009_v20 = vadd.f32 %v1008_v55, %v1007_v13  ;;  %v1032_v41 = vsel %vm968_vm0, %v1915_v25, 0.0 }
  0x5c   :  { %v767_v53 = vcombine.high %v765_v30, %v765_v30  ;;  %v1026_v55 = vsel %vm968_vm0, %v766_v4, 0.0  ;;  %v1028_v39 = vsel %vm968_vm0, %v765_v30, 0.0 }
  0x5d   :  { %v1011_v43 = vadd.f32 %v1010_v10, %v1009_v20 }
  0x5e   :  { %v1030_v9 = vsel %vm968_vm0, %v767_v53, 0.0 }
  0x5f   :  { %v1013_v57 = vadd.f32 %v1012_v11, %v1011_v43 }
  0x61   :  { %v1015_v52 = vadd.f32 %v1014_v1, %v1013_v57 }
  0x63   :  { %v1017_v19 = vadd.f32 %v1016_v31, %v1015_v52 }
  0x65   :  { %v1019_v29 = vadd.f32 %v1018_v34, %v1017_v19 }
  0x67   :  { %v1021_v5 = vadd.f32 %v1020_v33, %v1019_v29 }
  0x69   :  { %v1023_v6 = vadd.f32 %v1022_v38, %v1021_v5 }
  0x6b   :  { %v1025_v48 = vadd.f32 %v1024_v7, %v1023_v6 }
  0x6d   :  { %v1027_v13 = vadd.f32 %v1026_v55, %v1025_v48 }
  0x6f   :  { %v1029_v21 = vadd.f32 %v1028_v39, %v1027_v13 }
  0x71   :  { %v1031_v10 = vadd.f32 %v1030_v9, %v1029_v21 }
  0x73   :  { %v1033_v20 = vadd.f32 %v1032_v41, %v1031_v10 }
  0x75   :  { %v1035_v11 = vadd.f32 %v1670_v8, %v1033_v20 }
  0x77   :  { %v1037_v43 = vadd.f32 %v1674_v14, %v1035_v11 }
  0x79   :  { %v1039_v26 = vadd.f32 %v1677_v3, %v1037_v43 }
  0x7b   :  { %v1041_v59 = vadd.f32 %v1681_v35, %v1039_v26 }
  0x7d   :  { %v1043_v63 = vadd.f32 %v1684_v51, %v1041_v59 }
  0x7f   :  { %v1045_v1 = vadd.f32 %v1688_v18, %v1043_v63 }
  0x81   :  { %v1047_v57 = vadd.f32 %v1691_v23, %v1045_v1 }
  0x83   :  { %v1049_v31 = vadd.f32 %v1695_v15, %v1047_v57 }
  0x85   :  { %v1051_v52 = vadd.f32 %v1698_v45, %v1049_v31 }
  0x87   :  { %v1053_v12 = vadd.f32 %v1702_v47, %v1051_v52 }
  0x89   :  { %v1055_v8 = vadd.f32 %v1705_v60, %v1053_v12 }
  0x8b   :  { %v1057_v14 = vadd.f32 %v1709_v44, %v1055_v8 }
  0x8d   :  { %v1059_v3 = vadd.f32 %v1712_v32, %v1057_v14 }
  0x8f   :  { %v1061_v35 = vadd.f32 %v1716_v27, %v1059_v3 }
  0x91   :  { %v1063_v51 = vadd.f32 %v1719_v58, %v1061_v35 }
  0x93   :  { %v1065_v18 = vadd.f32 %v1723_v49, %v1063_v51 }
  0x95   :  { %v1067_v23 = vadd.f32 %v1726_v22, %v1065_v18 }
  0x97   :  { %v1069_v15 = vadd.f32 %v1730_v0, %v1067_v23 }
  0x99   :  { %v1071_v45 = vadd.f32 %v1733_v50, %v1069_v15 }
  0x9b   :  { %v1073_v47 = vadd.f32 %v1737_v54, %v1071_v45 }
  0x9d   :  { %v1075_v60 = vadd.f32 %v1740_v28, %v1073_v47 }
  0x9f   :  { %v1077_v44 = vadd.f32 %v1744_v36, %v1075_v60  ;;  %v1118_v36 = vld [vmem:[#allocation2] ss:$0 sm:$0xff] }
  0xa1   :  { %v1079_v32 = vadd.f32 %v1747_v17, %v1077_v44 }
  0xa3   :  { %v1081_v27 = vadd.f32 %v1751_v40, %v1079_v32 }
  0xa5   :  { %v1083_v58 = vadd.f32 %v1754_v2, %v1081_v27 }
  0xa7   :  { %v1085_v49 = vadd.f32 %v1758_v56, %v1083_v58 }
  0xa9   :  { %v1087_v22 = vadd.f32 %v1761_v61, %v1085_v49 }
  0xab   :  { %v1089_v0 = vadd.f32 %v1765_v16, %v1087_v22 }
  0xad   :  { %v1091_v50 = vadd.f32 %v1768_v46, %v1089_v0 }
  0xaf   :  { %v1093_v54 = vadd.f32 %v1772_v42, %v1091_v50 }
  0xb1   :  { %v1095_v28 = vadd.f32 %v1775_v24, %v1093_v54 }
  0xb3   :  { %1096 = vadd.xlane.f32.xlu0 %v1095_v28 }
 0x140   :  { %v1097_v37 = vpop.xlane.xlu0 %1096 }
 0x141   :  { %v1105_v17 = vadd.f32 %v1118_v36, %v1097_v37 }
 0x143   :  { %v1106_v62 = vsub.f32 0.0, %v1105_v17 }
 0x145   :  { %v1107_v40 = vmul.f32 1.442695, %v1106_v62 }
 0x147   :  { %1120 = vpow2.f32 %v1107_v40 }
 0x151   :  { %v1121_v2 = vpop.eup %1120 }
 0x152   :  { %v1109_v34 = vadd.f32 1.0, %v1121_v2 }
 0x154   :  { %1122 = vrcp.f32 %v1109_v34 }
 0x15e   :  { %v1123_v56 = vpop.eup %1122 }
 0x15f   :  { %1113 = vst.msk [vmem:[%s1888_s3] sm:$0x3] %vm1112_vm1, %v1123_v56 }

// kernel: discriminator_forward.8
= control target key start
LH: loop header
LB: loop body
LE: loop exit
PB: predicated region body
PF: predicated region fallthrough
CT: control target
= control target key end

     0   :  { %s14846_s1 = inlined_call_operand.vmem [shape: bf16[4096,512], index: 1, kind: input, shape index: {}]   ;;  %s14847_s0 = inlined_call_operand.vmem [shape: bf16[32,4096], index: 0, kind: input, shape index: {}]   ;;  %s14848_s2 = inlined_call_operand.vmem [shape: f32[1,512], index: 2, kind: input, shape index: {}]   ;;  %s14849_s3 = inlined_call_operand.vmem [shape: bf16[32,512], index: 3, kind: output, shape index: {0}]   ;;  %s14850_s4 = inlined_call_operand.vmem [shape: f32[8,512], index: 4, kind: output, shape index: {1}]   ;;  %s14851_s5 = inlined_call_operand.vmem [shape: f32[8,512], index: 5, kind: output, shape index: {2}]  }
   0x1   :  { %v9798_v0 = vld [vmem:[%s14846_s1 + $0x4] ss:$16 sps:$4 sm:$0xff]   ;;  %v9800_v1 = vld [vmem:[%s14846_s1 + $0xc] ss:$16 sps:$4 sm:$0xff]   ;;  %v9802_v2 = vld [vmem:[%s14846_s1] ss:$16 sps:$4 sm:$0xff]  }
   0x2   :  { %6567 = vmatprep.subr.bf16.mxu0 %v9798_v0  ;;  %v9803_v3 = vld [vmem:[%s14846_s1 + $0x8] ss:$16 sps:$4 sm:$0xff]   ;;  %7415 = vmatprep.subr.bf16.mxu1 %v9800_v1  ;;  %v9804_v4 = vld [vmem:[%s14846_s1 + $0x24] ss:$16 sps:$4 sm:$0xff]   ;;  %v9806_v5 = vld [vmem:[%s14846_s1 + $0x2c] ss:$16 sps:$4 sm:$0xff]  }
   0x3   :  { %6568 = vmatpush1.bf16.msra.mxu0 %v9802_v2  ;;  %7416 = vmatpush1.bf16.msra.mxu1 %v9803_v3  ;;  %v9808_v6 = vld [vmem:[%s14846_s1 + $0x20] ss:$16 sps:$4 sm:$0xff]   ;;  %v9809_v7 = vld [vmem:[%s14846_s1 + $0x28] ss:$16 sps:$4 sm:$0xff]   ;;  %v9810_v8 = vld [vmem:[%s14846_s1 + $0x44] ss:$16 sps:$4 sm:$0xff]  }
   0x4   :  { %6569 = vmatprep.subr.bf16.mxu0 %v9804_v4  ;;  %7417 = vmatprep.subr.bf16.mxu1 %v9806_v5  ;;  %v9812_v9 = vld [vmem:[%s14846_s1 + $0x4c] ss:$16 sps:$4 sm:$0xff]   ;;  %v9814_v10 = vld [vmem:[%s14846_s1 + $0x40] ss:$16 sps:$4 sm:$0xff]   ;;  %v9815_v11 = vld [vmem:[%s14846_s1 + $0x48] ss:$16 sps:$4 sm:$0xff]  }
   0x5   :  { %v9816_v12 = vld [vmem:[%s14846_s1 + $0x64] ss:$16 sps:$4 sm:$0xff]   ;;  %v9818_v13 = vld [vmem:[%s14846_s1 + $0x6c] ss:$16 sps:$4 sm:$0xff]   ;;  %v9820_v14 = vld [vmem:[%s14846_s1 + $0x60] ss:$16 sps:$4 sm:$0xff]  }
   0x6   :  { %v9821_v15 = vld [vmem:[%s14846_s1 + $0x68] ss:$16 sps:$4 sm:$0xff]   ;;  %v9822_v16 = vld [vmem:[%s14846_s1 + $0x84] ss:$16 sps:$4 sm:$0xff]   ;;  %v9824_v17 = vld [vmem:[%s14846_s1 + $0x8c] ss:$16 sps:$4 sm:$0xff]  }
   0x7   :  { %6570 = vmatpush1.bf16.msra.mxu0 %v9808_v6  ;;  %7418 = vmatpush1.bf16.msra.mxu1 %v9809_v7  ;;  %v9826_v18 = vld [vmem:[%s14846_s1 + $0x80] ss:$16 sps:$4 sm:$0xff]   ;;  %v9827_v19 = vld [vmem:[%s14846_s1 + $0x88] ss:$16 sps:$4 sm:$0xff]   ;;  %v9828_v20 = vld [vmem:[%s14846_s1 + $0xa4] ss:$16 sps:$4 sm:$0xff]  }
   0x8   :  { %6571 = vmatprep.subr.bf16.mxu0 %v9810_v8  ;;  %7419 = vmatprep.subr.bf16.mxu1 %v9812_v9  ;;  %v9830_v21 = vld [vmem:[%s14846_s1 + $0xac] ss:$16 sps:$4 sm:$0xff]   ;;  %v9832_v22 = vld [vmem:[%s14846_s1 + $0xa0] ss:$16 sps:$4 sm:$0xff]   ;;  %v9833_v23 = vld [vmem:[%s14846_s1 + $0xa8] ss:$16 sps:$4 sm:$0xff]  }
   0x9   :  { %v9834_v24 = vld [vmem:[%s14846_s1 + $0xc4] ss:$16 sps:$4 sm:$0xff]   ;;  %v9836_v25 = vld [vmem:[%s14846_s1 + $0xcc] ss:$16 sps:$4 sm:$0xff]   ;;  %v9838_v26 = vld [vmem:[%s14846_s1 + $0xc0] ss:$16 sps:$4 sm:$0xff]  }
   0xa   :  { %v9839_v27 = vld [vmem:[%s14846_s1 + $0xc8] ss:$16 sps:$4 sm:$0xff]   ;;  %v9840_v28 = vld [vmem:[%s14846_s1 + $0xe4] ss:$16 sps:$4 sm:$0xff]   ;;  %v9842_v29 = vld [vmem:[%s14846_s1 + $0xec] ss:$16 sps:$4 sm:$0xff]  }
   0xb   :  { %6572 = vmatpush1.bf16.msra.mxu0 %v9814_v10  ;;  %7420 = vmatpush1.bf16.msra.mxu1 %v9815_v11  ;;  %v9844_v30 = vld [vmem:[%s14846_s1 + $0xe0] ss:$16 sps:$4 sm:$0xff]   ;;  %v9845_v31 = vld [vmem:[%s14846_s1 + $0xe8] ss:$16 sps:$4 sm:$0xff]   ;;  %v9846_v32 = vld [vmem:[%s14846_s1 + $0x104] ss:$16 sps:$4 sm:$0xff]  }
   0xc   :  { %6573 = vmatprep.subr.bf16.mxu0 %v9816_v12  ;;  %7421 = vmatprep.subr.bf16.mxu1 %v9818_v13  ;;  %v9848_v33 = vld [vmem:[%s14846_s1 + $0x10c] ss:$16 sps:$4 sm:$0xff]   ;;  %v9850_v34 = vld [vmem:[%s14846_s1 + $0x100] ss:$16 sps:$4 sm:$0xff]   ;;  %v9851_v35 = vld [vmem:[%s14846_s1 + $0x108] ss:$16 sps:$4 sm:$0xff]  }
   0xd   :  { %v9852_v36 = vld [vmem:[%s14846_s1 + $0x124] ss:$16 sps:$4 sm:$0xff]   ;;  %v9854_v37 = vld [vmem:[%s14846_s1 + $0x12c] ss:$16 sps:$4 sm:$0xff]   ;;  %v9856_v38 = vld [vmem:[%s14846_s1 + $0x120] ss:$16 sps:$4 sm:$0xff]  }
   0xe   :  { %v9857_v39 = vld [vmem:[%s14846_s1 + $0x128] ss:$16 sps:$4 sm:$0xff]   ;;  %v9858_v40 = vld [vmem:[%s14846_s1 + $0x144] ss:$16 sps:$4 sm:$0xff]   ;;  %v9860_v41 = vld [vmem:[%s14846_s1 + $0x14c] ss:$16 sps:$4 sm:$0xff]  }
   0xf   :  { %6574 = vmatpush1.bf16.msra.mxu0 %v9820_v14  ;;  %7422 = vmatpush1.bf16.msra.mxu1 %v9821_v15  ;;  %v9862_v42 = vld [vmem:[%s14846_s1 + $0x140] ss:$16 sps:$4 sm:$0xff]   ;;  %v9863_v43 = vld [vmem:[%s14846_s1 + $0x148] ss:$16 sps:$4 sm:$0xff]   ;;  %v9864_v44 = vld [vmem:[%s14846_s1 + $0x164] ss:$16 sps:$4 sm:$0xff]  }
  0x10   :  { %6575 = vmatprep.subr.bf16.mxu0 %v9822_v16  ;;  %7423 = vmatprep.subr.bf16.mxu1 %v9824_v17  ;;  %v9866_v45 = vld [vmem:[%s14846_s1 + $0x16c] ss:$16 sps:$4 sm:$0xff]   ;;  %v17_v46 = vld [vmem:[%s14847_s0] sm:$0xff]  ;;  %v9869_v49 = vld [vmem:[%s14846_s1 + $0x168] ss:$16 sps:$4 sm:$0xff]  }
  0x11   :  { %v33_v47 = vld [vmem:[%s14847_s0 + $0x80] sm:$0xff]  ;;  %v9872_v52 = vld [vmem:[%s14846_s1 + $0x18c] ss:$16 sps:$4 sm:$0xff]   ;;  %v9875_v54 = vld [vmem:[%s14846_s1 + $0x188] ss:$16 sps:$4 sm:$0xff]  }
  0x12   :  { %v9868_v48 = vld [vmem:[%s14846_s1 + $0x160] ss:$16 sps:$4 sm:$0xff]   ;;  %v8439_v50 = vcombine.high %v17_v46, %v33_v47  ;;  %v9870_v51 = vld [vmem:[%s14846_s1 + $0x184] ss:$16 sps:$4 sm:$0xff]   ;;  %v9878_v56 = vld [vmem:[%s14846_s1 + $0x1ac] ss:$16 sps:$4 sm:$0xff]   ;;  %v8438_v5 = vcombine.low %v17_v46, %v33_v47 }
  0x13   :  { %6576 = vmatpush1.bf16.msra.mxu0 %v9826_v18  ;;  %7424 = vmatpush1.bf16.msra.mxu1 %v9827_v19  ;;  %v9874_v53 = vld [vmem:[%s14846_s1 + $0x180] ss:$16 sps:$4 sm:$0xff]   ;;  %v9876_v55 = vld [vmem:[%s14846_s1 + $0x1a4] ss:$16 sps:$4 sm:$0xff]   ;;  %v9881_v58 = vld [vmem:[%s14846_s1 + $0x1a8] ss:$16 sps:$4 sm:$0xff]  }
  0x14   :  { %6577 = vmatprep.subr.bf16.mxu0 %v9828_v20  ;;  %7425 = vmatprep.subr.bf16.mxu1 %v9830_v21  ;;  %v9880_v57 = vld [vmem:[%s14846_s1 + $0x1a0] ss:$16 sps:$4 sm:$0xff]   ;;  %v9882_v59 = vld [vmem:[%s14846_s1 + $0x1c4] ss:$16 sps:$4 sm:$0xff]   ;;  %v9884_v60 = vld [vmem:[%s14846_s1 + $0x1cc] ss:$16 sps:$4 sm:$0xff]  }
  0x15   :  { %6599 = vmatprep.mubr.bf16.mxu0 %v8439_v50  ;;  %7447 = vmatprep.mubr.bf16.mxu1 %v8439_v50  ;;  %v9886_v61 = vld [vmem:[%s14846_s1 + $0x1c0] ss:$16 sps:$4 sm:$0xff]   ;;  %v9887_v62 = vld [vmem:[%s14846_s1 + $0x1c8] ss:$16 sps:$4 sm:$0xff]   ;;  %v9888_v63 = vld [vmem:[%s14846_s1 + $0x1e4] ss:$16 sps:$4 sm:$0xff]  }
  0x16   :  { %v9890_v0 = vld [vmem:[%s14846_s1 + $0x1ec] ss:$16 sps:$4 sm:$0xff]   ;;  %v9892_v1 = vld [vmem:[%s14846_s1 + $0x1e0] ss:$16 sps:$4 sm:$0xff]   ;;  %v9893_v2 = vld [vmem:[%s14846_s1 + $0x1e8] ss:$16 sps:$4 sm:$0xff]  }
  0x17   :  { %6578 = vmatpush1.bf16.msra.mxu0 %v9832_v22  ;;  %7426 = vmatpush1.bf16.msra.mxu1 %v9833_v23  ;;  %v9896_v3 = vld [vmem:[%s14846_s1 + $0x204] ss:$16 sps:$4 sm:$0xff]   ;;  %v9899_v4 = vld [vmem:[%s14846_s1 + $0x20c] ss:$16 sps:$4 sm:$0xff]   ;;  %v9894_v6 = vld [vmem:[%s14846_s1 + $0x200] ss:$16 sps:$4 sm:$0xff]  }
  0x18   :  { %6579 = vmatprep.subr.bf16.mxu0 %v9834_v24  ;;  %7427 = vmatprep.subr.bf16.mxu1 %v9836_v25  ;;  %v9897_v7 = vld [vmem:[%s14846_s1 + $0x208] ss:$16 sps:$4 sm:$0xff]   ;;  %v9902_v8 = vld [vmem:[%s14846_s1 + $0x224] ss:$16 sps:$4 sm:$0xff]   ;;  %v9905_v9 = vld [vmem:[%s14846_s1 + $0x22c] ss:$16 sps:$4 sm:$0xff]  }
  0x19   :  { %v9900_v10 = vld [vmem:[%s14846_s1 + $0x220] ss:$16 sps:$4 sm:$0xff]   ;;  %v9903_v11 = vld [vmem:[%s14846_s1 + $0x228] ss:$16 sps:$4 sm:$0xff]   ;;  %v9908_v12 = vld [vmem:[%s14846_s1 + $0x244] ss:$16 sps:$4 sm:$0xff]  }
  0x1a   :  { %v9911_v13 = vld [vmem:[%s14846_s1 + $0x24c] ss:$16 sps:$4 sm:$0xff]   ;;  %v9906_v14 = vld [vmem:[%s14846_s1 + $0x240] ss:$16 sps:$4 sm:$0xff]   ;;  %v9909_v15 = vld [vmem:[%s14846_s1 + $0x248] ss:$16 sps:$4 sm:$0xff]  }
  0x1b   :  { %6580 = vmatpush1.bf16.msra.mxu0 %v9838_v26  ;;  %7428 = vmatpush1.bf16.msra.mxu1 %v9839_v27  ;;  %v9914_v16 = vld [vmem:[%s14846_s1 + $0x264] ss:$16 sps:$4 sm:$0xff]   ;;  %v9917_v17 = vld [vmem:[%s14846_s1 + $0x26c] ss:$16 sps:$4 sm:$0xff]   ;;  %v9912_v18 = vld [vmem:[%s14846_s1 + $0x260] ss:$16 sps:$4 sm:$0xff]  }
  0x1c   :  { %6581 = vmatprep.subr.bf16.mxu0 %v9840_v28  ;;  %7429 = vmatprep.subr.bf16.mxu1 %v9842_v29  ;;  %v9915_v19 = vld [vmem:[%s14846_s1 + $0x268] ss:$16 sps:$4 sm:$0xff]   ;;  %v9920_v20 = vld [vmem:[%s14846_s1 + $0x284] ss:$16 sps:$4 sm:$0xff]   ;;  %v9923_v21 = vld [vmem:[%s14846_s1 + $0x28c] ss:$16 sps:$4 sm:$0xff]  }
  0x1d   :  { %v9918_v22 = vld [vmem:[%s14846_s1 + $0x280] ss:$16 sps:$4 sm:$0xff]   ;;  %v9921_v23 = vld [vmem:[%s14846_s1 + $0x288] ss:$16 sps:$4 sm:$0xff]   ;;  %v9926_v24 = vld [vmem:[%s14846_s1 + $0x2a4] ss:$16 sps:$4 sm:$0xff]  }
  0x1e   :  { %v9929_v25 = vld [vmem:[%s14846_s1 + $0x2ac] ss:$16 sps:$4 sm:$0xff]   ;;  %v49_v26 = vld [vmem:[%s14847_s0 + $0x100] sm:$0xff]  ;;  %v9945_v46 = vld [vmem:[%s14846_s1 + $0x308] ss:$16 sps:$4 sm:$0xff]  }
  0x1f   :  { %6582 = vmatpush1.bf16.msra.mxu0 %v9844_v30  ;;  %7430 = vmatpush1.bf16.msra.mxu1 %v9845_v31  ;;  %v65_v27 = vld [vmem:[%s14847_s0 + $0x180] sm:$0xff]  ;;  %v9927_v30 = vld [vmem:[%s14846_s1 + $0x2a8] ss:$16 sps:$4 sm:$0xff]  }
  0x20   :  { %6583 = vmatprep.subr.bf16.mxu0 %v9846_v32  ;;  %7431 = vmatprep.subr.bf16.mxu1 %v9848_v33  ;;  %v8471_v28 = vcombine.high %v49_v26, %v65_v27  ;;  %v9924_v29 = vld [vmem:[%s14846_s1 + $0x2a0] ss:$16 sps:$4 sm:$0xff]   ;;  %v8470_v31 = vcombine.low %v49_v26, %v65_v27  ;;  %v9932_v32 = vld [vmem:[%s14846_s1 + $0x2c4] ss:$16 sps:$4 sm:$0xff]   ;;  %v9935_v33 = vld [vmem:[%s14846_s1 + $0x2cc] ss:$16 sps:$4 sm:$0xff]  }
  0x21   :  { %v9950_v47 = vld [vmem:[%s14846_s1 + $0x324] ss:$16 sps:$4 sm:$0xff]   ;;  %v9951_v50 = vld [vmem:[%s14846_s1 + $0x328] ss:$16 sps:$4 sm:$0xff]  }
  0x22   :  { %v11818_v27 = vld [vmem:[%s14847_s0 + $0x90] sm:$0xff] }
  0x23   :  { %6584 = vmatpush1.bf16.msra.mxu0 %v9850_v34  ;;  %7432 = vmatpush1.bf16.msra.mxu1 %v9851_v35  ;;  %v11649_v34 = vld [vmem:[%s14847_s0 + $0x8] sm:$0xff] }
  0x24   :  { %6585 = vmatprep.subr.bf16.mxu0 %v9852_v36  ;;  %7433 = vmatprep.subr.bf16.mxu1 %v9854_v37  ;;  %v11654_v35 = vld [vmem:[%s14847_s0 + $0x88] sm:$0xff]  ;;  %v9930_v36 = vld [vmem:[%s14846_s1 + $0x2c0] ss:$16 sps:$4 sm:$0xff]  }
  0x25   :  { %v9933_v37 = vld [vmem:[%s14846_s1 + $0x2c8] ss:$16 sps:$4 sm:$0xff]  }
  0x27   :  { %6586 = vmatpush1.bf16.msra.mxu0 %v9856_v38  ;;  %7434 = vmatpush1.bf16.msra.mxu1 %v9857_v39  ;;  %v8441_v38 = vcombine.high %v11649_v34, %v11654_v35  ;;  %v9938_v39 = vld [vmem:[%s14846_s1 + $0x2e4] ss:$16 sps:$4 sm:$0xff]  }
  0x28   :  { %6587 = vmatprep.subr.bf16.mxu0 %v9858_v40  ;;  %7435 = vmatprep.subr.bf16.mxu1 %v9860_v41  ;;  %v9941_v40 = vld [vmem:[%s14846_s1 + $0x2ec] ss:$16 sps:$4 sm:$0xff]   ;;  %v9936_v41 = vld [vmem:[%s14846_s1 + $0x2e0] ss:$16 sps:$4 sm:$0xff]  }
  0x2b   :  { %6588 = vmatpush1.bf16.msra.mxu0 %v9862_v42  ;;  %7436 = vmatpush1.bf16.msra.mxu1 %v9863_v43  ;;  %v9939_v42 = vld [vmem:[%s14846_s1 + $0x2e8] ss:$16 sps:$4 sm:$0xff]   ;;  %v9944_v43 = vld [vmem:[%s14846_s1 + $0x304] ss:$16 sps:$4 sm:$0xff]  }
  0x2c   :  { %6589 = vmatprep.subr.bf16.mxu0 %v9864_v44  ;;  %7437 = vmatprep.subr.bf16.mxu1 %v9866_v45  ;;  %v9947_v44 = vld [vmem:[%s14846_s1 + $0x30c] ss:$16 sps:$4 sm:$0xff]   ;;  %v9942_v45 = vld [vmem:[%s14846_s1 + $0x300] ss:$16 sps:$4 sm:$0xff]  }
  0x2f   :  { %6590 = vmatpush1.bf16.msra.mxu0 %v9868_v48  ;;  %7438 = vmatpush1.bf16.msra.mxu1 %v9869_v49  ;;  %v9953_v48 = vld [vmem:[%s14846_s1 + $0x32c] ss:$16 sps:$4 sm:$0xff]   ;;  %v9948_v49 = vld [vmem:[%s14846_s1 + $0x320] ss:$16 sps:$4 sm:$0xff]  }
  0x30   :  { %6591 = vmatprep.subr.bf16.mxu0 %v9870_v51  ;;  %7439 = vmatprep.subr.bf16.mxu1 %v9872_v52  ;;  %v9956_v51 = vld [vmem:[%s14846_s1 + $0x344] ss:$16 sps:$4 sm:$0xff]   ;;  %v9959_v52 = vld [vmem:[%s14846_s1 + $0x34c] ss:$16 sps:$4 sm:$0xff]  }
  0x33   :  { %6592 = vmatpush1.bf16.msra.mxu0 %v9874_v53  ;;  %7440 = vmatpush1.bf16.msra.mxu1 %v9875_v54  ;;  %v9954_v53 = vld [vmem:[%s14846_s1 + $0x340] ss:$16 sps:$4 sm:$0xff]   ;;  %v9957_v54 = vld [vmem:[%s14846_s1 + $0x348] ss:$16 sps:$4 sm:$0xff]  }
  0x34   :  { %6593 = vmatprep.subr.bf16.mxu0 %v9876_v55  ;;  %7441 = vmatprep.subr.bf16.mxu1 %v9878_v56  ;;  %v9962_v55 = vld [vmem:[%s14846_s1 + $0x364] ss:$16 sps:$4 sm:$0xff]   ;;  %v9965_v56 = vld [vmem:[%s14846_s1 + $0x36c] ss:$16 sps:$4 sm:$0xff]  }
  0x37   :  { %6594 = vmatpush1.bf16.msra.mxu0 %v9880_v57  ;;  %7442 = vmatpush1.bf16.msra.mxu1 %v9881_v58  ;;  %v9960_v57 = vld [vmem:[%s14846_s1 + $0x360] ss:$16 sps:$4 sm:$0xff]   ;;  %v9963_v58 = vld [vmem:[%s14846_s1 + $0x368] ss:$16 sps:$4 sm:$0xff]  }
  0x38   :  { %6595 = vmatprep.subr.bf16.mxu0 %v9882_v59  ;;  %7443 = vmatprep.subr.bf16.mxu1 %v9884_v60  ;;  %v9968_v59 = vld [vmem:[%s14846_s1 + $0x384] ss:$16 sps:$4 sm:$0xff]   ;;  %v9971_v60 = vld [vmem:[%s14846_s1 + $0x38c] ss:$16 sps:$4 sm:$0xff]  }
  0x3b   :  { %6596 = vmatpush1.bf16.msra.mxu0 %v9886_v61  ;;  %7444 = vmatpush1.bf16.msra.mxu1 %v9887_v62  ;;  %v9966_v61 = vld [vmem:[%s14846_s1 + $0x380] ss:$16 sps:$4 sm:$0xff]   ;;  %v9969_v62 = vld [vmem:[%s14846_s1 + $0x388] ss:$16 sps:$4 sm:$0xff]  }
  0x3c   :  { %6597 = vmatprep.subr.bf16.mxu0 %v9888_v63  ;;  %7445 = vmatprep.subr.bf16.mxu1 %v9890_v0  ;;  %v9974_v63 = vld [vmem:[%s14846_s1 + $0x3a4] ss:$16 sps:$4 sm:$0xff]   ;;  %v9977_v0 = vld [vmem:[%s14846_s1 + $0x3ac] ss:$16 sps:$4 sm:$0xff]  }
  0x3f   :  { %6598 = vmatpush1.bf16.msra.mxu0 %v9892_v1  ;;  %7446 = vmatpush1.bf16.msra.mxu1 %v9893_v2  ;;  %v9972_v1 = vld [vmem:[%s14846_s1 + $0x3a0] ss:$16 sps:$4 sm:$0xff]   ;;  %v9975_v2 = vld [vmem:[%s14846_s1 + $0x3a8] ss:$16 sps:$4 sm:$0xff]  }
  0x40   :  { %6620 = vmatprep.subr.bf16.mxu0 %v9896_v3  ;;  %7468 = vmatprep.subr.bf16.mxu1 %v9899_v4  ;;  %v9980_v3 = vld [vmem:[%s14846_s1 + $0x3c4] ss:$16 sps:$4 sm:$0xff]   ;;  %v9983_v4 = vld [vmem:[%s14846_s1 + $0x3cc] ss:$16 sps:$4 sm:$0xff]  }
  0x42   :  { %6600 = vmatmul.mubr.bf16.vlgmr.msra.gmra.mrb[0].mxu0 %v8438_v5  ;;  %7448 = vmatmul.mubr.bf16.vlgmr.msra.gmra.mrb[0].mxu1 %v8438_v5  ;;  %v9978_v5 = vld [vmem:[%s14846_s1 + $0x3c0] ss:$16 sps:$4 sm:$0xff]  }
  0x43   :  { %6621 = vmatpush1.bf16.msra.mxu0 %v9894_v6  ;;  %7469 = vmatpush1.bf16.msra.mxu1 %v9897_v7  ;;  %v9981_v6 = vld [vmem:[%s14846_s1 + $0x3c8] ss:$16 sps:$4 sm:$0xff]   ;;  %v9986_v7 = vld [vmem:[%s14846_s1 + $0x3e4] ss:$16 sps:$4 sm:$0xff]  }
  0x44   :  { %6622 = vmatprep.subr.bf16.mxu0 %v9902_v8  ;;  %7470 = vmatprep.subr.bf16.mxu1 %v9905_v9  ;;  %v9989_v8 = vld [vmem:[%s14846_s1 + $0x3ec] ss:$16 sps:$4 sm:$0xff]   ;;  %v9984_v9 = vld [vmem:[%s14846_s1 + $0x3e0] ss:$16 sps:$4 sm:$0xff]  }
  0x45   :  { %6609 = vmatprep.mubr.bf16.mxu0 %v8471_v28  ;;  %7457 = vmatprep.mubr.bf16.mxu1 %v8471_v28  ;;  %v10002_v28 = vld [vmem:[%s14846_s1 + $0x440] ss:$16 sps:$4 sm:$0xff]  }
  0x47   :  { %6623 = vmatpush1.bf16.msra.mxu0 %v9900_v10  ;;  %7471 = vmatpush1.bf16.msra.mxu1 %v9903_v11  ;;  %v9987_v10 = vld [vmem:[%s14846_s1 + $0x3e8] ss:$16 sps:$4 sm:$0xff]   ;;  %v9992_v11 = vld [vmem:[%s14846_s1 + $0x404] ss:$16 sps:$4 sm:$0xff]  }
  0x48   :  { %6624 = vmatprep.subr.bf16.mxu0 %v9908_v12  ;;  %7472 = vmatprep.subr.bf16.mxu1 %v9911_v13  ;;  %v9995_v12 = vld [vmem:[%s14846_s1 + $0x40c] ss:$16 sps:$4 sm:$0xff]   ;;  %v9990_v13 = vld [vmem:[%s14846_s1 + $0x400] ss:$16 sps:$4 sm:$0xff]  }
  0x4a   :  { %6610 = vmatmul.mubr.bf16.gmra.mrb[4].mxu0 %v8470_v31  ;;  %7458 = vmatmul.mubr.bf16.gmra.mrb[4].mxu1 %v8470_v31  ;;  %v10013_v31 = vld [vmem:[%s14846_s1 + $0x46c] ss:$16 sps:$4 sm:$0xff]  }
  0x4b   :  { %6625 = vmatpush1.bf16.msra.mxu0 %v9906_v14  ;;  %7473 = vmatpush1.bf16.msra.mxu1 %v9909_v15  ;;  %v9993_v14 = vld [vmem:[%s14846_s1 + $0x408] ss:$16 sps:$4 sm:$0xff]   ;;  %v8440_v15 = vcombine.low %v11649_v34, %v11654_v35  ;;  %v10016_v35 = vld [vmem:[%s14846_s1 + $0x484] ss:$16 sps:$4 sm:$0xff]  }
  0x4c   :  { %6626 = vmatprep.subr.bf16.mxu0 %v9914_v16  ;;  %7474 = vmatprep.subr.bf16.mxu1 %v9917_v17  ;;  %v50_v16 = vld [vmem:[%s14847_s0 + $0x108] sm:$0xff] }
  0x4d   :  { %6652 = vmatprep.mubr.bf16.mxu0 %v8441_v38  ;;  %7500 = vmatprep.mubr.bf16.mxu1 %v8441_v38  ;;  %v66_v17 = vld [vmem:[%s14847_s0 + $0x188] sm:$0xff] }
  0x4e   :  { %v8472_v26 = vcombine.low %v50_v16, %v66_v17  ;;  %v10011_v34 = vld [vmem:[%s14846_s1 + $0x468] ss:$16 sps:$4 sm:$0xff]  }
  0x4f   :  { %6627 = vmatpush1.bf16.msra.mxu0 %v9912_v18  ;;  %7475 = vmatpush1.bf16.msra.mxu1 %v9915_v19  ;;  %v9998_v18 = vld [vmem:[%s14846_s1 + $0x424] ss:$16 sps:$4 sm:$0xff]   ;;  %v10001_v19 = vld [vmem:[%s14846_s1 + $0x42c] ss:$16 sps:$4 sm:$0xff]   ;;  %v10017_v38 = vld [vmem:[%s14846_s1 + $0x488] ss:$16 sps:$4 sm:$0xff]  }
  0x50   :  { %6628 = vmatprep.subr.bf16.mxu0 %v9920_v20  ;;  %7476 = vmatprep.subr.bf16.mxu1 %v9923_v21  ;;  %v8473_v20 = vcombine.high %v50_v16, %v66_v17  ;;  %v9996_v21 = vld [vmem:[%s14846_s1 + $0x420] ss:$16 sps:$4 sm:$0xff]   ;;  %v10085_v16 = vld [vmem:[%s14846_s1 + $0x5ec] ss:$16 sps:$4 sm:$0xff]  }
  0x51   :  { %v10080_v17 = vld [vmem:[%s14846_s1 + $0x5e0] ss:$16 sps:$4 sm:$0xff]  }
  0x53   :  { %6629 = vmatpush1.bf16.msra.mxu0 %v9918_v22  ;;  %7477 = vmatpush1.bf16.msra.mxu1 %v9921_v23  ;;  %v9999_v22 = vld [vmem:[%s14846_s1 + $0x428] ss:$16 sps:$4 sm:$0xff]   ;;  %v10004_v23 = vld [vmem:[%s14846_s1 + $0x444] ss:$16 sps:$4 sm:$0xff]  }
  0x54   :  { %6630 = vmatprep.subr.bf16.mxu0 %v9926_v24  ;;  %7478 = vmatprep.subr.bf16.mxu1 %v9929_v25  ;;  %v10007_v24 = vld [vmem:[%s14846_s1 + $0x44c] ss:$16 sps:$4 sm:$0xff]   ;;  %v11813_v25 = vld [vmem:[%s14847_s0 + $0x10] sm:$0xff] }
  0x57   :  { %6631 = vmatpush1.bf16.msra.mxu0 %v9924_v29  ;;  %7479 = vmatpush1.bf16.msra.mxu1 %v9927_v30  ;;  %v10005_v29 = vld [vmem:[%s14846_s1 + $0x448] ss:$16 sps:$4 sm:$0xff]   ;;  %v10010_v30 = vld [vmem:[%s14846_s1 + $0x464] ss:$16 sps:$4 sm:$0xff]  }
  0x58   :  { %6632 = vmatprep.subr.bf16.mxu0 %v9932_v32  ;;  %7480 = vmatprep.subr.bf16.mxu1 %v9935_v33  ;;  %v8443_v32 = vcombine.high %v11813_v25, %v11818_v27  ;;  %v10008_v33 = vld [vmem:[%s14846_s1 + $0x460] ss:$16 sps:$4 sm:$0xff]  }
  0x5b   :  { %6633 = vmatpush1.bf16.msra.mxu0 %v9930_v36  ;;  %7481 = vmatpush1.bf16.msra.mxu1 %v9933_v37  ;;  %v10019_v36 = vld [vmem:[%s14846_s1 + $0x48c] ss:$16 sps:$4 sm:$0xff]   ;;  %v10014_v37 = vld [vmem:[%s14846_s1 + $0x480] ss:$16 sps:$4 sm:$0xff]  }
  0x5c   :  { %6634 = vmatprep.subr.bf16.mxu0 %v9938_v39  ;;  %7482 = vmatprep.subr.bf16.mxu1 %v9941_v40  ;;  %v10022_v39 = vld [vmem:[%s14846_s1 + $0x4a4] ss:$16 sps:$4 sm:$0xff]   ;;  %v10025_v40 = vld [vmem:[%s14846_s1 + $0x4ac] ss:$16 sps:$4 sm:$0xff]  }
  0x5f   :  { %6635 = vmatpush1.bf16.msra.mxu0 %v9936_v41  ;;  %7483 = vmatpush1.bf16.msra.mxu1 %v9939_v42  ;;  %v10020_v41 = vld [vmem:[%s14846_s1 + $0x4a0] ss:$16 sps:$4 sm:$0xff]   ;;  %v10023_v42 = vld [vmem:[%s14846_s1 + $0x4a8] ss:$16 sps:$4 sm:$0xff]  }
  0x60   :  { %6636 = vmatprep.subr.bf16.mxu0 %v9944_v43  ;;  %7484 = vmatprep.subr.bf16.mxu1 %v9947_v44  ;;  %v10028_v43 = vld [vmem:[%s14846_s1 + $0x4c4] ss:$16 sps:$4 sm:$0xff]   ;;  %v10031_v44 = vld [vmem:[%s14846_s1 + $0x4cc] ss:$16 sps:$4 sm:$0xff]  }
  0x63   :  { %6637 = vmatpush1.bf16.msra.mxu0 %v9942_v45  ;;  %7485 = vmatpush1.bf16.msra.mxu1 %v9945_v46  ;;  %v10026_v45 = vld [vmem:[%s14846_s1 + $0x4c0] ss:$16 sps:$4 sm:$0xff]   ;;  %v10029_v46 = vld [vmem:[%s14846_s1 + $0x4c8] ss:$16 sps:$4 sm:$0xff]  }
  0x64   :  { %6638 = vmatprep.subr.bf16.mxu0 %v9950_v47  ;;  %7486 = vmatprep.subr.bf16.mxu1 %v9953_v48  ;;  %v10034_v47 = vld [vmem:[%s14846_s1 + $0x4e4] ss:$16 sps:$4 sm:$0xff]   ;;  %v10037_v48 = vld [vmem:[%s14846_s1 + $0x4ec] ss:$16 sps:$4 sm:$0xff]  }
  0x67   :  { %6639 = vmatpush1.bf16.msra.mxu0 %v9948_v49  ;;  %7487 = vmatpush1.bf16.msra.mxu1 %v9951_v50  ;;  %v10032_v49 = vld [vmem:[%s14846_s1 + $0x4e0] ss:$16 sps:$4 sm:$0xff]   ;;  %v10035_v50 = vld [vmem:[%s14846_s1 + $0x4e8] ss:$16 sps:$4 sm:$0xff]  }
  0x68   :  { %6640 = vmatprep.subr.bf16.mxu0 %v9956_v51  ;;  %7488 = vmatprep.subr.bf16.mxu1 %v9959_v52  ;;  %v10040_v51 = vld [vmem:[%s14846_s1 + $0x504] ss:$16 sps:$4 sm:$0xff]   ;;  %v10043_v52 = vld [vmem:[%s14846_s1 + $0x50c] ss:$16 sps:$4 sm:$0xff]  }
  0x6b   :  { %6641 = vmatpush1.bf16.msra.mxu0 %v9954_v53  ;;  %7489 = vmatpush1.bf16.msra.mxu1 %v9957_v54  ;;  %v10038_v53 = vld [vmem:[%s14846_s1 + $0x500] ss:$16 sps:$4 sm:$0xff]   ;;  %v10041_v54 = vld [vmem:[%s14846_s1 + $0x508] ss:$16 sps:$4 sm:$0xff]  }
  0x6c   :  { %6642 = vmatprep.subr.bf16.mxu0 %v9962_v55  ;;  %7490 = vmatprep.subr.bf16.mxu1 %v9965_v56  ;;  %v10046_v55 = vld [vmem:[%s14846_s1 + $0x524] ss:$16 sps:$4 sm:$0xff]   ;;  %v10049_v56 = vld [vmem:[%s14846_s1 + $0x52c] ss:$16 sps:$4 sm:$0xff]  }
  0x6f   :  { %6643 = vmatpush1.bf16.msra.mxu0 %v9960_v57  ;;  %7491 = vmatpush1.bf16.msra.mxu1 %v9963_v58  ;;  %v10044_v57 = vld [vmem:[%s14846_s1 + $0x520] ss:$16 sps:$4 sm:$0xff]   ;;  %v10047_v58 = vld [vmem:[%s14846_s1 + $0x528] ss:$16 sps:$4 sm:$0xff]  }
  0x70   :  { %6644 = vmatprep.subr.bf16.mxu0 %v9968_v59  ;;  %7492 = vmatprep.subr.bf16.mxu1 %v9971_v60  ;;  %v10052_v59 = vld [vmem:[%s14846_s1 + $0x544] ss:$16 sps:$4 sm:$0xff]   ;;  %v10055_v60 = vld [vmem:[%s14846_s1 + $0x54c] ss:$16 sps:$4 sm:$0xff]  }
  0x73   :  { %6645 = vmatpush1.bf16.msra.mxu0 %v9966_v61  ;;  %7493 = vmatpush1.bf16.msra.mxu1 %v9969_v62  ;;  %v10050_v61 = vld [vmem:[%s14846_s1 + $0x540] ss:$16 sps:$4 sm:$0xff]   ;;  %v10053_v62 = vld [vmem:[%s14846_s1 + $0x548] ss:$16 sps:$4 sm:$0xff]  }
  0x74   :  { %6646 = vmatprep.subr.bf16.mxu0 %v9974_v63  ;;  %7494 = vmatprep.subr.bf16.mxu1 %v9977_v0  ;;  %v10058_v63 = vld [vmem:[%s14846_s1 + $0x564] ss:$16 sps:$4 sm:$0xff]   ;;  %v10061_v0 = vld [vmem:[%s14846_s1 + $0x56c] ss:$16 sps:$4 sm:$0xff]  }
  0x77   :  { %6647 = vmatpush1.bf16.msra.mxu0 %v9972_v1  ;;  %7495 = vmatpush1.bf16.msra.mxu1 %v9975_v2  ;;  %v10056_v1 = vld [vmem:[%s14846_s1 + $0x560] ss:$16 sps:$4 sm:$0xff]   ;;  %v10059_v2 = vld [vmem:[%s14846_s1 + $0x568] ss:$16 sps:$4 sm:$0xff]  }
  0x78   :  { %6648 = vmatprep.subr.bf16.mxu0 %v9980_v3  ;;  %7496 = vmatprep.subr.bf16.mxu1 %v9983_v4  ;;  %v10064_v3 = vld [vmem:[%s14846_s1 + $0x584] ss:$16 sps:$4 sm:$0xff]   ;;  %v10067_v4 = vld [vmem:[%s14846_s1 + $0x58c] ss:$16 sps:$4 sm:$0xff]  }
  0x7b   :  { %6649 = vmatpush1.bf16.msra.mxu0 %v9978_v5  ;;  %7497 = vmatpush1.bf16.msra.mxu1 %v9981_v6  ;;  %v10062_v5 = vld [vmem:[%s14846_s1 + $0x580] ss:$16 sps:$4 sm:$0xff]   ;;  %v10065_v6 = vld [vmem:[%s14846_s1 + $0x588] ss:$16 sps:$4 sm:$0xff]  }
  0x7c   :  { %6650 = vmatprep.subr.bf16.mxu0 %v9986_v7  ;;  %7498 = vmatprep.subr.bf16.mxu1 %v9989_v8  ;;  %v10070_v7 = vld [vmem:[%s14846_s1 + $0x5a4] ss:$16 sps:$4 sm:$0xff]   ;;  %v10073_v8 = vld [vmem:[%s14846_s1 + $0x5ac] ss:$16 sps:$4 sm:$0xff]  }
  0x7f   :  { %6651 = vmatpush1.bf16.msra.mxu0 %v9984_v9  ;;  %7499 = vmatpush1.bf16.msra.mxu1 %v9987_v10  ;;  %v10068_v9 = vld [vmem:[%s14846_s1 + $0x5a0] ss:$16 sps:$4 sm:$0xff]   ;;  %v10071_v10 = vld [vmem:[%s14846_s1 + $0x5a8] ss:$16 sps:$4 sm:$0xff]  }
  0x80   :  { %6673 = vmatprep.subr.bf16.mxu0 %v9992_v11  ;;  %7521 = vmatprep.subr.bf16.mxu1 %v9995_v12  ;;  %v10076_v11 = vld [vmem:[%s14846_s1 + $0x5c4] ss:$16 sps:$4 sm:$0xff]   ;;  %v10079_v12 = vld [vmem:[%s14846_s1 + $0x5cc] ss:$16 sps:$4 sm:$0xff]  }
  0x82   :  { %6653 = vmatmul.mubr.bf16.vlgmr.msra.gmra.mrb[0].mxu0 %v8440_v15  ;;  %7501 = vmatmul.mubr.bf16.vlgmr.msra.gmra.mrb[0].mxu1 %v8440_v15  ;;  %v10082_v15 = vld [vmem:[%s14846_s1 + $0x5e4] ss:$16 sps:$4 sm:$0xff]  }
  0x83   :  { %6674 = vmatpush1.bf16.msra.mxu0 %v9990_v13  ;;  %7522 = vmatpush1.bf16.msra.mxu1 %v9993_v14  ;;  %v10074_v13 = vld [vmem:[%s14846_s1 + $0x5c0] ss:$16 sps:$4 sm:$0xff]   ;;  %v10077_v14 = vld [vmem:[%s14846_s1 + $0x5c8] ss:$16 sps:$4 sm:$0xff]  }
  0x84   :  { %6675 = vmatprep.subr.bf16.mxu0 %v9998_v18  ;;  %7523 = vmatprep.subr.bf16.mxu1 %v10001_v19  ;;  %v10083_v18 = vld [vmem:[%s14846_s1 + $0x5e8] ss:$16 sps:$4 sm:$0xff]   ;;  %v10088_v19 = vld [vmem:[%s14846_s1 + $0x604] ss:$16 sps:$4 sm:$0xff]  }
  0x85   :  { %6662 = vmatprep.mubr.bf16.mxu0 %v8473_v20  ;;  %7510 = vmatprep.mubr.bf16.mxu1 %v8473_v20  ;;  %v10091_v20 = vld [vmem:[%s14846_s1 + $0x60c] ss:$16 sps:$4 sm:$0xff]  }
  0x87   :  { %6676 = vmatpush1.bf16.msra.mxu0 %v9996_v21  ;;  %7524 = vmatpush1.bf16.msra.mxu1 %v9999_v22  ;;  %v51_v21 = vld [vmem:[%s14847_s0 + $0x110] sm:$0xff]  ;;  %v8442_v22 = vcombine.low %v11813_v25, %v11818_v27  ;;  %v10097_v27 = vld [vmem:[%s14846_s1 + $0x62c] ss:$16 sps:$4 sm:$0xff]  }
  0x88   :  { %6677 = vmatprep.subr.bf16.mxu0 %v10004_v23  ;;  %7525 = vmatprep.subr.bf16.mxu1 %v10007_v24  ;;  %v67_v23 = vld [vmem:[%s14847_s0 + $0x190] sm:$0xff] }
  0x89   :  { %v10086_v24 = vld [vmem:[%s14846_s1 + $0x600] ss:$16 sps:$4 sm:$0xff]   ;;  %v10094_v25 = vld [vmem:[%s14846_s1 + $0x624] ss:$16 sps:$4 sm:$0xff]  }
  0x8a   :  { %6663 = vmatmul.mubr.bf16.gmra.mrb[4].mxu0 %v8472_v26  ;;  %7511 = vmatmul.mubr.bf16.gmra.mrb[4].mxu1 %v8472_v26  ;;  %v10089_v26 = vld [vmem:[%s14846_s1 + $0x608] ss:$16 sps:$4 sm:$0xff]  }
  0x8b   :  { %6678 = vmatpush1.bf16.msra.mxu0 %v10002_v28  ;;  %7526 = vmatpush1.bf16.msra.mxu1 %v10005_v29  ;;  %v8475_v28 = vcombine.high %v51_v21, %v67_v23  ;;  %v10092_v29 = vld [vmem:[%s14846_s1 + $0x620] ss:$16 sps:$4 sm:$0xff]  }
  0x8c   :  { %6679 = vmatprep.subr.bf16.mxu0 %v10010_v30  ;;  %7527 = vmatprep.subr.bf16.mxu1 %v10013_v31  ;;  %v10095_v30 = vld [vmem:[%s14846_s1 + $0x628] ss:$16 sps:$4 sm:$0xff]   ;;  %v10100_v31 = vld [vmem:[%s14846_s1 + $0x644] ss:$16 sps:$4 sm:$0xff]  }
  0x8d   :  { %6705 = vmatprep.mubr.bf16.mxu0 %v8443_v32  ;;  %7553 = vmatprep.mubr.bf16.mxu1 %v8443_v32  ;;  %v10103_v32 = vld [vmem:[%s14846_s1 + $0x64c] ss:$16 sps:$4 sm:$0xff]  }
  0x8f   :  { %6680 = vmatpush1.bf16.msra.mxu0 %v10008_v33  ;;  %7528 = vmatpush1.bf16.msra.mxu1 %v10011_v34  ;;  %v12025_v33 = vld [vmem:[%s14847_s0 + $0x18] sm:$0xff]  ;;  %v8474_v34 = vcombine.low %v51_v21, %v67_v23  ;;  %v10170_v21 = vld [vmem:[%s14846_s1 + $0x7c0] ss:$16 sps:$4 sm:$0xff]   ;;  %v10178_v23 = vld [vmem:[%s14846_s1 + $0x7e4] ss:$16 sps:$4 sm:$0xff]  }
  0x90   :  { %6681 = vmatprep.subr.bf16.mxu0 %v10016_v35  ;;  %7529 = vmatprep.subr.bf16.mxu1 %v10019_v36  ;;  %v12030_v35 = vld [vmem:[%s14847_s0 + $0x98] sm:$0xff]  ;;  %v10098_v36 = vld [vmem:[%s14846_s1 + $0x640] ss:$16 sps:$4 sm:$0xff]  }
  0x93   :  { %6682 = vmatpush1.bf16.msra.mxu0 %v10014_v37  ;;  %7530 = vmatpush1.bf16.msra.mxu1 %v10017_v38  ;;  %v10101_v37 = vld [vmem:[%s14846_s1 + $0x648] ss:$16 sps:$4 sm:$0xff]   ;;  %v10106_v38 = vld [vmem:[%s14846_s1 + $0x664] ss:$16 sps:$4 sm:$0xff]  }
  0x94   :  { %6683 = vmatprep.subr.bf16.mxu0 %v10022_v39  ;;  %7531 = vmatprep.subr.bf16.mxu1 %v10025_v40  ;;  %v10109_v39 = vld [vmem:[%s14846_s1 + $0x66c] ss:$16 sps:$4 sm:$0xff]   ;;  %v8445_v40 = vcombine.high %v12025_v33, %v12030_v35 }
  0x97   :  { %6684 = vmatpush1.bf16.msra.mxu0 %v10020_v41  ;;  %7532 = vmatpush1.bf16.msra.mxu1 %v10023_v42  ;;  %v10104_v41 = vld [vmem:[%s14846_s1 + $0x660] ss:$16 sps:$4 sm:$0xff]   ;;  %v10107_v42 = vld [vmem:[%s14846_s1 + $0x668] ss:$16 sps:$4 sm:$0xff]  }
  0x98   :  { %6685 = vmatprep.subr.bf16.mxu0 %v10028_v43  ;;  %7533 = vmatprep.subr.bf16.mxu1 %v10031_v44  ;;  %v10112_v43 = vld [vmem:[%s14846_s1 + $0x684] ss:$16 sps:$4 sm:$0xff]   ;;  %v10115_v44 = vld [vmem:[%s14846_s1 + $0x68c] ss:$16 sps:$4 sm:$0xff]  }
  0x9b   :  { %6686 = vmatpush1.bf16.msra.mxu0 %v10026_v45  ;;  %7534 = vmatpush1.bf16.msra.mxu1 %v10029_v46  ;;  %v10110_v45 = vld [vmem:[%s14846_s1 + $0x680] ss:$16 sps:$4 sm:$0xff]   ;;  %v10113_v46 = vld [vmem:[%s14846_s1 + $0x688] ss:$16 sps:$4 sm:$0xff]  }
  0x9c   :  { %6687 = vmatprep.subr.bf16.mxu0 %v10034_v47  ;;  %7535 = vmatprep.subr.bf16.mxu1 %v10037_v48  ;;  %v10118_v47 = vld [vmem:[%s14846_s1 + $0x6a4] ss:$16 sps:$4 sm:$0xff]   ;;  %v10121_v48 = vld [vmem:[%s14846_s1 + $0x6ac] ss:$16 sps:$4 sm:$0xff]  }
  0x9f   :  { %6688 = vmatpush1.bf16.msra.mxu0 %v10032_v49  ;;  %7536 = vmatpush1.bf16.msra.mxu1 %v10035_v50  ;;  %v10116_v49 = vld [vmem:[%s14846_s1 + $0x6a0] ss:$16 sps:$4 sm:$0xff]   ;;  %v10119_v50 = vld [vmem:[%s14846_s1 + $0x6a8] ss:$16 sps:$4 sm:$0xff]  }
  0xa0   :  { %6689 = vmatprep.subr.bf16.mxu0 %v10040_v51  ;;  %7537 = vmatprep.subr.bf16.mxu1 %v10043_v52  ;;  %v10124_v51 = vld [vmem:[%s14846_s1 + $0x6c4] ss:$16 sps:$4 sm:$0xff]   ;;  %v10127_v52 = vld [vmem:[%s14846_s1 + $0x6cc] ss:$16 sps:$4 sm:$0xff]  }
  0xa3   :  { %6690 = vmatpush1.bf16.msra.mxu0 %v10038_v53  ;;  %7538 = vmatpush1.bf16.msra.mxu1 %v10041_v54  ;;  %v10122_v53 = vld [vmem:[%s14846_s1 + $0x6c0] ss:$16 sps:$4 sm:$0xff]   ;;  %v10125_v54 = vld [vmem:[%s14846_s1 + $0x6c8] ss:$16 sps:$4 sm:$0xff]  }
  0xa4   :  { %6691 = vmatprep.subr.bf16.mxu0 %v10046_v55  ;;  %7539 = vmatprep.subr.bf16.mxu1 %v10049_v56  ;;  %v10130_v55 = vld [vmem:[%s14846_s1 + $0x6e4] ss:$16 sps:$4 sm:$0xff]   ;;  %v10133_v56 = vld [vmem:[%s14846_s1 + $0x6ec] ss:$16 sps:$4 sm:$0xff]  }
  0xa7   :  { %6692 = vmatpush1.bf16.msra.mxu0 %v10044_v57  ;;  %7540 = vmatpush1.bf16.msra.mxu1 %v10047_v58  ;;  %v10128_v57 = vld [vmem:[%s14846_s1 + $0x6e0] ss:$16 sps:$4 sm:$0xff]   ;;  %v10131_v58 = vld [vmem:[%s14846_s1 + $0x6e8] ss:$16 sps:$4 sm:$0xff]  }
  0xa8   :  { %6693 = vmatprep.subr.bf16.mxu0 %v10052_v59  ;;  %7541 = vmatprep.subr.bf16.mxu1 %v10055_v60  ;;  %v10136_v59 = vld [vmem:[%s14846_s1 + $0x704] ss:$16 sps:$4 sm:$0xff]   ;;  %v10139_v60 = vld [vmem:[%s14846_s1 + $0x70c] ss:$16 sps:$4 sm:$0xff]  }
  0xab   :  { %6694 = vmatpush1.bf16.msra.mxu0 %v10050_v61  ;;  %7542 = vmatpush1.bf16.msra.mxu1 %v10053_v62  ;;  %v10134_v61 = vld [vmem:[%s14846_s1 + $0x700] ss:$16 sps:$4 sm:$0xff]   ;;  %v10137_v62 = vld [vmem:[%s14846_s1 + $0x708] ss:$16 sps:$4 sm:$0xff]  }
  0xac   :  { %6695 = vmatprep.subr.bf16.mxu0 %v10058_v63  ;;  %7543 = vmatprep.subr.bf16.mxu1 %v10061_v0  ;;  %v10142_v63 = vld [vmem:[%s14846_s1 + $0x724] ss:$16 sps:$4 sm:$0xff]   ;;  %v10145_v0 = vld [vmem:[%s14846_s1 + $0x72c] ss:$16 sps:$4 sm:$0xff]  }
  0xaf   :  { %6696 = vmatpush1.bf16.msra.mxu0 %v10056_v1  ;;  %7544 = vmatpush1.bf16.msra.mxu1 %v10059_v2  ;;  %v10140_v1 = vld [vmem:[%s14846_s1 + $0x720] ss:$16 sps:$4 sm:$0xff]   ;;  %v10143_v2 = vld [vmem:[%s14846_s1 + $0x728] ss:$16 sps:$4 sm:$0xff]  }
  0xb0   :  { %6697 = vmatprep.subr.bf16.mxu0 %v10064_v3  ;;  %7545 = vmatprep.subr.bf16.mxu1 %v10067_v4  ;;  %v10148_v3 = vld [vmem:[%s14846_s1 + $0x744] ss:$16 sps:$4 sm:$0xff]   ;;  %v10151_v4 = vld [vmem:[%s14846_s1 + $0x74c] ss:$16 sps:$4 sm:$0xff]  }
  0xb3   :  { %6698 = vmatpush1.bf16.msra.mxu0 %v10062_v5  ;;  %7546 = vmatpush1.bf16.msra.mxu1 %v10065_v6  ;;  %v10146_v5 = vld [vmem:[%s14846_s1 + $0x740] ss:$16 sps:$4 sm:$0xff]   ;;  %v10149_v6 = vld [vmem:[%s14846_s1 + $0x748] ss:$16 sps:$4 sm:$0xff]  }
  0xb4   :  { %6699 = vmatprep.subr.bf16.mxu0 %v10070_v7  ;;  %7547 = vmatprep.subr.bf16.mxu1 %v10073_v8  ;;  %v10154_v7 = vld [vmem:[%s14846_s1 + $0x764] ss:$16 sps:$4 sm:$0xff]   ;;  %v10157_v8 = vld [vmem:[%s14846_s1 + $0x76c] ss:$16 sps:$4 sm:$0xff]  }
  0xb7   :  { %6700 = vmatpush1.bf16.msra.mxu0 %v10068_v9  ;;  %7548 = vmatpush1.bf16.msra.mxu1 %v10071_v10  ;;  %v10152_v9 = vld [vmem:[%s14846_s1 + $0x760] ss:$16 sps:$4 sm:$0xff]   ;;  %v10155_v10 = vld [vmem:[%s14846_s1 + $0x768] ss:$16 sps:$4 sm:$0xff]  }
  0xb8   :  { %6701 = vmatprep.subr.bf16.mxu0 %v10076_v11  ;;  %7549 = vmatprep.subr.bf16.mxu1 %v10079_v12  ;;  %v10160_v11 = vld [vmem:[%s14846_s1 + $0x784] ss:$16 sps:$4 sm:$0xff]   ;;  %v10163_v12 = vld [vmem:[%s14846_s1 + $0x78c] ss:$16 sps:$4 sm:$0xff]  }
  0xbb   :  { %6702 = vmatpush1.bf16.msra.mxu0 %v10074_v13  ;;  %7550 = vmatpush1.bf16.msra.mxu1 %v10077_v14  ;;  %v10158_v13 = vld [vmem:[%s14846_s1 + $0x780] ss:$16 sps:$4 sm:$0xff]   ;;  %v10161_v14 = vld [vmem:[%s14846_s1 + $0x788] ss:$16 sps:$4 sm:$0xff]  }
  0xbc   :  { %6703 = vmatprep.subr.bf16.mxu0 %v10082_v15  ;;  %7551 = vmatprep.subr.bf16.mxu1 %v10085_v16  ;;  %v10166_v15 = vld [vmem:[%s14846_s1 + $0x7a4] ss:$16 sps:$4 sm:$0xff]   ;;  %v10169_v16 = vld [vmem:[%s14846_s1 + $0x7ac] ss:$16 sps:$4 sm:$0xff]  }
  0xbf   :  { %6704 = vmatpush1.bf16.msra.mxu0 %v10080_v17  ;;  %7552 = vmatpush1.bf16.msra.mxu1 %v10083_v18  ;;  %v10164_v17 = vld [vmem:[%s14846_s1 + $0x7a0] ss:$16 sps:$4 sm:$0xff]   ;;  %v10167_v18 = vld [vmem:[%s14846_s1 + $0x7a8] ss:$16 sps:$4 sm:$0xff]  }
  0xc0   :  { %6726 = vmatprep.subr.bf16.mxu0 %v10088_v19  ;;  %7574 = vmatprep.subr.bf16.mxu1 %v10091_v20  ;;  %v10172_v19 = vld [vmem:[%s14846_s1 + $0x7c4] ss:$16 sps:$4 sm:$0xff]   ;;  %v10175_v20 = vld [vmem:[%s14846_s1 + $0x7cc] ss:$16 sps:$4 sm:$0xff]  }
  0xc2   :  { %6706 = vmatmul.mubr.bf16.vlgmr.msra.gmra.mrb[0].mxu0 %v8442_v22  ;;  %7554 = vmatmul.mubr.bf16.vlgmr.msra.gmra.mrb[0].mxu1 %v8442_v22  ;;  %v10173_v22 = vld [vmem:[%s14846_s1 + $0x7c8] ss:$16 sps:$4 sm:$0xff]  }
  0xc3   :  { %6727 = vmatpush1.bf16.msra.mxu0 %v10086_v24  ;;  %7575 = vmatpush1.bf16.msra.mxu1 %v10089_v26  ;;  %v10181_v24 = vld [vmem:[%s14846_s1 + $0x7ec] ss:$16 sps:$4 sm:$0xff]   ;;  %v10176_v26 = vld [vmem:[%s14846_s1 + $0x7e0] ss:$16 sps:$4 sm:$0xff]  }
  0xc4   :  { %6728 = vmatprep.subr.bf16.mxu0 %v10094_v25  ;;  %7576 = vmatprep.subr.bf16.mxu1 %v10097_v27  ;;  %v10179_v25 = vld [vmem:[%s14846_s1 + $0x7e8] ss:$16 sps:$4 sm:$0xff]   ;;  %v10184_v27 = vld [vmem:[%s14846_s1 + $0x804] ss:$16 sps:$4 sm:$0xff]  }
  0xc5   :  { %6715 = vmatprep.mubr.bf16.mxu0 %v8475_v28  ;;  %7563 = vmatprep.mubr.bf16.mxu1 %v8475_v28  ;;  %v10187_v28 = vld [vmem:[%s14846_s1 + $0x80c] ss:$16 sps:$4 sm:$0xff]  }
  0xc7   :  { %6729 = vmatpush1.bf16.msra.mxu0 %v10092_v29  ;;  %7577 = vmatpush1.bf16.msra.mxu1 %v10095_v30  ;;  %v52_v29 = vld [vmem:[%s14847_s0 + $0x118] sm:$0xff]  ;;  %v8444_v30 = vcombine.low %v12025_v33, %v12030_v35 }
  0xc8   :  { %6730 = vmatprep.subr.bf16.mxu0 %v10100_v31  ;;  %7578 = vmatprep.subr.bf16.mxu1 %v10103_v32  ;;  %v68_v31 = vld [vmem:[%s14847_s0 + $0x198] sm:$0xff]  ;;  %v10182_v32 = vld [vmem:[%s14846_s1 + $0x800] ss:$16 sps:$4 sm:$0xff]  }
  0xc9   :  { %v10193_v33 = vld [vmem:[%s14846_s1 + $0x82c] ss:$16 sps:$4 sm:$0xff]   ;;  %v8477_v35 = vcombine.high %v52_v29, %v68_v31 }
  0xca   :  { %6716 = vmatmul.mubr.bf16.gmra.mrb[4].mxu0 %v8474_v34  ;;  %7564 = vmatmul.mubr.bf16.gmra.mrb[4].mxu1 %v8474_v34  ;;  %v10185_v34 = vld [vmem:[%s14846_s1 + $0x808] ss:$16 sps:$4 sm:$0xff]  }
  0xcb   :  { %6731 = vmatpush1.bf16.msra.mxu0 %v10098_v36  ;;  %7579 = vmatpush1.bf16.msra.mxu1 %v10101_v37  ;;  %v10190_v36 = vld [vmem:[%s14846_s1 + $0x824] ss:$16 sps:$4 sm:$0xff]   ;;  %v10188_v37 = vld [vmem:[%s14846_s1 + $0x820] ss:$16 sps:$4 sm:$0xff]  }
  0xcc   :  { %6732 = vmatprep.subr.bf16.mxu0 %v10106_v38  ;;  %7580 = vmatprep.subr.bf16.mxu1 %v10109_v39  ;;  %v10191_v38 = vld [vmem:[%s14846_s1 + $0x828] ss:$16 sps:$4 sm:$0xff]   ;;  %v10196_v39 = vld [vmem:[%s14846_s1 + $0x844] ss:$16 sps:$4 sm:$0xff]  }
  0xcd   :  { %6758 = vmatprep.mubr.bf16.mxu0 %v8445_v40  ;;  %7606 = vmatprep.mubr.bf16.mxu1 %v8445_v40  ;;  %v10199_v40 = vld [vmem:[%s14846_s1 + $0x84c] ss:$16 sps:$4 sm:$0xff]  }
  0xcf   :  { %6733 = vmatpush1.bf16.msra.mxu0 %v10104_v41  ;;  %7581 = vmatpush1.bf16.msra.mxu1 %v10107_v42  ;;  %v12237_v41 = vld [vmem:[%s14847_s0 + $0x20] sm:$0xff]  ;;  %v8476_v42 = vcombine.low %v52_v29, %v68_v31 }
  0xd0   :  { %6734 = vmatprep.subr.bf16.mxu0 %v10112_v43  ;;  %7582 = vmatprep.subr.bf16.mxu1 %v10115_v44  ;;  %v12242_v43 = vld [vmem:[%s14847_s0 + $0xa0] sm:$0xff] }
  0xd1   :  { %v10194_v44 = vld [vmem:[%s14846_s1 + $0x840] ss:$16 sps:$4 sm:$0xff]   ;;  %v10274_v31 = vld [vmem:[%s14846_s1 + $0x9e4] ss:$16 sps:$4 sm:$0xff]  }
  0xd2   :  { %v10266_v29 = vld [vmem:[%s14846_s1 + $0x9c0] ss:$16 sps:$4 sm:$0xff]  }
  0xd3   :  { %6735 = vmatpush1.bf16.msra.mxu0 %v10110_v45  ;;  %7583 = vmatpush1.bf16.msra.mxu1 %v10113_v46  ;;  %v10197_v45 = vld [vmem:[%s14846_s1 + $0x848] ss:$16 sps:$4 sm:$0xff]   ;;  %v10202_v46 = vld [vmem:[%s14846_s1 + $0x864] ss:$16 sps:$4 sm:$0xff]  }
  0xd4   :  { %6736 = vmatprep.subr.bf16.mxu0 %v10118_v47  ;;  %7584 = vmatprep.subr.bf16.mxu1 %v10121_v48  ;;  %v10205_v47 = vld [vmem:[%s14846_s1 + $0x86c] ss:$16 sps:$4 sm:$0xff]   ;;  %v8447_v48 = vcombine.high %v12237_v41, %v12242_v43 }
  0xd7   :  { %6737 = vmatpush1.bf16.msra.mxu0 %v10116_v49  ;;  %7585 = vmatpush1.bf16.msra.mxu1 %v10119_v50  ;;  %v10200_v49 = vld [vmem:[%s14846_s1 + $0x860] ss:$16 sps:$4 sm:$0xff]   ;;  %v10203_v50 = vld [vmem:[%s14846_s1 + $0x868] ss:$16 sps:$4 sm:$0xff]  }
  0xd8   :  { %6738 = vmatprep.subr.bf16.mxu0 %v10124_v51  ;;  %7586 = vmatprep.subr.bf16.mxu1 %v10127_v52  ;;  %v10208_v51 = vld [vmem:[%s14846_s1 + $0x884] ss:$16 sps:$4 sm:$0xff]   ;;  %v10211_v52 = vld [vmem:[%s14846_s1 + $0x88c] ss:$16 sps:$4 sm:$0xff]  }
  0xdb   :  { %6739 = vmatpush1.bf16.msra.mxu0 %v10122_v53  ;;  %7587 = vmatpush1.bf16.msra.mxu1 %v10125_v54  ;;  %v10206_v53 = vld [vmem:[%s14846_s1 + $0x880] ss:$16 sps:$4 sm:$0xff]   ;;  %v10209_v54 = vld [vmem:[%s14846_s1 + $0x888] ss:$16 sps:$4 sm:$0xff]  }
  0xdc   :  { %6740 = vmatprep.subr.bf16.mxu0 %v10130_v55  ;;  %7588 = vmatprep.subr.bf16.mxu1 %v10133_v56  ;;  %v10214_v55 = vld [vmem:[%s14846_s1 + $0x8a4] ss:$16 sps:$4 sm:$0xff]   ;;  %v10217_v56 = vld [vmem:[%s14846_s1 + $0x8ac] ss:$16 sps:$4 sm:$0xff]  }
  0xdf   :  { %6741 = vmatpush1.bf16.msra.mxu0 %v10128_v57  ;;  %7589 = vmatpush1.bf16.msra.mxu1 %v10131_v58  ;;  %v10212_v57 = vld [vmem:[%s14846_s1 + $0x8a0] ss:$16 sps:$4 sm:$0xff]   ;;  %v10215_v58 = vld [vmem:[%s14846_s1 + $0x8a8] ss:$16 sps:$4 sm:$0xff]  }
  0xe0   :  { %6742 = vmatprep.subr.bf16.mxu0 %v10136_v59  ;;  %7590 = vmatprep.subr.bf16.mxu1 %v10139_v60  ;;  %v10220_v59 = vld [vmem:[%s14846_s1 + $0x8c4] ss:$16 sps:$4 sm:$0xff]   ;;  %v10223_v60 = vld [vmem:[%s14846_s1 + $0x8cc] ss:$16 sps:$4 sm:$0xff]  }
  0xe3   :  { %6743 = vmatpush1.bf16.msra.mxu0 %v10134_v61  ;;  %7591 = vmatpush1.bf16.msra.mxu1 %v10137_v62  ;;  %v10218_v61 = vld [vmem:[%s14846_s1 + $0x8c0] ss:$16 sps:$4 sm:$0xff]   ;;  %v10221_v62 = vld [vmem:[%s14846_s1 + $0x8c8] ss:$16 sps:$4 sm:$0xff]  }
  0xe4   :  { %6744 = vmatprep.subr.bf16.mxu0 %v10142_v63  ;;  %7592 = vmatprep.subr.bf16.mxu1 %v10145_v0  ;;  %v10226_v63 = vld [vmem:[%s14846_s1 + $0x8e4] ss:$16 sps:$4 sm:$0xff]   ;;  %v10229_v0 = vld [vmem:[%s14846_s1 + $0x8ec] ss:$16 sps:$4 sm:$0xff]  }
  0xe7   :  { %6745 = vmatpush1.bf16.msra.mxu0 %v10140_v1  ;;  %7593 = vmatpush1.bf16.msra.mxu1 %v10143_v2  ;;  %v10224_v1 = vld [vmem:[%s14846_s1 + $0x8e0] ss:$16 sps:$4 sm:$0xff]   ;;  %v10227_v2 = vld [vmem:[%s14846_s1 + $0x8e8] ss:$16 sps:$4 sm:$0xff]  }
  0xe8   :  { %6746 = vmatprep.subr.bf16.mxu0 %v10148_v3  ;;  %7594 = vmatprep.subr.bf16.mxu1 %v10151_v4  ;;  %v10232_v3 = vld [vmem:[%s14846_s1 + $0x904] ss:$16 sps:$4 sm:$0xff]   ;;  %v10235_v4 = vld [vmem:[%s14846_s1 + $0x90c] ss:$16 sps:$4 sm:$0xff]  }
  0xeb   :  { %6747 = vmatpush1.bf16.msra.mxu0 %v10146_v5  ;;  %7595 = vmatpush1.bf16.msra.mxu1 %v10149_v6  ;;  %v10230_v5 = vld [vmem:[%s14846_s1 + $0x900] ss:$16 sps:$4 sm:$0xff]   ;;  %v10233_v6 = vld [vmem:[%s14846_s1 + $0x908] ss:$16 sps:$4 sm:$0xff]  }
  0xec   :  { %6748 = vmatprep.subr.bf16.mxu0 %v10154_v7  ;;  %7596 = vmatprep.subr.bf16.mxu1 %v10157_v8  ;;  %v10238_v7 = vld [vmem:[%s14846_s1 + $0x924] ss:$16 sps:$4 sm:$0xff]   ;;  %v10241_v8 = vld [vmem:[%s14846_s1 + $0x92c] ss:$16 sps:$4 sm:$0xff]  }
  0xef   :  { %6749 = vmatpush1.bf16.msra.mxu0 %v10152_v9  ;;  %7597 = vmatpush1.bf16.msra.mxu1 %v10155_v10  ;;  %v10236_v9 = vld [vmem:[%s14846_s1 + $0x920] ss:$16 sps:$4 sm:$0xff]   ;;  %v10239_v10 = vld [vmem:[%s14846_s1 + $0x928] ss:$16 sps:$4 sm:$0xff]  }
  0xf0   :  { %6750 = vmatprep.subr.bf16.mxu0 %v10160_v11  ;;  %7598 = vmatprep.subr.bf16.mxu1 %v10163_v12  ;;  %v10244_v11 = vld [vmem:[%s14846_s1 + $0x944] ss:$16 sps:$4 sm:$0xff]   ;;  %v10247_v12 = vld [vmem:[%s14846_s1 + $0x94c] ss:$16 sps:$4 sm:$0xff]  }
  0xf3   :  { %6751 = vmatpush1.bf16.msra.mxu0 %v10158_v13  ;;  %7599 = vmatpush1.bf16.msra.mxu1 %v10161_v14  ;;  %v10242_v13 = vld [vmem:[%s14846_s1 + $0x940] ss:$16 sps:$4 sm:$0xff]   ;;  %v10245_v14 = vld [vmem:[%s14846_s1 + $0x948] ss:$16 sps:$4 sm:$0xff]  }
  0xf4   :  { %6752 = vmatprep.subr.bf16.mxu0 %v10166_v15  ;;  %7600 = vmatprep.subr.bf16.mxu1 %v10169_v16  ;;  %v10250_v15 = vld [vmem:[%s14846_s1 + $0x964] ss:$16 sps:$4 sm:$0xff]   ;;  %v10253_v16 = vld [vmem:[%s14846_s1 + $0x96c] ss:$16 sps:$4 sm:$0xff]  }
  0xf7   :  { %6753 = vmatpush1.bf16.msra.mxu0 %v10164_v17  ;;  %7601 = vmatpush1.bf16.msra.mxu1 %v10167_v18  ;;  %v10248_v17 = vld [vmem:[%s14846_s1 + $0x960] ss:$16 sps:$4 sm:$0xff]   ;;  %v10251_v18 = vld [vmem:[%s14846_s1 + $0x968] ss:$16 sps:$4 sm:$0xff]  }
  0xf8   :  { %6754 = vmatprep.subr.bf16.mxu0 %v10172_v19  ;;  %7602 = vmatprep.subr.bf16.mxu1 %v10175_v20  ;;  %v10256_v19 = vld [vmem:[%s14846_s1 + $0x984] ss:$16 sps:$4 sm:$0xff]   ;;  %v10259_v20 = vld [vmem:[%s14846_s1 + $0x98c] ss:$16 sps:$4 sm:$0xff]  }
  0xfb   :  { %6755 = vmatpush1.bf16.msra.mxu0 %v10170_v21  ;;  %7603 = vmatpush1.bf16.msra.mxu1 %v10173_v22  ;;  %v10254_v21 = vld [vmem:[%s14846_s1 + $0x980] ss:$16 sps:$4 sm:$0xff]   ;;  %v10257_v22 = vld [vmem:[%s14846_s1 + $0x988] ss:$16 sps:$4 sm:$0xff]  }
  0xfc   :  { %6756 = vmatprep.subr.bf16.mxu0 %v10178_v23  ;;  %7604 = vmatprep.subr.bf16.mxu1 %v10181_v24  ;;  %v10262_v23 = vld [vmem:[%s14846_s1 + $0x9a4] ss:$16 sps:$4 sm:$0xff]   ;;  %v10265_v24 = vld [vmem:[%s14846_s1 + $0x9ac] ss:$16 sps:$4 sm:$0xff]  }
  0xff   :  { %6757 = vmatpush1.bf16.msra.mxu0 %v10176_v26  ;;  %7605 = vmatpush1.bf16.msra.mxu1 %v10179_v25  ;;  %v10260_v26 = vld [vmem:[%s14846_s1 + $0x9a0] ss:$16 sps:$4 sm:$0xff]   ;;  %v10263_v25 = vld [vmem:[%s14846_s1 + $0x9a8] ss:$16 sps:$4 sm:$0xff]  }
 0x100   :  { %6779 = vmatprep.subr.bf16.mxu0 %v10184_v27  ;;  %7627 = vmatprep.subr.bf16.mxu1 %v10187_v28  ;;  %v10268_v27 = vld [vmem:[%s14846_s1 + $0x9c4] ss:$16 sps:$4 sm:$0xff]   ;;  %v10271_v28 = vld [vmem:[%s14846_s1 + $0x9cc] ss:$16 sps:$4 sm:$0xff]  }
 0x102   :  { %6759 = vmatmul.mubr.bf16.vlgmr.msra.gmra.mrb[0].mxu0 %v8444_v30  ;;  %7607 = vmatmul.mubr.bf16.vlgmr.msra.gmra.mrb[0].mxu1 %v8444_v30  ;;  %v10269_v30 = vld [vmem:[%s14846_s1 + $0x9c8] ss:$16 sps:$4 sm:$0xff]  }
 0x103   :  { %6780 = vmatpush1.bf16.msra.mxu0 %v10182_v32  ;;  %7628 = vmatpush1.bf16.msra.mxu1 %v10185_v34  ;;  %v10277_v32 = vld [vmem:[%s14846_s1 + $0x9ec] ss:$16 sps:$4 sm:$0xff]   ;;  %v10272_v34 = vld [vmem:[%s14846_s1 + $0x9e0] ss:$16 sps:$4 sm:$0xff]  }
 0x104   :  { %6781 = vmatprep.subr.bf16.mxu0 %v10190_v36  ;;  %7629 = vmatprep.subr.bf16.mxu1 %v10193_v33  ;;  %v10275_v36 = vld [vmem:[%s14846_s1 + $0x9e8] ss:$16 sps:$4 sm:$0xff]   ;;  %v10280_v33 = vld [vmem:[%s14846_s1 + $0xa04] ss:$16 sps:$4 sm:$0xff]  }
 0x105   :  { %6768 = vmatprep.mubr.bf16.mxu0 %v8477_v35  ;;  %7616 = vmatprep.mubr.bf16.mxu1 %v8477_v35  ;;  %v10283_v35 = vld [vmem:[%s14846_s1 + $0xa0c] ss:$16 sps:$4 sm:$0xff]  }
 0x107   :  { %6782 = vmatpush1.bf16.msra.mxu0 %v10188_v37  ;;  %7630 = vmatpush1.bf16.msra.mxu1 %v10191_v38  ;;  %v53_v37 = vld [vmem:[%s14847_s0 + $0x120] sm:$0xff] }
 0x108   :  { %6783 = vmatprep.subr.bf16.mxu0 %v10196_v39  ;;  %7631 = vmatprep.subr.bf16.mxu1 %v10199_v40  ;;  %v69_v38 = vld [vmem:[%s14847_s0 + $0x1a0] sm:$0xff]  ;;  %v8446_v39 = vcombine.low %v12237_v41, %v12242_v43  ;;  %v10289_v41 = vld [vmem:[%s14846_s1 + $0xa2c] ss:$16 sps:$4 sm:$0xff]  }
 0x109   :  { %v10278_v40 = vld [vmem:[%s14846_s1 + $0xa00] ss:$16 sps:$4 sm:$0xff]  }
 0x10a   :  { %6769 = vmatmul.mubr.bf16.gmra.mrb[4].mxu0 %v8476_v42  ;;  %7617 = vmatmul.mubr.bf16.gmra.mrb[4].mxu1 %v8476_v42  ;;  %v10281_v42 = vld [vmem:[%s14846_s1 + $0xa08] ss:$16 sps:$4 sm:$0xff]   ;;  %v10284_v43 = vld [vmem:[%s14846_s1 + $0xa20] ss:$16 sps:$4 sm:$0xff]  }
 0x10b   :  { %6784 = vmatpush1.bf16.msra.mxu0 %v10194_v44  ;;  %7632 = vmatpush1.bf16.msra.mxu1 %v10197_v45  ;;  %v10286_v44 = vld [vmem:[%s14846_s1 + $0xa24] ss:$16 sps:$4 sm:$0xff]   ;;  %v10287_v45 = vld [vmem:[%s14846_s1 + $0xa28] ss:$16 sps:$4 sm:$0xff]  }
 0x10c   :  { %6785 = vmatprep.subr.bf16.mxu0 %v10202_v46  ;;  %7633 = vmatprep.subr.bf16.mxu1 %v10205_v47  ;;  %v8479_v46 = vcombine.high %v53_v37, %v69_v38  ;;  %v10292_v47 = vld [vmem:[%s14846_s1 + $0xa44] ss:$16 sps:$4 sm:$0xff]  }
 0x10d   :  { %6811 = vmatprep.mubr.bf16.mxu0 %v8447_v48  ;;  %7659 = vmatprep.mubr.bf16.mxu1 %v8447_v48  ;;  %v10295_v48 = vld [vmem:[%s14846_s1 + $0xa4c] ss:$16 sps:$4 sm:$0xff]  }
 0x10f   :  { %6786 = vmatpush1.bf16.msra.mxu0 %v10200_v49  ;;  %7634 = vmatpush1.bf16.msra.mxu1 %v10203_v50  ;;  %v12449_v49 = vld [vmem:[%s14847_s0 + $0x28] sm:$0xff] }
 0x110   :  { %6787 = vmatprep.subr.bf16.mxu0 %v10208_v51  ;;  %7635 = vmatprep.subr.bf16.mxu1 %v10211_v52  ;;  %v12454_v50 = vld [vmem:[%s14847_s0 + $0xa8] sm:$0xff]  ;;  %v8478_v51 = vcombine.low %v53_v37, %v69_v38  ;;  %v10290_v52 = vld [vmem:[%s14846_s1 + $0xa40] ss:$16 sps:$4 sm:$0xff]  }
 0x111   :  { %v10362_v37 = vld [vmem:[%s14846_s1 + $0xbc0] ss:$16 sps:$4 sm:$0xff]   ;;  %v10365_v38 = vld [vmem:[%s14846_s1 + $0xbc8] ss:$16 sps:$4 sm:$0xff]  }
 0x113   :  { %6788 = vmatpush1.bf16.msra.mxu0 %v10206_v53  ;;  %7636 = vmatpush1.bf16.msra.mxu1 %v10209_v54  ;;  %v10293_v53 = vld [vmem:[%s14846_s1 + $0xa48] ss:$16 sps:$4 sm:$0xff]   ;;  %v10298_v54 = vld [vmem:[%s14846_s1 + $0xa64] ss:$16 sps:$4 sm:$0xff]  }
 0x114   :  { %6789 = vmatprep.subr.bf16.mxu0 %v10214_v55  ;;  %7637 = vmatprep.subr.bf16.mxu1 %v10217_v56  ;;  %v10301_v55 = vld [vmem:[%s14846_s1 + $0xa6c] ss:$16 sps:$4 sm:$0xff]   ;;  %v8449_v56 = vcombine.high %v12449_v49, %v12454_v50 }
 0x117   :  { %6790 = vmatpush1.bf16.msra.mxu0 %v10212_v57  ;;  %7638 = vmatpush1.bf16.msra.mxu1 %v10215_v58  ;;  %v10296_v57 = vld [vmem:[%s14846_s1 + $0xa60] ss:$16 sps:$4 sm:$0xff]   ;;  %v10299_v58 = vld [vmem:[%s14846_s1 + $0xa68] ss:$16 sps:$4 sm:$0xff]  }
 0x118   :  { %6791 = vmatprep.subr.bf16.mxu0 %v10220_v59  ;;  %7639 = vmatprep.subr.bf16.mxu1 %v10223_v60  ;;  %v10304_v59 = vld [vmem:[%s14846_s1 + $0xa84] ss:$16 sps:$4 sm:$0xff]   ;;  %v10307_v60 = vld [vmem:[%s14846_s1 + $0xa8c] ss:$16 sps:$4 sm:$0xff]  }
 0x11b   :  { %6792 = vmatpush1.bf16.msra.mxu0 %v10218_v61  ;;  %7640 = vmatpush1.bf16.msra.mxu1 %v10221_v62  ;;  %v10302_v61 = vld [vmem:[%s14846_s1 + $0xa80] ss:$16 sps:$4 sm:$0xff]   ;;  %v10305_v62 = vld [vmem:[%s14846_s1 + $0xa88] ss:$16 sps:$4 sm:$0xff]  }
 0x11c   :  { %6793 = vmatprep.subr.bf16.mxu0 %v10226_v63  ;;  %7641 = vmatprep.subr.bf16.mxu1 %v10229_v0  ;;  %v10310_v63 = vld [vmem:[%s14846_s1 + $0xaa4] ss:$16 sps:$4 sm:$0xff]   ;;  %v10313_v0 = vld [vmem:[%s14846_s1 + $0xaac] ss:$16 sps:$4 sm:$0xff]  }
 0x11f   :  { %6794 = vmatpush1.bf16.msra.mxu0 %v10224_v1  ;;  %7642 = vmatpush1.bf16.msra.mxu1 %v10227_v2  ;;  %v10308_v1 = vld [vmem:[%s14846_s1 + $0xaa0] ss:$16 sps:$4 sm:$0xff]   ;;  %v10311_v2 = vld [vmem:[%s14846_s1 + $0xaa8] ss:$16 sps:$4 sm:$0xff]  }
 0x120   :  { %6795 = vmatprep.subr.bf16.mxu0 %v10232_v3  ;;  %7643 = vmatprep.subr.bf16.mxu1 %v10235_v4  ;;  %v10316_v3 = vld [vmem:[%s14846_s1 + $0xac4] ss:$16 sps:$4 sm:$0xff]   ;;  %v10319_v4 = vld [vmem:[%s14846_s1 + $0xacc] ss:$16 sps:$4 sm:$0xff]  }
 0x123   :  { %6796 = vmatpush1.bf16.msra.mxu0 %v10230_v5  ;;  %7644 = vmatpush1.bf16.msra.mxu1 %v10233_v6  ;;  %v10314_v5 = vld [vmem:[%s14846_s1 + $0xac0] ss:$16 sps:$4 sm:$0xff]   ;;  %v10317_v6 = vld [vmem:[%s14846_s1 + $0xac8] ss:$16 sps:$4 sm:$0xff]  }
 0x124   :  { %6797 = vmatprep.subr.bf16.mxu0 %v10238_v7  ;;  %7645 = vmatprep.subr.bf16.mxu1 %v10241_v8  ;;  %v10322_v7 = vld [vmem:[%s14846_s1 + $0xae4] ss:$16 sps:$4 sm:$0xff]   ;;  %v10325_v8 = vld [vmem:[%s14846_s1 + $0xaec] ss:$16 sps:$4 sm:$0xff]  }
 0x127   :  { %6798 = vmatpush1.bf16.msra.mxu0 %v10236_v9  ;;  %7646 = vmatpush1.bf16.msra.mxu1 %v10239_v10  ;;  %v10320_v9 = vld [vmem:[%s14846_s1 + $0xae0] ss:$16 sps:$4 sm:$0xff]   ;;  %v10323_v10 = vld [vmem:[%s14846_s1 + $0xae8] ss:$16 sps:$4 sm:$0xff]  }
 0x128   :  { %6799 = vmatprep.subr.bf16.mxu0 %v10244_v11  ;;  %7647 = vmatprep.subr.bf16.mxu1 %v10247_v12  ;;  %v10328_v11 = vld [vmem:[%s14846_s1 + $0xb04] ss:$16 sps:$4 sm:$0xff]   ;;  %v10331_v12 = vld [vmem:[%s14846_s1 + $0xb0c] ss:$16 sps:$4 sm:$0xff]  }
 0x12b   :  { %6800 = vmatpush1.bf16.msra.mxu0 %v10242_v13  ;;  %7648 = vmatpush1.bf16.msra.mxu1 %v10245_v14  ;;  %v10326_v13 = vld [vmem:[%s14846_s1 + $0xb00] ss:$16 sps:$4 sm:$0xff]   ;;  %v10329_v14 = vld [vmem:[%s14846_s1 + $0xb08] ss:$16 sps:$4 sm:$0xff]  }
 0x12c   :  { %6801 = vmatprep.subr.bf16.mxu0 %v10250_v15  ;;  %7649 = vmatprep.subr.bf16.mxu1 %v10253_v16  ;;  %v10334_v15 = vld [vmem:[%s14846_s1 + $0xb24] ss:$16 sps:$4 sm:$0xff]   ;;  %v10337_v16 = vld [vmem:[%s14846_s1 + $0xb2c] ss:$16 sps:$4 sm:$0xff]  }
 0x12f   :  { %6802 = vmatpush1.bf16.msra.mxu0 %v10248_v17  ;;  %7650 = vmatpush1.bf16.msra.mxu1 %v10251_v18  ;;  %v10332_v17 = vld [vmem:[%s14846_s1 + $0xb20] ss:$16 sps:$4 sm:$0xff]   ;;  %v10335_v18 = vld [vmem:[%s14846_s1 + $0xb28] ss:$16 sps:$4 sm:$0xff]  }
 0x130   :  { %6803 = vmatprep.subr.bf16.mxu0 %v10256_v19  ;;  %7651 = vmatprep.subr.bf16.mxu1 %v10259_v20  ;;  %v10340_v19 = vld [vmem:[%s14846_s1 + $0xb44] ss:$16 sps:$4 sm:$0xff]   ;;  %v10343_v20 = vld [vmem:[%s14846_s1 + $0xb4c] ss:$16 sps:$4 sm:$0xff]  }
 0x133   :  { %6804 = vmatpush1.bf16.msra.mxu0 %v10254_v21  ;;  %7652 = vmatpush1.bf16.msra.mxu1 %v10257_v22  ;;  %v10338_v21 = vld [vmem:[%s14846_s1 + $0xb40] ss:$16 sps:$4 sm:$0xff]   ;;  %v10341_v22 = vld [vmem:[%s14846_s1 + $0xb48] ss:$16 sps:$4 sm:$0xff]  }
 0x134   :  { %6805 = vmatprep.subr.bf16.mxu0 %v10262_v23  ;;  %7653 = vmatprep.subr.bf16.mxu1 %v10265_v24  ;;  %v10346_v23 = vld [vmem:[%s14846_s1 + $0xb64] ss:$16 sps:$4 sm:$0xff]   ;;  %v10349_v24 = vld [vmem:[%s14846_s1 + $0xb6c] ss:$16 sps:$4 sm:$0xff]  }
 0x137   :  { %6806 = vmatpush1.bf16.msra.mxu0 %v10260_v26  ;;  %7654 = vmatpush1.bf16.msra.mxu1 %v10263_v25  ;;  %v10344_v26 = vld [vmem:[%s14846_s1 + $0xb60] ss:$16 sps:$4 sm:$0xff]   ;;  %v10347_v25 = vld [vmem:[%s14846_s1 + $0xb68] ss:$16 sps:$4 sm:$0xff]  }
 0x138   :  { %6807 = vmatprep.subr.bf16.mxu0 %v10268_v27  ;;  %7655 = vmatprep.subr.bf16.mxu1 %v10271_v28  ;;  %v10352_v27 = vld [vmem:[%s14846_s1 + $0xb84] ss:$16 sps:$4 sm:$0xff]   ;;  %v10355_v28 = vld [vmem:[%s14846_s1 + $0xb8c] ss:$16 sps:$4 sm:$0xff]  }
 0x13b   :  { %6808 = vmatpush1.bf16.msra.mxu0 %v10266_v29  ;;  %7656 = vmatpush1.bf16.msra.mxu1 %v10269_v30  ;;  %v10350_v29 = vld [vmem:[%s14846_s1 + $0xb80] ss:$16 sps:$4 sm:$0xff]   ;;  %v10353_v30 = vld [vmem:[%s14846_s1 + $0xb88] ss:$16 sps:$4 sm:$0xff]  }
 0x13c   :  { %6809 = vmatprep.subr.bf16.mxu0 %v10274_v31  ;;  %7657 = vmatprep.subr.bf16.mxu1 %v10277_v32  ;;  %v10358_v31 = vld [vmem:[%s14846_s1 + $0xba4] ss:$16 sps:$4 sm:$0xff]   ;;  %v10361_v32 = vld [vmem:[%s14846_s1 + $0xbac] ss:$16 sps:$4 sm:$0xff]  }
 0x13f   :  { %6810 = vmatpush1.bf16.msra.mxu0 %v10272_v34  ;;  %7658 = vmatpush1.bf16.msra.mxu1 %v10275_v36  ;;  %v10356_v34 = vld [vmem:[%s14846_s1 + $0xba0] ss:$16 sps:$4 sm:$0xff]   ;;  %v10359_v36 = vld [vmem:[%s14846_s1 + $0xba8] ss:$16 sps:$4 sm:$0xff]  }
 0x140   :  { %6832 = vmatprep.subr.bf16.mxu0 %v10280_v33  ;;  %7680 = vmatprep.subr.bf16.mxu1 %v10283_v35  ;;  %v10364_v33 = vld [vmem:[%s14846_s1 + $0xbc4] ss:$16 sps:$4 sm:$0xff]   ;;  %v10367_v35 = vld [vmem:[%s14846_s1 + $0xbcc] ss:$16 sps:$4 sm:$0xff]  }
 0x142   :  { %6812 = vmatmul.mubr.bf16.vlgmr.msra.gmra.mrb[0].mxu0 %v8446_v39  ;;  %7660 = vmatmul.mubr.bf16.vlgmr.msra.gmra.mrb[0].mxu1 %v8446_v39  ;;  %v10370_v39 = vld [vmem:[%s14846_s1 + $0xbe4] ss:$16 sps:$4 sm:$0xff]  }
 0x143   :  { %6833 = vmatpush1.bf16.msra.mxu0 %v10278_v40  ;;  %7681 = vmatpush1.bf16.msra.mxu1 %v10281_v42  ;;  %v10373_v40 = vld [vmem:[%s14846_s1 + $0xbec] ss:$16 sps:$4 sm:$0xff]   ;;  %v10368_v42 = vld [vmem:[%s14846_s1 + $0xbe0] ss:$16 sps:$4 sm:$0xff]  }
 0x144   :  { %6834 = vmatprep.subr.bf16.mxu0 %v10286_v44  ;;  %7682 = vmatprep.subr.bf16.mxu1 %v10289_v41  ;;  %v10371_v44 = vld [vmem:[%s14846_s1 + $0xbe8] ss:$16 sps:$4 sm:$0xff]   ;;  %v10376_v41 = vld [vmem:[%s14846_s1 + $0xc04] ss:$16 sps:$4 sm:$0xff]  }
 0x145   :  { %6821 = vmatprep.mubr.bf16.mxu0 %v8479_v46  ;;  %7669 = vmatprep.mubr.bf16.mxu1 %v8479_v46  ;;  %v70_v46 = vld [vmem:[%s14847_s0 + $0x1a8] sm:$0xff] }
 0x147   :  { %6835 = vmatpush1.bf16.msra.mxu0 %v10284_v43  ;;  %7683 = vmatpush1.bf16.msra.mxu1 %v10287_v45  ;;  %v10379_v43 = vld [vmem:[%s14846_s1 + $0xc0c] ss:$16 sps:$4 sm:$0xff]  }
 0x148   :  { %6836 = vmatprep.subr.bf16.mxu0 %v10292_v47  ;;  %7684 = vmatprep.subr.bf16.mxu1 %v10295_v48  ;;  %v54_v45 = vld [vmem:[%s14847_s0 + $0x128] sm:$0xff]  ;;  %v8448_v47 = vcombine.low %v12449_v49, %v12454_v50  ;;  %v10374_v48 = vld [vmem:[%s14846_s1 + $0xc00] ss:$16 sps:$4 sm:$0xff]  }
 0x149   :  { %v10385_v49 = vld [vmem:[%s14846_s1 + $0xc2c] ss:$16 sps:$4 sm:$0xff]   ;;  %v10380_v50 = vld [vmem:[%s14846_s1 + $0xc20] ss:$16 sps:$4 sm:$0xff]  }
 0x14a   :  { %6822 = vmatmul.mubr.bf16.gmra.mrb[4].mxu0 %v8478_v51  ;;  %7670 = vmatmul.mubr.bf16.gmra.mrb[4].mxu1 %v8478_v51  ;;  %v10377_v51 = vld [vmem:[%s14846_s1 + $0xc08] ss:$16 sps:$4 sm:$0xff]  }
 0x14b   :  { %6837 = vmatpush1.bf16.msra.mxu0 %v10290_v52  ;;  %7685 = vmatpush1.bf16.msra.mxu1 %v10293_v53  ;;  %v10382_v52 = vld [vmem:[%s14846_s1 + $0xc24] ss:$16 sps:$4 sm:$0xff]   ;;  %v10383_v53 = vld [vmem:[%s14846_s1 + $0xc28] ss:$16 sps:$4 sm:$0xff]  }
 0x14c   :  { %6838 = vmatprep.subr.bf16.mxu0 %v10298_v54  ;;  %7686 = vmatprep.subr.bf16.mxu1 %v10301_v55  ;;  %v8481_v54 = vcombine.high %v54_v45, %v70_v46  ;;  %v10388_v55 = vld [vmem:[%s14846_s1 + $0xc44] ss:$16 sps:$4 sm:$0xff]  }
 0x14d   :  { %6864 = vmatprep.mubr.bf16.mxu0 %v8449_v56  ;;  %7712 = vmatprep.mubr.bf16.mxu1 %v8449_v56  ;;  %v10391_v56 = vld [vmem:[%s14846_s1 + $0xc4c] ss:$16 sps:$4 sm:$0xff]  }
 0x14f   :  { %6839 = vmatpush1.bf16.msra.mxu0 %v10296_v57  ;;  %7687 = vmatpush1.bf16.msra.mxu1 %v10299_v58  ;;  %v12661_v57 = vld [vmem:[%s14847_s0 + $0x30] sm:$0xff] }
 0x150   :  { %6840 = vmatprep.subr.bf16.mxu0 %v10304_v59  ;;  %7688 = vmatprep.subr.bf16.mxu1 %v10307_v60  ;;  %v12666_v58 = vld [vmem:[%s14847_s0 + $0xb0] sm:$0xff]  ;;  %v8480_v59 = vcombine.low %v54_v45, %v70_v46  ;;  %v10461_v46 = vld [vmem:[%s14846_s1 + $0xdc8] ss:$16 sps:$4 sm:$0xff]  }
 0x151   :  { %v10386_v60 = vld [vmem:[%s14846_s1 + $0xc40] ss:$16 sps:$4 sm:$0xff]  }
 0x152   :  { %v10458_v45 = vld [vmem:[%s14846_s1 + $0xdc0] ss:$16 sps:$4 sm:$0xff]  }
 0x153   :  { %6841 = vmatpush1.bf16.msra.mxu0 %v10302_v61  ;;  %7689 = vmatpush1.bf16.msra.mxu1 %v10305_v62  ;;  %v10389_v61 = vld [vmem:[%s14846_s1 + $0xc48] ss:$16 sps:$4 sm:$0xff]   ;;  %v10394_v62 = vld [vmem:[%s14846_s1 + $0xc64] ss:$16 sps:$4 sm:$0xff]  }
 0x154   :  { %6842 = vmatprep.subr.bf16.mxu0 %v10310_v63  ;;  %7690 = vmatprep.subr.bf16.mxu1 %v10313_v0  ;;  %v10397_v63 = vld [vmem:[%s14846_s1 + $0xc6c] ss:$16 sps:$4 sm:$0xff]   ;;  %v8451_v0 = vcombine.high %v12661_v57, %v12666_v58 }
 0x157   :  { %6843 = vmatpush1.bf16.msra.mxu0 %v10308_v1  ;;  %7691 = vmatpush1.bf16.msra.mxu1 %v10311_v2  ;;  %v10392_v1 = vld [vmem:[%s14846_s1 + $0xc60] ss:$16 sps:$4 sm:$0xff]   ;;  %v10395_v2 = vld [vmem:[%s14846_s1 + $0xc68] ss:$16 sps:$4 sm:$0xff]  }
 0x158   :  { %6844 = vmatprep.subr.bf16.mxu0 %v10316_v3  ;;  %7692 = vmatprep.subr.bf16.mxu1 %v10319_v4  ;;  %v10400_v3 = vld [vmem:[%s14846_s1 + $0xc84] ss:$16 sps:$4 sm:$0xff]   ;;  %v10403_v4 = vld [vmem:[%s14846_s1 + $0xc8c] ss:$16 sps:$4 sm:$0xff]  }
 0x15b   :  { %6845 = vmatpush1.bf16.msra.mxu0 %v10314_v5  ;;  %7693 = vmatpush1.bf16.msra.mxu1 %v10317_v6  ;;  %v10398_v5 = vld [vmem:[%s14846_s1 + $0xc80] ss:$16 sps:$4 sm:$0xff]   ;;  %v10401_v6 = vld [vmem:[%s14846_s1 + $0xc88] ss:$16 sps:$4 sm:$0xff]  }
 0x15c   :  { %6846 = vmatprep.subr.bf16.mxu0 %v10322_v7  ;;  %7694 = vmatprep.subr.bf16.mxu1 %v10325_v8  ;;  %v10406_v7 = vld [vmem:[%s14846_s1 + $0xca4] ss:$16 sps:$4 sm:$0xff]   ;;  %v10409_v8 = vld [vmem:[%s14846_s1 + $0xcac] ss:$16 sps:$4 sm:$0xff]  }
 0x15f   :  { %6847 = vmatpush1.bf16.msra.mxu0 %v10320_v9  ;;  %7695 = vmatpush1.bf16.msra.mxu1 %v10323_v10  ;;  %v10404_v9 = vld [vmem:[%s14846_s1 + $0xca0] ss:$16 sps:$4 sm:$0xff]   ;;  %v10407_v10 = vld [vmem:[%s14846_s1 + $0xca8] ss:$16 sps:$4 sm:$0xff]  }
 0x160   :  { %6848 = vmatprep.subr.bf16.mxu0 %v10328_v11  ;;  %7696 = vmatprep.subr.bf16.mxu1 %v10331_v12  ;;  %v10412_v11 = vld [vmem:[%s14846_s1 + $0xcc4] ss:$16 sps:$4 sm:$0xff]   ;;  %v10415_v12 = vld [vmem:[%s14846_s1 + $0xccc] ss:$16 sps:$4 sm:$0xff]  }
 0x163   :  { %6849 = vmatpush1.bf16.msra.mxu0 %v10326_v13  ;;  %7697 = vmatpush1.bf16.msra.mxu1 %v10329_v14  ;;  %v10410_v13 = vld [vmem:[%s14846_s1 + $0xcc0] ss:$16 sps:$4 sm:$0xff]   ;;  %v10413_v14 = vld [vmem:[%s14846_s1 + $0xcc8] ss:$16 sps:$4 sm:$0xff]  }
 0x164   :  { %6850 = vmatprep.subr.bf16.mxu0 %v10334_v15  ;;  %7698 = vmatprep.subr.bf16.mxu1 %v10337_v16  ;;  %v10418_v15 = vld [vmem:[%s14846_s1 + $0xce4] ss:$16 sps:$4 sm:$0xff]   ;;  %v10421_v16 = vld [vmem:[%s14846_s1 + $0xcec] ss:$16 sps:$4 sm:$0xff]  }
 0x167   :  { %6851 = vmatpush1.bf16.msra.mxu0 %v10332_v17  ;;  %7699 = vmatpush1.bf16.msra.mxu1 %v10335_v18  ;;  %v10416_v17 = vld [vmem:[%s14846_s1 + $0xce0] ss:$16 sps:$4 sm:$0xff]   ;;  %v10419_v18 = vld [vmem:[%s14846_s1 + $0xce8] ss:$16 sps:$4 sm:$0xff]  }
 0x168   :  { %6852 = vmatprep.subr.bf16.mxu0 %v10340_v19  ;;  %7700 = vmatprep.subr.bf16.mxu1 %v10343_v20  ;;  %v10424_v19 = vld [vmem:[%s14846_s1 + $0xd04] ss:$16 sps:$4 sm:$0xff]   ;;  %v10427_v20 = vld [vmem:[%s14846_s1 + $0xd0c] ss:$16 sps:$4 sm:$0xff]  }
 0x16b   :  { %6853 = vmatpush1.bf16.msra.mxu0 %v10338_v21  ;;  %7701 = vmatpush1.bf16.msra.mxu1 %v10341_v22  ;;  %v10422_v21 = vld [vmem:[%s14846_s1 + $0xd00] ss:$16 sps:$4 sm:$0xff]   ;;  %v10425_v22 = vld [vmem:[%s14846_s1 + $0xd08] ss:$16 sps:$4 sm:$0xff]  }
 0x16c   :  { %6854 = vmatprep.subr.bf16.mxu0 %v10346_v23  ;;  %7702 = vmatprep.subr.bf16.mxu1 %v10349_v24  ;;  %v10430_v23 = vld [vmem:[%s14846_s1 + $0xd24] ss:$16 sps:$4 sm:$0xff]   ;;  %v10433_v24 = vld [vmem:[%s14846_s1 + $0xd2c] ss:$16 sps:$4 sm:$0xff]  }
 0x16f   :  { %6855 = vmatpush1.bf16.msra.mxu0 %v10344_v26  ;;  %7703 = vmatpush1.bf16.msra.mxu1 %v10347_v25  ;;  %v10428_v26 = vld [vmem:[%s14846_s1 + $0xd20] ss:$16 sps:$4 sm:$0xff]   ;;  %v10431_v25 = vld [vmem:[%s14846_s1 + $0xd28] ss:$16 sps:$4 sm:$0xff]  }
 0x170   :  { %6856 = vmatprep.subr.bf16.mxu0 %v10352_v27  ;;  %7704 = vmatprep.subr.bf16.mxu1 %v10355_v28  ;;  %v10436_v27 = vld [vmem:[%s14846_s1 + $0xd44] ss:$16 sps:$4 sm:$0xff]   ;;  %v10439_v28 = vld [vmem:[%s14846_s1 + $0xd4c] ss:$16 sps:$4 sm:$0xff]  }
 0x173   :  { %6857 = vmatpush1.bf16.msra.mxu0 %v10350_v29  ;;  %7705 = vmatpush1.bf16.msra.mxu1 %v10353_v30  ;;  %v10434_v29 = vld [vmem:[%s14846_s1 + $0xd40] ss:$16 sps:$4 sm:$0xff]   ;;  %v10437_v30 = vld [vmem:[%s14846_s1 + $0xd48] ss:$16 sps:$4 sm:$0xff]  }
 0x174   :  { %6858 = vmatprep.subr.bf16.mxu0 %v10358_v31  ;;  %7706 = vmatprep.subr.bf16.mxu1 %v10361_v32  ;;  %v10442_v31 = vld [vmem:[%s14846_s1 + $0xd64] ss:$16 sps:$4 sm:$0xff]   ;;  %v10445_v32 = vld [vmem:[%s14846_s1 + $0xd6c] ss:$16 sps:$4 sm:$0xff]  }
 0x177   :  { %6859 = vmatpush1.bf16.msra.mxu0 %v10356_v34  ;;  %7707 = vmatpush1.bf16.msra.mxu1 %v10359_v36  ;;  %v10440_v34 = vld [vmem:[%s14846_s1 + $0xd60] ss:$16 sps:$4 sm:$0xff]   ;;  %v10443_v36 = vld [vmem:[%s14846_s1 + $0xd68] ss:$16 sps:$4 sm:$0xff]  }
 0x178   :  { %6860 = vmatprep.subr.bf16.mxu0 %v10364_v33  ;;  %7708 = vmatprep.subr.bf16.mxu1 %v10367_v35  ;;  %v10448_v33 = vld [vmem:[%s14846_s1 + $0xd84] ss:$16 sps:$4 sm:$0xff]   ;;  %v10451_v35 = vld [vmem:[%s14846_s1 + $0xd8c] ss:$16 sps:$4 sm:$0xff]  }
 0x17b   :  { %6861 = vmatpush1.bf16.msra.mxu0 %v10362_v37  ;;  %7709 = vmatpush1.bf16.msra.mxu1 %v10365_v38  ;;  %v10446_v37 = vld [vmem:[%s14846_s1 + $0xd80] ss:$16 sps:$4 sm:$0xff]   ;;  %v10449_v38 = vld [vmem:[%s14846_s1 + $0xd88] ss:$16 sps:$4 sm:$0xff]  }
 0x17c   :  { %6862 = vmatprep.subr.bf16.mxu0 %v10370_v39  ;;  %7710 = vmatprep.subr.bf16.mxu1 %v10373_v40  ;;  %v10454_v39 = vld [vmem:[%s14846_s1 + $0xda4] ss:$16 sps:$4 sm:$0xff]   ;;  %v10457_v40 = vld [vmem:[%s14846_s1 + $0xdac] ss:$16 sps:$4 sm:$0xff]  }
 0x17f   :  { %6863 = vmatpush1.bf16.msra.mxu0 %v10368_v42  ;;  %7711 = vmatpush1.bf16.msra.mxu1 %v10371_v44  ;;  %v10452_v42 = vld [vmem:[%s14846_s1 + $0xda0] ss:$16 sps:$4 sm:$0xff]   ;;  %v10455_v44 = vld [vmem:[%s14846_s1 + $0xda8] ss:$16 sps:$4 sm:$0xff]  }
 0x180   :  { %6885 = vmatprep.subr.bf16.mxu0 %v10376_v41  ;;  %7733 = vmatprep.subr.bf16.mxu1 %v10379_v43  ;;  %v10460_v41 = vld [vmem:[%s14846_s1 + $0xdc4] ss:$16 sps:$4 sm:$0xff]   ;;  %v10463_v43 = vld [vmem:[%s14846_s1 + $0xdcc] ss:$16 sps:$4 sm:$0xff]  }
 0x182   :  { %6865 = vmatmul.mubr.bf16.vlgmr.msra.gmra.mrb[0].mxu0 %v8448_v47  ;;  %7713 = vmatmul.mubr.bf16.vlgmr.msra.gmra.mrb[0].mxu1 %v8448_v47  ;;  %v10466_v47 = vld [vmem:[%s14846_s1 + $0xde4] ss:$16 sps:$4 sm:$0xff]  }
 0x183   :  { %6886 = vmatpush1.bf16.msra.mxu0 %v10374_v48  ;;  %7734 = vmatpush1.bf16.msra.mxu1 %v10377_v51  ;;  %v10469_v48 = vld [vmem:[%s14846_s1 + $0xdec] ss:$16 sps:$4 sm:$0xff]   ;;  %v10464_v51 = vld [vmem:[%s14846_s1 + $0xde0] ss:$16 sps:$4 sm:$0xff]  }
 0x184   :  { %6887 = vmatprep.subr.bf16.mxu0 %v10382_v52  ;;  %7735 = vmatprep.subr.bf16.mxu1 %v10385_v49  ;;  %v10467_v52 = vld [vmem:[%s14846_s1 + $0xde8] ss:$16 sps:$4 sm:$0xff]   ;;  %v10472_v49 = vld [vmem:[%s14846_s1 + $0xe04] ss:$16 sps:$4 sm:$0xff]  }
 0x185   :  { %6874 = vmatprep.mubr.bf16.mxu0 %v8481_v54  ;;  %7722 = vmatprep.mubr.bf16.mxu1 %v8481_v54  ;;  %v71_v54 = vld [vmem:[%s14847_s0 + $0x1b0] sm:$0xff] }
 0x187   :  { %6888 = vmatpush1.bf16.msra.mxu0 %v10380_v50  ;;  %7736 = vmatpush1.bf16.msra.mxu1 %v10383_v53  ;;  %v10475_v50 = vld [vmem:[%s14846_s1 + $0xe0c] ss:$16 sps:$4 sm:$0xff]   ;;  %v55_v53 = vld [vmem:[%s14847_s0 + $0x130] sm:$0xff] }
 0x188   :  { %6889 = vmatprep.subr.bf16.mxu0 %v10388_v55  ;;  %7737 = vmatprep.subr.bf16.mxu1 %v10391_v56  ;;  %v8450_v55 = vcombine.low %v12661_v57, %v12666_v58  ;;  %v10470_v56 = vld [vmem:[%s14846_s1 + $0xe00] ss:$16 sps:$4 sm:$0xff]   ;;  %v10481_v57 = vld [vmem:[%s14846_s1 + $0xe2c] ss:$16 sps:$4 sm:$0xff]  }
 0x189   :  { %v10476_v58 = vld [vmem:[%s14846_s1 + $0xe20] ss:$16 sps:$4 sm:$0xff]  }
 0x18a   :  { %6875 = vmatmul.mubr.bf16.gmra.mrb[4].mxu0 %v8480_v59  ;;  %7723 = vmatmul.mubr.bf16.gmra.mrb[4].mxu1 %v8480_v59  ;;  %v10473_v59 = vld [vmem:[%s14846_s1 + $0xe08] ss:$16 sps:$4 sm:$0xff]  }
 0x18b   :  { %6890 = vmatpush1.bf16.msra.mxu0 %v10386_v60  ;;  %7738 = vmatpush1.bf16.msra.mxu1 %v10389_v61  ;;  %v10478_v60 = vld [vmem:[%s14846_s1 + $0xe24] ss:$16 sps:$4 sm:$0xff]   ;;  %v10479_v61 = vld [vmem:[%s14846_s1 + $0xe28] ss:$16 sps:$4 sm:$0xff]  }
 0x18c   :  { %6891 = vmatprep.subr.bf16.mxu0 %v10394_v62  ;;  %7739 = vmatprep.subr.bf16.mxu1 %v10397_v63  ;;  %v8483_v62 = vcombine.high %v55_v53, %v71_v54  ;;  %v10484_v63 = vld [vmem:[%s14846_s1 + $0xe44] ss:$16 sps:$4 sm:$0xff]  }
 0x18d   :  { %6917 = vmatprep.mubr.bf16.mxu0 %v8451_v0  ;;  %7765 = vmatprep.mubr.bf16.mxu1 %v8451_v0  ;;  %v10487_v0 = vld [vmem:[%s14846_s1 + $0xe4c] ss:$16 sps:$4 sm:$0xff]  }
 0x18f   :  { %6892 = vmatpush1.bf16.msra.mxu0 %v10392_v1  ;;  %7740 = vmatpush1.bf16.msra.mxu1 %v10395_v2  ;;  %v12873_v1 = vld [vmem:[%s14847_s0 + $0x38] sm:$0xff] }
 0x190   :  { %6893 = vmatprep.subr.bf16.mxu0 %v10400_v3  ;;  %7741 = vmatprep.subr.bf16.mxu1 %v10403_v4  ;;  %v12878_v2 = vld [vmem:[%s14847_s0 + $0xb8] sm:$0xff]  ;;  %v8482_v3 = vcombine.low %v55_v53, %v71_v54  ;;  %v10482_v4 = vld [vmem:[%s14846_s1 + $0xe40] ss:$16 sps:$4 sm:$0xff]  }
 0x191   :  { %v10554_v53 = vld [vmem:[%s14846_s1 + $0xfc0] ss:$16 sps:$4 sm:$0xff]   ;;  %v10557_v54 = vld [vmem:[%s14846_s1 + $0xfc8] ss:$16 sps:$4 sm:$0xff]  }
 0x193   :  { %6894 = vmatpush1.bf16.msra.mxu0 %v10398_v5  ;;  %7742 = vmatpush1.bf16.msra.mxu1 %v10401_v6  ;;  %v10485_v5 = vld [vmem:[%s14846_s1 + $0xe48] ss:$16 sps:$4 sm:$0xff]   ;;  %v10490_v6 = vld [vmem:[%s14846_s1 + $0xe64] ss:$16 sps:$4 sm:$0xff]  }
 0x194   :  { %6895 = vmatprep.subr.bf16.mxu0 %v10406_v7  ;;  %7743 = vmatprep.subr.bf16.mxu1 %v10409_v8  ;;  %v10493_v7 = vld [vmem:[%s14846_s1 + $0xe6c] ss:$16 sps:$4 sm:$0xff]   ;;  %v8453_v8 = vcombine.high %v12873_v1, %v12878_v2 }
 0x197   :  { %6896 = vmatpush1.bf16.msra.mxu0 %v10404_v9  ;;  %7744 = vmatpush1.bf16.msra.mxu1 %v10407_v10  ;;  %v10488_v9 = vld [vmem:[%s14846_s1 + $0xe60] ss:$16 sps:$4 sm:$0xff]   ;;  %v10491_v10 = vld [vmem:[%s14846_s1 + $0xe68] ss:$16 sps:$4 sm:$0xff]  }
 0x198   :  { %6897 = vmatprep.subr.bf16.mxu0 %v10412_v11  ;;  %7745 = vmatprep.subr.bf16.mxu1 %v10415_v12  ;;  %v10496_v11 = vld [vmem:[%s14846_s1 + $0xe84] ss:$16 sps:$4 sm:$0xff]   ;;  %v10499_v12 = vld [vmem:[%s14846_s1 + $0xe8c] ss:$16 sps:$4 sm:$0xff]  }
 0x19b   :  { %6898 = vmatpush1.bf16.msra.mxu0 %v10410_v13  ;;  %7746 = vmatpush1.bf16.msra.mxu1 %v10413_v14  ;;  %v10494_v13 = vld [vmem:[%s14846_s1 + $0xe80] ss:$16 sps:$4 sm:$0xff]   ;;  %v10497_v14 = vld [vmem:[%s14846_s1 + $0xe88] ss:$16 sps:$4 sm:$0xff]  }
 0x19c   :  { %6899 = vmatprep.subr.bf16.mxu0 %v10418_v15  ;;  %7747 = vmatprep.subr.bf16.mxu1 %v10421_v16  ;;  %v10502_v15 = vld [vmem:[%s14846_s1 + $0xea4] ss:$16 sps:$4 sm:$0xff]   ;;  %v10505_v16 = vld [vmem:[%s14846_s1 + $0xeac] ss:$16 sps:$4 sm:$0xff]  }
 0x19f   :  { %6900 = vmatpush1.bf16.msra.mxu0 %v10416_v17  ;;  %7748 = vmatpush1.bf16.msra.mxu1 %v10419_v18  ;;  %v10500_v17 = vld [vmem:[%s14846_s1 + $0xea0] ss:$16 sps:$4 sm:$0xff]   ;;  %v10503_v18 = vld [vmem:[%s14846_s1 + $0xea8] ss:$16 sps:$4 sm:$0xff]  }
 0x1a0   :  { %6901 = vmatprep.subr.bf16.mxu0 %v10424_v19  ;;  %7749 = vmatprep.subr.bf16.mxu1 %v10427_v20  ;;  %v10508_v19 = vld [vmem:[%s14846_s1 + $0xec4] ss:$16 sps:$4 sm:$0xff]   ;;  %v10511_v20 = vld [vmem:[%s14846_s1 + $0xecc] ss:$16 sps:$4 sm:$0xff]  }
 0x1a3   :  { %6902 = vmatpush1.bf16.msra.mxu0 %v10422_v21  ;;  %7750 = vmatpush1.bf16.msra.mxu1 %v10425_v22  ;;  %v10506_v21 = vld [vmem:[%s14846_s1 + $0xec0] ss:$16 sps:$4 sm:$0xff]   ;;  %v10509_v22 = vld [vmem:[%s14846_s1 + $0xec8] ss:$16 sps:$4 sm:$0xff]  }
 0x1a4   :  { %6903 = vmatprep.subr.bf16.mxu0 %v10430_v23  ;;  %7751 = vmatprep.subr.bf16.mxu1 %v10433_v24  ;;  %v10514_v23 = vld [vmem:[%s14846_s1 + $0xee4] ss:$16 sps:$4 sm:$0xff]   ;;  %v10517_v24 = vld [vmem:[%s14846_s1 + $0xeec] ss:$16 sps:$4 sm:$0xff]  }
 0x1a7   :  { %6904 = vmatpush1.bf16.msra.mxu0 %v10428_v26  ;;  %7752 = vmatpush1.bf16.msra.mxu1 %v10431_v25  ;;  %v10512_v26 = vld [vmem:[%s14846_s1 + $0xee0] ss:$16 sps:$4 sm:$0xff]   ;;  %v10515_v25 = vld [vmem:[%s14846_s1 + $0xee8] ss:$16 sps:$4 sm:$0xff]  }
 0x1a8   :  { %6905 = vmatprep.subr.bf16.mxu0 %v10436_v27  ;;  %7753 = vmatprep.subr.bf16.mxu1 %v10439_v28  ;;  %v10520_v27 = vld [vmem:[%s14846_s1 + $0xf04] ss:$16 sps:$4 sm:$0xff]   ;;  %v10523_v28 = vld [vmem:[%s14846_s1 + $0xf0c] ss:$16 sps:$4 sm:$0xff]  }
 0x1ab   :  { %6906 = vmatpush1.bf16.msra.mxu0 %v10434_v29  ;;  %7754 = vmatpush1.bf16.msra.mxu1 %v10437_v30  ;;  %v10518_v29 = vld [vmem:[%s14846_s1 + $0xf00] ss:$16 sps:$4 sm:$0xff]   ;;  %v10521_v30 = vld [vmem:[%s14846_s1 + $0xf08] ss:$16 sps:$4 sm:$0xff]  }
 0x1ac   :  { %6907 = vmatprep.subr.bf16.mxu0 %v10442_v31  ;;  %7755 = vmatprep.subr.bf16.mxu1 %v10445_v32  ;;  %v10526_v31 = vld [vmem:[%s14846_s1 + $0xf24] ss:$16 sps:$4 sm:$0xff]   ;;  %v10529_v32 = vld [vmem:[%s14846_s1 + $0xf2c] ss:$16 sps:$4 sm:$0xff]  }
 0x1af   :  { %6908 = vmatpush1.bf16.msra.mxu0 %v10440_v34  ;;  %7756 = vmatpush1.bf16.msra.mxu1 %v10443_v36  ;;  %v10524_v34 = vld [vmem:[%s14846_s1 + $0xf20] ss:$16 sps:$4 sm:$0xff]   ;;  %v10527_v36 = vld [vmem:[%s14846_s1 + $0xf28] ss:$16 sps:$4 sm:$0xff]  }
 0x1b0   :  { %6909 = vmatprep.subr.bf16.mxu0 %v10448_v33  ;;  %7757 = vmatprep.subr.bf16.mxu1 %v10451_v35  ;;  %v10532_v33 = vld [vmem:[%s14846_s1 + $0xf44] ss:$16 sps:$4 sm:$0xff]   ;;  %v10535_v35 = vld [vmem:[%s14846_s1 + $0xf4c] ss:$16 sps:$4 sm:$0xff]  }
 0x1b3   :  { %6910 = vmatpush1.bf16.msra.mxu0 %v10446_v37  ;;  %7758 = vmatpush1.bf16.msra.mxu1 %v10449_v38  ;;  %v10530_v37 = vld [vmem:[%s14846_s1 + $0xf40] ss:$16 sps:$4 sm:$0xff]   ;;  %v10533_v38 = vld [vmem:[%s14846_s1 + $0xf48] ss:$16 sps:$4 sm:$0xff]  }
 0x1b4   :  { %6911 = vmatprep.subr.bf16.mxu0 %v10454_v39  ;;  %7759 = vmatprep.subr.bf16.mxu1 %v10457_v40  ;;  %v10538_v39 = vld [vmem:[%s14846_s1 + $0xf64] ss:$16 sps:$4 sm:$0xff]   ;;  %v10541_v40 = vld [vmem:[%s14846_s1 + $0xf6c] ss:$16 sps:$4 sm:$0xff]  }
 0x1b7   :  { %6912 = vmatpush1.bf16.msra.mxu0 %v10452_v42  ;;  %7760 = vmatpush1.bf16.msra.mxu1 %v10455_v44  ;;  %v10536_v42 = vld [vmem:[%s14846_s1 + $0xf60] ss:$16 sps:$4 sm:$0xff]   ;;  %v10539_v44 = vld [vmem:[%s14846_s1 + $0xf68] ss:$16 sps:$4 sm:$0xff]  }
 0x1b8   :  { %6913 = vmatprep.subr.bf16.mxu0 %v10460_v41  ;;  %7761 = vmatprep.subr.bf16.mxu1 %v10463_v43  ;;  %v10544_v41 = vld [vmem:[%s14846_s1 + $0xf84] ss:$16 sps:$4 sm:$0xff]   ;;  %v10547_v43 = vld [vmem:[%s14846_s1 + $0xf8c] ss:$16 sps:$4 sm:$0xff]  }
 0x1bb   :  { %6914 = vmatpush1.bf16.msra.mxu0 %v10458_v45  ;;  %7762 = vmatpush1.bf16.msra.mxu1 %v10461_v46  ;;  %v10542_v45 = vld [vmem:[%s14846_s1 + $0xf80] ss:$16 sps:$4 sm:$0xff]   ;;  %v10545_v46 = vld [vmem:[%s14846_s1 + $0xf88] ss:$16 sps:$4 sm:$0xff]  }
 0x1bc   :  { %6915 = vmatprep.subr.bf16.mxu0 %v10466_v47  ;;  %7763 = vmatprep.subr.bf16.mxu1 %v10469_v48  ;;  %v10550_v47 = vld [vmem:[%s14846_s1 + $0xfa4] ss:$16 sps:$4 sm:$0xff]   ;;  %v10553_v48 = vld [vmem:[%s14846_s1 + $0xfac] ss:$16 sps:$4 sm:$0xff]  }
 0x1bf   :  { %6916 = vmatpush1.bf16.msra.mxu0 %v10464_v51  ;;  %7764 = vmatpush1.bf16.msra.mxu1 %v10467_v52  ;;  %v10548_v51 = vld [vmem:[%s14846_s1 + $0xfa0] ss:$16 sps:$4 sm:$0xff]   ;;  %v10551_v52 = vld [vmem:[%s14846_s1 + $0xfa8] ss:$16 sps:$4 sm:$0xff]  }
 0x1c0   :  { %6938 = vmatprep.subr.bf16.mxu0 %v10472_v49  ;;  %7786 = vmatprep.subr.bf16.mxu1 %v10475_v50  ;;  %v10556_v49 = vld [vmem:[%s14846_s1 + $0xfc4] ss:$16 sps:$4 sm:$0xff]   ;;  %v10559_v50 = vld [vmem:[%s14846_s1 + $0xfcc] ss:$16 sps:$4 sm:$0xff]  }
 0x1c2   :  { %6918 = vmatmul.mubr.bf16.vlgmr.msra.gmra.mrb[0].mxu0 %v8450_v55  ;;  %7766 = vmatmul.mubr.bf16.vlgmr.msra.gmra.mrb[0].mxu1 %v8450_v55  ;;  %v10562_v55 = vld [vmem:[%s14846_s1 + $0xfe4] ss:$16 sps:$4 sm:$0xff]  }
 0x1c3   :  { %6939 = vmatpush1.bf16.msra.mxu0 %v10470_v56  ;;  %7787 = vmatpush1.bf16.msra.mxu1 %v10473_v59  ;;  %v10565_v56 = vld [vmem:[%s14846_s1 + $0xfec] ss:$16 sps:$4 sm:$0xff]   ;;  %v10560_v59 = vld [vmem:[%s14846_s1 + $0xfe0] ss:$16 sps:$4 sm:$0xff]  }
 0x1c4   :  { %6940 = vmatprep.subr.bf16.mxu0 %v10478_v60  ;;  %7788 = vmatprep.subr.bf16.mxu1 %v10481_v57  ;;  %v10563_v60 = vld [vmem:[%s14846_s1 + $0xfe8] ss:$16 sps:$4 sm:$0xff]   ;;  %v10568_v57 = vld [vmem:[%s14846_s1 + $0x1004] ss:$16 sps:$4 sm:$0xff]  }
 0x1c5   :  { %6927 = vmatprep.mubr.bf16.mxu0 %v8483_v62  ;;  %7775 = vmatprep.mubr.bf16.mxu1 %v8483_v62  ;;  %v72_v62 = vld [vmem:[%s14847_s0 + $0x1b8] sm:$0xff] }
 0x1c7   :  { %6941 = vmatpush1.bf16.msra.mxu0 %v10476_v58  ;;  %7789 = vmatpush1.bf16.msra.mxu1 %v10479_v61  ;;  %v10571_v58 = vld [vmem:[%s14846_s1 + $0x100c] ss:$16 sps:$4 sm:$0xff]  }
 0x1c8   :  { %6942 = vmatprep.subr.bf16.mxu0 %v10484_v63  ;;  %7790 = vmatprep.subr.bf16.mxu1 %v10487_v0  ;;  %v56_v61 = vld [vmem:[%s14847_s0 + $0x138] sm:$0xff]  ;;  %v8452_v63 = vcombine.low %v12873_v1, %v12878_v2  ;;  %v10566_v0 = vld [vmem:[%s14846_s1 + $0x1000] ss:$16 sps:$4 sm:$0xff]  }
 0x1c9   :  { %v10577_v1 = vld [vmem:[%s14846_s1 + $0x102c] ss:$16 sps:$4 sm:$0xff]   ;;  %v10572_v2 = vld [vmem:[%s14846_s1 + $0x1020] ss:$16 sps:$4 sm:$0xff]  }
 0x1ca   :  { %6928 = vmatmul.mubr.bf16.gmra.mrb[4].mxu0 %v8482_v3  ;;  %7776 = vmatmul.mubr.bf16.gmra.mrb[4].mxu1 %v8482_v3  ;;  %v10569_v3 = vld [vmem:[%s14846_s1 + $0x1008] ss:$16 sps:$4 sm:$0xff]  }
 0x1cb   :  { %6943 = vmatpush1.bf16.msra.mxu0 %v10482_v4  ;;  %7791 = vmatpush1.bf16.msra.mxu1 %v10485_v5  ;;  %v10574_v4 = vld [vmem:[%s14846_s1 + $0x1024] ss:$16 sps:$4 sm:$0xff]   ;;  %v10575_v5 = vld [vmem:[%s14846_s1 + $0x1028] ss:$16 sps:$4 sm:$0xff]  }
 0x1cc   :  { %6944 = vmatprep.subr.bf16.mxu0 %v10490_v6  ;;  %7792 = vmatprep.subr.bf16.mxu1 %v10493_v7  ;;  %v8485_v6 = vcombine.high %v56_v61, %v72_v62  ;;  %v10580_v7 = vld [vmem:[%s14846_s1 + $0x1044] ss:$16 sps:$4 sm:$0xff]  }
 0x1cd   :  { %6970 = vmatprep.mubr.bf16.mxu0 %v8453_v8  ;;  %7818 = vmatprep.mubr.bf16.mxu1 %v8453_v8  ;;  %v10583_v8 = vld [vmem:[%s14846_s1 + $0x104c] ss:$16 sps:$4 sm:$0xff]  }
 0x1cf   :  { %6945 = vmatpush1.bf16.msra.mxu0 %v10488_v9  ;;  %7793 = vmatpush1.bf16.msra.mxu1 %v10491_v10  ;;  %v13085_v9 = vld [vmem:[%s14847_s0 + $0x40] sm:$0xff] }
 0x1d0   :  { %6946 = vmatprep.subr.bf16.mxu0 %v10496_v11  ;;  %7794 = vmatprep.subr.bf16.mxu1 %v10499_v12  ;;  %v13090_v10 = vld [vmem:[%s14847_s0 + $0xc0] sm:$0xff]  ;;  %v8484_v11 = vcombine.low %v56_v61, %v72_v62  ;;  %v10653_v62 = vld [vmem:[%s14846_s1 + $0x11c8] ss:$16 sps:$4 sm:$0xff]  }
 0x1d1   :  { %v10578_v12 = vld [vmem:[%s14846_s1 + $0x1040] ss:$16 sps:$4 sm:$0xff]  }
 0x1d2   :  { %v10650_v61 = vld [vmem:[%s14846_s1 + $0x11c0] ss:$16 sps:$4 sm:$0xff]  }
 0x1d3   :  { %6947 = vmatpush1.bf16.msra.mxu0 %v10494_v13  ;;  %7795 = vmatpush1.bf16.msra.mxu1 %v10497_v14  ;;  %v10581_v13 = vld [vmem:[%s14846_s1 + $0x1048] ss:$16 sps:$4 sm:$0xff]   ;;  %v10586_v14 = vld [vmem:[%s14846_s1 + $0x1064] ss:$16 sps:$4 sm:$0xff]  }
 0x1d4   :  { %6948 = vmatprep.subr.bf16.mxu0 %v10502_v15  ;;  %7796 = vmatprep.subr.bf16.mxu1 %v10505_v16  ;;  %v10589_v15 = vld [vmem:[%s14846_s1 + $0x106c] ss:$16 sps:$4 sm:$0xff]   ;;  %v8455_v16 = vcombine.high %v13085_v9, %v13090_v10 }
 0x1d7   :  { %6949 = vmatpush1.bf16.msra.mxu0 %v10500_v17  ;;  %7797 = vmatpush1.bf16.msra.mxu1 %v10503_v18  ;;  %v10584_v17 = vld [vmem:[%s14846_s1 + $0x1060] ss:$16 sps:$4 sm:$0xff]   ;;  %v10587_v18 = vld [vmem:[%s14846_s1 + $0x1068] ss:$16 sps:$4 sm:$0xff]  }
 0x1d8   :  { %6950 = vmatprep.subr.bf16.mxu0 %v10508_v19  ;;  %7798 = vmatprep.subr.bf16.mxu1 %v10511_v20  ;;  %v10592_v19 = vld [vmem:[%s14846_s1 + $0x1084] ss:$16 sps:$4 sm:$0xff]   ;;  %v10595_v20 = vld [vmem:[%s14846_s1 + $0x108c] ss:$16 sps:$4 sm:$0xff]  }
 0x1db   :  { %6951 = vmatpush1.bf16.msra.mxu0 %v10506_v21  ;;  %7799 = vmatpush1.bf16.msra.mxu1 %v10509_v22  ;;  %v10590_v21 = vld [vmem:[%s14846_s1 + $0x1080] ss:$16 sps:$4 sm:$0xff]   ;;  %v10593_v22 = vld [vmem:[%s14846_s1 + $0x1088] ss:$16 sps:$4 sm:$0xff]  }
 0x1dc   :  { %6952 = vmatprep.subr.bf16.mxu0 %v10514_v23  ;;  %7800 = vmatprep.subr.bf16.mxu1 %v10517_v24  ;;  %v10598_v23 = vld [vmem:[%s14846_s1 + $0x10a4] ss:$16 sps:$4 sm:$0xff]   ;;  %v10601_v24 = vld [vmem:[%s14846_s1 + $0x10ac] ss:$16 sps:$4 sm:$0xff]  }
 0x1df   :  { %6953 = vmatpush1.bf16.msra.mxu0 %v10512_v26  ;;  %7801 = vmatpush1.bf16.msra.mxu1 %v10515_v25  ;;  %v10596_v26 = vld [vmem:[%s14846_s1 + $0x10a0] ss:$16 sps:$4 sm:$0xff]   ;;  %v10599_v25 = vld [vmem:[%s14846_s1 + $0x10a8] ss:$16 sps:$4 sm:$0xff]  }
 0x1e0   :  { %6954 = vmatprep.subr.bf16.mxu0 %v10520_v27  ;;  %7802 = vmatprep.subr.bf16.mxu1 %v10523_v28  ;;  %v10604_v27 = vld [vmem:[%s14846_s1 + $0x10c4] ss:$16 sps:$4 sm:$0xff]   ;;  %v10607_v28 = vld [vmem:[%s14846_s1 + $0x10cc] ss:$16 sps:$4 sm:$0xff]  }
 0x1e3   :  { %6955 = vmatpush1.bf16.msra.mxu0 %v10518_v29  ;;  %7803 = vmatpush1.bf16.msra.mxu1 %v10521_v30  ;;  %v10602_v29 = vld [vmem:[%s14846_s1 + $0x10c0] ss:$16 sps:$4 sm:$0xff]   ;;  %v10605_v30 = vld [vmem:[%s14846_s1 + $0x10c8] ss:$16 sps:$4 sm:$0xff]  }
 0x1e4   :  { %6956 = vmatprep.subr.bf16.mxu0 %v10526_v31  ;;  %7804 = vmatprep.subr.bf16.mxu1 %v10529_v32  ;;  %v10610_v31 = vld [vmem:[%s14846_s1 + $0x10e4] ss:$16 sps:$4 sm:$0xff]   ;;  %v10613_v32 = vld [vmem:[%s14846_s1 + $0x10ec] ss:$16 sps:$4 sm:$0xff]  }
 0x1e7   :  { %6957 = vmatpush1.bf16.msra.mxu0 %v10524_v34  ;;  %7805 = vmatpush1.bf16.msra.mxu1 %v10527_v36  ;;  %v10608_v34 = vld [vmem:[%s14846_s1 + $0x10e0] ss:$16 sps:$4 sm:$0xff]   ;;  %v10611_v36 = vld [vmem:[%s14846_s1 + $0x10e8] ss:$16 sps:$4 sm:$0xff]  }
 0x1e8   :  { %6958 = vmatprep.subr.bf16.mxu0 %v10532_v33  ;;  %7806 = vmatprep.subr.bf16.mxu1 %v10535_v35  ;;  %v10616_v33 = vld [vmem:[%s14846_s1 + $0x1104] ss:$16 sps:$4 sm:$0xff]   ;;  %v10619_v35 = vld [vmem:[%s14846_s1 + $0x110c] ss:$16 sps:$4 sm:$0xff]  }
 0x1eb   :  { %6959 = vmatpush1.bf16.msra.mxu0 %v10530_v37  ;;  %7807 = vmatpush1.bf16.msra.mxu1 %v10533_v38  ;;  %v10614_v37 = vld [vmem:[%s14846_s1 + $0x1100] ss:$16 sps:$4 sm:$0xff]   ;;  %v10617_v38 = vld [vmem:[%s14846_s1 + $0x1108] ss:$16 sps:$4 sm:$0xff]  }
 0x1ec   :  { %6960 = vmatprep.subr.bf16.mxu0 %v10538_v39  ;;  %7808 = vmatprep.subr.bf16.mxu1 %v10541_v40  ;;  %v10622_v39 = vld [vmem:[%s14846_s1 + $0x1124] ss:$16 sps:$4 sm:$0xff]   ;;  %v10625_v40 = vld [vmem:[%s14846_s1 + $0x112c] ss:$16 sps:$4 sm:$0xff]  }
 0x1ef   :  { %6961 = vmatpush1.bf16.msra.mxu0 %v10536_v42  ;;  %7809 = vmatpush1.bf16.msra.mxu1 %v10539_v44  ;;  %v10620_v42 = vld [vmem:[%s14846_s1 + $0x1120] ss:$16 sps:$4 sm:$0xff]   ;;  %v10623_v44 = vld [vmem:[%s14846_s1 + $0x1128] ss:$16 sps:$4 sm:$0xff]  }
 0x1f0   :  { %6962 = vmatprep.subr.bf16.mxu0 %v10544_v41  ;;  %7810 = vmatprep.subr.bf16.mxu1 %v10547_v43  ;;  %v10628_v41 = vld [vmem:[%s14846_s1 + $0x1144] ss:$16 sps:$4 sm:$0xff]   ;;  %v10631_v43 = vld [vmem:[%s14846_s1 + $0x114c] ss:$16 sps:$4 sm:$0xff]  }
 0x1f3   :  { %6963 = vmatpush1.bf16.msra.mxu0 %v10542_v45  ;;  %7811 = vmatpush1.bf16.msra.mxu1 %v10545_v46  ;;  %v10626_v45 = vld [vmem:[%s14846_s1 + $0x1140] ss:$16 sps:$4 sm:$0xff]   ;;  %v10629_v46 = vld [vmem:[%s14846_s1 + $0x1148] ss:$16 sps:$4 sm:$0xff]  }
 0x1f4   :  { %6964 = vmatprep.subr.bf16.mxu0 %v10550_v47  ;;  %7812 = vmatprep.subr.bf16.mxu1 %v10553_v48  ;;  %v10634_v47 = vld [vmem:[%s14846_s1 + $0x1164] ss:$16 sps:$4 sm:$0xff]   ;;  %v10637_v48 = vld [vmem:[%s14846_s1 + $0x116c] ss:$16 sps:$4 sm:$0xff]  }
 0x1f7   :  { %6965 = vmatpush1.bf16.msra.mxu0 %v10548_v51  ;;  %7813 = vmatpush1.bf16.msra.mxu1 %v10551_v52  ;;  %v10632_v51 = vld [vmem:[%s14846_s1 + $0x1160] ss:$16 sps:$4 sm:$0xff]   ;;  %v10635_v52 = vld [vmem:[%s14846_s1 + $0x1168] ss:$16 sps:$4 sm:$0xff]  }
 0x1f8   :  { %6966 = vmatprep.subr.bf16.mxu0 %v10556_v49  ;;  %7814 = vmatprep.subr.bf16.mxu1 %v10559_v50  ;;  %v10640_v49 = vld [vmem:[%s14846_s1 + $0x1184] ss:$16 sps:$4 sm:$0xff]   ;;  %v10643_v50 = vld [vmem:[%s14846_s1 + $0x118c] ss:$16 sps:$4 sm:$0xff]  }
 0x1fb   :  { %6967 = vmatpush1.bf16.msra.mxu0 %v10554_v53  ;;  %7815 = vmatpush1.bf16.msra.mxu1 %v10557_v54  ;;  %v10638_v53 = vld [vmem:[%s14846_s1 + $0x1180] ss:$16 sps:$4 sm:$0xff]   ;;  %v10641_v54 = vld [vmem:[%s14846_s1 + $0x1188] ss:$16 sps:$4 sm:$0xff]  }
 0x1fc   :  { %6968 = vmatprep.subr.bf16.mxu0 %v10562_v55  ;;  %7816 = vmatprep.subr.bf16.mxu1 %v10565_v56  ;;  %v10646_v55 = vld [vmem:[%s14846_s1 + $0x11a4] ss:$16 sps:$4 sm:$0xff]   ;;  %v10649_v56 = vld [vmem:[%s14846_s1 + $0x11ac] ss:$16 sps:$4 sm:$0xff]  }
 0x1ff   :  { %6969 = vmatpush1.bf16.msra.mxu0 %v10560_v59  ;;  %7817 = vmatpush1.bf16.msra.mxu1 %v10563_v60  ;;  %v10644_v59 = vld [vmem:[%s14846_s1 + $0x11a0] ss:$16 sps:$4 sm:$0xff]   ;;  %v10647_v60 = vld [vmem:[%s14846_s1 + $0x11a8] ss:$16 sps:$4 sm:$0xff]  }
 0x200   :  { %6991 = vmatprep.subr.bf16.mxu0 %v10568_v57  ;;  %7839 = vmatprep.subr.bf16.mxu1 %v10571_v58  ;;  %v10652_v57 = vld [vmem:[%s14846_s1 + $0x11c4] ss:$16 sps:$4 sm:$0xff]   ;;  %v10655_v58 = vld [vmem:[%s14846_s1 + $0x11cc] ss:$16 sps:$4 sm:$0xff]  }
 0x202   :  { %6971 = vmatmul.mubr.bf16.vlgmr.msra.gmra.mrb[0].mxu0 %v8452_v63  ;;  %7819 = vmatmul.mubr.bf16.vlgmr.msra.gmra.mrb[0].mxu1 %v8452_v63  ;;  %v10658_v63 = vld [vmem:[%s14846_s1 + $0x11e4] ss:$16 sps:$4 sm:$0xff]  }
 0x203   :  { %6992 = vmatpush1.bf16.msra.mxu0 %v10566_v0  ;;  %7840 = vmatpush1.bf16.msra.mxu1 %v10569_v3  ;;  %v10661_v0 = vld [vmem:[%s14846_s1 + $0x11ec] ss:$16 sps:$4 sm:$0xff]   ;;  %v10656_v3 = vld [vmem:[%s14846_s1 + $0x11e0] ss:$16 sps:$4 sm:$0xff]  }
 0x204   :  { %6993 = vmatprep.subr.bf16.mxu0 %v10574_v4  ;;  %7841 = vmatprep.subr.bf16.mxu1 %v10577_v1  ;;  %v10659_v4 = vld [vmem:[%s14846_s1 + $0x11e8] ss:$16 sps:$4 sm:$0xff]   ;;  %v10664_v1 = vld [vmem:[%s14846_s1 + $0x1204] ss:$16 sps:$4 sm:$0xff]  }
 0x205   :  { %6980 = vmatprep.mubr.bf16.mxu0 %v8485_v6  ;;  %7828 = vmatprep.mubr.bf16.mxu1 %v8485_v6  ;;  %v73_v6 = vld [vmem:[%s14847_s0 + $0x1c0] sm:$0xff] }
 0x207   :  { %6994 = vmatpush1.bf16.msra.mxu0 %v10572_v2  ;;  %7842 = vmatpush1.bf16.msra.mxu1 %v10575_v5  ;;  %v10667_v2 = vld [vmem:[%s14846_s1 + $0x120c] ss:$16 sps:$4 sm:$0xff]   ;;  %v57_v5 = vld [vmem:[%s14847_s0 + $0x140] sm:$0xff] }
 0x208   :  { %6995 = vmatprep.subr.bf16.mxu0 %v10580_v7  ;;  %7843 = vmatprep.subr.bf16.mxu1 %v10583_v8  ;;  %v8454_v7 = vcombine.low %v13085_v9, %v13090_v10  ;;  %v10662_v8 = vld [vmem:[%s14846_s1 + $0x1200] ss:$16 sps:$4 sm:$0xff]   ;;  %v10673_v9 = vld [vmem:[%s14846_s1 + $0x122c] ss:$16 sps:$4 sm:$0xff]  }
 0x209   :  { %v10668_v10 = vld [vmem:[%s14846_s1 + $0x1220] ss:$16 sps:$4 sm:$0xff]  }
 0x20a   :  { %6981 = vmatmul.mubr.bf16.gmra.mrb[4].mxu0 %v8484_v11  ;;  %7829 = vmatmul.mubr.bf16.gmra.mrb[4].mxu1 %v8484_v11  ;;  %v10665_v11 = vld [vmem:[%s14846_s1 + $0x1208] ss:$16 sps:$4 sm:$0xff]  }
 0x20b   :  { %6996 = vmatpush1.bf16.msra.mxu0 %v10578_v12  ;;  %7844 = vmatpush1.bf16.msra.mxu1 %v10581_v13  ;;  %v10670_v12 = vld [vmem:[%s14846_s1 + $0x1224] ss:$16 sps:$4 sm:$0xff]   ;;  %v10671_v13 = vld [vmem:[%s14846_s1 + $0x1228] ss:$16 sps:$4 sm:$0xff]  }
 0x20c   :  { %6997 = vmatprep.subr.bf16.mxu0 %v10586_v14  ;;  %7845 = vmatprep.subr.bf16.mxu1 %v10589_v15  ;;  %v8487_v14 = vcombine.high %v57_v5, %v73_v6  ;;  %v10676_v15 = vld [vmem:[%s14846_s1 + $0x1244] ss:$16 sps:$4 sm:$0xff]  }
 0x20d   :  { %7023 = vmatprep.mubr.bf16.mxu0 %v8455_v16  ;;  %7871 = vmatprep.mubr.bf16.mxu1 %v8455_v16  ;;  %v10679_v16 = vld [vmem:[%s14846_s1 + $0x124c] ss:$16 sps:$4 sm:$0xff]  }
 0x20f   :  { %6998 = vmatpush1.bf16.msra.mxu0 %v10584_v17  ;;  %7846 = vmatpush1.bf16.msra.mxu1 %v10587_v18  ;;  %v13297_v17 = vld [vmem:[%s14847_s0 + $0x48] sm:$0xff] }
 0x210   :  { %6999 = vmatprep.subr.bf16.mxu0 %v10592_v19  ;;  %7847 = vmatprep.subr.bf16.mxu1 %v10595_v20  ;;  %v13302_v18 = vld [vmem:[%s14847_s0 + $0xc8] sm:$0xff]  ;;  %v8486_v19 = vcombine.low %v57_v5, %v73_v6  ;;  %v10674_v20 = vld [vmem:[%s14846_s1 + $0x1240] ss:$16 sps:$4 sm:$0xff]  }
 0x211   :  { %v10746_v5 = vld [vmem:[%s14846_s1 + $0x13c0] ss:$16 sps:$4 sm:$0xff]   ;;  %v10749_v6 = vld [vmem:[%s14846_s1 + $0x13c8] ss:$16 sps:$4 sm:$0xff]  }
 0x213   :  { %7000 = vmatpush1.bf16.msra.mxu0 %v10590_v21  ;;  %7848 = vmatpush1.bf16.msra.mxu1 %v10593_v22  ;;  %v10677_v21 = vld [vmem:[%s14846_s1 + $0x1248] ss:$16 sps:$4 sm:$0xff]   ;;  %v10682_v22 = vld [vmem:[%s14846_s1 + $0x1264] ss:$16 sps:$4 sm:$0xff]  }
 0x214   :  { %7001 = vmatprep.subr.bf16.mxu0 %v10598_v23  ;;  %7849 = vmatprep.subr.bf16.mxu1 %v10601_v24  ;;  %v10685_v23 = vld [vmem:[%s14846_s1 + $0x126c] ss:$16 sps:$4 sm:$0xff]   ;;  %v8457_v24 = vcombine.high %v13297_v17, %v13302_v18 }
 0x217   :  { %7002 = vmatpush1.bf16.msra.mxu0 %v10596_v26  ;;  %7850 = vmatpush1.bf16.msra.mxu1 %v10599_v25  ;;  %v10680_v26 = vld [vmem:[%s14846_s1 + $0x1260] ss:$16 sps:$4 sm:$0xff]   ;;  %v10683_v25 = vld [vmem:[%s14846_s1 + $0x1268] ss:$16 sps:$4 sm:$0xff]  }
 0x218   :  { %7003 = vmatprep.subr.bf16.mxu0 %v10604_v27  ;;  %7851 = vmatprep.subr.bf16.mxu1 %v10607_v28  ;;  %v10688_v27 = vld [vmem:[%s14846_s1 + $0x1284] ss:$16 sps:$4 sm:$0xff]   ;;  %v10691_v28 = vld [vmem:[%s14846_s1 + $0x128c] ss:$16 sps:$4 sm:$0xff]  }
 0x21b   :  { %7004 = vmatpush1.bf16.msra.mxu0 %v10602_v29  ;;  %7852 = vmatpush1.bf16.msra.mxu1 %v10605_v30  ;;  %v10686_v29 = vld [vmem:[%s14846_s1 + $0x1280] ss:$16 sps:$4 sm:$0xff]   ;;  %v10689_v30 = vld [vmem:[%s14846_s1 + $0x1288] ss:$16 sps:$4 sm:$0xff]  }
 0x21c   :  { %7005 = vmatprep.subr.bf16.mxu0 %v10610_v31  ;;  %7853 = vmatprep.subr.bf16.mxu1 %v10613_v32  ;;  %v10694_v31 = vld [vmem:[%s14846_s1 + $0x12a4] ss:$16 sps:$4 sm:$0xff]   ;;  %v10697_v32 = vld [vmem:[%s14846_s1 + $0x12ac] ss:$16 sps:$4 sm:$0xff]  }
 0x21f   :  { %7006 = vmatpush1.bf16.msra.mxu0 %v10608_v34  ;;  %7854 = vmatpush1.bf16.msra.mxu1 %v10611_v36  ;;  %v10692_v34 = vld [vmem:[%s14846_s1 + $0x12a0] ss:$16 sps:$4 sm:$0xff]   ;;  %v10695_v36 = vld [vmem:[%s14846_s1 + $0x12a8] ss:$16 sps:$4 sm:$0xff]  }
 0x220   :  { %7007 = vmatprep.subr.bf16.mxu0 %v10616_v33  ;;  %7855 = vmatprep.subr.bf16.mxu1 %v10619_v35  ;;  %v10700_v33 = vld [vmem:[%s14846_s1 + $0x12c4] ss:$16 sps:$4 sm:$0xff]   ;;  %v10703_v35 = vld [vmem:[%s14846_s1 + $0x12cc] ss:$16 sps:$4 sm:$0xff]  }
 0x223   :  { %7008 = vmatpush1.bf16.msra.mxu0 %v10614_v37  ;;  %7856 = vmatpush1.bf16.msra.mxu1 %v10617_v38  ;;  %v10698_v37 = vld [vmem:[%s14846_s1 + $0x12c0] ss:$16 sps:$4 sm:$0xff]   ;;  %v10701_v38 = vld [vmem:[%s14846_s1 + $0x12c8] ss:$16 sps:$4 sm:$0xff]  }
 0x224   :  { %7009 = vmatprep.subr.bf16.mxu0 %v10622_v39  ;;  %7857 = vmatprep.subr.bf16.mxu1 %v10625_v40  ;;  %v10706_v39 = vld [vmem:[%s14846_s1 + $0x12e4] ss:$16 sps:$4 sm:$0xff]   ;;  %v10709_v40 = vld [vmem:[%s14846_s1 + $0x12ec] ss:$16 sps:$4 sm:$0xff]  }
 0x227   :  { %7010 = vmatpush1.bf16.msra.mxu0 %v10620_v42  ;;  %7858 = vmatpush1.bf16.msra.mxu1 %v10623_v44  ;;  %v10704_v42 = vld [vmem:[%s14846_s1 + $0x12e0] ss:$16 sps:$4 sm:$0xff]   ;;  %v10707_v44 = vld [vmem:[%s14846_s1 + $0x12e8] ss:$16 sps:$4 sm:$0xff]  }
 0x228   :  { %7011 = vmatprep.subr.bf16.mxu0 %v10628_v41  ;;  %7859 = vmatprep.subr.bf16.mxu1 %v10631_v43  ;;  %v10712_v41 = vld [vmem:[%s14846_s1 + $0x1304] ss:$16 sps:$4 sm:$0xff]   ;;  %v10715_v43 = vld [vmem:[%s14846_s1 + $0x130c] ss:$16 sps:$4 sm:$0xff]  }
 0x22b   :  { %7012 = vmatpush1.bf16.msra.mxu0 %v10626_v45  ;;  %7860 = vmatpush1.bf16.msra.mxu1 %v10629_v46  ;;  %v10710_v45 = vld [vmem:[%s14846_s1 + $0x1300] ss:$16 sps:$4 sm:$0xff]   ;;  %v10713_v46 = vld [vmem:[%s14846_s1 + $0x1308] ss:$16 sps:$4 sm:$0xff]  }
 0x22c   :  { %7013 = vmatprep.subr.bf16.mxu0 %v10634_v47  ;;  %7861 = vmatprep.subr.bf16.mxu1 %v10637_v48  ;;  %v10718_v47 = vld [vmem:[%s14846_s1 + $0x1324] ss:$16 sps:$4 sm:$0xff]   ;;  %v10721_v48 = vld [vmem:[%s14846_s1 + $0x132c] ss:$16 sps:$4 sm:$0xff]  }
 0x22f   :  { %7014 = vmatpush1.bf16.msra.mxu0 %v10632_v51  ;;  %7862 = vmatpush1.bf16.msra.mxu1 %v10635_v52  ;;  %v10716_v51 = vld [vmem:[%s14846_s1 + $0x1320] ss:$16 sps:$4 sm:$0xff]   ;;  %v10719_v52 = vld [vmem:[%s14846_s1 + $0x1328] ss:$16 sps:$4 sm:$0xff]  }
 0x230   :  { %7015 = vmatprep.subr.bf16.mxu0 %v10640_v49  ;;  %7863 = vmatprep.subr.bf16.mxu1 %v10643_v50  ;;  %v10724_v49 = vld [vmem:[%s14846_s1 + $0x1344] ss:$16 sps:$4 sm:$0xff]   ;;  %v10727_v50 = vld [vmem:[%s14846_s1 + $0x134c] ss:$16 sps:$4 sm:$0xff]  }
 0x233   :  { %7016 = vmatpush1.bf16.msra.mxu0 %v10638_v53  ;;  %7864 = vmatpush1.bf16.msra.mxu1 %v10641_v54  ;;  %v10722_v53 = vld [vmem:[%s14846_s1 + $0x1340] ss:$16 sps:$4 sm:$0xff]   ;;  %v10725_v54 = vld [vmem:[%s14846_s1 + $0x1348] ss:$16 sps:$4 sm:$0xff]  }
 0x234   :  { %7017 = vmatprep.subr.bf16.mxu0 %v10646_v55  ;;  %7865 = vmatprep.subr.bf16.mxu1 %v10649_v56  ;;  %v10730_v55 = vld [vmem:[%s14846_s1 + $0x1364] ss:$16 sps:$4 sm:$0xff]   ;;  %v10733_v56 = vld [vmem:[%s14846_s1 + $0x136c] ss:$16 sps:$4 sm:$0xff]  }
 0x237   :  { %7018 = vmatpush1.bf16.msra.mxu0 %v10644_v59  ;;  %7866 = vmatpush1.bf16.msra.mxu1 %v10647_v60  ;;  %v10728_v59 = vld [vmem:[%s14846_s1 + $0x1360] ss:$16 sps:$4 sm:$0xff]   ;;  %v10731_v60 = vld [vmem:[%s14846_s1 + $0x1368] ss:$16 sps:$4 sm:$0xff]  }
 0x238   :  { %7019 = vmatprep.subr.bf16.mxu0 %v10652_v57  ;;  %7867 = vmatprep.subr.bf16.mxu1 %v10655_v58  ;;  %v10736_v57 = vld [vmem:[%s14846_s1 + $0x1384] ss:$16 sps:$4 sm:$0xff]   ;;  %v10739_v58 = vld [vmem:[%s14846_s1 + $0x138c] ss:$16 sps:$4 sm:$0xff]  }
 0x23b   :  { %7020 = vmatpush1.bf16.msra.mxu0 %v10650_v61  ;;  %7868 = vmatpush1.bf16.msra.mxu1 %v10653_v62  ;;  %v10734_v61 = vld [vmem:[%s14846_s1 + $0x1380] ss:$16 sps:$4 sm:$0xff]   ;;  %v10737_v62 = vld [vmem:[%s14846_s1 + $0x1388] ss:$16 sps:$4 sm:$0xff]  }
 0x23c   :  { %7021 = vmatprep.subr.bf16.mxu0 %v10658_v63  ;;  %7869 = vmatprep.subr.bf16.mxu1 %v10661_v0  ;;  %v10742_v63 = vld [vmem:[%s14846_s1 + $0x13a4] ss:$16 sps:$4 sm:$0xff]   ;;  %v10745_v0 = vld [vmem:[%s14846_s1 + $0x13ac] ss:$16 sps:$4 sm:$0xff]  }
 0x23f   :  { %7022 = vmatpush1.bf16.msra.mxu0 %v10656_v3  ;;  %7870 = vmatpush1.bf16.msra.mxu1 %v10659_v4  ;;  %v10740_v3 = vld [vmem:[%s14846_s1 + $0x13a0] ss:$16 sps:$4 sm:$0xff]   ;;  %v10743_v4 = vld [vmem:[%s14846_s1 + $0x13a8] ss:$16 sps:$4 sm:$0xff]  }
 0x240   :  { %7044 = vmatprep.subr.bf16.mxu0 %v10664_v1  ;;  %7892 = vmatprep.subr.bf16.mxu1 %v10667_v2  ;;  %v10748_v1 = vld [vmem:[%s14846_s1 + $0x13c4] ss:$16 sps:$4 sm:$0xff]   ;;  %v10751_v2 = vld [vmem:[%s14846_s1 + $0x13cc] ss:$16 sps:$4 sm:$0xff]  }
 0x242   :  { %7024 = vmatmul.mubr.bf16.vlgmr.msra.gmra.mrb[0].mxu0 %v8454_v7  ;;  %7872 = vmatmul.mubr.bf16.vlgmr.msra.gmra.mrb[0].mxu1 %v8454_v7  ;;  %v10754_v7 = vld [vmem:[%s14846_s1 + $0x13e4] ss:$16 sps:$4 sm:$0xff]  }
 0x243   :  { %7045 = vmatpush1.bf16.msra.mxu0 %v10662_v8  ;;  %7893 = vmatpush1.bf16.msra.mxu1 %v10665_v11  ;;  %v10757_v8 = vld [vmem:[%s14846_s1 + $0x13ec] ss:$16 sps:$4 sm:$0xff]   ;;  %v10752_v11 = vld [vmem:[%s14846_s1 + $0x13e0] ss:$16 sps:$4 sm:$0xff]  }
 0x244   :  { %7046 = vmatprep.subr.bf16.mxu0 %v10670_v12  ;;  %7894 = vmatprep.subr.bf16.mxu1 %v10673_v9  ;;  %v10755_v12 = vld [vmem:[%s14846_s1 + $0x13e8] ss:$16 sps:$4 sm:$0xff]   ;;  %v10760_v9 = vld [vmem:[%s14846_s1 + $0x1404] ss:$16 sps:$4 sm:$0xff]  }
 0x245   :  { %7033 = vmatprep.mubr.bf16.mxu0 %v8487_v14  ;;  %7881 = vmatprep.mubr.bf16.mxu1 %v8487_v14  ;;  %v58_v14 = vld [vmem:[%s14847_s0 + $0x148] sm:$0xff] }
 0x247   :  { %7047 = vmatpush1.bf16.msra.mxu0 %v10668_v10  ;;  %7895 = vmatpush1.bf16.msra.mxu1 %v10671_v13  ;;  %v10763_v10 = vld [vmem:[%s14846_s1 + $0x140c] ss:$16 sps:$4 sm:$0xff]   ;;  %v8456_v13 = vcombine.low %v13297_v17, %v13302_v18  ;;  %v10766_v17 = vld [vmem:[%s14846_s1 + $0x1424] ss:$16 sps:$4 sm:$0xff]  }
 0x248   :  { %7048 = vmatprep.subr.bf16.mxu0 %v10676_v15  ;;  %7896 = vmatprep.subr.bf16.mxu1 %v10679_v16  ;;  %v74_v15 = vld [vmem:[%s14847_s0 + $0x1c8] sm:$0xff]  ;;  %v10758_v16 = vld [vmem:[%s14846_s1 + $0x1400] ss:$16 sps:$4 sm:$0xff]  }
 0x249   :  { %v10769_v18 = vld [vmem:[%s14846_s1 + $0x142c] ss:$16 sps:$4 sm:$0xff]  }
 0x24a   :  { %7034 = vmatmul.mubr.bf16.gmra.mrb[4].mxu0 %v8486_v19  ;;  %7882 = vmatmul.mubr.bf16.gmra.mrb[4].mxu1 %v8486_v19  ;;  %v10761_v19 = vld [vmem:[%s14846_s1 + $0x1408] ss:$16 sps:$4 sm:$0xff]  }
 0x24b   :  { %7049 = vmatpush1.bf16.msra.mxu0 %v10674_v20  ;;  %7897 = vmatpush1.bf16.msra.mxu1 %v10677_v21  ;;  %v8489_v20 = vcombine.high %v58_v14, %v74_v15  ;;  %v10764_v21 = vld [vmem:[%s14846_s1 + $0x1420] ss:$16 sps:$4 sm:$0xff]  }
 0x24c   :  { %7050 = vmatprep.subr.bf16.mxu0 %v10682_v22  ;;  %7898 = vmatprep.subr.bf16.mxu1 %v10685_v23  ;;  %v10767_v22 = vld [vmem:[%s14846_s1 + $0x1428] ss:$16 sps:$4 sm:$0xff]   ;;  %v10772_v23 = vld [vmem:[%s14846_s1 + $0x1444] ss:$16 sps:$4 sm:$0xff]  }
 0x24d   :  { %7076 = vmatprep.mubr.bf16.mxu0 %v8457_v24  ;;  %7924 = vmatprep.mubr.bf16.mxu1 %v8457_v24  ;;  %v10775_v24 = vld [vmem:[%s14846_s1 + $0x144c] ss:$16 sps:$4 sm:$0xff]  }
 0x24f   :  { %7051 = vmatpush1.bf16.msra.mxu0 %v10680_v26  ;;  %7899 = vmatpush1.bf16.msra.mxu1 %v10683_v25  ;;  %v8488_v26 = vcombine.low %v58_v14, %v74_v15  ;;  %v13509_v25 = vld [vmem:[%s14847_s0 + $0x50] sm:$0xff]  ;;  %v10845_v14 = vld [vmem:[%s14846_s1 + $0x15c8] ss:$16 sps:$4 sm:$0xff]  }
 0x250   :  { %7052 = vmatprep.subr.bf16.mxu0 %v10688_v27  ;;  %7900 = vmatprep.subr.bf16.mxu1 %v10691_v28  ;;  %v13514_v27 = vld [vmem:[%s14847_s0 + $0xd0] sm:$0xff] }
 0x251   :  { %v10770_v28 = vld [vmem:[%s14846_s1 + $0x1440] ss:$16 sps:$4 sm:$0xff]   ;;  %v10850_v15 = vld [vmem:[%s14846_s1 + $0x15e4] ss:$16 sps:$4 sm:$0xff]  }
 0x253   :  { %7053 = vmatpush1.bf16.msra.mxu0 %v10686_v29  ;;  %7901 = vmatpush1.bf16.msra.mxu1 %v10689_v30  ;;  %v10773_v29 = vld [vmem:[%s14846_s1 + $0x1448] ss:$16 sps:$4 sm:$0xff]   ;;  %v10778_v30 = vld [vmem:[%s14846_s1 + $0x1464] ss:$16 sps:$4 sm:$0xff]  }
 0x254   :  { %7054 = vmatprep.subr.bf16.mxu0 %v10694_v31  ;;  %7902 = vmatprep.subr.bf16.mxu1 %v10697_v32  ;;  %v10781_v31 = vld [vmem:[%s14846_s1 + $0x146c] ss:$16 sps:$4 sm:$0xff]   ;;  %v8459_v32 = vcombine.high %v13509_v25, %v13514_v27 }
 0x257   :  { %7055 = vmatpush1.bf16.msra.mxu0 %v10692_v34  ;;  %7903 = vmatpush1.bf16.msra.mxu1 %v10695_v36  ;;  %v10776_v34 = vld [vmem:[%s14846_s1 + $0x1460] ss:$16 sps:$4 sm:$0xff]   ;;  %v10779_v36 = vld [vmem:[%s14846_s1 + $0x1468] ss:$16 sps:$4 sm:$0xff]  }
 0x258   :  { %7056 = vmatprep.subr.bf16.mxu0 %v10700_v33  ;;  %7904 = vmatprep.subr.bf16.mxu1 %v10703_v35  ;;  %v10784_v33 = vld [vmem:[%s14846_s1 + $0x1484] ss:$16 sps:$4 sm:$0xff]   ;;  %v10787_v35 = vld [vmem:[%s14846_s1 + $0x148c] ss:$16 sps:$4 sm:$0xff]  }
 0x25b   :  { %7057 = vmatpush1.bf16.msra.mxu0 %v10698_v37  ;;  %7905 = vmatpush1.bf16.msra.mxu1 %v10701_v38  ;;  %v10782_v37 = vld [vmem:[%s14846_s1 + $0x1480] ss:$16 sps:$4 sm:$0xff]   ;;  %v10785_v38 = vld [vmem:[%s14846_s1 + $0x1488] ss:$16 sps:$4 sm:$0xff]  }
 0x25c   :  { %7058 = vmatprep.subr.bf16.mxu0 %v10706_v39  ;;  %7906 = vmatprep.subr.bf16.mxu1 %v10709_v40  ;;  %v10790_v39 = vld [vmem:[%s14846_s1 + $0x14a4] ss:$16 sps:$4 sm:$0xff]   ;;  %v10793_v40 = vld [vmem:[%s14846_s1 + $0x14ac] ss:$16 sps:$4 sm:$0xff]  }
 0x25f   :  { %7059 = vmatpush1.bf16.msra.mxu0 %v10704_v42  ;;  %7907 = vmatpush1.bf16.msra.mxu1 %v10707_v44  ;;  %v10788_v42 = vld [vmem:[%s14846_s1 + $0x14a0] ss:$16 sps:$4 sm:$0xff]   ;;  %v10791_v44 = vld [vmem:[%s14846_s1 + $0x14a8] ss:$16 sps:$4 sm:$0xff]  }
 0x260   :  { %7060 = vmatprep.subr.bf16.mxu0 %v10712_v41  ;;  %7908 = vmatprep.subr.bf16.mxu1 %v10715_v43  ;;  %v10796_v41 = vld [vmem:[%s14846_s1 + $0x14c4] ss:$16 sps:$4 sm:$0xff]   ;;  %v10799_v43 = vld [vmem:[%s14846_s1 + $0x14cc] ss:$16 sps:$4 sm:$0xff]  }
 0x263   :  { %7061 = vmatpush1.bf16.msra.mxu0 %v10710_v45  ;;  %7909 = vmatpush1.bf16.msra.mxu1 %v10713_v46  ;;  %v10794_v45 = vld [vmem:[%s14846_s1 + $0x14c0] ss:$16 sps:$4 sm:$0xff]   ;;  %v10797_v46 = vld [vmem:[%s14846_s1 + $0x14c8] ss:$16 sps:$4 sm:$0xff]  }
 0x264   :  { %7062 = vmatprep.subr.bf16.mxu0 %v10718_v47  ;;  %7910 = vmatprep.subr.bf16.mxu1 %v10721_v48  ;;  %v10802_v47 = vld [vmem:[%s14846_s1 + $0x14e4] ss:$16 sps:$4 sm:$0xff]   ;;  %v10805_v48 = vld [vmem:[%s14846_s1 + $0x14ec] ss:$16 sps:$4 sm:$0xff]  }
 0x267   :  { %7063 = vmatpush1.bf16.msra.mxu0 %v10716_v51  ;;  %7911 = vmatpush1.bf16.msra.mxu1 %v10719_v52  ;;  %v10800_v51 = vld [vmem:[%s14846_s1 + $0x14e0] ss:$16 sps:$4 sm:$0xff]   ;;  %v10803_v52 = vld [vmem:[%s14846_s1 + $0x14e8] ss:$16 sps:$4 sm:$0xff]  }
 0x268   :  { %7064 = vmatprep.subr.bf16.mxu0 %v10724_v49  ;;  %7912 = vmatprep.subr.bf16.mxu1 %v10727_v50  ;;  %v10808_v49 = vld [vmem:[%s14846_s1 + $0x1504] ss:$16 sps:$4 sm:$0xff]   ;;  %v10811_v50 = vld [vmem:[%s14846_s1 + $0x150c] ss:$16 sps:$4 sm:$0xff]  }
 0x26b   :  { %7065 = vmatpush1.bf16.msra.mxu0 %v10722_v53  ;;  %7913 = vmatpush1.bf16.msra.mxu1 %v10725_v54  ;;  %v10806_v53 = vld [vmem:[%s14846_s1 + $0x1500] ss:$16 sps:$4 sm:$0xff]   ;;  %v10809_v54 = vld [vmem:[%s14846_s1 + $0x1508] ss:$16 sps:$4 sm:$0xff]  }
 0x26c   :  { %7066 = vmatprep.subr.bf16.mxu0 %v10730_v55  ;;  %7914 = vmatprep.subr.bf16.mxu1 %v10733_v56  ;;  %v10814_v55 = vld [vmem:[%s14846_s1 + $0x1524] ss:$16 sps:$4 sm:$0xff]   ;;  %v10817_v56 = vld [vmem:[%s14846_s1 + $0x152c] ss:$16 sps:$4 sm:$0xff]  }
 0x26f   :  { %7067 = vmatpush1.bf16.msra.mxu0 %v10728_v59  ;;  %7915 = vmatpush1.bf16.msra.mxu1 %v10731_v60  ;;  %v10812_v59 = vld [vmem:[%s14846_s1 + $0x1520] ss:$16 sps:$4 sm:$0xff]   ;;  %v10815_v60 = vld [vmem:[%s14846_s1 + $0x1528] ss:$16 sps:$4 sm:$0xff]  }
 0x270   :  { %7068 = vmatprep.subr.bf16.mxu0 %v10736_v57  ;;  %7916 = vmatprep.subr.bf16.mxu1 %v10739_v58  ;;  %v10820_v57 = vld [vmem:[%s14846_s1 + $0x1544] ss:$16 sps:$4 sm:$0xff]   ;;  %v10823_v58 = vld [vmem:[%s14846_s1 + $0x154c] ss:$16 sps:$4 sm:$0xff]  }
 0x273   :  { %7069 = vmatpush1.bf16.msra.mxu0 %v10734_v61  ;;  %7917 = vmatpush1.bf16.msra.mxu1 %v10737_v62  ;;  %v10818_v61 = vld [vmem:[%s14846_s1 + $0x1540] ss:$16 sps:$4 sm:$0xff]   ;;  %v10821_v62 = vld [vmem:[%s14846_s1 + $0x1548] ss:$16 sps:$4 sm:$0xff]  }
 0x274   :  { %7070 = vmatprep.subr.bf16.mxu0 %v10742_v63  ;;  %7918 = vmatprep.subr.bf16.mxu1 %v10745_v0  ;;  %v10826_v63 = vld [vmem:[%s14846_s1 + $0x1564] ss:$16 sps:$4 sm:$0xff]   ;;  %v10829_v0 = vld [vmem:[%s14846_s1 + $0x156c] ss:$16 sps:$4 sm:$0xff]  }
 0x277   :  { %7071 = vmatpush1.bf16.msra.mxu0 %v10740_v3  ;;  %7919 = vmatpush1.bf16.msra.mxu1 %v10743_v4  ;;  %v10824_v3 = vld [vmem:[%s14846_s1 + $0x1560] ss:$16 sps:$4 sm:$0xff]   ;;  %v10827_v4 = vld [vmem:[%s14846_s1 + $0x1568] ss:$16 sps:$4 sm:$0xff]  }
 0x278   :  { %7072 = vmatprep.subr.bf16.mxu0 %v10748_v1  ;;  %7920 = vmatprep.subr.bf16.mxu1 %v10751_v2  ;;  %v10832_v1 = vld [vmem:[%s14846_s1 + $0x1584] ss:$16 sps:$4 sm:$0xff]   ;;  %v10835_v2 = vld [vmem:[%s14846_s1 + $0x158c] ss:$16 sps:$4 sm:$0xff]  }
 0x27b   :  { %7073 = vmatpush1.bf16.msra.mxu0 %v10746_v5  ;;  %7921 = vmatpush1.bf16.msra.mxu1 %v10749_v6  ;;  %v10830_v5 = vld [vmem:[%s14846_s1 + $0x1580] ss:$16 sps:$4 sm:$0xff]   ;;  %v10833_v6 = vld [vmem:[%s14846_s1 + $0x1588] ss:$16 sps:$4 sm:$0xff]  }
 0x27c   :  { %7074 = vmatprep.subr.bf16.mxu0 %v10754_v7  ;;  %7922 = vmatprep.subr.bf16.mxu1 %v10757_v8  ;;  %v10838_v7 = vld [vmem:[%s14846_s1 + $0x15a4] ss:$16 sps:$4 sm:$0xff]   ;;  %v10841_v8 = vld [vmem:[%s14846_s1 + $0x15ac] ss:$16 sps:$4 sm:$0xff]  }
 0x27f   :  { %7075 = vmatpush1.bf16.msra.mxu0 %v10752_v11  ;;  %7923 = vmatpush1.bf16.msra.mxu1 %v10755_v12  ;;  %v10836_v11 = vld [vmem:[%s14846_s1 + $0x15a0] ss:$16 sps:$4 sm:$0xff]   ;;  %v10839_v12 = vld [vmem:[%s14846_s1 + $0x15a8] ss:$16 sps:$4 sm:$0xff]  }
 0x280   :  { %7097 = vmatprep.subr.bf16.mxu0 %v10760_v9  ;;  %7945 = vmatprep.subr.bf16.mxu1 %v10763_v10  ;;  %v10844_v9 = vld [vmem:[%s14846_s1 + $0x15c4] ss:$16 sps:$4 sm:$0xff]   ;;  %v10847_v10 = vld [vmem:[%s14846_s1 + $0x15cc] ss:$16 sps:$4 sm:$0xff]  }
 0x282   :  { %7077 = vmatmul.mubr.bf16.vlgmr.msra.gmra.mrb[0].mxu0 %v8456_v13  ;;  %7925 = vmatmul.mubr.bf16.vlgmr.msra.gmra.mrb[0].mxu1 %v8456_v13  ;;  %v10842_v13 = vld [vmem:[%s14846_s1 + $0x15c0] ss:$16 sps:$4 sm:$0xff]  }
 0x283   :  { %7098 = vmatpush1.bf16.msra.mxu0 %v10758_v16  ;;  %7946 = vmatpush1.bf16.msra.mxu1 %v10761_v19  ;;  %v10853_v16 = vld [vmem:[%s14846_s1 + $0x15ec] ss:$16 sps:$4 sm:$0xff]   ;;  %v10848_v19 = vld [vmem:[%s14846_s1 + $0x15e0] ss:$16 sps:$4 sm:$0xff]  }
 0x284   :  { %7099 = vmatprep.subr.bf16.mxu0 %v10766_v17  ;;  %7947 = vmatprep.subr.bf16.mxu1 %v10769_v18  ;;  %v10851_v17 = vld [vmem:[%s14846_s1 + $0x15e8] ss:$16 sps:$4 sm:$0xff]   ;;  %v10856_v18 = vld [vmem:[%s14846_s1 + $0x1604] ss:$16 sps:$4 sm:$0xff]  }
 0x285   :  { %7086 = vmatprep.mubr.bf16.mxu0 %v8489_v20  ;;  %7934 = vmatprep.mubr.bf16.mxu1 %v8489_v20  ;;  %v10859_v20 = vld [vmem:[%s14846_s1 + $0x160c] ss:$16 sps:$4 sm:$0xff]  }
 0x287   :  { %7100 = vmatpush1.bf16.msra.mxu0 %v10764_v21  ;;  %7948 = vmatpush1.bf16.msra.mxu1 %v10767_v22  ;;  %v8458_v21 = vcombine.low %v13509_v25, %v13514_v27  ;;  %v59_v22 = vld [vmem:[%s14847_s0 + $0x150] sm:$0xff]  ;;  %v10865_v27 = vld [vmem:[%s14846_s1 + $0x162c] ss:$16 sps:$4 sm:$0xff]  }
 0x288   :  { %7101 = vmatprep.subr.bf16.mxu0 %v10772_v23  ;;  %7949 = vmatprep.subr.bf16.mxu1 %v10775_v24  ;;  %v75_v23 = vld [vmem:[%s14847_s0 + $0x1d0] sm:$0xff] }
 0x289   :  { %v10854_v24 = vld [vmem:[%s14846_s1 + $0x1600] ss:$16 sps:$4 sm:$0xff]   ;;  %v10862_v25 = vld [vmem:[%s14846_s1 + $0x1624] ss:$16 sps:$4 sm:$0xff]  }
 0x28a   :  { %7087 = vmatmul.mubr.bf16.gmra.mrb[4].mxu0 %v8488_v26  ;;  %7935 = vmatmul.mubr.bf16.gmra.mrb[4].mxu1 %v8488_v26  ;;  %v10857_v26 = vld [vmem:[%s14846_s1 + $0x1608] ss:$16 sps:$4 sm:$0xff]  }
 0x28b   :  { %7102 = vmatpush1.bf16.msra.mxu0 %v10770_v28  ;;  %7950 = vmatpush1.bf16.msra.mxu1 %v10773_v29  ;;  %v8491_v28 = vcombine.high %v59_v22, %v75_v23  ;;  %v10860_v29 = vld [vmem:[%s14846_s1 + $0x1620] ss:$16 sps:$4 sm:$0xff]  }
 0x28c   :  { %7103 = vmatprep.subr.bf16.mxu0 %v10778_v30  ;;  %7951 = vmatprep.subr.bf16.mxu1 %v10781_v31  ;;  %v10863_v30 = vld [vmem:[%s14846_s1 + $0x1628] ss:$16 sps:$4 sm:$0xff]   ;;  %v10868_v31 = vld [vmem:[%s14846_s1 + $0x1644] ss:$16 sps:$4 sm:$0xff]  }
 0x28d   :  { %7129 = vmatprep.mubr.bf16.mxu0 %v8459_v32  ;;  %7977 = vmatprep.mubr.bf16.mxu1 %v8459_v32  ;;  %v10871_v32 = vld [vmem:[%s14846_s1 + $0x164c] ss:$16 sps:$4 sm:$0xff]  }
 0x28f   :  { %7104 = vmatpush1.bf16.msra.mxu0 %v10776_v34  ;;  %7952 = vmatpush1.bf16.msra.mxu1 %v10779_v36  ;;  %v8490_v34 = vcombine.low %v59_v22, %v75_v23  ;;  %v13721_v36 = vld [vmem:[%s14847_s0 + $0x58] sm:$0xff]  ;;  %v10946_v23 = vld [vmem:[%s14846_s1 + $0x17e4] ss:$16 sps:$4 sm:$0xff]  }
 0x290   :  { %7105 = vmatprep.subr.bf16.mxu0 %v10784_v33  ;;  %7953 = vmatprep.subr.bf16.mxu1 %v10787_v35  ;;  %v13726_v33 = vld [vmem:[%s14847_s0 + $0xd8] sm:$0xff]  ;;  %v10866_v35 = vld [vmem:[%s14846_s1 + $0x1640] ss:$16 sps:$4 sm:$0xff]  }
 0x291   :  { %v10941_v22 = vld [vmem:[%s14846_s1 + $0x17c8] ss:$16 sps:$4 sm:$0xff]  }
 0x293   :  { %7106 = vmatpush1.bf16.msra.mxu0 %v10782_v37  ;;  %7954 = vmatpush1.bf16.msra.mxu1 %v10785_v38  ;;  %v10869_v37 = vld [vmem:[%s14846_s1 + $0x1648] ss:$16 sps:$4 sm:$0xff]   ;;  %v10874_v38 = vld [vmem:[%s14846_s1 + $0x1664] ss:$16 sps:$4 sm:$0xff]  }
 0x294   :  { %7107 = vmatprep.subr.bf16.mxu0 %v10790_v39  ;;  %7955 = vmatprep.subr.bf16.mxu1 %v10793_v40  ;;  %v10877_v39 = vld [vmem:[%s14846_s1 + $0x166c] ss:$16 sps:$4 sm:$0xff]   ;;  %v8461_v40 = vcombine.high %v13721_v36, %v13726_v33 }
 0x297   :  { %7108 = vmatpush1.bf16.msra.mxu0 %v10788_v42  ;;  %7956 = vmatpush1.bf16.msra.mxu1 %v10791_v44  ;;  %v10872_v42 = vld [vmem:[%s14846_s1 + $0x1660] ss:$16 sps:$4 sm:$0xff]   ;;  %v10875_v44 = vld [vmem:[%s14846_s1 + $0x1668] ss:$16 sps:$4 sm:$0xff]  }
 0x298   :  { %7109 = vmatprep.subr.bf16.mxu0 %v10796_v41  ;;  %7957 = vmatprep.subr.bf16.mxu1 %v10799_v43  ;;  %v10880_v41 = vld [vmem:[%s14846_s1 + $0x1684] ss:$16 sps:$4 sm:$0xff]   ;;  %v10883_v43 = vld [vmem:[%s14846_s1 + $0x168c] ss:$16 sps:$4 sm:$0xff]  }
 0x29b   :  { %7110 = vmatpush1.bf16.msra.mxu0 %v10794_v45  ;;  %7958 = vmatpush1.bf16.msra.mxu1 %v10797_v46  ;;  %v10878_v45 = vld [vmem:[%s14846_s1 + $0x1680] ss:$16 sps:$4 sm:$0xff]   ;;  %v10881_v46 = vld [vmem:[%s14846_s1 + $0x1688] ss:$16 sps:$4 sm:$0xff]  }
 0x29c   :  { %7111 = vmatprep.subr.bf16.mxu0 %v10802_v47  ;;  %7959 = vmatprep.subr.bf16.mxu1 %v10805_v48  ;;  %v10886_v47 = vld [vmem:[%s14846_s1 + $0x16a4] ss:$16 sps:$4 sm:$0xff]   ;;  %v10889_v48 = vld [vmem:[%s14846_s1 + $0x16ac] ss:$16 sps:$4 sm:$0xff]  }
 0x29f   :  { %7112 = vmatpush1.bf16.msra.mxu0 %v10800_v51  ;;  %7960 = vmatpush1.bf16.msra.mxu1 %v10803_v52  ;;  %v10884_v51 = vld [vmem:[%s14846_s1 + $0x16a0] ss:$16 sps:$4 sm:$0xff]   ;;  %v10887_v52 = vld [vmem:[%s14846_s1 + $0x16a8] ss:$16 sps:$4 sm:$0xff]  }
 0x2a0   :  { %7113 = vmatprep.subr.bf16.mxu0 %v10808_v49  ;;  %7961 = vmatprep.subr.bf16.mxu1 %v10811_v50  ;;  %v10892_v49 = vld [vmem:[%s14846_s1 + $0x16c4] ss:$16 sps:$4 sm:$0xff]   ;;  %v10895_v50 = vld [vmem:[%s14846_s1 + $0x16cc] ss:$16 sps:$4 sm:$0xff]  }
 0x2a3   :  { %7114 = vmatpush1.bf16.msra.mxu0 %v10806_v53  ;;  %7962 = vmatpush1.bf16.msra.mxu1 %v10809_v54  ;;  %v10890_v53 = vld [vmem:[%s14846_s1 + $0x16c0] ss:$16 sps:$4 sm:$0xff]   ;;  %v10893_v54 = vld [vmem:[%s14846_s1 + $0x16c8] ss:$16 sps:$4 sm:$0xff]  }
 0x2a4   :  { %7115 = vmatprep.subr.bf16.mxu0 %v10814_v55  ;;  %7963 = vmatprep.subr.bf16.mxu1 %v10817_v56  ;;  %v10898_v55 = vld [vmem:[%s14846_s1 + $0x16e4] ss:$16 sps:$4 sm:$0xff]   ;;  %v10901_v56 = vld [vmem:[%s14846_s1 + $0x16ec] ss:$16 sps:$4 sm:$0xff]  }
 0x2a7   :  { %7116 = vmatpush1.bf16.msra.mxu0 %v10812_v59  ;;  %7964 = vmatpush1.bf16.msra.mxu1 %v10815_v60  ;;  %v10896_v59 = vld [vmem:[%s14846_s1 + $0x16e0] ss:$16 sps:$4 sm:$0xff]   ;;  %v10899_v60 = vld [vmem:[%s14846_s1 + $0x16e8] ss:$16 sps:$4 sm:$0xff]  }
 0x2a8   :  { %7117 = vmatprep.subr.bf16.mxu0 %v10820_v57  ;;  %7965 = vmatprep.subr.bf16.mxu1 %v10823_v58  ;;  %v10904_v57 = vld [vmem:[%s14846_s1 + $0x1704] ss:$16 sps:$4 sm:$0xff]   ;;  %v10907_v58 = vld [vmem:[%s14846_s1 + $0x170c] ss:$16 sps:$4 sm:$0xff]  }
 0x2ab   :  { %7118 = vmatpush1.bf16.msra.mxu0 %v10818_v61  ;;  %7966 = vmatpush1.bf16.msra.mxu1 %v10821_v62  ;;  %v10902_v61 = vld [vmem:[%s14846_s1 + $0x1700] ss:$16 sps:$4 sm:$0xff]   ;;  %v10905_v62 = vld [vmem:[%s14846_s1 + $0x1708] ss:$16 sps:$4 sm:$0xff]  }
 0x2ac   :  { %7119 = vmatprep.subr.bf16.mxu0 %v10826_v63  ;;  %7967 = vmatprep.subr.bf16.mxu1 %v10829_v0  ;;  %v10910_v63 = vld [vmem:[%s14846_s1 + $0x1724] ss:$16 sps:$4 sm:$0xff]   ;;  %v10913_v0 = vld [vmem:[%s14846_s1 + $0x172c] ss:$16 sps:$4 sm:$0xff]  }
 0x2af   :  { %7120 = vmatpush1.bf16.msra.mxu0 %v10824_v3  ;;  %7968 = vmatpush1.bf16.msra.mxu1 %v10827_v4  ;;  %v10908_v3 = vld [vmem:[%s14846_s1 + $0x1720] ss:$16 sps:$4 sm:$0xff]   ;;  %v10911_v4 = vld [vmem:[%s14846_s1 + $0x1728] ss:$16 sps:$4 sm:$0xff]  }
 0x2b0   :  { %7121 = vmatprep.subr.bf16.mxu0 %v10832_v1  ;;  %7969 = vmatprep.subr.bf16.mxu1 %v10835_v2  ;;  %v10916_v1 = vld [vmem:[%s14846_s1 + $0x1744] ss:$16 sps:$4 sm:$0xff]   ;;  %v10919_v2 = vld [vmem:[%s14846_s1 + $0x174c] ss:$16 sps:$4 sm:$0xff]  }
 0x2b3   :  { %7122 = vmatpush1.bf16.msra.mxu0 %v10830_v5  ;;  %7970 = vmatpush1.bf16.msra.mxu1 %v10833_v6  ;;  %v10914_v5 = vld [vmem:[%s14846_s1 + $0x1740] ss:$16 sps:$4 sm:$0xff]   ;;  %v10917_v6 = vld [vmem:[%s14846_s1 + $0x1748] ss:$16 sps:$4 sm:$0xff]  }
 0x2b4   :  { %7123 = vmatprep.subr.bf16.mxu0 %v10838_v7  ;;  %7971 = vmatprep.subr.bf16.mxu1 %v10841_v8  ;;  %v10922_v7 = vld [vmem:[%s14846_s1 + $0x1764] ss:$16 sps:$4 sm:$0xff]   ;;  %v10925_v8 = vld [vmem:[%s14846_s1 + $0x176c] ss:$16 sps:$4 sm:$0xff]  }
 0x2b7   :  { %7124 = vmatpush1.bf16.msra.mxu0 %v10836_v11  ;;  %7972 = vmatpush1.bf16.msra.mxu1 %v10839_v12  ;;  %v10920_v11 = vld [vmem:[%s14846_s1 + $0x1760] ss:$16 sps:$4 sm:$0xff]   ;;  %v10923_v12 = vld [vmem:[%s14846_s1 + $0x1768] ss:$16 sps:$4 sm:$0xff]  }
 0x2b8   :  { %7125 = vmatprep.subr.bf16.mxu0 %v10844_v9  ;;  %7973 = vmatprep.subr.bf16.mxu1 %v10847_v10  ;;  %v10928_v9 = vld [vmem:[%s14846_s1 + $0x1784] ss:$16 sps:$4 sm:$0xff]   ;;  %v10931_v10 = vld [vmem:[%s14846_s1 + $0x178c] ss:$16 sps:$4 sm:$0xff]  }
 0x2bb   :  { %7126 = vmatpush1.bf16.msra.mxu0 %v10842_v13  ;;  %7974 = vmatpush1.bf16.msra.mxu1 %v10845_v14  ;;  %v10926_v13 = vld [vmem:[%s14846_s1 + $0x1780] ss:$16 sps:$4 sm:$0xff]   ;;  %v10929_v14 = vld [vmem:[%s14846_s1 + $0x1788] ss:$16 sps:$4 sm:$0xff]  }
 0x2bc   :  { %7127 = vmatprep.subr.bf16.mxu0 %v10850_v15  ;;  %7975 = vmatprep.subr.bf16.mxu1 %v10853_v16  ;;  %v10934_v15 = vld [vmem:[%s14846_s1 + $0x17a4] ss:$16 sps:$4 sm:$0xff]   ;;  %v10937_v16 = vld [vmem:[%s14846_s1 + $0x17ac] ss:$16 sps:$4 sm:$0xff]  }
 0x2bf   :  { %7128 = vmatpush1.bf16.msra.mxu0 %v10848_v19  ;;  %7976 = vmatpush1.bf16.msra.mxu1 %v10851_v17  ;;  %v10932_v19 = vld [vmem:[%s14846_s1 + $0x17a0] ss:$16 sps:$4 sm:$0xff]   ;;  %v10935_v17 = vld [vmem:[%s14846_s1 + $0x17a8] ss:$16 sps:$4 sm:$0xff]  }
 0x2c0   :  { %7150 = vmatprep.subr.bf16.mxu0 %v10856_v18  ;;  %7998 = vmatprep.subr.bf16.mxu1 %v10859_v20  ;;  %v10940_v18 = vld [vmem:[%s14846_s1 + $0x17c4] ss:$16 sps:$4 sm:$0xff]   ;;  %v10943_v20 = vld [vmem:[%s14846_s1 + $0x17cc] ss:$16 sps:$4 sm:$0xff]  }
 0x2c2   :  { %7130 = vmatmul.mubr.bf16.vlgmr.msra.gmra.mrb[0].mxu0 %v8458_v21  ;;  %7978 = vmatmul.mubr.bf16.vlgmr.msra.gmra.mrb[0].mxu1 %v8458_v21  ;;  %v10938_v21 = vld [vmem:[%s14846_s1 + $0x17c0] ss:$16 sps:$4 sm:$0xff]  }
 0x2c3   :  { %7151 = vmatpush1.bf16.msra.mxu0 %v10854_v24  ;;  %7999 = vmatpush1.bf16.msra.mxu1 %v10857_v26  ;;  %v10949_v24 = vld [vmem:[%s14846_s1 + $0x17ec] ss:$16 sps:$4 sm:$0xff]   ;;  %v10944_v26 = vld [vmem:[%s14846_s1 + $0x17e0] ss:$16 sps:$4 sm:$0xff]  }
 0x2c4   :  { %7152 = vmatprep.subr.bf16.mxu0 %v10862_v25  ;;  %8000 = vmatprep.subr.bf16.mxu1 %v10865_v27  ;;  %v10947_v25 = vld [vmem:[%s14846_s1 + $0x17e8] ss:$16 sps:$4 sm:$0xff]   ;;  %v10952_v27 = vld [vmem:[%s14846_s1 + $0x1804] ss:$16 sps:$4 sm:$0xff]  }
 0x2c5   :  { %7139 = vmatprep.mubr.bf16.mxu0 %v8491_v28  ;;  %7987 = vmatprep.mubr.bf16.mxu1 %v8491_v28  ;;  %v10955_v28 = vld [vmem:[%s14846_s1 + $0x180c] ss:$16 sps:$4 sm:$0xff]  }
 0x2c7   :  { %7153 = vmatpush1.bf16.msra.mxu0 %v10860_v29  ;;  %8001 = vmatpush1.bf16.msra.mxu1 %v10863_v30  ;;  %v8460_v29 = vcombine.low %v13721_v36, %v13726_v33  ;;  %v60_v30 = vld [vmem:[%s14847_s0 + $0x158] sm:$0xff]  ;;  %v10958_v36 = vld [vmem:[%s14846_s1 + $0x1824] ss:$16 sps:$4 sm:$0xff]  }
 0x2c8   :  { %7154 = vmatprep.subr.bf16.mxu0 %v10868_v31  ;;  %8002 = vmatprep.subr.bf16.mxu1 %v10871_v32  ;;  %v76_v31 = vld [vmem:[%s14847_s0 + $0x1d8] sm:$0xff]  ;;  %v10950_v32 = vld [vmem:[%s14846_s1 + $0x1800] ss:$16 sps:$4 sm:$0xff]  }
 0x2c9   :  { %v10961_v33 = vld [vmem:[%s14846_s1 + $0x182c] ss:$16 sps:$4 sm:$0xff]  }
 0x2ca   :  { %7140 = vmatmul.mubr.bf16.gmra.mrb[4].mxu0 %v8490_v34  ;;  %7988 = vmatmul.mubr.bf16.gmra.mrb[4].mxu1 %v8490_v34  ;;  %v10953_v34 = vld [vmem:[%s14846_s1 + $0x1808] ss:$16 sps:$4 sm:$0xff]  }
 0x2cb   :  { %7155 = vmatpush1.bf16.msra.mxu0 %v10866_v35  ;;  %8003 = vmatpush1.bf16.msra.mxu1 %v10869_v37  ;;  %v8493_v35 = vcombine.high %v60_v30, %v76_v31  ;;  %v10956_v37 = vld [vmem:[%s14846_s1 + $0x1820] ss:$16 sps:$4 sm:$0xff]  }
 0x2cc   :  { %7156 = vmatprep.subr.bf16.mxu0 %v10874_v38  ;;  %8004 = vmatprep.subr.bf16.mxu1 %v10877_v39  ;;  %v10959_v38 = vld [vmem:[%s14846_s1 + $0x1828] ss:$16 sps:$4 sm:$0xff]   ;;  %v10964_v39 = vld [vmem:[%s14846_s1 + $0x1844] ss:$16 sps:$4 sm:$0xff]  }
 0x2cd   :  { %7182 = vmatprep.mubr.bf16.mxu0 %v8461_v40  ;;  %8030 = vmatprep.mubr.bf16.mxu1 %v8461_v40  ;;  %v10967_v40 = vld [vmem:[%s14846_s1 + $0x184c] ss:$16 sps:$4 sm:$0xff]  }
 0x2cf   :  { %7157 = vmatpush1.bf16.msra.mxu0 %v10872_v42  ;;  %8005 = vmatpush1.bf16.msra.mxu1 %v10875_v44  ;;  %v8492_v42 = vcombine.low %v60_v30, %v76_v31  ;;  %v13933_v44 = vld [vmem:[%s14847_s0 + $0x60] sm:$0xff]  ;;  %v11037_v30 = vld [vmem:[%s14846_s1 + $0x19c8] ss:$16 sps:$4 sm:$0xff]  }
 0x2d0   :  { %7158 = vmatprep.subr.bf16.mxu0 %v10880_v41  ;;  %8006 = vmatprep.subr.bf16.mxu1 %v10883_v43  ;;  %v13938_v41 = vld [vmem:[%s14847_s0 + $0xe0] sm:$0xff] }
 0x2d1   :  { %v10962_v43 = vld [vmem:[%s14846_s1 + $0x1840] ss:$16 sps:$4 sm:$0xff]   ;;  %v11042_v31 = vld [vmem:[%s14846_s1 + $0x19e4] ss:$16 sps:$4 sm:$0xff]  }
 0x2d3   :  { %7159 = vmatpush1.bf16.msra.mxu0 %v10878_v45  ;;  %8007 = vmatpush1.bf16.msra.mxu1 %v10881_v46  ;;  %v10965_v45 = vld [vmem:[%s14846_s1 + $0x1848] ss:$16 sps:$4 sm:$0xff]   ;;  %v10970_v46 = vld [vmem:[%s14846_s1 + $0x1864] ss:$16 sps:$4 sm:$0xff]  }
 0x2d4   :  { %7160 = vmatprep.subr.bf16.mxu0 %v10886_v47  ;;  %8008 = vmatprep.subr.bf16.mxu1 %v10889_v48  ;;  %v10973_v47 = vld [vmem:[%s14846_s1 + $0x186c] ss:$16 sps:$4 sm:$0xff]   ;;  %v8463_v48 = vcombine.high %v13933_v44, %v13938_v41 }
 0x2d7   :  { %7161 = vmatpush1.bf16.msra.mxu0 %v10884_v51  ;;  %8009 = vmatpush1.bf16.msra.mxu1 %v10887_v52  ;;  %v10968_v51 = vld [vmem:[%s14846_s1 + $0x1860] ss:$16 sps:$4 sm:$0xff]   ;;  %v10971_v52 = vld [vmem:[%s14846_s1 + $0x1868] ss:$16 sps:$4 sm:$0xff]  }
 0x2d8   :  { %7162 = vmatprep.subr.bf16.mxu0 %v10892_v49  ;;  %8010 = vmatprep.subr.bf16.mxu1 %v10895_v50  ;;  %v10976_v49 = vld [vmem:[%s14846_s1 + $0x1884] ss:$16 sps:$4 sm:$0xff]   ;;  %v10979_v50 = vld [vmem:[%s14846_s1 + $0x188c] ss:$16 sps:$4 sm:$0xff]  }
 0x2db   :  { %7163 = vmatpush1.bf16.msra.mxu0 %v10890_v53  ;;  %8011 = vmatpush1.bf16.msra.mxu1 %v10893_v54  ;;  %v10974_v53 = vld [vmem:[%s14846_s1 + $0x1880] ss:$16 sps:$4 sm:$0xff]   ;;  %v10977_v54 = vld [vmem:[%s14846_s1 + $0x1888] ss:$16 sps:$4 sm:$0xff]  }
 0x2dc   :  { %7164 = vmatprep.subr.bf16.mxu0 %v10898_v55  ;;  %8012 = vmatprep.subr.bf16.mxu1 %v10901_v56  ;;  %v10982_v55 = vld [vmem:[%s14846_s1 + $0x18a4] ss:$16 sps:$4 sm:$0xff]   ;;  %v10985_v56 = vld [vmem:[%s14846_s1 + $0x18ac] ss:$16 sps:$4 sm:$0xff]  }
 0x2df   :  { %7165 = vmatpush1.bf16.msra.mxu0 %v10896_v59  ;;  %8013 = vmatpush1.bf16.msra.mxu1 %v10899_v60  ;;  %v10980_v59 = vld [vmem:[%s14846_s1 + $0x18a0] ss:$16 sps:$4 sm:$0xff]   ;;  %v10983_v60 = vld [vmem:[%s14846_s1 + $0x18a8] ss:$16 sps:$4 sm:$0xff]  }
 0x2e0   :  { %7166 = vmatprep.subr.bf16.mxu0 %v10904_v57  ;;  %8014 = vmatprep.subr.bf16.mxu1 %v10907_v58  ;;  %v10988_v57 = vld [vmem:[%s14846_s1 + $0x18c4] ss:$16 sps:$4 sm:$0xff]   ;;  %v10991_v58 = vld [vmem:[%s14846_s1 + $0x18cc] ss:$16 sps:$4 sm:$0xff]  }
 0x2e3   :  { %7167 = vmatpush1.bf16.msra.mxu0 %v10902_v61  ;;  %8015 = vmatpush1.bf16.msra.mxu1 %v10905_v62  ;;  %v10986_v61 = vld [vmem:[%s14846_s1 + $0x18c0] ss:$16 sps:$4 sm:$0xff]   ;;  %v10989_v62 = vld [vmem:[%s14846_s1 + $0x18c8] ss:$16 sps:$4 sm:$0xff]  }
 0x2e4   :  { %7168 = vmatprep.subr.bf16.mxu0 %v10910_v63  ;;  %8016 = vmatprep.subr.bf16.mxu1 %v10913_v0  ;;  %v10994_v63 = vld [vmem:[%s14846_s1 + $0x18e4] ss:$16 sps:$4 sm:$0xff]   ;;  %v10997_v0 = vld [vmem:[%s14846_s1 + $0x18ec] ss:$16 sps:$4 sm:$0xff]  }
 0x2e7   :  { %7169 = vmatpush1.bf16.msra.mxu0 %v10908_v3  ;;  %8017 = vmatpush1.bf16.msra.mxu1 %v10911_v4  ;;  %v10992_v3 = vld [vmem:[%s14846_s1 + $0x18e0] ss:$16 sps:$4 sm:$0xff]   ;;  %v10995_v4 = vld [vmem:[%s14846_s1 + $0x18e8] ss:$16 sps:$4 sm:$0xff]  }
 0x2e8   :  { %7170 = vmatprep.subr.bf16.mxu0 %v10916_v1  ;;  %8018 = vmatprep.subr.bf16.mxu1 %v10919_v2  ;;  %v11000_v1 = vld [vmem:[%s14846_s1 + $0x1904] ss:$16 sps:$4 sm:$0xff]   ;;  %v11003_v2 = vld [vmem:[%s14846_s1 + $0x190c] ss:$16 sps:$4 sm:$0xff]  }
 0x2eb   :  { %7171 = vmatpush1.bf16.msra.mxu0 %v10914_v5  ;;  %8019 = vmatpush1.bf16.msra.mxu1 %v10917_v6  ;;  %v10998_v5 = vld [vmem:[%s14846_s1 + $0x1900] ss:$16 sps:$4 sm:$0xff]   ;;  %v11001_v6 = vld [vmem:[%s14846_s1 + $0x1908] ss:$16 sps:$4 sm:$0xff]  }
 0x2ec   :  { %7172 = vmatprep.subr.bf16.mxu0 %v10922_v7  ;;  %8020 = vmatprep.subr.bf16.mxu1 %v10925_v8  ;;  %v11006_v7 = vld [vmem:[%s14846_s1 + $0x1924] ss:$16 sps:$4 sm:$0xff]   ;;  %v11009_v8 = vld [vmem:[%s14846_s1 + $0x192c] ss:$16 sps:$4 sm:$0xff]  }
 0x2ef   :  { %7173 = vmatpush1.bf16.msra.mxu0 %v10920_v11  ;;  %8021 = vmatpush1.bf16.msra.mxu1 %v10923_v12  ;;  %v11004_v11 = vld [vmem:[%s14846_s1 + $0x1920] ss:$16 sps:$4 sm:$0xff]   ;;  %v11007_v12 = vld [vmem:[%s14846_s1 + $0x1928] ss:$16 sps:$4 sm:$0xff]  }
 0x2f0   :  { %7174 = vmatprep.subr.bf16.mxu0 %v10928_v9  ;;  %8022 = vmatprep.subr.bf16.mxu1 %v10931_v10  ;;  %v11012_v9 = vld [vmem:[%s14846_s1 + $0x1944] ss:$16 sps:$4 sm:$0xff]   ;;  %v11015_v10 = vld [vmem:[%s14846_s1 + $0x194c] ss:$16 sps:$4 sm:$0xff]  }
 0x2f3   :  { %7175 = vmatpush1.bf16.msra.mxu0 %v10926_v13  ;;  %8023 = vmatpush1.bf16.msra.mxu1 %v10929_v14  ;;  %v11010_v13 = vld [vmem:[%s14846_s1 + $0x1940] ss:$16 sps:$4 sm:$0xff]   ;;  %v11013_v14 = vld [vmem:[%s14846_s1 + $0x1948] ss:$16 sps:$4 sm:$0xff]  }
 0x2f4   :  { %7176 = vmatprep.subr.bf16.mxu0 %v10934_v15  ;;  %8024 = vmatprep.subr.bf16.mxu1 %v10937_v16  ;;  %v11018_v15 = vld [vmem:[%s14846_s1 + $0x1964] ss:$16 sps:$4 sm:$0xff]   ;;  %v11021_v16 = vld [vmem:[%s14846_s1 + $0x196c] ss:$16 sps:$4 sm:$0xff]  }
 0x2f7   :  { %7177 = vmatpush1.bf16.msra.mxu0 %v10932_v19  ;;  %8025 = vmatpush1.bf16.msra.mxu1 %v10935_v17  ;;  %v11016_v19 = vld [vmem:[%s14846_s1 + $0x1960] ss:$16 sps:$4 sm:$0xff]   ;;  %v11019_v17 = vld [vmem:[%s14846_s1 + $0x1968] ss:$16 sps:$4 sm:$0xff]  }
 0x2f8   :  { %7178 = vmatprep.subr.bf16.mxu0 %v10940_v18  ;;  %8026 = vmatprep.subr.bf16.mxu1 %v10943_v20  ;;  %v11024_v18 = vld [vmem:[%s14846_s1 + $0x1984] ss:$16 sps:$4 sm:$0xff]   ;;  %v11027_v20 = vld [vmem:[%s14846_s1 + $0x198c] ss:$16 sps:$4 sm:$0xff]  }
 0x2fb   :  { %7179 = vmatpush1.bf16.msra.mxu0 %v10938_v21  ;;  %8027 = vmatpush1.bf16.msra.mxu1 %v10941_v22  ;;  %v11022_v21 = vld [vmem:[%s14846_s1 + $0x1980] ss:$16 sps:$4 sm:$0xff]   ;;  %v11025_v22 = vld [vmem:[%s14846_s1 + $0x1988] ss:$16 sps:$4 sm:$0xff]  }
 0x2fc   :  { %7180 = vmatprep.subr.bf16.mxu0 %v10946_v23  ;;  %8028 = vmatprep.subr.bf16.mxu1 %v10949_v24  ;;  %v11030_v23 = vld [vmem:[%s14846_s1 + $0x19a4] ss:$16 sps:$4 sm:$0xff]   ;;  %v11033_v24 = vld [vmem:[%s14846_s1 + $0x19ac] ss:$16 sps:$4 sm:$0xff]  }
 0x2ff   :  { %7181 = vmatpush1.bf16.msra.mxu0 %v10944_v26  ;;  %8029 = vmatpush1.bf16.msra.mxu1 %v10947_v25  ;;  %v11028_v26 = vld [vmem:[%s14846_s1 + $0x19a0] ss:$16 sps:$4 sm:$0xff]   ;;  %v11031_v25 = vld [vmem:[%s14846_s1 + $0x19a8] ss:$16 sps:$4 sm:$0xff]  }
 0x300   :  { %7203 = vmatprep.subr.bf16.mxu0 %v10952_v27  ;;  %8051 = vmatprep.subr.bf16.mxu1 %v10955_v28  ;;  %v11036_v27 = vld [vmem:[%s14846_s1 + $0x19c4] ss:$16 sps:$4 sm:$0xff]   ;;  %v11039_v28 = vld [vmem:[%s14846_s1 + $0x19cc] ss:$16 sps:$4 sm:$0xff]  }
 0x302   :  { %7183 = vmatmul.mubr.bf16.vlgmr.msra.gmra.mrb[0].mxu0 %v8460_v29  ;;  %8031 = vmatmul.mubr.bf16.vlgmr.msra.gmra.mrb[0].mxu1 %v8460_v29  ;;  %v11034_v29 = vld [vmem:[%s14846_s1 + $0x19c0] ss:$16 sps:$4 sm:$0xff]  }
 0x303   :  { %7204 = vmatpush1.bf16.msra.mxu0 %v10950_v32  ;;  %8052 = vmatpush1.bf16.msra.mxu1 %v10953_v34  ;;  %v11045_v32 = vld [vmem:[%s14846_s1 + $0x19ec] ss:$16 sps:$4 sm:$0xff]   ;;  %v11040_v34 = vld [vmem:[%s14846_s1 + $0x19e0] ss:$16 sps:$4 sm:$0xff]  }
 0x304   :  { %7205 = vmatprep.subr.bf16.mxu0 %v10958_v36  ;;  %8053 = vmatprep.subr.bf16.mxu1 %v10961_v33  ;;  %v11043_v36 = vld [vmem:[%s14846_s1 + $0x19e8] ss:$16 sps:$4 sm:$0xff]   ;;  %v11048_v33 = vld [vmem:[%s14846_s1 + $0x1a04] ss:$16 sps:$4 sm:$0xff]  }
 0x305   :  { %7192 = vmatprep.mubr.bf16.mxu0 %v8493_v35  ;;  %8040 = vmatprep.mubr.bf16.mxu1 %v8493_v35  ;;  %v11051_v35 = vld [vmem:[%s14846_s1 + $0x1a0c] ss:$16 sps:$4 sm:$0xff]  }
 0x307   :  { %7206 = vmatpush1.bf16.msra.mxu0 %v10956_v37  ;;  %8054 = vmatpush1.bf16.msra.mxu1 %v10959_v38  ;;  %v8462_v37 = vcombine.low %v13933_v44, %v13938_v41  ;;  %v61_v38 = vld [vmem:[%s14847_s0 + $0x160] sm:$0xff]  ;;  %v11057_v41 = vld [vmem:[%s14846_s1 + $0x1a2c] ss:$16 sps:$4 sm:$0xff]  }
 0x308   :  { %7207 = vmatprep.subr.bf16.mxu0 %v10964_v39  ;;  %8055 = vmatprep.subr.bf16.mxu1 %v10967_v40  ;;  %v77_v39 = vld [vmem:[%s14847_s0 + $0x1e0] sm:$0xff] }
 0x309   :  { %v11046_v40 = vld [vmem:[%s14846_s1 + $0x1a00] ss:$16 sps:$4 sm:$0xff]   ;;  %v11054_v44 = vld [vmem:[%s14846_s1 + $0x1a24] ss:$16 sps:$4 sm:$0xff]  }
 0x30a   :  { %7193 = vmatmul.mubr.bf16.gmra.mrb[4].mxu0 %v8492_v42  ;;  %8041 = vmatmul.mubr.bf16.gmra.mrb[4].mxu1 %v8492_v42  ;;  %v11049_v42 = vld [vmem:[%s14846_s1 + $0x1a08] ss:$16 sps:$4 sm:$0xff]  }
 0x30b   :  { %7208 = vmatpush1.bf16.msra.mxu0 %v10962_v43  ;;  %8056 = vmatpush1.bf16.msra.mxu1 %v10965_v45  ;;  %v8495_v43 = vcombine.high %v61_v38, %v77_v39  ;;  %v11052_v45 = vld [vmem:[%s14846_s1 + $0x1a20] ss:$16 sps:$4 sm:$0xff]  }
 0x30c   :  { %7209 = vmatprep.subr.bf16.mxu0 %v10970_v46  ;;  %8057 = vmatprep.subr.bf16.mxu1 %v10973_v47  ;;  %v11055_v46 = vld [vmem:[%s14846_s1 + $0x1a28] ss:$16 sps:$4 sm:$0xff]   ;;  %v11060_v47 = vld [vmem:[%s14846_s1 + $0x1a44] ss:$16 sps:$4 sm:$0xff]  }
 0x30d   :  { %7235 = vmatprep.mubr.bf16.mxu0 %v8463_v48  ;;  %8083 = vmatprep.mubr.bf16.mxu1 %v8463_v48  ;;  %v11063_v48 = vld [vmem:[%s14846_s1 + $0x1a4c] ss:$16 sps:$4 sm:$0xff]  }
 0x30f   :  { %7210 = vmatpush1.bf16.msra.mxu0 %v10968_v51  ;;  %8058 = vmatpush1.bf16.msra.mxu1 %v10971_v52  ;;  %v8494_v51 = vcombine.low %v61_v38, %v77_v39  ;;  %v14145_v52 = vld [vmem:[%s14847_s0 + $0x68] sm:$0xff]  ;;  %v11138_v39 = vld [vmem:[%s14846_s1 + $0x1be4] ss:$16 sps:$4 sm:$0xff]  }
 0x310   :  { %7211 = vmatprep.subr.bf16.mxu0 %v10976_v49  ;;  %8059 = vmatprep.subr.bf16.mxu1 %v10979_v50  ;;  %v14150_v49 = vld [vmem:[%s14847_s0 + $0xe8] sm:$0xff]  ;;  %v11058_v50 = vld [vmem:[%s14846_s1 + $0x1a40] ss:$16 sps:$4 sm:$0xff]  }
 0x311   :  { %v11133_v38 = vld [vmem:[%s14846_s1 + $0x1bc8] ss:$16 sps:$4 sm:$0xff]  }
 0x313   :  { %7212 = vmatpush1.bf16.msra.mxu0 %v10974_v53  ;;  %8060 = vmatpush1.bf16.msra.mxu1 %v10977_v54  ;;  %v11061_v53 = vld [vmem:[%s14846_s1 + $0x1a48] ss:$16 sps:$4 sm:$0xff]   ;;  %v11066_v54 = vld [vmem:[%s14846_s1 + $0x1a64] ss:$16 sps:$4 sm:$0xff]  }
 0x314   :  { %7213 = vmatprep.subr.bf16.mxu0 %v10982_v55  ;;  %8061 = vmatprep.subr.bf16.mxu1 %v10985_v56  ;;  %v11069_v55 = vld [vmem:[%s14846_s1 + $0x1a6c] ss:$16 sps:$4 sm:$0xff]   ;;  %v8465_v56 = vcombine.high %v14145_v52, %v14150_v49 }
 0x317   :  { %7214 = vmatpush1.bf16.msra.mxu0 %v10980_v59  ;;  %8062 = vmatpush1.bf16.msra.mxu1 %v10983_v60  ;;  %v11064_v59 = vld [vmem:[%s14846_s1 + $0x1a60] ss:$16 sps:$4 sm:$0xff]   ;;  %v11067_v60 = vld [vmem:[%s14846_s1 + $0x1a68] ss:$16 sps:$4 sm:$0xff]  }
 0x318   :  { %7215 = vmatprep.subr.bf16.mxu0 %v10988_v57  ;;  %8063 = vmatprep.subr.bf16.mxu1 %v10991_v58  ;;  %v11072_v57 = vld [vmem:[%s14846_s1 + $0x1a84] ss:$16 sps:$4 sm:$0xff]   ;;  %v11075_v58 = vld [vmem:[%s14846_s1 + $0x1a8c] ss:$16 sps:$4 sm:$0xff]  }
 0x31b   :  { %7216 = vmatpush1.bf16.msra.mxu0 %v10986_v61  ;;  %8064 = vmatpush1.bf16.msra.mxu1 %v10989_v62  ;;  %v11070_v61 = vld [vmem:[%s14846_s1 + $0x1a80] ss:$16 sps:$4 sm:$0xff]   ;;  %v11073_v62 = vld [vmem:[%s14846_s1 + $0x1a88] ss:$16 sps:$4 sm:$0xff]  }
 0x31c   :  { %7217 = vmatprep.subr.bf16.mxu0 %v10994_v63  ;;  %8065 = vmatprep.subr.bf16.mxu1 %v10997_v0  ;;  %v11078_v63 = vld [vmem:[%s14846_s1 + $0x1aa4] ss:$16 sps:$4 sm:$0xff]   ;;  %v11081_v0 = vld [vmem:[%s14846_s1 + $0x1aac] ss:$16 sps:$4 sm:$0xff]  }
 0x31f   :  { %7218 = vmatpush1.bf16.msra.mxu0 %v10992_v3  ;;  %8066 = vmatpush1.bf16.msra.mxu1 %v10995_v4  ;;  %v11076_v3 = vld [vmem:[%s14846_s1 + $0x1aa0] ss:$16 sps:$4 sm:$0xff]   ;;  %v11079_v4 = vld [vmem:[%s14846_s1 + $0x1aa8] ss:$16 sps:$4 sm:$0xff]  }
 0x320   :  { %7219 = vmatprep.subr.bf16.mxu0 %v11000_v1  ;;  %8067 = vmatprep.subr.bf16.mxu1 %v11003_v2  ;;  %v11084_v1 = vld [vmem:[%s14846_s1 + $0x1ac4] ss:$16 sps:$4 sm:$0xff]   ;;  %v11087_v2 = vld [vmem:[%s14846_s1 + $0x1acc] ss:$16 sps:$4 sm:$0xff]  }
 0x323   :  { %7220 = vmatpush1.bf16.msra.mxu0 %v10998_v5  ;;  %8068 = vmatpush1.bf16.msra.mxu1 %v11001_v6  ;;  %v11082_v5 = vld [vmem:[%s14846_s1 + $0x1ac0] ss:$16 sps:$4 sm:$0xff]   ;;  %v11085_v6 = vld [vmem:[%s14846_s1 + $0x1ac8] ss:$16 sps:$4 sm:$0xff]  }
 0x324   :  { %7221 = vmatprep.subr.bf16.mxu0 %v11006_v7  ;;  %8069 = vmatprep.subr.bf16.mxu1 %v11009_v8  ;;  %v11090_v7 = vld [vmem:[%s14846_s1 + $0x1ae4] ss:$16 sps:$4 sm:$0xff]   ;;  %v11093_v8 = vld [vmem:[%s14846_s1 + $0x1aec] ss:$16 sps:$4 sm:$0xff]  }
 0x327   :  { %7222 = vmatpush1.bf16.msra.mxu0 %v11004_v11  ;;  %8070 = vmatpush1.bf16.msra.mxu1 %v11007_v12  ;;  %v11088_v11 = vld [vmem:[%s14846_s1 + $0x1ae0] ss:$16 sps:$4 sm:$0xff]   ;;  %v11091_v12 = vld [vmem:[%s14846_s1 + $0x1ae8] ss:$16 sps:$4 sm:$0xff]  }
 0x328   :  { %7223 = vmatprep.subr.bf16.mxu0 %v11012_v9  ;;  %8071 = vmatprep.subr.bf16.mxu1 %v11015_v10  ;;  %v11096_v9 = vld [vmem:[%s14846_s1 + $0x1b04] ss:$16 sps:$4 sm:$0xff]   ;;  %v11099_v10 = vld [vmem:[%s14846_s1 + $0x1b0c] ss:$16 sps:$4 sm:$0xff]  }
 0x32b   :  { %7224 = vmatpush1.bf16.msra.mxu0 %v11010_v13  ;;  %8072 = vmatpush1.bf16.msra.mxu1 %v11013_v14  ;;  %v11094_v13 = vld [vmem:[%s14846_s1 + $0x1b00] ss:$16 sps:$4 sm:$0xff]   ;;  %v11097_v14 = vld [vmem:[%s14846_s1 + $0x1b08] ss:$16 sps:$4 sm:$0xff]  }
 0x32c   :  { %7225 = vmatprep.subr.bf16.mxu0 %v11018_v15  ;;  %8073 = vmatprep.subr.bf16.mxu1 %v11021_v16  ;;  %v11102_v15 = vld [vmem:[%s14846_s1 + $0x1b24] ss:$16 sps:$4 sm:$0xff]   ;;  %v11105_v16 = vld [vmem:[%s14846_s1 + $0x1b2c] ss:$16 sps:$4 sm:$0xff]  }
 0x32f   :  { %7226 = vmatpush1.bf16.msra.mxu0 %v11016_v19  ;;  %8074 = vmatpush1.bf16.msra.mxu1 %v11019_v17  ;;  %v11100_v19 = vld [vmem:[%s14846_s1 + $0x1b20] ss:$16 sps:$4 sm:$0xff]   ;;  %v11103_v17 = vld [vmem:[%s14846_s1 + $0x1b28] ss:$16 sps:$4 sm:$0xff]  }
 0x330   :  { %7227 = vmatprep.subr.bf16.mxu0 %v11024_v18  ;;  %8075 = vmatprep.subr.bf16.mxu1 %v11027_v20  ;;  %v11108_v18 = vld [vmem:[%s14846_s1 + $0x1b44] ss:$16 sps:$4 sm:$0xff]   ;;  %v11111_v20 = vld [vmem:[%s14846_s1 + $0x1b4c] ss:$16 sps:$4 sm:$0xff]  }
 0x333   :  { %7228 = vmatpush1.bf16.msra.mxu0 %v11022_v21  ;;  %8076 = vmatpush1.bf16.msra.mxu1 %v11025_v22  ;;  %v11106_v21 = vld [vmem:[%s14846_s1 + $0x1b40] ss:$16 sps:$4 sm:$0xff]   ;;  %v11109_v22 = vld [vmem:[%s14846_s1 + $0x1b48] ss:$16 sps:$4 sm:$0xff]  }
 0x334   :  { %7229 = vmatprep.subr.bf16.mxu0 %v11030_v23  ;;  %8077 = vmatprep.subr.bf16.mxu1 %v11033_v24  ;;  %v11114_v23 = vld [vmem:[%s14846_s1 + $0x1b64] ss:$16 sps:$4 sm:$0xff]   ;;  %v11117_v24 = vld [vmem:[%s14846_s1 + $0x1b6c] ss:$16 sps:$4 sm:$0xff]  }
 0x337   :  { %7230 = vmatpush1.bf16.msra.mxu0 %v11028_v26  ;;  %8078 = vmatpush1.bf16.msra.mxu1 %v11031_v25  ;;  %v11112_v26 = vld [vmem:[%s14846_s1 + $0x1b60] ss:$16 sps:$4 sm:$0xff]   ;;  %v11115_v25 = vld [vmem:[%s14846_s1 + $0x1b68] ss:$16 sps:$4 sm:$0xff]  }
 0x338   :  { %7231 = vmatprep.subr.bf16.mxu0 %v11036_v27  ;;  %8079 = vmatprep.subr.bf16.mxu1 %v11039_v28  ;;  %v11120_v27 = vld [vmem:[%s14846_s1 + $0x1b84] ss:$16 sps:$4 sm:$0xff]   ;;  %v11123_v28 = vld [vmem:[%s14846_s1 + $0x1b8c] ss:$16 sps:$4 sm:$0xff]  }
 0x33b   :  { %7232 = vmatpush1.bf16.msra.mxu0 %v11034_v29  ;;  %8080 = vmatpush1.bf16.msra.mxu1 %v11037_v30  ;;  %v11118_v29 = vld [vmem:[%s14846_s1 + $0x1b80] ss:$16 sps:$4 sm:$0xff]   ;;  %v11121_v30 = vld [vmem:[%s14846_s1 + $0x1b88] ss:$16 sps:$4 sm:$0xff]  }
 0x33c   :  { %7233 = vmatprep.subr.bf16.mxu0 %v11042_v31  ;;  %8081 = vmatprep.subr.bf16.mxu1 %v11045_v32  ;;  %v11126_v31 = vld [vmem:[%s14846_s1 + $0x1ba4] ss:$16 sps:$4 sm:$0xff]   ;;  %v11129_v32 = vld [vmem:[%s14846_s1 + $0x1bac] ss:$16 sps:$4 sm:$0xff]  }
 0x33f   :  { %7234 = vmatpush1.bf16.msra.mxu0 %v11040_v34  ;;  %8082 = vmatpush1.bf16.msra.mxu1 %v11043_v36  ;;  %v11124_v34 = vld [vmem:[%s14846_s1 + $0x1ba0] ss:$16 sps:$4 sm:$0xff]   ;;  %v11127_v36 = vld [vmem:[%s14846_s1 + $0x1ba8] ss:$16 sps:$4 sm:$0xff]  }
 0x340   :  { %7256 = vmatprep.subr.bf16.mxu0 %v11048_v33  ;;  %8104 = vmatprep.subr.bf16.mxu1 %v11051_v35  ;;  %v11132_v33 = vld [vmem:[%s14846_s1 + $0x1bc4] ss:$16 sps:$4 sm:$0xff]   ;;  %v11135_v35 = vld [vmem:[%s14846_s1 + $0x1bcc] ss:$16 sps:$4 sm:$0xff]  }
 0x342   :  { %7236 = vmatmul.mubr.bf16.vlgmr.msra.gmra.mrb[0].mxu0 %v8462_v37  ;;  %8084 = vmatmul.mubr.bf16.vlgmr.msra.gmra.mrb[0].mxu1 %v8462_v37  ;;  %v11130_v37 = vld [vmem:[%s14846_s1 + $0x1bc0] ss:$16 sps:$4 sm:$0xff]  }
 0x343   :  { %7257 = vmatpush1.bf16.msra.mxu0 %v11046_v40  ;;  %8105 = vmatpush1.bf16.msra.mxu1 %v11049_v42  ;;  %v11141_v40 = vld [vmem:[%s14846_s1 + $0x1bec] ss:$16 sps:$4 sm:$0xff]   ;;  %v11136_v42 = vld [vmem:[%s14846_s1 + $0x1be0] ss:$16 sps:$4 sm:$0xff]  }
 0x344   :  { %7258 = vmatprep.subr.bf16.mxu0 %v11054_v44  ;;  %8106 = vmatprep.subr.bf16.mxu1 %v11057_v41  ;;  %v11139_v44 = vld [vmem:[%s14846_s1 + $0x1be8] ss:$16 sps:$4 sm:$0xff]   ;;  %v11144_v41 = vld [vmem:[%s14846_s1 + $0x1c04] ss:$16 sps:$4 sm:$0xff]  }
 0x345   :  { %7245 = vmatprep.mubr.bf16.mxu0 %v8495_v43  ;;  %8093 = vmatprep.mubr.bf16.mxu1 %v8495_v43  ;;  %v11147_v43 = vld [vmem:[%s14846_s1 + $0x1c0c] ss:$16 sps:$4 sm:$0xff]  }
 0x347   :  { %7259 = vmatpush1.bf16.msra.mxu0 %v11052_v45  ;;  %8107 = vmatpush1.bf16.msra.mxu1 %v11055_v46  ;;  %v8464_v45 = vcombine.low %v14145_v52, %v14150_v49  ;;  %v62_v46 = vld [vmem:[%s14847_s0 + $0x168] sm:$0xff]  ;;  %v11150_v52 = vld [vmem:[%s14846_s1 + $0x1c24] ss:$16 sps:$4 sm:$0xff]  }
 0x348   :  { %7260 = vmatprep.subr.bf16.mxu0 %v11060_v47  ;;  %8108 = vmatprep.subr.bf16.mxu1 %v11063_v48  ;;  %v78_v47 = vld [vmem:[%s14847_s0 + $0x1e8] sm:$0xff]  ;;  %v11142_v48 = vld [vmem:[%s14846_s1 + $0x1c00] ss:$16 sps:$4 sm:$0xff]  }
 0x349   :  { %v11153_v49 = vld [vmem:[%s14846_s1 + $0x1c2c] ss:$16 sps:$4 sm:$0xff]  }
 0x34a   :  { %7246 = vmatmul.mubr.bf16.gmra.mrb[4].mxu0 %v8494_v51  ;;  %8094 = vmatmul.mubr.bf16.gmra.mrb[4].mxu1 %v8494_v51  ;;  %v11145_v51 = vld [vmem:[%s14846_s1 + $0x1c08] ss:$16 sps:$4 sm:$0xff]  }
 0x34b   :  { %7261 = vmatpush1.bf16.msra.mxu0 %v11058_v50  ;;  %8109 = vmatpush1.bf16.msra.mxu1 %v11061_v53  ;;  %v8497_v50 = vcombine.high %v62_v46, %v78_v47  ;;  %v11148_v53 = vld [vmem:[%s14846_s1 + $0x1c20] ss:$16 sps:$4 sm:$0xff]  }
 0x34c   :  { %7262 = vmatprep.subr.bf16.mxu0 %v11066_v54  ;;  %8110 = vmatprep.subr.bf16.mxu1 %v11069_v55  ;;  %v11151_v54 = vld [vmem:[%s14846_s1 + $0x1c28] ss:$16 sps:$4 sm:$0xff]   ;;  %v11156_v55 = vld [vmem:[%s14846_s1 + $0x1c44] ss:$16 sps:$4 sm:$0xff]  }
 0x34d   :  { %7288 = vmatprep.mubr.bf16.mxu0 %v8465_v56  ;;  %8136 = vmatprep.mubr.bf16.mxu1 %v8465_v56  ;;  %v11159_v56 = vld [vmem:[%s14846_s1 + $0x1c4c] ss:$16 sps:$4 sm:$0xff]  }
 0x34f   :  { %7263 = vmatpush1.bf16.msra.mxu0 %v11064_v59  ;;  %8111 = vmatpush1.bf16.msra.mxu1 %v11067_v60  ;;  %v8496_v59 = vcombine.low %v62_v46, %v78_v47  ;;  %v14357_v60 = vld [vmem:[%s14847_s0 + $0x70] sm:$0xff]  ;;  %v11229_v46 = vld [vmem:[%s14846_s1 + $0x1dc8] ss:$16 sps:$4 sm:$0xff]  }
 0x350   :  { %7264 = vmatprep.subr.bf16.mxu0 %v11072_v57  ;;  %8112 = vmatprep.subr.bf16.mxu1 %v11075_v58  ;;  %v14362_v57 = vld [vmem:[%s14847_s0 + $0xf0] sm:$0xff] }
 0x351   :  { %v11154_v58 = vld [vmem:[%s14846_s1 + $0x1c40] ss:$16 sps:$4 sm:$0xff]   ;;  %v11234_v47 = vld [vmem:[%s14846_s1 + $0x1de4] ss:$16 sps:$4 sm:$0xff]  }
 0x353   :  { %7265 = vmatpush1.bf16.msra.mxu0 %v11070_v61  ;;  %8113 = vmatpush1.bf16.msra.mxu1 %v11073_v62  ;;  %v11157_v61 = vld [vmem:[%s14846_s1 + $0x1c48] ss:$16 sps:$4 sm:$0xff]   ;;  %v11162_v62 = vld [vmem:[%s14846_s1 + $0x1c64] ss:$16 sps:$4 sm:$0xff]  }
 0x354   :  { %7266 = vmatprep.subr.bf16.mxu0 %v11078_v63  ;;  %8114 = vmatprep.subr.bf16.mxu1 %v11081_v0  ;;  %v11165_v63 = vld [vmem:[%s14846_s1 + $0x1c6c] ss:$16 sps:$4 sm:$0xff]   ;;  %v8467_v0 = vcombine.high %v14357_v60, %v14362_v57 }
 0x357   :  { %7267 = vmatpush1.bf16.msra.mxu0 %v11076_v3  ;;  %8115 = vmatpush1.bf16.msra.mxu1 %v11079_v4  ;;  %v11160_v3 = vld [vmem:[%s14846_s1 + $0x1c60] ss:$16 sps:$4 sm:$0xff]   ;;  %v11163_v4 = vld [vmem:[%s14846_s1 + $0x1c68] ss:$16 sps:$4 sm:$0xff]  }
 0x358   :  { %7268 = vmatprep.subr.bf16.mxu0 %v11084_v1  ;;  %8116 = vmatprep.subr.bf16.mxu1 %v11087_v2  ;;  %v11168_v1 = vld [vmem:[%s14846_s1 + $0x1c84] ss:$16 sps:$4 sm:$0xff]   ;;  %v11171_v2 = vld [vmem:[%s14846_s1 + $0x1c8c] ss:$16 sps:$4 sm:$0xff]  }
 0x35b   :  { %7269 = vmatpush1.bf16.msra.mxu0 %v11082_v5  ;;  %8117 = vmatpush1.bf16.msra.mxu1 %v11085_v6  ;;  %v11166_v5 = vld [vmem:[%s14846_s1 + $0x1c80] ss:$16 sps:$4 sm:$0xff]   ;;  %v11169_v6 = vld [vmem:[%s14846_s1 + $0x1c88] ss:$16 sps:$4 sm:$0xff]  }
 0x35c   :  { %7270 = vmatprep.subr.bf16.mxu0 %v11090_v7  ;;  %8118 = vmatprep.subr.bf16.mxu1 %v11093_v8  ;;  %v11174_v7 = vld [vmem:[%s14846_s1 + $0x1ca4] ss:$16 sps:$4 sm:$0xff]   ;;  %v11177_v8 = vld [vmem:[%s14846_s1 + $0x1cac] ss:$16 sps:$4 sm:$0xff]  }
 0x35f   :  { %7271 = vmatpush1.bf16.msra.mxu0 %v11088_v11  ;;  %8119 = vmatpush1.bf16.msra.mxu1 %v11091_v12  ;;  %v11172_v11 = vld [vmem:[%s14846_s1 + $0x1ca0] ss:$16 sps:$4 sm:$0xff]   ;;  %v11175_v12 = vld [vmem:[%s14846_s1 + $0x1ca8] ss:$16 sps:$4 sm:$0xff]  }
 0x360   :  { %7272 = vmatprep.subr.bf16.mxu0 %v11096_v9  ;;  %8120 = vmatprep.subr.bf16.mxu1 %v11099_v10  ;;  %v11180_v9 = vld [vmem:[%s14846_s1 + $0x1cc4] ss:$16 sps:$4 sm:$0xff]   ;;  %v11183_v10 = vld [vmem:[%s14846_s1 + $0x1ccc] ss:$16 sps:$4 sm:$0xff]  }
 0x363   :  { %7273 = vmatpush1.bf16.msra.mxu0 %v11094_v13  ;;  %8121 = vmatpush1.bf16.msra.mxu1 %v11097_v14  ;;  %v11178_v13 = vld [vmem:[%s14846_s1 + $0x1cc0] ss:$16 sps:$4 sm:$0xff]   ;;  %v11181_v14 = vld [vmem:[%s14846_s1 + $0x1cc8] ss:$16 sps:$4 sm:$0xff]  }
 0x364   :  { %7274 = vmatprep.subr.bf16.mxu0 %v11102_v15  ;;  %8122 = vmatprep.subr.bf16.mxu1 %v11105_v16  ;;  %v11186_v15 = vld [vmem:[%s14846_s1 + $0x1ce4] ss:$16 sps:$4 sm:$0xff]   ;;  %v11189_v16 = vld [vmem:[%s14846_s1 + $0x1cec] ss:$16 sps:$4 sm:$0xff]  }
 0x367   :  { %7275 = vmatpush1.bf16.msra.mxu0 %v11100_v19  ;;  %8123 = vmatpush1.bf16.msra.mxu1 %v11103_v17  ;;  %v11184_v19 = vld [vmem:[%s14846_s1 + $0x1ce0] ss:$16 sps:$4 sm:$0xff]   ;;  %v11187_v17 = vld [vmem:[%s14846_s1 + $0x1ce8] ss:$16 sps:$4 sm:$0xff]  }
 0x368   :  { %7276 = vmatprep.subr.bf16.mxu0 %v11108_v18  ;;  %8124 = vmatprep.subr.bf16.mxu1 %v11111_v20  ;;  %v11192_v18 = vld [vmem:[%s14846_s1 + $0x1d04] ss:$16 sps:$4 sm:$0xff]   ;;  %v11195_v20 = vld [vmem:[%s14846_s1 + $0x1d0c] ss:$16 sps:$4 sm:$0xff]  }
 0x36b   :  { %7277 = vmatpush1.bf16.msra.mxu0 %v11106_v21  ;;  %8125 = vmatpush1.bf16.msra.mxu1 %v11109_v22  ;;  %v11190_v21 = vld [vmem:[%s14846_s1 + $0x1d00] ss:$16 sps:$4 sm:$0xff]   ;;  %v11193_v22 = vld [vmem:[%s14846_s1 + $0x1d08] ss:$16 sps:$4 sm:$0xff]  }
 0x36c   :  { %7278 = vmatprep.subr.bf16.mxu0 %v11114_v23  ;;  %8126 = vmatprep.subr.bf16.mxu1 %v11117_v24  ;;  %v11198_v23 = vld [vmem:[%s14846_s1 + $0x1d24] ss:$16 sps:$4 sm:$0xff]   ;;  %v11201_v24 = vld [vmem:[%s14846_s1 + $0x1d2c] ss:$16 sps:$4 sm:$0xff]  }
 0x36f   :  { %7279 = vmatpush1.bf16.msra.mxu0 %v11112_v26  ;;  %8127 = vmatpush1.bf16.msra.mxu1 %v11115_v25  ;;  %v11196_v26 = vld [vmem:[%s14846_s1 + $0x1d20] ss:$16 sps:$4 sm:$0xff]   ;;  %v11199_v25 = vld [vmem:[%s14846_s1 + $0x1d28] ss:$16 sps:$4 sm:$0xff]  }
 0x370   :  { %7280 = vmatprep.subr.bf16.mxu0 %v11120_v27  ;;  %8128 = vmatprep.subr.bf16.mxu1 %v11123_v28  ;;  %v11204_v27 = vld [vmem:[%s14846_s1 + $0x1d44] ss:$16 sps:$4 sm:$0xff]   ;;  %v11207_v28 = vld [vmem:[%s14846_s1 + $0x1d4c] ss:$16 sps:$4 sm:$0xff]  }
 0x373   :  { %7281 = vmatpush1.bf16.msra.mxu0 %v11118_v29  ;;  %8129 = vmatpush1.bf16.msra.mxu1 %v11121_v30  ;;  %v11202_v29 = vld [vmem:[%s14846_s1 + $0x1d40] ss:$16 sps:$4 sm:$0xff]   ;;  %v11205_v30 = vld [vmem:[%s14846_s1 + $0x1d48] ss:$16 sps:$4 sm:$0xff]  }
 0x374   :  { %7282 = vmatprep.subr.bf16.mxu0 %v11126_v31  ;;  %8130 = vmatprep.subr.bf16.mxu1 %v11129_v32  ;;  %v11210_v31 = vld [vmem:[%s14846_s1 + $0x1d64] ss:$16 sps:$4 sm:$0xff]   ;;  %v11213_v32 = vld [vmem:[%s14846_s1 + $0x1d6c] ss:$16 sps:$4 sm:$0xff]  }
 0x377   :  { %7283 = vmatpush1.bf16.msra.mxu0 %v11124_v34  ;;  %8131 = vmatpush1.bf16.msra.mxu1 %v11127_v36  ;;  %v11208_v34 = vld [vmem:[%s14846_s1 + $0x1d60] ss:$16 sps:$4 sm:$0xff]   ;;  %v11211_v36 = vld [vmem:[%s14846_s1 + $0x1d68] ss:$16 sps:$4 sm:$0xff]  }
 0x378   :  { %7284 = vmatprep.subr.bf16.mxu0 %v11132_v33  ;;  %8132 = vmatprep.subr.bf16.mxu1 %v11135_v35  ;;  %v11216_v33 = vld [vmem:[%s14846_s1 + $0x1d84] ss:$16 sps:$4 sm:$0xff]   ;;  %v11219_v35 = vld [vmem:[%s14846_s1 + $0x1d8c] ss:$16 sps:$4 sm:$0xff]  }
 0x37b   :  { %7285 = vmatpush1.bf16.msra.mxu0 %v11130_v37  ;;  %8133 = vmatpush1.bf16.msra.mxu1 %v11133_v38  ;;  %v11214_v37 = vld [vmem:[%s14846_s1 + $0x1d80] ss:$16 sps:$4 sm:$0xff]   ;;  %v11217_v38 = vld [vmem:[%s14846_s1 + $0x1d88] ss:$16 sps:$4 sm:$0xff]  }
 0x37c   :  { %7286 = vmatprep.subr.bf16.mxu0 %v11138_v39  ;;  %8134 = vmatprep.subr.bf16.mxu1 %v11141_v40  ;;  %v11222_v39 = vld [vmem:[%s14846_s1 + $0x1da4] ss:$16 sps:$4 sm:$0xff]   ;;  %v11225_v40 = vld [vmem:[%s14846_s1 + $0x1dac] ss:$16 sps:$4 sm:$0xff]  }
 0x37f   :  { %7287 = vmatpush1.bf16.msra.mxu0 %v11136_v42  ;;  %8135 = vmatpush1.bf16.msra.mxu1 %v11139_v44  ;;  %v11220_v42 = vld [vmem:[%s14846_s1 + $0x1da0] ss:$16 sps:$4 sm:$0xff]   ;;  %v11223_v44 = vld [vmem:[%s14846_s1 + $0x1da8] ss:$16 sps:$4 sm:$0xff]  }
 0x380   :  { %7309 = vmatprep.subr.bf16.mxu0 %v11144_v41  ;;  %8157 = vmatprep.subr.bf16.mxu1 %v11147_v43  ;;  %v11228_v41 = vld [vmem:[%s14846_s1 + $0x1dc4] ss:$16 sps:$4 sm:$0xff]   ;;  %v11231_v43 = vld [vmem:[%s14846_s1 + $0x1dcc] ss:$16 sps:$4 sm:$0xff]  }
 0x382   :  { %7289 = vmatmul.mubr.bf16.vlgmr.msra.gmra.mrb[0].mxu0 %v8464_v45  ;;  %8137 = vmatmul.mubr.bf16.vlgmr.msra.gmra.mrb[0].mxu1 %v8464_v45  ;;  %v11226_v45 = vld [vmem:[%s14846_s1 + $0x1dc0] ss:$16 sps:$4 sm:$0xff]  }
 0x383   :  { %7310 = vmatpush1.bf16.msra.mxu0 %v11142_v48  ;;  %8158 = vmatpush1.bf16.msra.mxu1 %v11145_v51  ;;  %v11237_v48 = vld [vmem:[%s14846_s1 + $0x1dec] ss:$16 sps:$4 sm:$0xff]   ;;  %v11232_v51 = vld [vmem:[%s14846_s1 + $0x1de0] ss:$16 sps:$4 sm:$0xff]  }
 0x384   :  { %7311 = vmatprep.subr.bf16.mxu0 %v11150_v52  ;;  %8159 = vmatprep.subr.bf16.mxu1 %v11153_v49  ;;  %v11235_v52 = vld [vmem:[%s14846_s1 + $0x1de8] ss:$16 sps:$4 sm:$0xff]   ;;  %v11240_v49 = vld [vmem:[%s14846_s1 + $0x1e04] ss:$16 sps:$4 sm:$0xff]  }
 0x385   :  { %7298 = vmatprep.mubr.bf16.mxu0 %v8497_v50  ;;  %8146 = vmatprep.mubr.bf16.mxu1 %v8497_v50  ;;  %v11243_v50 = vld [vmem:[%s14846_s1 + $0x1e0c] ss:$16 sps:$4 sm:$0xff]  }
 0x387   :  { %7312 = vmatpush1.bf16.msra.mxu0 %v11148_v53  ;;  %8160 = vmatpush1.bf16.msra.mxu1 %v11151_v54  ;;  %v8466_v53 = vcombine.low %v14357_v60, %v14362_v57  ;;  %v63_v54 = vld [vmem:[%s14847_s0 + $0x170] sm:$0xff]  ;;  %v11249_v57 = vld [vmem:[%s14846_s1 + $0x1e2c] ss:$16 sps:$4 sm:$0xff]  }
 0x388   :  { %7313 = vmatprep.subr.bf16.mxu0 %v11156_v55  ;;  %8161 = vmatprep.subr.bf16.mxu1 %v11159_v56  ;;  %v79_v55 = vld [vmem:[%s14847_s0 + $0x1f0] sm:$0xff] }
 0x389   :  { %v11238_v56 = vld [vmem:[%s14846_s1 + $0x1e00] ss:$16 sps:$4 sm:$0xff]   ;;  %v11246_v60 = vld [vmem:[%s14846_s1 + $0x1e24] ss:$16 sps:$4 sm:$0xff]  }
 0x38a   :  { %7299 = vmatmul.mubr.bf16.gmra.mrb[4].mxu0 %v8496_v59  ;;  %8147 = vmatmul.mubr.bf16.gmra.mrb[4].mxu1 %v8496_v59  ;;  %v11241_v59 = vld [vmem:[%s14846_s1 + $0x1e08] ss:$16 sps:$4 sm:$0xff]  }
 0x38b   :  { %7314 = vmatpush1.bf16.msra.mxu0 %v11154_v58  ;;  %8162 = vmatpush1.bf16.msra.mxu1 %v11157_v61  ;;  %v8499_v58 = vcombine.high %v63_v54, %v79_v55  ;;  %v11244_v61 = vld [vmem:[%s14846_s1 + $0x1e20] ss:$16 sps:$4 sm:$0xff]  }
 0x38c   :  { %7315 = vmatprep.subr.bf16.mxu0 %v11162_v62  ;;  %8163 = vmatprep.subr.bf16.mxu1 %v11165_v63  ;;  %v11247_v62 = vld [vmem:[%s14846_s1 + $0x1e28] ss:$16 sps:$4 sm:$0xff]   ;;  %v11252_v63 = vld [vmem:[%s14846_s1 + $0x1e44] ss:$16 sps:$4 sm:$0xff]  }
 0x38d   :  { %7341 = vmatprep.mubr.bf16.mxu0 %v8467_v0  ;;  %8189 = vmatprep.mubr.bf16.mxu1 %v8467_v0  ;;  %v11255_v0 = vld [vmem:[%s14846_s1 + $0x1e4c] ss:$16 sps:$4 sm:$0xff]  }
 0x38f   :  { %7316 = vmatpush1.bf16.msra.mxu0 %v11160_v3  ;;  %8164 = vmatpush1.bf16.msra.mxu1 %v11163_v4  ;;  %v8498_v3 = vcombine.low %v63_v54, %v79_v55  ;;  %v14569_v4 = vld [vmem:[%s14847_s0 + $0x78] sm:$0xff]  ;;  %v11330_v55 = vld [vmem:[%s14846_s1 + $0x1fe4] ss:$16 sps:$4 sm:$0xff]  }
 0x390   :  { %7317 = vmatprep.subr.bf16.mxu0 %v11168_v1  ;;  %8165 = vmatprep.subr.bf16.mxu1 %v11171_v2  ;;  %v14574_v1 = vld [vmem:[%s14847_s0 + $0xf8] sm:$0xff]  ;;  %v11250_v2 = vld [vmem:[%s14846_s1 + $0x1e40] ss:$16 sps:$4 sm:$0xff]  }
 0x391   :  { %v11325_v54 = vld [vmem:[%s14846_s1 + $0x1fc8] ss:$16 sps:$4 sm:$0xff]  }
 0x393   :  { %7318 = vmatpush1.bf16.msra.mxu0 %v11166_v5  ;;  %8166 = vmatpush1.bf16.msra.mxu1 %v11169_v6  ;;  %v11253_v5 = vld [vmem:[%s14846_s1 + $0x1e48] ss:$16 sps:$4 sm:$0xff]   ;;  %v11258_v6 = vld [vmem:[%s14846_s1 + $0x1e64] ss:$16 sps:$4 sm:$0xff]  }
 0x394   :  { %7319 = vmatprep.subr.bf16.mxu0 %v11174_v7  ;;  %8167 = vmatprep.subr.bf16.mxu1 %v11177_v8  ;;  %v11261_v7 = vld [vmem:[%s14846_s1 + $0x1e6c] ss:$16 sps:$4 sm:$0xff]   ;;  %v8469_v8 = vcombine.high %v14569_v4, %v14574_v1 }
 0x397   :  { %7320 = vmatpush1.bf16.msra.mxu0 %v11172_v11  ;;  %8168 = vmatpush1.bf16.msra.mxu1 %v11175_v12  ;;  %v11256_v11 = vld [vmem:[%s14846_s1 + $0x1e60] ss:$16 sps:$4 sm:$0xff]   ;;  %v11259_v12 = vld [vmem:[%s14846_s1 + $0x1e68] ss:$16 sps:$4 sm:$0xff]  }
 0x398   :  { %7321 = vmatprep.subr.bf16.mxu0 %v11180_v9  ;;  %8169 = vmatprep.subr.bf16.mxu1 %v11183_v10  ;;  %v11264_v9 = vld [vmem:[%s14846_s1 + $0x1e84] ss:$16 sps:$4 sm:$0xff]   ;;  %v11267_v10 = vld [vmem:[%s14846_s1 + $0x1e8c] ss:$16 sps:$4 sm:$0xff]  }
 0x39b   :  { %7322 = vmatpush1.bf16.msra.mxu0 %v11178_v13  ;;  %8170 = vmatpush1.bf16.msra.mxu1 %v11181_v14  ;;  %v11262_v13 = vld [vmem:[%s14846_s1 + $0x1e80] ss:$16 sps:$4 sm:$0xff]   ;;  %v11265_v14 = vld [vmem:[%s14846_s1 + $0x1e88] ss:$16 sps:$4 sm:$0xff]  }
 0x39c   :  { %7323 = vmatprep.subr.bf16.mxu0 %v11186_v15  ;;  %8171 = vmatprep.subr.bf16.mxu1 %v11189_v16  ;;  %v11270_v15 = vld [vmem:[%s14846_s1 + $0x1ea4] ss:$16 sps:$4 sm:$0xff]   ;;  %v11273_v16 = vld [vmem:[%s14846_s1 + $0x1eac] ss:$16 sps:$4 sm:$0xff]  }
 0x39f   :  { %7324 = vmatpush1.bf16.msra.mxu0 %v11184_v19  ;;  %8172 = vmatpush1.bf16.msra.mxu1 %v11187_v17  ;;  %v11268_v19 = vld [vmem:[%s14846_s1 + $0x1ea0] ss:$16 sps:$4 sm:$0xff]   ;;  %v11271_v17 = vld [vmem:[%s14846_s1 + $0x1ea8] ss:$16 sps:$4 sm:$0xff]  }
 0x3a0   :  { %7325 = vmatprep.subr.bf16.mxu0 %v11192_v18  ;;  %8173 = vmatprep.subr.bf16.mxu1 %v11195_v20  ;;  %v11276_v18 = vld [vmem:[%s14846_s1 + $0x1ec4] ss:$16 sps:$4 sm:$0xff]   ;;  %v11279_v20 = vld [vmem:[%s14846_s1 + $0x1ecc] ss:$16 sps:$4 sm:$0xff]  }
 0x3a3   :  { %7326 = vmatpush1.bf16.msra.mxu0 %v11190_v21  ;;  %8174 = vmatpush1.bf16.msra.mxu1 %v11193_v22  ;;  %v11274_v21 = vld [vmem:[%s14846_s1 + $0x1ec0] ss:$16 sps:$4 sm:$0xff]   ;;  %v11277_v22 = vld [vmem:[%s14846_s1 + $0x1ec8] ss:$16 sps:$4 sm:$0xff]  }
 0x3a4   :  { %7327 = vmatprep.subr.bf16.mxu0 %v11198_v23  ;;  %8175 = vmatprep.subr.bf16.mxu1 %v11201_v24  ;;  %v11282_v23 = vld [vmem:[%s14846_s1 + $0x1ee4] ss:$16 sps:$4 sm:$0xff]   ;;  %v11285_v24 = vld [vmem:[%s14846_s1 + $0x1eec] ss:$16 sps:$4 sm:$0xff]  }
 0x3a7   :  { %7328 = vmatpush1.bf16.msra.mxu0 %v11196_v26  ;;  %8176 = vmatpush1.bf16.msra.mxu1 %v11199_v25  ;;  %v11280_v26 = vld [vmem:[%s14846_s1 + $0x1ee0] ss:$16 sps:$4 sm:$0xff]   ;;  %v11283_v25 = vld [vmem:[%s14846_s1 + $0x1ee8] ss:$16 sps:$4 sm:$0xff]  }
 0x3a8   :  { %7329 = vmatprep.subr.bf16.mxu0 %v11204_v27  ;;  %8177 = vmatprep.subr.bf16.mxu1 %v11207_v28  ;;  %v11288_v27 = vld [vmem:[%s14846_s1 + $0x1f04] ss:$16 sps:$4 sm:$0xff]   ;;  %v11291_v28 = vld [vmem:[%s14846_s1 + $0x1f0c] ss:$16 sps:$4 sm:$0xff]  }
 0x3ab   :  { %7330 = vmatpush1.bf16.msra.mxu0 %v11202_v29  ;;  %8178 = vmatpush1.bf16.msra.mxu1 %v11205_v30  ;;  %v11286_v29 = vld [vmem:[%s14846_s1 + $0x1f00] ss:$16 sps:$4 sm:$0xff]   ;;  %v11289_v30 = vld [vmem:[%s14846_s1 + $0x1f08] ss:$16 sps:$4 sm:$0xff]  }
 0x3ac   :  { %7331 = vmatprep.subr.bf16.mxu0 %v11210_v31  ;;  %8179 = vmatprep.subr.bf16.mxu1 %v11213_v32  ;;  %v11294_v31 = vld [vmem:[%s14846_s1 + $0x1f24] ss:$16 sps:$4 sm:$0xff]   ;;  %v11297_v32 = vld [vmem:[%s14846_s1 + $0x1f2c] ss:$16 sps:$4 sm:$0xff]  }
 0x3af   :  { %7332 = vmatpush1.bf16.msra.mxu0 %v11208_v34  ;;  %8180 = vmatpush1.bf16.msra.mxu1 %v11211_v36  ;;  %v11292_v34 = vld [vmem:[%s14846_s1 + $0x1f20] ss:$16 sps:$4 sm:$0xff]   ;;  %v11295_v36 = vld [vmem:[%s14846_s1 + $0x1f28] ss:$16 sps:$4 sm:$0xff]  }
 0x3b0   :  { %7333 = vmatprep.subr.bf16.mxu0 %v11216_v33  ;;  %8181 = vmatprep.subr.bf16.mxu1 %v11219_v35  ;;  %v11300_v33 = vld [vmem:[%s14846_s1 + $0x1f44] ss:$16 sps:$4 sm:$0xff]   ;;  %v11303_v35 = vld [vmem:[%s14846_s1 + $0x1f4c] ss:$16 sps:$4 sm:$0xff]  }
 0x3b3   :  { %7334 = vmatpush1.bf16.msra.mxu0 %v11214_v37  ;;  %8182 = vmatpush1.bf16.msra.mxu1 %v11217_v38  ;;  %v11298_v37 = vld [vmem:[%s14846_s1 + $0x1f40] ss:$16 sps:$4 sm:$0xff]   ;;  %v11301_v38 = vld [vmem:[%s14846_s1 + $0x1f48] ss:$16 sps:$4 sm:$0xff]  }
 0x3b4   :  { %7335 = vmatprep.subr.bf16.mxu0 %v11222_v39  ;;  %8183 = vmatprep.subr.bf16.mxu1 %v11225_v40  ;;  %v11306_v39 = vld [vmem:[%s14846_s1 + $0x1f64] ss:$16 sps:$4 sm:$0xff]   ;;  %v11309_v40 = vld [vmem:[%s14846_s1 + $0x1f6c] ss:$16 sps:$4 sm:$0xff]  }
 0x3b7   :  { %7336 = vmatpush1.bf16.msra.mxu0 %v11220_v42  ;;  %8184 = vmatpush1.bf16.msra.mxu1 %v11223_v44  ;;  %v11304_v42 = vld [vmem:[%s14846_s1 + $0x1f60] ss:$16 sps:$4 sm:$0xff]   ;;  %v11307_v44 = vld [vmem:[%s14846_s1 + $0x1f68] ss:$16 sps:$4 sm:$0xff]  }
 0x3b8   :  { %7337 = vmatprep.subr.bf16.mxu0 %v11228_v41  ;;  %8185 = vmatprep.subr.bf16.mxu1 %v11231_v43  ;;  %v11312_v41 = vld [vmem:[%s14846_s1 + $0x1f84] ss:$16 sps:$4 sm:$0xff]   ;;  %v11315_v43 = vld [vmem:[%s14846_s1 + $0x1f8c] ss:$16 sps:$4 sm:$0xff]  }
 0x3bb   :  { %7338 = vmatpush1.bf16.msra.mxu0 %v11226_v45  ;;  %8186 = vmatpush1.bf16.msra.mxu1 %v11229_v46  ;;  %v11310_v45 = vld [vmem:[%s14846_s1 + $0x1f80] ss:$16 sps:$4 sm:$0xff]   ;;  %v11313_v46 = vld [vmem:[%s14846_s1 + $0x1f88] ss:$16 sps:$4 sm:$0xff]  }
 0x3bc   :  { %7339 = vmatprep.subr.bf16.mxu0 %v11234_v47  ;;  %8187 = vmatprep.subr.bf16.mxu1 %v11237_v48  ;;  %v11318_v47 = vld [vmem:[%s14846_s1 + $0x1fa4] ss:$16 sps:$4 sm:$0xff]   ;;  %v11321_v48 = vld [vmem:[%s14846_s1 + $0x1fac] ss:$16 sps:$4 sm:$0xff]  }
 0x3bf   :  { %7340 = vmatpush1.bf16.msra.mxu0 %v11232_v51  ;;  %8188 = vmatpush1.bf16.msra.mxu1 %v11235_v52  ;;  %v11316_v51 = vld [vmem:[%s14846_s1 + $0x1fa0] ss:$16 sps:$4 sm:$0xff]   ;;  %v11319_v52 = vld [vmem:[%s14846_s1 + $0x1fa8] ss:$16 sps:$4 sm:$0xff]  }
 0x3c0   :  { %7362 = vmatprep.subr.bf16.mxu0 %v11240_v49  ;;  %8210 = vmatprep.subr.bf16.mxu1 %v11243_v50  ;;  %v11324_v49 = vld [vmem:[%s14846_s1 + $0x1fc4] ss:$16 sps:$4 sm:$0xff]   ;;  %v11327_v50 = vld [vmem:[%s14846_s1 + $0x1fcc] ss:$16 sps:$4 sm:$0xff]  }
 0x3c2   :  { %7342 = vmatmul.mubr.bf16.vlgmr.msra.gmra.mrb[0].mxu0 %v8466_v53  ;;  %8190 = vmatmul.mubr.bf16.vlgmr.msra.gmra.mrb[0].mxu1 %v8466_v53  ;;  %v11322_v53 = vld [vmem:[%s14846_s1 + $0x1fc0] ss:$16 sps:$4 sm:$0xff]  }
 0x3c3   :  { %7363 = vmatpush1.bf16.msra.mxu0 %v11238_v56  ;;  %8211 = vmatpush1.bf16.msra.mxu1 %v11241_v59  ;;  %v11333_v56 = vld [vmem:[%s14846_s1 + $0x1fec] ss:$16 sps:$4 sm:$0xff]   ;;  %v11328_v59 = vld [vmem:[%s14846_s1 + $0x1fe0] ss:$16 sps:$4 sm:$0xff]  }
 0x3c4   :  { %7364 = vmatprep.subr.bf16.mxu0 %v11246_v60  ;;  %8212 = vmatprep.subr.bf16.mxu1 %v11249_v57  ;;  %v11331_v60 = vld [vmem:[%s14846_s1 + $0x1fe8] ss:$16 sps:$4 sm:$0xff]  }
 0x3c5   :  { %7351 = vmatprep.mubr.bf16.mxu0 %v8499_v58  ;;  %8199 = vmatprep.mubr.bf16.mxu1 %v8499_v58  ;;  %v64_v57 = vld [vmem:[%s14847_s0 + $0x178] sm:$0xff] }
 0x3c6   :  { %v80_v58 = vld [vmem:[%s14847_s0 + $0x1f8] sm:$0xff] }
 0x3c7   :  { %7365 = vmatpush1.bf16.msra.mxu0 %v11244_v61  ;;  %8213 = vmatpush1.bf16.msra.mxu1 %v11247_v62  ;;  %v8468_v61 = vcombine.low %v14569_v4, %v14574_v1  ;;  %v8501_v62 = vcombine.high %v64_v57, %v80_v58  ;;  %v1105_v4 = vld [vmem:[%s14848_s2] sm:$0xf] }
 0x3c8   :  { %7366 = vmatprep.subr.bf16.mxu0 %v11252_v63  ;;  %8214 = vmatprep.subr.bf16.mxu1 %v11255_v0  ;;  %v8500_v63 = vcombine.low %v64_v57, %v80_v58  ;;  %v1107_v0 = vlaneseq }
 0x3ca   :  { %7352 = vmatmul.mubr.bf16.gmra.mrb[4].mxu0 %v8498_v3  ;;  %8200 = vmatmul.mubr.bf16.gmra.mrb[4].mxu1 %v8498_v3  ;;  %v14748_v3 = vshrl.u32 %v1107_v0, 7 }
 0x3cb   :  { %7367 = vmatpush1.bf16.msra.mxu0 %v11250_v2  ;;  %8215 = vmatpush1.bf16.msra.mxu1 %v11253_v5 }
 0x3cc   :  { %7368 = vmatprep.subr.bf16.mxu0 %v11258_v6  ;;  %8216 = vmatprep.subr.bf16.mxu1 %v11261_v7  ;;  %v1109_v2 = vsub.s32 0, %v14748_v3  ;;  %v1117_v5 = vsub.s32 2, %v14748_v3  ;;  %v1113_v1 = vsub.s32 1, %v14748_v3  ;;  %v1121_v6 = vsub.s32 3, %v14748_v3 }
 0x3cd   :  { %7394 = vmatprep.mubr.bf16.mxu0 %v8469_v8  ;;  %8242 = vmatprep.mubr.bf16.mxu1 %v8469_v8  ;;  %vm8409_vm0 = vcmp.eq.s32.totalorder %v14748_v3, 0 }
 0x3ce   :  { %v14757_v7 = vrot.slane %v1105_v4, %v1109_v2  ;;  %v14759_v8 = vrot.slane %v1105_v4, %v1117_v5 }
 0x3cf   :  { %7369 = vmatpush1.bf16.msra.mxu0 %v11256_v11  ;;  %8217 = vmatpush1.bf16.msra.mxu1 %v11259_v12  ;;  %v14761_v11 = vrot.slane %v1105_v4, %v1113_v1  ;;  %v14763_v12 = vrot.slane %v1105_v4, %v1121_v6 }
 0x3d0   :  { %7370 = vmatprep.subr.bf16.mxu0 %v11264_v9  ;;  %8218 = vmatprep.subr.bf16.mxu1 %v11267_v10 }
 0x3d3   :  { %7371 = vmatpush1.bf16.msra.mxu0 %v11262_v13  ;;  %8219 = vmatpush1.bf16.msra.mxu1 %v11265_v14 }
 0x3d4   :  { %7372 = vmatprep.subr.bf16.mxu0 %v11270_v15  ;;  %8220 = vmatprep.subr.bf16.mxu1 %v11273_v16 }
 0x3d7   :  { %7373 = vmatpush1.bf16.msra.mxu0 %v11268_v19  ;;  %8221 = vmatpush1.bf16.msra.mxu1 %v11271_v17 }
 0x3d8   :  { %7374 = vmatprep.subr.bf16.mxu0 %v11276_v18  ;;  %8222 = vmatprep.subr.bf16.mxu1 %v11279_v20 }
 0x3db   :  { %7375 = vmatpush1.bf16.msra.mxu0 %v11274_v21  ;;  %8223 = vmatpush1.bf16.msra.mxu1 %v11277_v22 }
 0x3dc   :  { %7376 = vmatprep.subr.bf16.mxu0 %v11282_v23  ;;  %8224 = vmatprep.subr.bf16.mxu1 %v11285_v24 }
 0x3df   :  { %7377 = vmatpush1.bf16.msra.mxu0 %v11280_v26  ;;  %8225 = vmatpush1.bf16.msra.mxu1 %v11283_v25 }
 0x3e0   :  { %7378 = vmatprep.subr.bf16.mxu0 %v11288_v27  ;;  %8226 = vmatprep.subr.bf16.mxu1 %v11291_v28 }
 0x3e3   :  { %7379 = vmatpush1.bf16.msra.mxu0 %v11286_v29  ;;  %8227 = vmatpush1.bf16.msra.mxu1 %v11289_v30 }
 0x3e4   :  { %7380 = vmatprep.subr.bf16.mxu0 %v11294_v31  ;;  %8228 = vmatprep.subr.bf16.mxu1 %v11297_v32 }
 0x3e7   :  { %7381 = vmatpush1.bf16.msra.mxu0 %v11292_v34  ;;  %8229 = vmatpush1.bf16.msra.mxu1 %v11295_v36 }
 0x3e8   :  { %7382 = vmatprep.subr.bf16.mxu0 %v11300_v33  ;;  %8230 = vmatprep.subr.bf16.mxu1 %v11303_v35 }
 0x3eb   :  { %7383 = vmatpush1.bf16.msra.mxu0 %v11298_v37  ;;  %8231 = vmatpush1.bf16.msra.mxu1 %v11301_v38 }
 0x3ec   :  { %7384 = vmatprep.subr.bf16.mxu0 %v11306_v39  ;;  %8232 = vmatprep.subr.bf16.mxu1 %v11309_v40 }
 0x3ef   :  { %7385 = vmatpush1.bf16.msra.mxu0 %v11304_v42  ;;  %8233 = vmatpush1.bf16.msra.mxu1 %v11307_v44 }
 0x3f0   :  { %7386 = vmatprep.subr.bf16.mxu0 %v11312_v41  ;;  %8234 = vmatprep.subr.bf16.mxu1 %v11315_v43 }
 0x3f3   :  { %7387 = vmatpush1.bf16.msra.mxu0 %v11310_v45  ;;  %8235 = vmatpush1.bf16.msra.mxu1 %v11313_v46 }
 0x3f4   :  { %7388 = vmatprep.subr.bf16.mxu0 %v11318_v47  ;;  %8236 = vmatprep.subr.bf16.mxu1 %v11321_v48 }
 0x3f7   :  { %7389 = vmatpush1.bf16.msra.mxu0 %v11316_v51  ;;  %8237 = vmatpush1.bf16.msra.mxu1 %v11319_v52 }
 0x3f8   :  { %7390 = vmatprep.subr.bf16.mxu0 %v11324_v49  ;;  %8238 = vmatprep.subr.bf16.mxu1 %v11327_v50 }
 0x3fb   :  { %7391 = vmatpush1.bf16.msra.mxu0 %v11322_v53  ;;  %8239 = vmatpush1.bf16.msra.mxu1 %v11325_v54 }
 0x3fc   :  { %7392 = vmatprep.subr.bf16.mxu0 %v11330_v55  ;;  %8240 = vmatprep.subr.bf16.mxu1 %v11333_v56 }
 0x3ff   :  { %7393 = vmatpush1.bf16.msra.mxu0 %v11328_v59  ;;  %8241 = vmatpush1.bf16.msra.mxu1 %v11331_v60 }
 0x402   :  { %7395 = vmatmul.mubr.bf16.vlgmr.msra.gmra.mrb[0].mxu0 %v8468_v61  ;;  %8243 = vmatmul.mubr.bf16.vlgmr.msra.gmra.mrb[0].mxu1 %v8468_v61 }
 0x403   :  { %7404 = vmatprep.mubr.bf16.mxu0 %v8501_v62  ;;  %8252 = vmatprep.mubr.bf16.mxu1 %v8501_v62 }
 0x40a   :  { %7405 = vmatmul.mubr.bf16.gmra.mrb[4].mxu0 %v8500_v63  ;;  %8253 = vmatmul.mubr.bf16.gmra.mrb[4].mxu1 %v8500_v63 }
 0x4d5   :  { %v7396_v9 = vpop.f32.mrb[0].mxu0  ;;  %v8244_v10 = vpop.f32.mrb[0].mxu1 }
 0x4d6   :  { %v9542_v13 = vadd.f32 %v7396_v9, %v14757_v7  ;;  %v9550_v14 = vadd.f32 %v8244_v10, %v14759_v8  ;;  %v7398_v15 = vpop.f32.mrb[1].mxu0  ;;  %v8246_v16 = vpop.f32.mrb[1].mxu1 }
 0x4d7   :  { %v9543_v19 = vadd.f32 %v7398_v15, %v14761_v11  ;;  %v9551_v17 = vadd.f32 %v8246_v16, %v14763_v12  ;;  %v7400_v18 = vpop.f32.mrb[2].mxu0  ;;  %v8248_v20 = vpop.f32.mrb[2].mxu1 }
 0x4d8   :  { %v9544_v21 = vadd.f32 %v7400_v18, %v14757_v7  ;;  %v9552_v22 = vadd.f32 %v8248_v20, %v14759_v8  ;;  %v7402_v23 = vpop.f32.mrb[3].mxu0  ;;  %v8250_v24 = vpop.f32.mrb[3].mxu1  ;;  %v8355_v26 = vmul.f32 %v9542_v13, %v9542_v13  ;;  %v8357_v25 = vmul.f32 %v9550_v14, %v9550_v14 }
 0x4d9   :  { %v9534_v27 = vpack.c.bf16 %v9543_v19, %v9542_v13  ;;  %v9535_v28 = vpack.c.bf16 %v9551_v17, %v9550_v14  ;;  %v9545_v34 = vadd.f32 %v7402_v23, %v14761_v11  ;;  %v9553_v36 = vadd.f32 %v8250_v24, %v14763_v12 }
 0x4da   :  { %v8319_v29 = vadd.f32 %v9544_v21, %v9542_v13  ;;  %v8359_v30 = vmul.f32 %v9544_v21, %v9544_v21  ;;  %v8337_v31 = vadd.f32 %v9552_v22, %v9550_v14  ;;  %v8361_v32 = vmul.f32 %v9552_v22, %v9552_v22 }
 0x4db   :  { %8311 = vst [vmem:[%s14849_s3] sm:$0xff] %v9534_v27  ;;  %8312 = vst [vmem:[%s14849_s3 + $0x8] sm:$0xff] %v9535_v28  ;;  %v8356_v33 = vmul.f32 %v9543_v19, %v9543_v19  ;;  %v8358_v35 = vmul.f32 %v9551_v17, %v9551_v17  ;;  %v9536_v39 = vpack.c.bf16 %v9545_v34, %v9544_v21 }
 0x4dc   :  { %v8371_v37 = vadd.f32 %v8359_v30, %v8355_v26  ;;  %v8389_v38 = vadd.f32 %v8361_v32, %v8357_v25  ;;  %v8328_v40 = vadd.f32 %v9545_v34, %v9543_v19  ;;  %v8360_v42 = vmul.f32 %v9545_v34, %v9545_v34 }
 0x4dd   :  { %v9537_v44 = vpack.c.bf16 %v9553_v36, %v9552_v22  ;;  %v7406_v41 = vpop.f32.mrb[4].mxu0  ;;  %v8254_v43 = vpop.f32.mrb[4].mxu1  ;;  %v8346_v45 = vadd.f32 %v9553_v36, %v9551_v17  ;;  %v8362_v46 = vmul.f32 %v9553_v36, %v9553_v36  ;;  %8313 = vst [vmem:[%s14849_s3 + $0x10] sm:$0xff] %v9536_v39 }
 0x4de   :  { %v9546_v47 = vadd.f32 %v7406_v41, %v14757_v7  ;;  %v9554_v48 = vadd.f32 %v8254_v43, %v14759_v8  ;;  %v7408_v51 = vpop.f32.mrb[5].mxu0  ;;  %v8256_v52 = vpop.f32.mrb[5].mxu1  ;;  %v8380_v49 = vadd.f32 %v8360_v42, %v8356_v33 }
 0x4df   :  { %8314 = vst [vmem:[%s14849_s3 + $0x18] sm:$0xff] %v9537_v44  ;;  %v9547_v50 = vadd.f32 %v7408_v51, %v14761_v11  ;;  %v9555_v53 = vadd.f32 %v8256_v52, %v14763_v12  ;;  %v7410_v54 = vpop.f32.mrb[6].mxu0  ;;  %v8258_v55 = vpop.f32.mrb[6].mxu1  ;;  %v8398_v56 = vadd.f32 %v8362_v46, %v8358_v35 }
 0x4e0   :  { %v8320_v59 = vadd.f32 %v9546_v47, %v8319_v29  ;;  %v8363_v60 = vmul.f32 %v9546_v47, %v9546_v47  ;;  %v8338_v57 = vadd.f32 %v9554_v48, %v8337_v31  ;;  %v7412_v58 = vpop.f32.mrb[7].mxu0  ;;  %v8260_v61 = vpop.f32.mrb[7].mxu1  ;;  %v8365_v62 = vmul.f32 %v9554_v48, %v9554_v48 }
 0x4e1   :  { %v9538_v63 = vpack.c.bf16 %v9547_v50, %v9546_v47  ;;  %v8329_v0 = vadd.f32 %v9547_v50, %v8328_v40  ;;  %v8364_v2 = vmul.f32 %v9547_v50, %v9547_v50  ;;  %v9539_v4 = vpack.c.bf16 %v9555_v53, %v9554_v48 }
 0x4e2   :  { %v8372_v5 = vadd.f32 %v8371_v37, %v8363_v60  ;;  %v8347_v1 = vadd.f32 %v9555_v53, %v8346_v45  ;;  %v8366_v6 = vmul.f32 %v9555_v53, %v9555_v53  ;;  %v8390_v9 = vadd.f32 %v8389_v38, %v8365_v62 }
 0x4e3   :  { %8315 = vst [vmem:[%s14849_s3 + $0x20] sm:$0xff] %v9538_v63  ;;  %v8381_v10 = vadd.f32 %v8380_v49, %v8364_v2  ;;  %v9548_v13 = vadd.f32 %v7410_v54, %v14757_v7  ;;  %v9556_v14 = vadd.f32 %v8258_v55, %v14759_v8  ;;  %8316 = vst [vmem:[%s14849_s3 + $0x28] sm:$0xff] %v9539_v4 }
 0x4e4   :  { %v8399_v15 = vadd.f32 %v8398_v56, %v8366_v6  ;;  %v9549_v16 = vadd.f32 %v7412_v58, %v14761_v11  ;;  %v9557_v19 = vadd.f32 %v8260_v61, %v14763_v12 }
 0x4e5   :  { %v8321_v17 = vadd.f32 %v9548_v13, %v8320_v59  ;;  %v8367_v18 = vmul.f32 %v9548_v13, %v9548_v13  ;;  %v8339_v20 = vadd.f32 %v9556_v14, %v8338_v57  ;;  %v8369_v21 = vmul.f32 %v9556_v14, %v9556_v14 }
 0x4e6   :  { %v9540_v22 = vpack.c.bf16 %v9549_v16, %v9548_v13  ;;  %v8330_v23 = vadd.f32 %v9549_v16, %v8329_v0  ;;  %v8368_v24 = vmul.f32 %v9549_v16, %v9549_v16  ;;  %v9541_v26 = vpack.c.bf16 %v9557_v19, %v9556_v14 }
 0x4e7   :  { %v8322_v7 = vrot.slane %v8321_v17, 4  ;;  %v8373_v25 = vadd.f32 %v8372_v5, %v8367_v18  ;;  %v8340_v8 = vrot.slane %v8339_v20, 4  ;;  %v8391_v27 = vadd.f32 %v8390_v9, %v8369_v21 }
 0x4e8   :  { %8317 = vst [vmem:[%s14849_s3 + $0x30] sm:$0xff] %v9540_v22  ;;  %v8331_v11 = vrot.slane %v8330_v23, 4  ;;  %v8382_v12 = vadd.f32 %v8381_v10, %v8368_v24  ;;  %8318 = vst [vmem:[%s14849_s3 + $0x38] sm:$0xff] %v9541_v26  ;;  %v8348_v28 = vadd.f32 %v9557_v19, %v8347_v1  ;;  %v8370_v29 = vmul.f32 %v9557_v19, %v9557_v19 }
 0x4e9   :  { %v8323_v30 = vadd.f32 %v8322_v7, %v8321_v17  ;;  %v8374_v31 = vrot.slane %v8373_v25, 4  ;;  %v8341_v32 = vadd.f32 %v8340_v8, %v8339_v20  ;;  %v8392_v34 = vrot.slane %v8391_v27, 4 }
 0x4ea   :  { %v8332_v36 = vadd.f32 %v8331_v11, %v8330_v23  ;;  %v8383_v33 = vrot.slane %v8382_v12, 4  ;;  %v8349_v35 = vrot.slane %v8348_v28, 4  ;;  %v8400_v37 = vadd.f32 %v8399_v15, %v8370_v29 }
 0x4eb   :  { %v8324_v38 = vrot.slane %v8323_v30, 2  ;;  %v8375_v39 = vadd.f32 %v8374_v31, %v8373_v25  ;;  %v8342_v40 = vrot.slane %v8341_v32, 2  ;;  %v8393_v42 = vadd.f32 %v8392_v34, %v8391_v27 }
 0x4ec   :  { %v8333_v44 = vrot.slane %v8332_v36, 2  ;;  %v8384_v41 = vadd.f32 %v8383_v33, %v8382_v12  ;;  %v8350_v43 = vadd.f32 %v8349_v35, %v8348_v28  ;;  %v8401_v45 = vrot.slane %v8400_v37, 4 }
 0x4ed   :  { %v8325_v46 = vadd.f32 %v8324_v38, %v8323_v30  ;;  %v8376_v47 = vrot.slane %v8375_v39, 2  ;;  %v8343_v48 = vadd.f32 %v8342_v40, %v8341_v32  ;;  %v8394_v51 = vrot.slane %v8393_v42, 2 }
 0x4ee   :  { %v8334_v52 = vadd.f32 %v8333_v44, %v8332_v36  ;;  %v8385_v49 = vrot.slane %v8384_v41, 2  ;;  %v8351_v50 = vrot.slane %v8350_v43, 2  ;;  %v8402_v53 = vadd.f32 %v8401_v45, %v8400_v37 }
 0x4ef   :  { %v8326_v54 = vrot.slane %v8325_v46, 1  ;;  %v8377_v55 = vadd.f32 %v8376_v47, %v8375_v39  ;;  %v8344_v56 = vrot.slane %v8343_v48, 1  ;;  %v8395_v59 = vadd.f32 %v8394_v51, %v8393_v42 }
 0x4f0   :  { %v8335_v60 = vrot.slane %v8334_v52, 1  ;;  %v8386_v57 = vadd.f32 %v8385_v49, %v8384_v41  ;;  %v8352_v58 = vadd.f32 %v8351_v50, %v8350_v43  ;;  %v8403_v61 = vrot.slane %v8402_v53, 2 }
 0x4f1   :  { %v8327_v62 = vadd.f32 %v8326_v54, %v8325_v46  ;;  %v8378_v63 = vrot.slane %v8377_v55, 1  ;;  %v8345_v0 = vadd.f32 %v8344_v56, %v8343_v48  ;;  %v8396_v2 = vrot.slane %v8395_v59, 1 }
 0x4f2   :  { %v8336_v5 = vadd.f32 %v8335_v60, %v8334_v52  ;;  %v8387_v4 = vrot.slane %v8386_v57, 1  ;;  %v8353_v1 = vrot.slane %v8352_v58, 1  ;;  %v8404_v6 = vadd.f32 %v8403_v61, %v8402_v53 }
 0x4f3   :  { %v8379_v9 = vadd.f32 %v8378_v63, %v8377_v55  ;;  %v8410_v10 = vsel %vm8409_vm0, %v8327_v62, 0.0  ;;  %v8397_v13 = vadd.f32 %v8396_v2, %v8395_v59  ;;  %v8412_v14 = vsel %vm8409_vm0, %v8345_v0, 0.0 }
 0x4f4   :  { %8414 = vst [vmem:[%s14850_s4] sm:$0xff] %v8410_v10  ;;  %8416 = vst [vmem:[%s14850_s4 + $0x10] sm:$0xff] %v8412_v14  ;;  %v8388_v15 = vadd.f32 %v8387_v4, %v8386_v57  ;;  %v8411_v16 = vsel %vm8409_vm0, %v8336_v5, 0.0  ;;  %v8354_v19 = vadd.f32 %v8353_v1, %v8352_v58  ;;  %v8405_v17 = vrot.slane %v8404_v6, 1 }
 0x4f5   :  { %v8418_v18 = vsel %vm8409_vm0, %v8379_v9, 0.0  ;;  %v8420_v20 = vsel %vm8409_vm0, %v8397_v13, 0.0  ;;  %8415 = vst [vmem:[%s14850_s4 + $0x8] sm:$0xff] %v8411_v16 }
 0x4f6   :  { %8422 = vst [vmem:[%s14851_s5] sm:$0xff] %v8418_v18  ;;  %8424 = vst [vmem:[%s14851_s5 + $0x10] sm:$0xff] %v8420_v20  ;;  %v8419_v21 = vsel %vm8409_vm0, %v8388_v15, 0.0  ;;  %v8406_v22 = vadd.f32 %v8405_v17, %v8404_v6  ;;  %v8413_v23 = vsel %vm8409_vm0, %v8354_v19, 0.0 }
 0x4f7   :  { %8423 = vst [vmem:[%s14851_s5 + $0x8] sm:$0xff] %v8419_v21  ;;  %8417 = vst [vmem:[%s14850_s4 + $0x18] sm:$0xff] %v8413_v23 }
 0x4f8   :  { %v8421_v24 = vsel %vm8409_vm0, %v8406_v22, 0.0 }
 0x4f9   :  { %8425 = vst [vmem:[%s14851_s5 + $0x18] sm:$0xff] %v8421_v24 }

</bundles_post_ra>
